<compile_context>
chip_gen: v6e
topology: v6e:2x2x1
jax: 0.10.0
libtpu: 0.0.40
codegen_flags: <defaults>
</compile_context>

<pallas_src>
import math

import jax
import jax.numpy as jnp
from jax import lax
from jax.experimental import pallas as pl
from jax.experimental.pallas import tpu as pltpu

# Small hyperparameters consistent with the module's forward pass.
NUM_TAGS = 64
EMBED_DIM = 32
HIDDEN_DIM = 32
NUM_LAYERS = 4
BATCH = 2
SEQ = 8

_VMEM = pl.BlockSpec(memory_space=pltpu.MemorySpace.VMEM)


# ---------------------------------------------------------------------------
# Fused Pallas kernel: embedding -> 4 BiLSTM layers -> MLP head
# ---------------------------------------------------------------------------
def fused_kernel(ids_ref, emb_ref,
                 wx0_ref, bx0_ref, wh0_ref,
                 wx1_ref, bx1_ref, wh1_ref,
                 wx2_ref, bx2_ref, wh2_ref,
                 wx3_ref, bx3_ref, wh3_ref,
                 w1_ref, b1_ref, w2_ref, b2_ref,
                 out_ref):
    TB = ids_ref.shape[0]
    B = out_ref.shape[0]
    T = TB // B
    H = wh0_ref.shape[0] // 2
    num_tags = emb_ref.shape[0]

    # ---- embedding as one-hot matmul (avoids TPU gather path) ----
    ids = ids_ref[...]                                                     # (T*B, 1) int32
    tag_iota = lax.broadcasted_iota(jnp.int32, (TB, num_tags), 1)
    onehot = (ids == tag_iota).astype(jnp.float32)                         # (T*B, num_tags)
    x = jnp.dot(onehot, emb_ref[...], preferred_element_type=jnp.float32)  # (T*B, E)

    def cell(gates, c):
        # packed gate column order (i, f, o, g): one contiguous sigmoid slice + one tanh slice
        sig = jax.nn.sigmoid(gates[:, :3 * H])
        g = jnp.tanh(gates[:, 3 * H:])
        i = sig[:, :H]
        f = sig[:, H:2 * H]
        o = sig[:, 2 * H:3 * H]
        c_new = f * c + i * g
        return o * jnp.tanh(c_new), c_new

    layers = ((wx0_ref, bx0_ref, wh0_ref),
              (wx1_ref, bx1_ref, wh1_ref),
              (wx2_ref, bx2_ref, wh2_ref),
              (wx3_ref, bx3_ref, wh3_ref))

    h_f = h_b = None
    for wx_ref, bx_ref, wh_ref in layers:
        wh = wh_ref[...]                                                   # (2H, 8H) block-diag
        # hoisted input projection: all T steps, both directions, one matmul
        gates_x = (jnp.dot(x, wx_ref[...], preferred_element_type=jnp.float32)
                   + bx_ref[...])                                          # (T*B, 8H)

        h_f = jnp.zeros((B, H), jnp.float32)
        c_f = jnp.zeros((B, H), jnp.float32)
        h_b = jnp.zeros((B, H), jnp.float32)
        c_b = jnp.zeros((B, H), jnp.float32)
        ys_f = [None] * T
        ys_b = [None] * T
        for s in range(T):                   # fully unrolled (T static & small)
            tb = T - 1 - s
            gh = jnp.dot(jnp.concatenate([h_f, h_b], axis=-1), wh,
                         preferred_element_type=jnp.float32)               # (B, 8H): one MXU call
            gates_f = gates_x[s * B:(s + 1) * B, :4 * H] + gh[:, :4 * H]
            gates_b = gates_x[tb * B:(tb + 1) * B, 4 * H:] + gh[:, 4 * H:]
            h_f, c_f = cell(gates_f, c_f)
            h_b, c_b = cell(gates_b, c_b)
            ys_f[s] = h_f
            ys_b[tb] = h_b
        # next-layer input: time-major (T*B, 2H) with [fwd | bwd] feature layout
        x = jnp.concatenate(
            [jnp.concatenate([ys_f[t], ys_b[t]], axis=-1) for t in range(T)], axis=0)

    # hidden[-2] = last-layer forward final state (t = T-1);
    # hidden[-1] = last-layer backward final state (processed down to t = 0).
    h_cat = jnp.concatenate([h_f, h_b], axis=-1)                           # (B, 2H)

    # MLP head: Linear(2H->H) -> exact GELU -> Linear(H->num_tags)
    z = jnp.dot(h_cat, w1_ref[...], preferred_element_type=jnp.float32) + b1_ref[...]
    z = 0.5 * z * (1.0 + lax.erf(z * (1.0 / math.sqrt(2.0))))
    out_ref[...] = jnp.dot(z, w2_ref[...], preferred_element_type=jnp.float32) + b2_ref[...]


# ---------------------------------------------------------------------------
# Host-side parameter packing (one-time): transpose, gate-reorder, stack directions
# ---------------------------------------------------------------------------
def pack_params(emb, lstm_params, mlp_params):
    H = HIDDEN_DIM
    # PyTorch gate row order (i, f, g, o)  ->  kernel column order (i, f, o, g)
    perm = jnp.concatenate([jnp.arange(0, H), jnp.arange(H, 2 * H),
                            jnp.arange(3 * H, 4 * H), jnp.arange(2 * H, 3 * H)])
    packed_layers = []
    for (wih_f, whh_f, b_f, wih_b, whh_b, b_b) in lstm_params:
        wx = jnp.concatenate([wih_f[perm, :].T, wih_b[perm, :].T], axis=1)   # (D_in, 8H)
        bx = jnp.concatenate([b_f[:, perm], b_b[:, perm]], axis=1)           # (1, 8H)
        whf = whh_f[perm, :].T                                               # (H, 4H)
        whb = whh_b[perm, :].T
        z = jnp.zeros((H, 4 * H), jnp.float32)
        wh = jnp.concatenate([jnp.concatenate([whf, z], axis=1),
                              jnp.concatenate([z, whb], axis=1)], axis=0)    # (2H, 8H) block-diag
        packed_layers.append((wx, bx, wh))
    w1, b1, w2, b2 = mlp_params
    mlp = (w1.T, b1, w2.T, b2)                                               # (2H,H),(1,H),(H,NT),(1,NT)
    return emb, tuple(packed_layers), mlp


# ---------------------------------------------------------------------------
# Forward wrapper: one pallas_call for the whole model
# ---------------------------------------------------------------------------
@jax.jit
def tag_expansion_forward(input_tags, emb, packed_layers, mlp_packed):
    B, T = input_tags.shape
    ids = jnp.transpose(input_tags).reshape(T * B, 1).astype(jnp.int32)  # time-major flat ids
    flat_w = []
    for wx, bx, wh in packed_layers:
        flat_w += [wx, bx, wh]
    w1, b1, w2, b2 = mlp_packed
    n_in = 2 + 3 * len(packed_layers) + 4
    return pl.pallas_call(
        fused_kernel,
        out_shape=jax.ShapeDtypeStruct((B, NUM_TAGS), jnp.float32),
        in_specs=[_VMEM] * n_in,
        out_specs=_VMEM,
    )(ids, emb, *flat_w, w1, b1, w2, b2)


# ---------------------------------------------------------------------------
# Deterministic synthetic parameters (PyTorch layout, shapes follow __init__)
# ---------------------------------------------------------------------------
def init_params(key):
    k_std = 1.0 / math.sqrt(HIDDEN_DIM)
    keys = jax.random.split(key, 3 + NUM_LAYERS)

    def u(k, shape, bound):
        return jax.random.uniform(k, shape, jnp.float32, -bound, bound)

    emb = jax.random.normal(keys[0], (NUM_TAGS, EMBED_DIM), jnp.float32)

    lstm_params = []
    for layer in range(NUM_LAYERS):
        d_in = EMBED_DIM if layer == 0 else 2 * HIDDEN_DIM
        sub = jax.random.split(keys[3 + layer], 8)
        wih_f = u(sub[0], (4 * HIDDEN_DIM, d_in), k_std)
        whh_f = u(sub[1], (4 * HIDDEN_DIM, HIDDEN_DIM), k_std)
        b_f = u(sub[2], (1, 4 * HIDDEN_DIM), k_std) + u(sub[3], (1, 4 * HIDDEN_DIM), k_std)
        wih_b = u(sub[4], (4 * HIDDEN_DIM, d_in), k_std)
        whh_b = u(sub[5], (4 * HIDDEN_DIM, HIDDEN_DIM), k_std)
        b_b = u(sub[6], (1, 4 * HIDDEN_DIM), k_std) + u(sub[7], (1, 4 * HIDDEN_DIM), k_std)
        lstm_params.append((wih_f, whh_f, b_f, wih_b, whh_b, b_b))

    k1 = 1.0 / math.sqrt(2 * HIDDEN_DIM)
    k2 = 1.0 / math.sqrt(HIDDEN_DIM)
    m1, m2, m3, m4 = jax.random.split(keys[1], 4)
    w1 = u(m1, (HIDDEN_DIM, 2 * HIDDEN_DIM), k1)
    b1 = u(m2, (1, HIDDEN_DIM), k1)
    w2 = u(m3, (NUM_TAGS, HIDDEN_DIM), k2)
    b2 = u(m4, (1, NUM_TAGS), k2)
    mlp_params = (w1, b1, w2, b2)

    return emb, lstm_params, mlp_params


# ---------------------------------------------------------------------------
# Pure-JAX reference of the PyTorch forward (PyTorch-layout params)
# ---------------------------------------------------------------------------
def _reference_forward(input_tags, emb, lstm_params, mlp_params):
    H = HIDDEN_DIM
    x = jnp.take(emb, input_tags, axis=0)          # (B, T, E)
    x = jnp.transpose(x, (1, 0, 2))                # (T, B, E)
    T, B, _ = x.shape

    def cell(x_t, h, c, w_ih, w_hh, b):
        gates = x_t @ w_ih.T + h @ w_hh.T + b
        i = jax.nn.sigmoid(gates[:, :H]); f = jax.nn.sigmoid(gates[:, H:2 * H])
        g = jnp.tanh(gates[:, 2 * H:3 * H]); o = jax.nn.sigmoid(gates[:, 3 * H:])
        c = f * c + i * g
        return o * jnp.tanh(c), c

    hf = hb = None
    for (wih_f, whh_f, b_f, wih_b, whh_b, b_b) in lstm_params:
        hf = jnp.zeros((B, H)); cf = jnp.zeros((B, H))
        hb = jnp.zeros((B, H)); cb = jnp.zeros((B, H))
        yf = [None] * T; yb = [None] * T
        for t in range(T):
            hf, cf = cell(x[t], hf, cf, wih_f, whh_f, b_f); yf[t] = hf
        for t in range(T - 1, -1, -1):
            hb, cb = cell(x[t], hb, cb, wih_b, whh_b, b_b); yb[t] = hb
        x = jnp.stack([jnp.concatenate([yf[t], yb[t]], -1) for t in range(T)], axis=0)

    h_cat = jnp.concatenate([hf, hb], axis=-1)
    w1, b1, w2, b2 = mlp_params
    z = h_cat @ w1.T + b1
    z = 0.5 * z * (1.0 + lax.erf(z * (1.0 / math.sqrt(2.0))))
    return z @ w2.T + b2


if __name__ == "__main__":
    key = jax.random.PRNGKey(0)
    pkey, dkey = jax.random.split(key)
    emb, lstm_params, mlp_params = init_params(pkey)
    input_tags = jax.random.randint(dkey, (BATCH, SEQ), 0, NUM_TAGS, dtype=jnp.int32)

    packed = pack_params(emb, lstm_params, mlp_params)
    logits = tag_expansion_forward(input_tags, *packed)
    logits = jax.block_until_ready(logits)
    assert logits.shape == (BATCH, NUM_TAGS) and logits.dtype == jnp.float32

    with jax.default_matmul_precision("highest"):
        ref = _reference_forward(input_tags, emb, lstm_params, mlp_params)
    max_err = float(jnp.max(jnp.abs(logits - ref)))
    assert jnp.allclose(logits, ref, rtol=2e-2, atol=2e-2), max_err

    print("KERNEL_OK")
</pallas_src>

<mosaic_0001>
module attributes {stable_mosaic.version = 11 : i64} {
  func.func @fused_kernel(%arg0: memref<16x1xi32, #tpu.memory_space<vmem>>, %arg1: memref<64x32xf32, #tpu.memory_space<vmem>>, %arg2: memref<32x256xf32, #tpu.memory_space<vmem>>, %arg3: memref<1x256xf32, #tpu.memory_space<vmem>>, %arg4: memref<64x256xf32, #tpu.memory_space<vmem>>, %arg5: memref<64x256xf32, #tpu.memory_space<vmem>>, %arg6: memref<1x256xf32, #tpu.memory_space<vmem>>, %arg7: memref<64x256xf32, #tpu.memory_space<vmem>>, %arg8: memref<64x256xf32, #tpu.memory_space<vmem>>, %arg9: memref<1x256xf32, #tpu.memory_space<vmem>>, %arg10: memref<64x256xf32, #tpu.memory_space<vmem>>, %arg11: memref<64x256xf32, #tpu.memory_space<vmem>>, %arg12: memref<1x256xf32, #tpu.memory_space<vmem>>, %arg13: memref<64x256xf32, #tpu.memory_space<vmem>>, %arg14: memref<64x32xf32, #tpu.memory_space<vmem>>, %arg15: memref<1x32xf32, #tpu.memory_space<vmem>>, %arg16: memref<32x64xf32, #tpu.memory_space<vmem>>, %arg17: memref<1x64xf32, #tpu.memory_space<vmem>>, %arg18: memref<2x64xf32, #tpu.memory_space<vmem>>) attributes {dimension_semantics = [], scalar_prefetch = 0 : i64, scratch_operands = 0 : i64, tpu.core_type = #tpu.core_type<tc>} {
    %c0 = arith.constant 0 : index
    %c0_0 = arith.constant 0 : index
    %0 = vector.load %arg0[%c0, %c0_0] : memref<16x1xi32, #tpu.memory_space<vmem>>, vector<16x1xi32>
    %1 = tpu.iota {dimensions = array<i32: 1>} : vector<16x64xi32>
    %2 = vector.broadcast %0 : vector<16x1xi32> to vector<16x64xi32>
    %3 = arith.cmpi eq, %2, %1 : vector<16x64xi32>
    %4 = arith.extui %3 : vector<16x64xi1> to vector<16x64xi32>
    %5 = arith.sitofp %4 : vector<16x64xi32> to vector<16x64xf32>
    %c0_1 = arith.constant 0 : index
    %c0_2 = arith.constant 0 : index
    %6 = vector.load %arg1[%c0_1, %c0_2] : memref<64x32xf32, #tpu.memory_space<vmem>>, vector<64x32xf32>
    %cst = arith.constant dense<0.000000e+00> : vector<16x32xf32>
    %7 = tpu.matmul %5, %6, %cst {dimension_numbers = #tpu.dot_dimension_numbers<[1], [0], [0], [1], [0, 0, 1, 1], [], []>} : vector<16x64xf32>, vector<64x32xf32>, vector<16x32xf32> -> vector<16x32xf32>
    %c0_3 = arith.constant 0 : index
    %c0_4 = arith.constant 0 : index
    %8 = vector.load %arg4[%c0_3, %c0_4] : memref<64x256xf32, #tpu.memory_space<vmem>>, vector<64x256xf32>
    %c0_5 = arith.constant 0 : index
    %c0_6 = arith.constant 0 : index
    %9 = vector.load %arg2[%c0_5, %c0_6] : memref<32x256xf32, #tpu.memory_space<vmem>>, vector<32x256xf32>
    %cst_7 = arith.constant dense<0.000000e+00> : vector<16x256xf32>
    %10 = tpu.matmul %7, %9, %cst_7 {dimension_numbers = #tpu.dot_dimension_numbers<[1], [0], [0], [1], [0, 0, 1, 1], [], []>} : vector<16x32xf32>, vector<32x256xf32>, vector<16x256xf32> -> vector<16x256xf32>
    %c0_8 = arith.constant 0 : index
    %c0_9 = arith.constant 0 : index
    %11 = vector.load %arg3[%c0_8, %c0_9] : memref<1x256xf32, #tpu.memory_space<vmem>>, vector<1x256xf32>
    %12 = vector.broadcast %11 : vector<1x256xf32> to vector<16x256xf32>
    %13 = arith.addf %10, %12 : vector<16x256xf32>
    %cst_10 = arith.constant 0.000000e+00 : f32
    %14 = vector.broadcast %cst_10 : f32 to vector<2x32xf32>
    %cst_11 = arith.constant 0.000000e+00 : f32
    %15 = vector.broadcast %cst_11 : f32 to vector<2x32xf32>
    %cst_12 = arith.constant 0.000000e+00 : f32
    %16 = vector.broadcast %cst_12 : f32 to vector<2x32xf32>
    %cst_13 = arith.constant 0.000000e+00 : f32
    %17 = vector.broadcast %cst_13 : f32 to vector<2x32xf32>
    %18 = tpu.concatenate %14, %16 in 1 : vector<2x32xf32>, vector<2x32xf32> -> vector<2x64xf32>
    %cst_14 = arith.constant dense<0.000000e+00> : vector<2x256xf32>
    %19 = tpu.matmul %18, %8, %cst_14 {dimension_numbers = #tpu.dot_dimension_numbers<[1], [0], [0], [1], [0, 0, 1, 1], [], []>} : vector<2x64xf32>, vector<64x256xf32>, vector<2x256xf32> -> vector<2x256xf32>
    %20 = vector.extract_strided_slice %13 {offsets = [0, 0], sizes = [2, 128], strides = [1, 1]} : vector<16x256xf32> to vector<2x128xf32>
    %21 = vector.extract_strided_slice %19 {offsets = [0, 0], sizes = [2, 128], strides = [1, 1]} : vector<2x256xf32> to vector<2x128xf32>
    %22 = arith.addf %20, %21 : vector<2x128xf32>
    %23 = vector.extract_strided_slice %13 {offsets = [14, 128], sizes = [2, 128], strides = [1, 1]} : vector<16x256xf32> to vector<2x128xf32>
    %24 = vector.extract_strided_slice %19 {offsets = [0, 128], sizes = [2, 128], strides = [1, 1]} : vector<2x256xf32> to vector<2x128xf32>
    %25 = arith.addf %23, %24 : vector<2x128xf32>
    %26 = vector.extract_strided_slice %22 {offsets = [0, 0], sizes = [2, 96], strides = [1, 1]} : vector<2x128xf32> to vector<2x96xf32>
    %27 = arith.negf %26 : vector<2x96xf32>
    %28 = math.exp %27 : vector<2x96xf32>
    %cst_15 = arith.constant 1.000000e+00 : f32
    %29 = vector.broadcast %cst_15 : f32 to vector<2x96xf32>
    %30 = arith.addf %29, %28 : vector<2x96xf32>
    %31 = arith.divf %29, %30 : vector<2x96xf32>
    %32 = vector.extract_strided_slice %22 {offsets = [0, 96], sizes = [2, 32], strides = [1, 1]} : vector<2x128xf32> to vector<2x32xf32>
    %33 = math.tanh %32 : vector<2x32xf32>
    %34 = vector.extract_strided_slice %31 {offsets = [0, 0], sizes = [2, 32], strides = [1, 1]} : vector<2x96xf32> to vector<2x32xf32>
    %35 = vector.extract_strided_slice %31 {offsets = [0, 32], sizes = [2, 32], strides = [1, 1]} : vector<2x96xf32> to vector<2x32xf32>
    %36 = vector.extract_strided_slice %31 {offsets = [0, 64], sizes = [2, 32], strides = [1, 1]} : vector<2x96xf32> to vector<2x32xf32>
    %37 = arith.mulf %35, %15 : vector<2x32xf32>
    %38 = arith.mulf %34, %33 : vector<2x32xf32>
    %39 = arith.addf %37, %38 : vector<2x32xf32>
    %40 = math.tanh %39 : vector<2x32xf32>
    %41 = arith.mulf %36, %40 : vector<2x32xf32>
    %42 = vector.extract_strided_slice %25 {offsets = [0, 0], sizes = [2, 96], strides = [1, 1]} : vector<2x128xf32> to vector<2x96xf32>
    %43 = arith.negf %42 : vector<2x96xf32>
    %44 = math.exp %43 : vector<2x96xf32>
    %cst_16 = arith.constant 1.000000e+00 : f32
    %45 = vector.broadcast %cst_16 : f32 to vector<2x96xf32>
    %46 = arith.addf %45, %44 : vector<2x96xf32>
    %47 = arith.divf %45, %46 : vector<2x96xf32>
    %48 = vector.extract_strided_slice %25 {offsets = [0, 96], sizes = [2, 32], strides = [1, 1]} : vector<2x128xf32> to vector<2x32xf32>
    %49 = math.tanh %48 : vector<2x32xf32>
    %50 = vector.extract_strided_slice %47 {offsets = [0, 0], sizes = [2, 32], strides = [1, 1]} : vector<2x96xf32> to vector<2x32xf32>
    %51 = vector.extract_strided_slice %47 {offsets = [0, 32], sizes = [2, 32], strides = [1, 1]} : vector<2x96xf32> to vector<2x32xf32>
    %52 = vector.extract_strided_slice %47 {offsets = [0, 64], sizes = [2, 32], strides = [1, 1]} : vector<2x96xf32> to vector<2x32xf32>
    %53 = arith.mulf %51, %17 : vector<2x32xf32>
    %54 = arith.mulf %50, %49 : vector<2x32xf32>
    %55 = arith.addf %53, %54 : vector<2x32xf32>
    %56 = math.tanh %55 : vector<2x32xf32>
    %57 = arith.mulf %52, %56 : vector<2x32xf32>
    %58 = tpu.concatenate %41, %57 in 1 : vector<2x32xf32>, vector<2x32xf32> -> vector<2x64xf32>
    %cst_17 = arith.constant dense<0.000000e+00> : vector<2x256xf32>
    %59 = tpu.matmul %58, %8, %cst_17 {dimension_numbers = #tpu.dot_dimension_numbers<[1], [0], [0], [1], [0, 0, 1, 1], [], []>} : vector<2x64xf32>, vector<64x256xf32>, vector<2x256xf32> -> vector<2x256xf32>
    %60 = vector.extract_strided_slice %13 {offsets = [2, 0], sizes = [2, 128], strides = [1, 1]} : vector<16x256xf32> to vector<2x128xf32>
    %61 = vector.extract_strided_slice %59 {offsets = [0, 0], sizes = [2, 128], strides = [1, 1]} : vector<2x256xf32> to vector<2x128xf32>
    %62 = arith.addf %60, %61 : vector<2x128xf32>
    %63 = vector.extract_strided_slice %13 {offsets = [12, 128], sizes = [2, 128], strides = [1, 1]} : vector<16x256xf32> to vector<2x128xf32>
    %64 = vector.extract_strided_slice %59 {offsets = [0, 128], sizes = [2, 128], strides = [1, 1]} : vector<2x256xf32> to vector<2x128xf32>
    %65 = arith.addf %63, %64 : vector<2x128xf32>
    %66 = vector.extract_strided_slice %62 {offsets = [0, 0], sizes = [2, 96], strides = [1, 1]} : vector<2x128xf32> to vector<2x96xf32>
    %67 = arith.negf %66 : vector<2x96xf32>
    %68 = math.exp %67 : vector<2x96xf32>
    %cst_18 = arith.constant 1.000000e+00 : f32
    %69 = vector.broadcast %cst_18 : f32 to vector<2x96xf32>
    %70 = arith.addf %69, %68 : vector<2x96xf32>
    %71 = arith.divf %69, %70 : vector<2x96xf32>
    %72 = vector.extract_strided_slice %62 {offsets = [0, 96], sizes = [2, 32], strides = [1, 1]} : vector<2x128xf32> to vector<2x32xf32>
    %73 = math.tanh %72 : vector<2x32xf32>
    %74 = vector.extract_strided_slice %71 {offsets = [0, 0], sizes = [2, 32], strides = [1, 1]} : vector<2x96xf32> to vector<2x32xf32>
    %75 = vector.extract_strided_slice %71 {offsets = [0, 32], sizes = [2, 32], strides = [1, 1]} : vector<2x96xf32> to vector<2x32xf32>
    %76 = vector.extract_strided_slice %71 {offsets = [0, 64], sizes = [2, 32], strides = [1, 1]} : vector<2x96xf32> to vector<2x32xf32>
    %77 = arith.mulf %75, %39 : vector<2x32xf32>
    %78 = arith.mulf %74, %73 : vector<2x32xf32>
    %79 = arith.addf %77, %78 : vector<2x32xf32>
    %80 = math.tanh %79 : vector<2x32xf32>
    %81 = arith.mulf %76, %80 : vector<2x32xf32>
    %82 = vector.extract_strided_slice %65 {offsets = [0, 0], sizes = [2, 96], strides = [1, 1]} : vector<2x128xf32> to vector<2x96xf32>
    %83 = arith.negf %82 : vector<2x96xf32>
    %84 = math.exp %83 : vector<2x96xf32>
    %cst_19 = arith.constant 1.000000e+00 : f32
    %85 = vector.broadcast %cst_19 : f32 to vector<2x96xf32>
    %86 = arith.addf %85, %84 : vector<2x96xf32>
    %87 = arith.divf %85, %86 : vector<2x96xf32>
    %88 = vector.extract_strided_slice %65 {offsets = [0, 96], sizes = [2, 32], strides = [1, 1]} : vector<2x128xf32> to vector<2x32xf32>
    %89 = math.tanh %88 : vector<2x32xf32>
    %90 = vector.extract_strided_slice %87 {offsets = [0, 0], sizes = [2, 32], strides = [1, 1]} : vector<2x96xf32> to vector<2x32xf32>
    %91 = vector.extract_strided_slice %87 {offsets = [0, 32], sizes = [2, 32], strides = [1, 1]} : vector<2x96xf32> to vector<2x32xf32>
    %92 = vector.extract_strided_slice %87 {offsets = [0, 64], sizes = [2, 32], strides = [1, 1]} : vector<2x96xf32> to vector<2x32xf32>
    %93 = arith.mulf %91, %55 : vector<2x32xf32>
    %94 = arith.mulf %90, %89 : vector<2x32xf32>
    %95 = arith.addf %93, %94 : vector<2x32xf32>
    %96 = math.tanh %95 : vector<2x32xf32>
    %97 = arith.mulf %92, %96 : vector<2x32xf32>
    %98 = tpu.concatenate %81, %97 in 1 : vector<2x32xf32>, vector<2x32xf32> -> vector<2x64xf32>
    %cst_20 = arith.constant dense<0.000000e+00> : vector<2x256xf32>
    %99 = tpu.matmul %98, %8, %cst_20 {dimension_numbers = #tpu.dot_dimension_numbers<[1], [0], [0], [1], [0, 0, 1, 1], [], []>} : vector<2x64xf32>, vector<64x256xf32>, vector<2x256xf32> -> vector<2x256xf32>
    %100 = vector.extract_strided_slice %13 {offsets = [4, 0], sizes = [2, 128], strides = [1, 1]} : vector<16x256xf32> to vector<2x128xf32>
    %101 = vector.extract_strided_slice %99 {offsets = [0, 0], sizes = [2, 128], strides = [1, 1]} : vector<2x256xf32> to vector<2x128xf32>
    %102 = arith.addf %100, %101 : vector<2x128xf32>
    %103 = vector.extract_strided_slice %13 {offsets = [10, 128], sizes = [2, 128], strides = [1, 1]} : vector<16x256xf32> to vector<2x128xf32>
    %104 = vector.extract_strided_slice %99 {offsets = [0, 128], sizes = [2, 128], strides = [1, 1]} : vector<2x256xf32> to vector<2x128xf32>
    %105 = arith.addf %103, %104 : vector<2x128xf32>
    %106 = vector.extract_strided_slice %102 {offsets = [0, 0], sizes = [2, 96], strides = [1, 1]} : vector<2x128xf32> to vector<2x96xf32>
    %107 = arith.negf %106 : vector<2x96xf32>
    %108 = math.exp %107 : vector<2x96xf32>
    %cst_21 = arith.constant 1.000000e+00 : f32
    %109 = vector.broadcast %cst_21 : f32 to vector<2x96xf32>
    %110 = arith.addf %109, %108 : vector<2x96xf32>
    %111 = arith.divf %109, %110 : vector<2x96xf32>
    %112 = vector.extract_strided_slice %102 {offsets = [0, 96], sizes = [2, 32], strides = [1, 1]} : vector<2x128xf32> to vector<2x32xf32>
    %113 = math.tanh %112 : vector<2x32xf32>
    %114 = vector.extract_strided_slice %111 {offsets = [0, 0], sizes = [2, 32], strides = [1, 1]} : vector<2x96xf32> to vector<2x32xf32>
    %115 = vector.extract_strided_slice %111 {offsets = [0, 32], sizes = [2, 32], strides = [1, 1]} : vector<2x96xf32> to vector<2x32xf32>
    %116 = vector.extract_strided_slice %111 {offsets = [0, 64], sizes = [2, 32], strides = [1, 1]} : vector<2x96xf32> to vector<2x32xf32>
    %117 = arith.mulf %115, %79 : vector<2x32xf32>
    %118 = arith.mulf %114, %113 : vector<2x32xf32>
    %119 = arith.addf %117, %118 : vector<2x32xf32>
    %120 = math.tanh %119 : vector<2x32xf32>
    %121 = arith.mulf %116, %120 : vector<2x32xf32>
    %122 = vector.extract_strided_slice %105 {offsets = [0, 0], sizes = [2, 96], strides = [1, 1]} : vector<2x128xf32> to vector<2x96xf32>
    %123 = arith.negf %122 : vector<2x96xf32>
    %124 = math.exp %123 : vector<2x96xf32>
    %cst_22 = arith.constant 1.000000e+00 : f32
    %125 = vector.broadcast %cst_22 : f32 to vector<2x96xf32>
    %126 = arith.addf %125, %124 : vector<2x96xf32>
    %127 = arith.divf %125, %126 : vector<2x96xf32>
    %128 = vector.extract_strided_slice %105 {offsets = [0, 96], sizes = [2, 32], strides = [1, 1]} : vector<2x128xf32> to vector<2x32xf32>
    %129 = math.tanh %128 : vector<2x32xf32>
    %130 = vector.extract_strided_slice %127 {offsets = [0, 0], sizes = [2, 32], strides = [1, 1]} : vector<2x96xf32> to vector<2x32xf32>
    %131 = vector.extract_strided_slice %127 {offsets = [0, 32], sizes = [2, 32], strides = [1, 1]} : vector<2x96xf32> to vector<2x32xf32>
    %132 = vector.extract_strided_slice %127 {offsets = [0, 64], sizes = [2, 32], strides = [1, 1]} : vector<2x96xf32> to vector<2x32xf32>
    %133 = arith.mulf %131, %95 : vector<2x32xf32>
    %134 = arith.mulf %130, %129 : vector<2x32xf32>
    %135 = arith.addf %133, %134 : vector<2x32xf32>
    %136 = math.tanh %135 : vector<2x32xf32>
    %137 = arith.mulf %132, %136 : vector<2x32xf32>
    %138 = tpu.concatenate %121, %137 in 1 : vector<2x32xf32>, vector<2x32xf32> -> vector<2x64xf32>
    %cst_23 = arith.constant dense<0.000000e+00> : vector<2x256xf32>
    %139 = tpu.matmul %138, %8, %cst_23 {dimension_numbers = #tpu.dot_dimension_numbers<[1], [0], [0], [1], [0, 0, 1, 1], [], []>} : vector<2x64xf32>, vector<64x256xf32>, vector<2x256xf32> -> vector<2x256xf32>
    %140 = vector.extract_strided_slice %13 {offsets = [6, 0], sizes = [2, 128], strides = [1, 1]} : vector<16x256xf32> to vector<2x128xf32>
    %141 = vector.extract_strided_slice %139 {offsets = [0, 0], sizes = [2, 128], strides = [1, 1]} : vector<2x256xf32> to vector<2x128xf32>
    %142 = arith.addf %140, %141 : vector<2x128xf32>
    %143 = vector.extract_strided_slice %13 {offsets = [8, 128], sizes = [2, 128], strides = [1, 1]} : vector<16x256xf32> to vector<2x128xf32>
    %144 = vector.extract_strided_slice %139 {offsets = [0, 128], sizes = [2, 128], strides = [1, 1]} : vector<2x256xf32> to vector<2x128xf32>
    %145 = arith.addf %143, %144 : vector<2x128xf32>
    %146 = vector.extract_strided_slice %142 {offsets = [0, 0], sizes = [2, 96], strides = [1, 1]} : vector<2x128xf32> to vector<2x96xf32>
    %147 = arith.negf %146 : vector<2x96xf32>
    %148 = math.exp %147 : vector<2x96xf32>
    %cst_24 = arith.constant 1.000000e+00 : f32
    %149 = vector.broadcast %cst_24 : f32 to vector<2x96xf32>
    %150 = arith.addf %149, %148 : vector<2x96xf32>
    %151 = arith.divf %149, %150 : vector<2x96xf32>
    %152 = vector.extract_strided_slice %142 {offsets = [0, 96], sizes = [2, 32], strides = [1, 1]} : vector<2x128xf32> to vector<2x32xf32>
    %153 = math.tanh %152 : vector<2x32xf32>
    %154 = vector.extract_strided_slice %151 {offsets = [0, 0], sizes = [2, 32], strides = [1, 1]} : vector<2x96xf32> to vector<2x32xf32>
    %155 = vector.extract_strided_slice %151 {offsets = [0, 32], sizes = [2, 32], strides = [1, 1]} : vector<2x96xf32> to vector<2x32xf32>
    %156 = vector.extract_strided_slice %151 {offsets = [0, 64], sizes = [2, 32], strides = [1, 1]} : vector<2x96xf32> to vector<2x32xf32>
    %157 = arith.mulf %155, %119 : vector<2x32xf32>
    %158 = arith.mulf %154, %153 : vector<2x32xf32>
    %159 = arith.addf %157, %158 : vector<2x32xf32>
    %160 = math.tanh %159 : vector<2x32xf32>
    %161 = arith.mulf %156, %160 : vector<2x32xf32>
    %162 = vector.extract_strided_slice %145 {offsets = [0, 0], sizes = [2, 96], strides = [1, 1]} : vector<2x128xf32> to vector<2x96xf32>
    %163 = arith.negf %162 : vector<2x96xf32>
    %164 = math.exp %163 : vector<2x96xf32>
    %cst_25 = arith.constant 1.000000e+00 : f32
    %165 = vector.broadcast %cst_25 : f32 to vector<2x96xf32>
    %166 = arith.addf %165, %164 : vector<2x96xf32>
    %167 = arith.divf %165, %166 : vector<2x96xf32>
    %168 = vector.extract_strided_slice %145 {offsets = [0, 96], sizes = [2, 32], strides = [1, 1]} : vector<2x128xf32> to vector<2x32xf32>
    %169 = math.tanh %168 : vector<2x32xf32>
    %170 = vector.extract_strided_slice %167 {offsets = [0, 0], sizes = [2, 32], strides = [1, 1]} : vector<2x96xf32> to vector<2x32xf32>
    %171 = vector.extract_strided_slice %167 {offsets = [0, 32], sizes = [2, 32], strides = [1, 1]} : vector<2x96xf32> to vector<2x32xf32>
    %172 = vector.extract_strided_slice %167 {offsets = [0, 64], sizes = [2, 32], strides = [1, 1]} : vector<2x96xf32> to vector<2x32xf32>
    %173 = arith.mulf %171, %135 : vector<2x32xf32>
    %174 = arith.mulf %170, %169 : vector<2x32xf32>
    %175 = arith.addf %173, %174 : vector<2x32xf32>
    %176 = math.tanh %175 : vector<2x32xf32>
    %177 = arith.mulf %172, %176 : vector<2x32xf32>
    %178 = tpu.concatenate %161, %177 in 1 : vector<2x32xf32>, vector<2x32xf32> -> vector<2x64xf32>
    %cst_26 = arith.constant dense<0.000000e+00> : vector<2x256xf32>
    %179 = tpu.matmul %178, %8, %cst_26 {dimension_numbers = #tpu.dot_dimension_numbers<[1], [0], [0], [1], [0, 0, 1, 1], [], []>} : vector<2x64xf32>, vector<64x256xf32>, vector<2x256xf32> -> vector<2x256xf32>
    %180 = vector.extract_strided_slice %13 {offsets = [8, 0], sizes = [2, 128], strides = [1, 1]} : vector<16x256xf32> to vector<2x128xf32>
    %181 = vector.extract_strided_slice %179 {offsets = [0, 0], sizes = [2, 128], strides = [1, 1]} : vector<2x256xf32> to vector<2x128xf32>
    %182 = arith.addf %180, %181 : vector<2x128xf32>
    %183 = vector.extract_strided_slice %13 {offsets = [6, 128], sizes = [2, 128], strides = [1, 1]} : vector<16x256xf32> to vector<2x128xf32>
    %184 = vector.extract_strided_slice %179 {offsets = [0, 128], sizes = [2, 128], strides = [1, 1]} : vector<2x256xf32> to vector<2x128xf32>
    %185 = arith.addf %183, %184 : vector<2x128xf32>
    %186 = vector.extract_strided_slice %182 {offsets = [0, 0], sizes = [2, 96], strides = [1, 1]} : vector<2x128xf32> to vector<2x96xf32>
    %187 = arith.negf %186 : vector<2x96xf32>
    %188 = math.exp %187 : vector<2x96xf32>
    %cst_27 = arith.constant 1.000000e+00 : f32
    %189 = vector.broadcast %cst_27 : f32 to vector<2x96xf32>
    %190 = arith.addf %189, %188 : vector<2x96xf32>
    %191 = arith.divf %189, %190 : vector<2x96xf32>
    %192 = vector.extract_strided_slice %182 {offsets = [0, 96], sizes = [2, 32], strides = [1, 1]} : vector<2x128xf32> to vector<2x32xf32>
    %193 = math.tanh %192 : vector<2x32xf32>
    %194 = vector.extract_strided_slice %191 {offsets = [0, 0], sizes = [2, 32], strides = [1, 1]} : vector<2x96xf32> to vector<2x32xf32>
    %195 = vector.extract_strided_slice %191 {offsets = [0, 32], sizes = [2, 32], strides = [1, 1]} : vector<2x96xf32> to vector<2x32xf32>
    %196 = vector.extract_strided_slice %191 {offsets = [0, 64], sizes = [2, 32], strides = [1, 1]} : vector<2x96xf32> to vector<2x32xf32>
    %197 = arith.mulf %195, %159 : vector<2x32xf32>
    %198 = arith.mulf %194, %193 : vector<2x32xf32>
    %199 = arith.addf %197, %198 : vector<2x32xf32>
    %200 = math.tanh %199 : vector<2x32xf32>
    %201 = arith.mulf %196, %200 : vector<2x32xf32>
    %202 = vector.extract_strided_slice %185 {offsets = [0, 0], sizes = [2, 96], strides = [1, 1]} : vector<2x128xf32> to vector<2x96xf32>
    %203 = arith.negf %202 : vector<2x96xf32>
    %204 = math.exp %203 : vector<2x96xf32>
    %cst_28 = arith.constant 1.000000e+00 : f32
    %205 = vector.broadcast %cst_28 : f32 to vector<2x96xf32>
    %206 = arith.addf %205, %204 : vector<2x96xf32>
    %207 = arith.divf %205, %206 : vector<2x96xf32>
    %208 = vector.extract_strided_slice %185 {offsets = [0, 96], sizes = [2, 32], strides = [1, 1]} : vector<2x128xf32> to vector<2x32xf32>
    %209 = math.tanh %208 : vector<2x32xf32>
    %210 = vector.extract_strided_slice %207 {offsets = [0, 0], sizes = [2, 32], strides = [1, 1]} : vector<2x96xf32> to vector<2x32xf32>
    %211 = vector.extract_strided_slice %207 {offsets = [0, 32], sizes = [2, 32], strides = [1, 1]} : vector<2x96xf32> to vector<2x32xf32>
    %212 = vector.extract_strided_slice %207 {offsets = [0, 64], sizes = [2, 32], strides = [1, 1]} : vector<2x96xf32> to vector<2x32xf32>
    %213 = arith.mulf %211, %175 : vector<2x32xf32>
    %214 = arith.mulf %210, %209 : vector<2x32xf32>
    %215 = arith.addf %213, %214 : vector<2x32xf32>
    %216 = math.tanh %215 : vector<2x32xf32>
    %217 = arith.mulf %212, %216 : vector<2x32xf32>
    %218 = tpu.concatenate %201, %217 in 1 : vector<2x32xf32>, vector<2x32xf32> -> vector<2x64xf32>
    %cst_29 = arith.constant dense<0.000000e+00> : vector<2x256xf32>
    %219 = tpu.matmul %218, %8, %cst_29 {dimension_numbers = #tpu.dot_dimension_numbers<[1], [0], [0], [1], [0, 0, 1, 1], [], []>} : vector<2x64xf32>, vector<64x256xf32>, vector<2x256xf32> -> vector<2x256xf32>
    %220 = vector.extract_strided_slice %13 {offsets = [10, 0], sizes = [2, 128], strides = [1, 1]} : vector<16x256xf32> to vector<2x128xf32>
    %221 = vector.extract_strided_slice %219 {offsets = [0, 0], sizes = [2, 128], strides = [1, 1]} : vector<2x256xf32> to vector<2x128xf32>
    %222 = arith.addf %220, %221 : vector<2x128xf32>
    %223 = vector.extract_strided_slice %13 {offsets = [4, 128], sizes = [2, 128], strides = [1, 1]} : vector<16x256xf32> to vector<2x128xf32>
    %224 = vector.extract_strided_slice %219 {offsets = [0, 128], sizes = [2, 128], strides = [1, 1]} : vector<2x256xf32> to vector<2x128xf32>
    %225 = arith.addf %223, %224 : vector<2x128xf32>
    %226 = vector.extract_strided_slice %222 {offsets = [0, 0], sizes = [2, 96], strides = [1, 1]} : vector<2x128xf32> to vector<2x96xf32>
    %227 = arith.negf %226 : vector<2x96xf32>
    %228 = math.exp %227 : vector<2x96xf32>
    %cst_30 = arith.constant 1.000000e+00 : f32
    %229 = vector.broadcast %cst_30 : f32 to vector<2x96xf32>
    %230 = arith.addf %229, %228 : vector<2x96xf32>
    %231 = arith.divf %229, %230 : vector<2x96xf32>
    %232 = vector.extract_strided_slice %222 {offsets = [0, 96], sizes = [2, 32], strides = [1, 1]} : vector<2x128xf32> to vector<2x32xf32>
    %233 = math.tanh %232 : vector<2x32xf32>
    %234 = vector.extract_strided_slice %231 {offsets = [0, 0], sizes = [2, 32], strides = [1, 1]} : vector<2x96xf32> to vector<2x32xf32>
    %235 = vector.extract_strided_slice %231 {offsets = [0, 32], sizes = [2, 32], strides = [1, 1]} : vector<2x96xf32> to vector<2x32xf32>
    %236 = vector.extract_strided_slice %231 {offsets = [0, 64], sizes = [2, 32], strides = [1, 1]} : vector<2x96xf32> to vector<2x32xf32>
    %237 = arith.mulf %235, %199 : vector<2x32xf32>
    %238 = arith.mulf %234, %233 : vector<2x32xf32>
    %239 = arith.addf %237, %238 : vector<2x32xf32>
    %240 = math.tanh %239 : vector<2x32xf32>
    %241 = arith.mulf %236, %240 : vector<2x32xf32>
    %242 = vector.extract_strided_slice %225 {offsets = [0, 0], sizes = [2, 96], strides = [1, 1]} : vector<2x128xf32> to vector<2x96xf32>
    %243 = arith.negf %242 : vector<2x96xf32>
    %244 = math.exp %243 : vector<2x96xf32>
    %cst_31 = arith.constant 1.000000e+00 : f32
    %245 = vector.broadcast %cst_31 : f32 to vector<2x96xf32>
    %246 = arith.addf %245, %244 : vector<2x96xf32>
    %247 = arith.divf %245, %246 : vector<2x96xf32>
    %248 = vector.extract_strided_slice %225 {offsets = [0, 96], sizes = [2, 32], strides = [1, 1]} : vector<2x128xf32> to vector<2x32xf32>
    %249 = math.tanh %248 : vector<2x32xf32>
    %250 = vector.extract_strided_slice %247 {offsets = [0, 0], sizes = [2, 32], strides = [1, 1]} : vector<2x96xf32> to vector<2x32xf32>
    %251 = vector.extract_strided_slice %247 {offsets = [0, 32], sizes = [2, 32], strides = [1, 1]} : vector<2x96xf32> to vector<2x32xf32>
    %252 = vector.extract_strided_slice %247 {offsets = [0, 64], sizes = [2, 32], strides = [1, 1]} : vector<2x96xf32> to vector<2x32xf32>
    %253 = arith.mulf %251, %215 : vector<2x32xf32>
    %254 = arith.mulf %250, %249 : vector<2x32xf32>
    %255 = arith.addf %253, %254 : vector<2x32xf32>
    %256 = math.tanh %255 : vector<2x32xf32>
    %257 = arith.mulf %252, %256 : vector<2x32xf32>
    %258 = tpu.concatenate %241, %257 in 1 : vector<2x32xf32>, vector<2x32xf32> -> vector<2x64xf32>
    %cst_32 = arith.constant dense<0.000000e+00> : vector<2x256xf32>
    %259 = tpu.matmul %258, %8, %cst_32 {dimension_numbers = #tpu.dot_dimension_numbers<[1], [0], [0], [1], [0, 0, 1, 1], [], []>} : vector<2x64xf32>, vector<64x256xf32>, vector<2x256xf32> -> vector<2x256xf32>
    %260 = vector.extract_strided_slice %13 {offsets = [12, 0], sizes = [2, 128], strides = [1, 1]} : vector<16x256xf32> to vector<2x128xf32>
    %261 = vector.extract_strided_slice %259 {offsets = [0, 0], sizes = [2, 128], strides = [1, 1]} : vector<2x256xf32> to vector<2x128xf32>
    %262 = arith.addf %260, %261 : vector<2x128xf32>
    %263 = vector.extract_strided_slice %13 {offsets = [2, 128], sizes = [2, 128], strides = [1, 1]} : vector<16x256xf32> to vector<2x128xf32>
    %264 = vector.extract_strided_slice %259 {offsets = [0, 128], sizes = [2, 128], strides = [1, 1]} : vector<2x256xf32> to vector<2x128xf32>
    %265 = arith.addf %263, %264 : vector<2x128xf32>
    %266 = vector.extract_strided_slice %262 {offsets = [0, 0], sizes = [2, 96], strides = [1, 1]} : vector<2x128xf32> to vector<2x96xf32>
    %267 = arith.negf %266 : vector<2x96xf32>
    %268 = math.exp %267 : vector<2x96xf32>
    %cst_33 = arith.constant 1.000000e+00 : f32
    %269 = vector.broadcast %cst_33 : f32 to vector<2x96xf32>
    %270 = arith.addf %269, %268 : vector<2x96xf32>
    %271 = arith.divf %269, %270 : vector<2x96xf32>
    %272 = vector.extract_strided_slice %262 {offsets = [0, 96], sizes = [2, 32], strides = [1, 1]} : vector<2x128xf32> to vector<2x32xf32>
    %273 = math.tanh %272 : vector<2x32xf32>
    %274 = vector.extract_strided_slice %271 {offsets = [0, 0], sizes = [2, 32], strides = [1, 1]} : vector<2x96xf32> to vector<2x32xf32>
    %275 = vector.extract_strided_slice %271 {offsets = [0, 32], sizes = [2, 32], strides = [1, 1]} : vector<2x96xf32> to vector<2x32xf32>
    %276 = vector.extract_strided_slice %271 {offsets = [0, 64], sizes = [2, 32], strides = [1, 1]} : vector<2x96xf32> to vector<2x32xf32>
    %277 = arith.mulf %275, %239 : vector<2x32xf32>
    %278 = arith.mulf %274, %273 : vector<2x32xf32>
    %279 = arith.addf %277, %278 : vector<2x32xf32>
    %280 = math.tanh %279 : vector<2x32xf32>
    %281 = arith.mulf %276, %280 : vector<2x32xf32>
    %282 = vector.extract_strided_slice %265 {offsets = [0, 0], sizes = [2, 96], strides = [1, 1]} : vector<2x128xf32> to vector<2x96xf32>
    %283 = arith.negf %282 : vector<2x96xf32>
    %284 = math.exp %283 : vector<2x96xf32>
    %cst_34 = arith.constant 1.000000e+00 : f32
    %285 = vector.broadcast %cst_34 : f32 to vector<2x96xf32>
    %286 = arith.addf %285, %284 : vector<2x96xf32>
    %287 = arith.divf %285, %286 : vector<2x96xf32>
    %288 = vector.extract_strided_slice %265 {offsets = [0, 96], sizes = [2, 32], strides = [1, 1]} : vector<2x128xf32> to vector<2x32xf32>
    %289 = math.tanh %288 : vector<2x32xf32>
    %290 = vector.extract_strided_slice %287 {offsets = [0, 0], sizes = [2, 32], strides = [1, 1]} : vector<2x96xf32> to vector<2x32xf32>
    %291 = vector.extract_strided_slice %287 {offsets = [0, 32], sizes = [2, 32], strides = [1, 1]} : vector<2x96xf32> to vector<2x32xf32>
    %292 = vector.extract_strided_slice %287 {offsets = [0, 64], sizes = [2, 32], strides = [1, 1]} : vector<2x96xf32> to vector<2x32xf32>
    %293 = arith.mulf %291, %255 : vector<2x32xf32>
    %294 = arith.mulf %290, %289 : vector<2x32xf32>
    %295 = arith.addf %293, %294 : vector<2x32xf32>
    %296 = math.tanh %295 : vector<2x32xf32>
    %297 = arith.mulf %292, %296 : vector<2x32xf32>
    %298 = tpu.concatenate %281, %297 in 1 : vector<2x32xf32>, vector<2x32xf32> -> vector<2x64xf32>
    %cst_35 = arith.constant dense<0.000000e+00> : vector<2x256xf32>
    %299 = tpu.matmul %298, %8, %cst_35 {dimension_numbers = #tpu.dot_dimension_numbers<[1], [0], [0], [1], [0, 0, 1, 1], [], []>} : vector<2x64xf32>, vector<64x256xf32>, vector<2x256xf32> -> vector<2x256xf32>
    %300 = vector.extract_strided_slice %13 {offsets = [14, 0], sizes = [2, 128], strides = [1, 1]} : vector<16x256xf32> to vector<2x128xf32>
    %301 = vector.extract_strided_slice %299 {offsets = [0, 0], sizes = [2, 128], strides = [1, 1]} : vector<2x256xf32> to vector<2x128xf32>
    %302 = arith.addf %300, %301 : vector<2x128xf32>
    %303 = vector.extract_strided_slice %13 {offsets = [0, 128], sizes = [2, 128], strides = [1, 1]} : vector<16x256xf32> to vector<2x128xf32>
    %304 = vector.extract_strided_slice %299 {offsets = [0, 128], sizes = [2, 128], strides = [1, 1]} : vector<2x256xf32> to vector<2x128xf32>
    %305 = arith.addf %303, %304 : vector<2x128xf32>
    %306 = vector.extract_strided_slice %302 {offsets = [0, 0], sizes = [2, 96], strides = [1, 1]} : vector<2x128xf32> to vector<2x96xf32>
    %307 = arith.negf %306 : vector<2x96xf32>
    %308 = math.exp %307 : vector<2x96xf32>
    %cst_36 = arith.constant 1.000000e+00 : f32
    %309 = vector.broadcast %cst_36 : f32 to vector<2x96xf32>
    %310 = arith.addf %309, %308 : vector<2x96xf32>
    %311 = arith.divf %309, %310 : vector<2x96xf32>
    %312 = vector.extract_strided_slice %302 {offsets = [0, 96], sizes = [2, 32], strides = [1, 1]} : vector<2x128xf32> to vector<2x32xf32>
    %313 = math.tanh %312 : vector<2x32xf32>
    %314 = vector.extract_strided_slice %311 {offsets = [0, 0], sizes = [2, 32], strides = [1, 1]} : vector<2x96xf32> to vector<2x32xf32>
    %315 = vector.extract_strided_slice %311 {offsets = [0, 32], sizes = [2, 32], strides = [1, 1]} : vector<2x96xf32> to vector<2x32xf32>
    %316 = vector.extract_strided_slice %311 {offsets = [0, 64], sizes = [2, 32], strides = [1, 1]} : vector<2x96xf32> to vector<2x32xf32>
    %317 = arith.mulf %315, %279 : vector<2x32xf32>
    %318 = arith.mulf %314, %313 : vector<2x32xf32>
    %319 = arith.addf %317, %318 : vector<2x32xf32>
    %320 = math.tanh %319 : vector<2x32xf32>
    %321 = arith.mulf %316, %320 : vector<2x32xf32>
    %322 = vector.extract_strided_slice %305 {offsets = [0, 0], sizes = [2, 96], strides = [1, 1]} : vector<2x128xf32> to vector<2x96xf32>
    %323 = arith.negf %322 : vector<2x96xf32>
    %324 = math.exp %323 : vector<2x96xf32>
    %cst_37 = arith.constant 1.000000e+00 : f32
    %325 = vector.broadcast %cst_37 : f32 to vector<2x96xf32>
    %326 = arith.addf %325, %324 : vector<2x96xf32>
    %327 = arith.divf %325, %326 : vector<2x96xf32>
    %328 = vector.extract_strided_slice %305 {offsets = [0, 96], sizes = [2, 32], strides = [1, 1]} : vector<2x128xf32> to vector<2x32xf32>
    %329 = math.tanh %328 : vector<2x32xf32>
    %330 = vector.extract_strided_slice %327 {offsets = [0, 0], sizes = [2, 32], strides = [1, 1]} : vector<2x96xf32> to vector<2x32xf32>
    %331 = vector.extract_strided_slice %327 {offsets = [0, 32], sizes = [2, 32], strides = [1, 1]} : vector<2x96xf32> to vector<2x32xf32>
    %332 = vector.extract_strided_slice %327 {offsets = [0, 64], sizes = [2, 32], strides = [1, 1]} : vector<2x96xf32> to vector<2x32xf32>
    %333 = arith.mulf %331, %295 : vector<2x32xf32>
    %334 = arith.mulf %330, %329 : vector<2x32xf32>
    %335 = arith.addf %333, %334 : vector<2x32xf32>
    %336 = math.tanh %335 : vector<2x32xf32>
    %337 = arith.mulf %332, %336 : vector<2x32xf32>
    %338 = tpu.concatenate %41, %337 in 1 : vector<2x32xf32>, vector<2x32xf32> -> vector<2x64xf32>
    %339 = tpu.concatenate %81, %297 in 1 : vector<2x32xf32>, vector<2x32xf32> -> vector<2x64xf32>
    %340 = tpu.concatenate %121, %257 in 1 : vector<2x32xf32>, vector<2x32xf32> -> vector<2x64xf32>
    %341 = tpu.concatenate %161, %217 in 1 : vector<2x32xf32>, vector<2x32xf32> -> vector<2x64xf32>
    %342 = tpu.concatenate %201, %177 in 1 : vector<2x32xf32>, vector<2x32xf32> -> vector<2x64xf32>
    %343 = tpu.concatenate %241, %137 in 1 : vector<2x32xf32>, vector<2x32xf32> -> vector<2x64xf32>
    %344 = tpu.concatenate %281, %97 in 1 : vector<2x32xf32>, vector<2x32xf32> -> vector<2x64xf32>
    %345 = tpu.concatenate %321, %57 in 1 : vector<2x32xf32>, vector<2x32xf32> -> vector<2x64xf32>
    %346 = tpu.concatenate %338, %339, %340, %341, %342, %343, %344, %345 in 0 : vector<2x64xf32>, vector<2x64xf32>, vector<2x64xf32>, vector<2x64xf32>, vector<2x64xf32>, vector<2x64xf32>, vector<2x64xf32>, vector<2x64xf32> -> vector<16x64xf32>
    %c0_38 = arith.constant 0 : index
    %c0_39 = arith.constant 0 : index
    %347 = vector.load %arg7[%c0_38, %c0_39] : memref<64x256xf32, #tpu.memory_space<vmem>>, vector<64x256xf32>
    %c0_40 = arith.constant 0 : index
    %c0_41 = arith.constant 0 : index
    %348 = vector.load %arg5[%c0_40, %c0_41] : memref<64x256xf32, #tpu.memory_space<vmem>>, vector<64x256xf32>
    %cst_42 = arith.constant dense<0.000000e+00> : vector<16x256xf32>
    %349 = tpu.matmul %346, %348, %cst_42 {dimension_numbers = #tpu.dot_dimension_numbers<[1], [0], [0], [1], [0, 0, 1, 1], [], []>} : vector<16x64xf32>, vector<64x256xf32>, vector<16x256xf32> -> vector<16x256xf32>
    %c0_43 = arith.constant 0 : index
    %c0_44 = arith.constant 0 : index
    %350 = vector.load %arg6[%c0_43, %c0_44] : memref<1x256xf32, #tpu.memory_space<vmem>>, vector<1x256xf32>
    %351 = vector.broadcast %350 : vector<1x256xf32> to vector<16x256xf32>
    %352 = arith.addf %349, %351 : vector<16x256xf32>
    %cst_45 = arith.constant 0.000000e+00 : f32
    %353 = vector.broadcast %cst_45 : f32 to vector<2x32xf32>
    %cst_46 = arith.constant 0.000000e+00 : f32
    %354 = vector.broadcast %cst_46 : f32 to vector<2x32xf32>
    %cst_47 = arith.constant 0.000000e+00 : f32
    %355 = vector.broadcast %cst_47 : f32 to vector<2x32xf32>
    %cst_48 = arith.constant 0.000000e+00 : f32
    %356 = vector.broadcast %cst_48 : f32 to vector<2x32xf32>
    %357 = tpu.concatenate %353, %355 in 1 : vector<2x32xf32>, vector<2x32xf32> -> vector<2x64xf32>
    %cst_49 = arith.constant dense<0.000000e+00> : vector<2x256xf32>
    %358 = tpu.matmul %357, %347, %cst_49 {dimension_numbers = #tpu.dot_dimension_numbers<[1], [0], [0], [1], [0, 0, 1, 1], [], []>} : vector<2x64xf32>, vector<64x256xf32>, vector<2x256xf32> -> vector<2x256xf32>
    %359 = vector.extract_strided_slice %352 {offsets = [0, 0], sizes = [2, 128], strides = [1, 1]} : vector<16x256xf32> to vector<2x128xf32>
    %360 = vector.extract_strided_slice %358 {offsets = [0, 0], sizes = [2, 128], strides = [1, 1]} : vector<2x256xf32> to vector<2x128xf32>
    %361 = arith.addf %359, %360 : vector<2x128xf32>
    %362 = vector.extract_strided_slice %352 {offsets = [14, 128], sizes = [2, 128], strides = [1, 1]} : vector<16x256xf32> to vector<2x128xf32>
    %363 = vector.extract_strided_slice %358 {offsets = [0, 128], sizes = [2, 128], strides = [1, 1]} : vector<2x256xf32> to vector<2x128xf32>
    %364 = arith.addf %362, %363 : vector<2x128xf32>
    %365 = vector.extract_strided_slice %361 {offsets = [0, 0], sizes = [2, 96], strides = [1, 1]} : vector<2x128xf32> to vector<2x96xf32>
    %366 = arith.negf %365 : vector<2x96xf32>
    %367 = math.exp %366 : vector<2x96xf32>
    %cst_50 = arith.constant 1.000000e+00 : f32
    %368 = vector.broadcast %cst_50 : f32 to vector<2x96xf32>
    %369 = arith.addf %368, %367 : vector<2x96xf32>
    %370 = arith.divf %368, %369 : vector<2x96xf32>
    %371 = vector.extract_strided_slice %361 {offsets = [0, 96], sizes = [2, 32], strides = [1, 1]} : vector<2x128xf32> to vector<2x32xf32>
    %372 = math.tanh %371 : vector<2x32xf32>
    %373 = vector.extract_strided_slice %370 {offsets = [0, 0], sizes = [2, 32], strides = [1, 1]} : vector<2x96xf32> to vector<2x32xf32>
    %374 = vector.extract_strided_slice %370 {offsets = [0, 32], sizes = [2, 32], strides = [1, 1]} : vector<2x96xf32> to vector<2x32xf32>
    %375 = vector.extract_strided_slice %370 {offsets = [0, 64], sizes = [2, 32], strides = [1, 1]} : vector<2x96xf32> to vector<2x32xf32>
    %376 = arith.mulf %374, %354 : vector<2x32xf32>
    %377 = arith.mulf %373, %372 : vector<2x32xf32>
    %378 = arith.addf %376, %377 : vector<2x32xf32>
    %379 = math.tanh %378 : vector<2x32xf32>
    %380 = arith.mulf %375, %379 : vector<2x32xf32>
    %381 = vector.extract_strided_slice %364 {offsets = [0, 0], sizes = [2, 96], strides = [1, 1]} : vector<2x128xf32> to vector<2x96xf32>
    %382 = arith.negf %381 : vector<2x96xf32>
    %383 = math.exp %382 : vector<2x96xf32>
    %cst_51 = arith.constant 1.000000e+00 : f32
    %384 = vector.broadcast %cst_51 : f32 to vector<2x96xf32>
    %385 = arith.addf %384, %383 : vector<2x96xf32>
    %386 = arith.divf %384, %385 : vector<2x96xf32>
    %387 = vector.extract_strided_slice %364 {offsets = [0, 96], sizes = [2, 32], strides = [1, 1]} : vector<2x128xf32> to vector<2x32xf32>
    %388 = math.tanh %387 : vector<2x32xf32>
    %389 = vector.extract_strided_slice %386 {offsets = [0, 0], sizes = [2, 32], strides = [1, 1]} : vector<2x96xf32> to vector<2x32xf32>
    %390 = vector.extract_strided_slice %386 {offsets = [0, 32], sizes = [2, 32], strides = [1, 1]} : vector<2x96xf32> to vector<2x32xf32>
    %391 = vector.extract_strided_slice %386 {offsets = [0, 64], sizes = [2, 32], strides = [1, 1]} : vector<2x96xf32> to vector<2x32xf32>
    %392 = arith.mulf %390, %356 : vector<2x32xf32>
    %393 = arith.mulf %389, %388 : vector<2x32xf32>
    %394 = arith.addf %392, %393 : vector<2x32xf32>
    %395 = math.tanh %394 : vector<2x32xf32>
    %396 = arith.mulf %391, %395 : vector<2x32xf32>
    %397 = tpu.concatenate %380, %396 in 1 : vector<2x32xf32>, vector<2x32xf32> -> vector<2x64xf32>
    %cst_52 = arith.constant dense<0.000000e+00> : vector<2x256xf32>
    %398 = tpu.matmul %397, %347, %cst_52 {dimension_numbers = #tpu.dot_dimension_numbers<[1], [0], [0], [1], [0, 0, 1, 1], [], []>} : vector<2x64xf32>, vector<64x256xf32>, vector<2x256xf32> -> vector<2x256xf32>
    %399 = vector.extract_strided_slice %352 {offsets = [2, 0], sizes = [2, 128], strides = [1, 1]} : vector<16x256xf32> to vector<2x128xf32>
    %400 = vector.extract_strided_slice %398 {offsets = [0, 0], sizes = [2, 128], strides = [1, 1]} : vector<2x256xf32> to vector<2x128xf32>
    %401 = arith.addf %399, %400 : vector<2x128xf32>
    %402 = vector.extract_strided_slice %352 {offsets = [12, 128], sizes = [2, 128], strides = [1, 1]} : vector<16x256xf32> to vector<2x128xf32>
    %403 = vector.extract_strided_slice %398 {offsets = [0, 128], sizes = [2, 128], strides = [1, 1]} : vector<2x256xf32> to vector<2x128xf32>
    %404 = arith.addf %402, %403 : vector<2x128xf32>
    %405 = vector.extract_strided_slice %401 {offsets = [0, 0], sizes = [2, 96], strides = [1, 1]} : vector<2x128xf32> to vector<2x96xf32>
    %406 = arith.negf %405 : vector<2x96xf32>
    %407 = math.exp %406 : vector<2x96xf32>
    %cst_53 = arith.constant 1.000000e+00 : f32
    %408 = vector.broadcast %cst_53 : f32 to vector<2x96xf32>
    %409 = arith.addf %408, %407 : vector<2x96xf32>
    %410 = arith.divf %408, %409 : vector<2x96xf32>
    %411 = vector.extract_strided_slice %401 {offsets = [0, 96], sizes = [2, 32], strides = [1, 1]} : vector<2x128xf32> to vector<2x32xf32>
    %412 = math.tanh %411 : vector<2x32xf32>
    %413 = vector.extract_strided_slice %410 {offsets = [0, 0], sizes = [2, 32], strides = [1, 1]} : vector<2x96xf32> to vector<2x32xf32>
    %414 = vector.extract_strided_slice %410 {offsets = [0, 32], sizes = [2, 32], strides = [1, 1]} : vector<2x96xf32> to vector<2x32xf32>
    %415 = vector.extract_strided_slice %410 {offsets = [0, 64], sizes = [2, 32], strides = [1, 1]} : vector<2x96xf32> to vector<2x32xf32>
    %416 = arith.mulf %414, %378 : vector<2x32xf32>
    %417 = arith.mulf %413, %412 : vector<2x32xf32>
    %418 = arith.addf %416, %417 : vector<2x32xf32>
    %419 = math.tanh %418 : vector<2x32xf32>
    %420 = arith.mulf %415, %419 : vector<2x32xf32>
    %421 = vector.extract_strided_slice %404 {offsets = [0, 0], sizes = [2, 96], strides = [1, 1]} : vector<2x128xf32> to vector<2x96xf32>
    %422 = arith.negf %421 : vector<2x96xf32>
    %423 = math.exp %422 : vector<2x96xf32>
    %cst_54 = arith.constant 1.000000e+00 : f32
    %424 = vector.broadcast %cst_54 : f32 to vector<2x96xf32>
    %425 = arith.addf %424, %423 : vector<2x96xf32>
    %426 = arith.divf %424, %425 : vector<2x96xf32>
    %427 = vector.extract_strided_slice %404 {offsets = [0, 96], sizes = [2, 32], strides = [1, 1]} : vector<2x128xf32> to vector<2x32xf32>
    %428 = math.tanh %427 : vector<2x32xf32>
    %429 = vector.extract_strided_slice %426 {offsets = [0, 0], sizes = [2, 32], strides = [1, 1]} : vector<2x96xf32> to vector<2x32xf32>
    %430 = vector.extract_strided_slice %426 {offsets = [0, 32], sizes = [2, 32], strides = [1, 1]} : vector<2x96xf32> to vector<2x32xf32>
    %431 = vector.extract_strided_slice %426 {offsets = [0, 64], sizes = [2, 32], strides = [1, 1]} : vector<2x96xf32> to vector<2x32xf32>
    %432 = arith.mulf %430, %394 : vector<2x32xf32>
    %433 = arith.mulf %429, %428 : vector<2x32xf32>
    %434 = arith.addf %432, %433 : vector<2x32xf32>
    %435 = math.tanh %434 : vector<2x32xf32>
    %436 = arith.mulf %431, %435 : vector<2x32xf32>
    %437 = tpu.concatenate %420, %436 in 1 : vector<2x32xf32>, vector<2x32xf32> -> vector<2x64xf32>
    %cst_55 = arith.constant dense<0.000000e+00> : vector<2x256xf32>
    %438 = tpu.matmul %437, %347, %cst_55 {dimension_numbers = #tpu.dot_dimension_numbers<[1], [0], [0], [1], [0, 0, 1, 1], [], []>} : vector<2x64xf32>, vector<64x256xf32>, vector<2x256xf32> -> vector<2x256xf32>
    %439 = vector.extract_strided_slice %352 {offsets = [4, 0], sizes = [2, 128], strides = [1, 1]} : vector<16x256xf32> to vector<2x128xf32>
    %440 = vector.extract_strided_slice %438 {offsets = [0, 0], sizes = [2, 128], strides = [1, 1]} : vector<2x256xf32> to vector<2x128xf32>
    %441 = arith.addf %439, %440 : vector<2x128xf32>
    %442 = vector.extract_strided_slice %352 {offsets = [10, 128], sizes = [2, 128], strides = [1, 1]} : vector<16x256xf32> to vector<2x128xf32>
    %443 = vector.extract_strided_slice %438 {offsets = [0, 128], sizes = [2, 128], strides = [1, 1]} : vector<2x256xf32> to vector<2x128xf32>
    %444 = arith.addf %442, %443 : vector<2x128xf32>
    %445 = vector.extract_strided_slice %441 {offsets = [0, 0], sizes = [2, 96], strides = [1, 1]} : vector<2x128xf32> to vector<2x96xf32>
    %446 = arith.negf %445 : vector<2x96xf32>
    %447 = math.exp %446 : vector<2x96xf32>
    %cst_56 = arith.constant 1.000000e+00 : f32
    %448 = vector.broadcast %cst_56 : f32 to vector<2x96xf32>
    %449 = arith.addf %448, %447 : vector<2x96xf32>
    %450 = arith.divf %448, %449 : vector<2x96xf32>
    %451 = vector.extract_strided_slice %441 {offsets = [0, 96], sizes = [2, 32], strides = [1, 1]} : vector<2x128xf32> to vector<2x32xf32>
    %452 = math.tanh %451 : vector<2x32xf32>
    %453 = vector.extract_strided_slice %450 {offsets = [0, 0], sizes = [2, 32], strides = [1, 1]} : vector<2x96xf32> to vector<2x32xf32>
    %454 = vector.extract_strided_slice %450 {offsets = [0, 32], sizes = [2, 32], strides = [1, 1]} : vector<2x96xf32> to vector<2x32xf32>
    %455 = vector.extract_strided_slice %450 {offsets = [0, 64], sizes = [2, 32], strides = [1, 1]} : vector<2x96xf32> to vector<2x32xf32>
    %456 = arith.mulf %454, %418 : vector<2x32xf32>
    %457 = arith.mulf %453, %452 : vector<2x32xf32>
    %458 = arith.addf %456, %457 : vector<2x32xf32>
    %459 = math.tanh %458 : vector<2x32xf32>
    %460 = arith.mulf %455, %459 : vector<2x32xf32>
    %461 = vector.extract_strided_slice %444 {offsets = [0, 0], sizes = [2, 96], strides = [1, 1]} : vector<2x128xf32> to vector<2x96xf32>
    %462 = arith.negf %461 : vector<2x96xf32>
    %463 = math.exp %462 : vector<2x96xf32>
    %cst_57 = arith.constant 1.000000e+00 : f32
    %464 = vector.broadcast %cst_57 : f32 to vector<2x96xf32>
    %465 = arith.addf %464, %463 : vector<2x96xf32>
    %466 = arith.divf %464, %465 : vector<2x96xf32>
    %467 = vector.extract_strided_slice %444 {offsets = [0, 96], sizes = [2, 32], strides = [1, 1]} : vector<2x128xf32> to vector<2x32xf32>
    %468 = math.tanh %467 : vector<2x32xf32>
    %469 = vector.extract_strided_slice %466 {offsets = [0, 0], sizes = [2, 32], strides = [1, 1]} : vector<2x96xf32> to vector<2x32xf32>
    %470 = vector.extract_strided_slice %466 {offsets = [0, 32], sizes = [2, 32], strides = [1, 1]} : vector<2x96xf32> to vector<2x32xf32>
    %471 = vector.extract_strided_slice %466 {offsets = [0, 64], sizes = [2, 32], strides = [1, 1]} : vector<2x96xf32> to vector<2x32xf32>
    %472 = arith.mulf %470, %434 : vector<2x32xf32>
    %473 = arith.mulf %469, %468 : vector<2x32xf32>
    %474 = arith.addf %472, %473 : vector<2x32xf32>
    %475 = math.tanh %474 : vector<2x32xf32>
    %476 = arith.mulf %471, %475 : vector<2x32xf32>
    %477 = tpu.concatenate %460, %476 in 1 : vector<2x32xf32>, vector<2x32xf32> -> vector<2x64xf32>
    %cst_58 = arith.constant dense<0.000000e+00> : vector<2x256xf32>
    %478 = tpu.matmul %477, %347, %cst_58 {dimension_numbers = #tpu.dot_dimension_numbers<[1], [0], [0], [1], [0, 0, 1, 1], [], []>} : vector<2x64xf32>, vector<64x256xf32>, vector<2x256xf32> -> vector<2x256xf32>
    %479 = vector.extract_strided_slice %352 {offsets = [6, 0], sizes = [2, 128], strides = [1, 1]} : vector<16x256xf32> to vector<2x128xf32>
    %480 = vector.extract_strided_slice %478 {offsets = [0, 0], sizes = [2, 128], strides = [1, 1]} : vector<2x256xf32> to vector<2x128xf32>
    %481 = arith.addf %479, %480 : vector<2x128xf32>
    %482 = vector.extract_strided_slice %352 {offsets = [8, 128], sizes = [2, 128], strides = [1, 1]} : vector<16x256xf32> to vector<2x128xf32>
    %483 = vector.extract_strided_slice %478 {offsets = [0, 128], sizes = [2, 128], strides = [1, 1]} : vector<2x256xf32> to vector<2x128xf32>
    %484 = arith.addf %482, %483 : vector<2x128xf32>
    %485 = vector.extract_strided_slice %481 {offsets = [0, 0], sizes = [2, 96], strides = [1, 1]} : vector<2x128xf32> to vector<2x96xf32>
    %486 = arith.negf %485 : vector<2x96xf32>
    %487 = math.exp %486 : vector<2x96xf32>
    %cst_59 = arith.constant 1.000000e+00 : f32
    %488 = vector.broadcast %cst_59 : f32 to vector<2x96xf32>
    %489 = arith.addf %488, %487 : vector<2x96xf32>
    %490 = arith.divf %488, %489 : vector<2x96xf32>
    %491 = vector.extract_strided_slice %481 {offsets = [0, 96], sizes = [2, 32], strides = [1, 1]} : vector<2x128xf32> to vector<2x32xf32>
    %492 = math.tanh %491 : vector<2x32xf32>
    %493 = vector.extract_strided_slice %490 {offsets = [0, 0], sizes = [2, 32], strides = [1, 1]} : vector<2x96xf32> to vector<2x32xf32>
    %494 = vector.extract_strided_slice %490 {offsets = [0, 32], sizes = [2, 32], strides = [1, 1]} : vector<2x96xf32> to vector<2x32xf32>
    %495 = vector.extract_strided_slice %490 {offsets = [0, 64], sizes = [2, 32], strides = [1, 1]} : vector<2x96xf32> to vector<2x32xf32>
    %496 = arith.mulf %494, %458 : vector<2x32xf32>
    %497 = arith.mulf %493, %492 : vector<2x32xf32>
    %498 = arith.addf %496, %497 : vector<2x32xf32>
    %499 = math.tanh %498 : vector<2x32xf32>
    %500 = arith.mulf %495, %499 : vector<2x32xf32>
    %501 = vector.extract_strided_slice %484 {offsets = [0, 0], sizes = [2, 96], strides = [1, 1]} : vector<2x128xf32> to vector<2x96xf32>
    %502 = arith.negf %501 : vector<2x96xf32>
    %503 = math.exp %502 : vector<2x96xf32>
    %cst_60 = arith.constant 1.000000e+00 : f32
    %504 = vector.broadcast %cst_60 : f32 to vector<2x96xf32>
    %505 = arith.addf %504, %503 : vector<2x96xf32>
    %506 = arith.divf %504, %505 : vector<2x96xf32>
    %507 = vector.extract_strided_slice %484 {offsets = [0, 96], sizes = [2, 32], strides = [1, 1]} : vector<2x128xf32> to vector<2x32xf32>
    %508 = math.tanh %507 : vector<2x32xf32>
    %509 = vector.extract_strided_slice %506 {offsets = [0, 0], sizes = [2, 32], strides = [1, 1]} : vector<2x96xf32> to vector<2x32xf32>
    %510 = vector.extract_strided_slice %506 {offsets = [0, 32], sizes = [2, 32], strides = [1, 1]} : vector<2x96xf32> to vector<2x32xf32>
    %511 = vector.extract_strided_slice %506 {offsets = [0, 64], sizes = [2, 32], strides = [1, 1]} : vector<2x96xf32> to vector<2x32xf32>
    %512 = arith.mulf %510, %474 : vector<2x32xf32>
    %513 = arith.mulf %509, %508 : vector<2x32xf32>
    %514 = arith.addf %512, %513 : vector<2x32xf32>
    %515 = math.tanh %514 : vector<2x32xf32>
    %516 = arith.mulf %511, %515 : vector<2x32xf32>
    %517 = tpu.concatenate %500, %516 in 1 : vector<2x32xf32>, vector<2x32xf32> -> vector<2x64xf32>
    %cst_61 = arith.constant dense<0.000000e+00> : vector<2x256xf32>
    %518 = tpu.matmul %517, %347, %cst_61 {dimension_numbers = #tpu.dot_dimension_numbers<[1], [0], [0], [1], [0, 0, 1, 1], [], []>} : vector<2x64xf32>, vector<64x256xf32>, vector<2x256xf32> -> vector<2x256xf32>
    %519 = vector.extract_strided_slice %352 {offsets = [8, 0], sizes = [2, 128], strides = [1, 1]} : vector<16x256xf32> to vector<2x128xf32>
    %520 = vector.extract_strided_slice %518 {offsets = [0, 0], sizes = [2, 128], strides = [1, 1]} : vector<2x256xf32> to vector<2x128xf32>
    %521 = arith.addf %519, %520 : vector<2x128xf32>
    %522 = vector.extract_strided_slice %352 {offsets = [6, 128], sizes = [2, 128], strides = [1, 1]} : vector<16x256xf32> to vector<2x128xf32>
    %523 = vector.extract_strided_slice %518 {offsets = [0, 128], sizes = [2, 128], strides = [1, 1]} : vector<2x256xf32> to vector<2x128xf32>
    %524 = arith.addf %522, %523 : vector<2x128xf32>
    %525 = vector.extract_strided_slice %521 {offsets = [0, 0], sizes = [2, 96], strides = [1, 1]} : vector<2x128xf32> to vector<2x96xf32>
    %526 = arith.negf %525 : vector<2x96xf32>
    %527 = math.exp %526 : vector<2x96xf32>
    %cst_62 = arith.constant 1.000000e+00 : f32
    %528 = vector.broadcast %cst_62 : f32 to vector<2x96xf32>
    %529 = arith.addf %528, %527 : vector<2x96xf32>
    %530 = arith.divf %528, %529 : vector<2x96xf32>
    %531 = vector.extract_strided_slice %521 {offsets = [0, 96], sizes = [2, 32], strides = [1, 1]} : vector<2x128xf32> to vector<2x32xf32>
    %532 = math.tanh %531 : vector<2x32xf32>
    %533 = vector.extract_strided_slice %530 {offsets = [0, 0], sizes = [2, 32], strides = [1, 1]} : vector<2x96xf32> to vector<2x32xf32>
    %534 = vector.extract_strided_slice %530 {offsets = [0, 32], sizes = [2, 32], strides = [1, 1]} : vector<2x96xf32> to vector<2x32xf32>
    %535 = vector.extract_strided_slice %530 {offsets = [0, 64], sizes = [2, 32], strides = [1, 1]} : vector<2x96xf32> to vector<2x32xf32>
    %536 = arith.mulf %534, %498 : vector<2x32xf32>
    %537 = arith.mulf %533, %532 : vector<2x32xf32>
    %538 = arith.addf %536, %537 : vector<2x32xf32>
    %539 = math.tanh %538 : vector<2x32xf32>
    %540 = arith.mulf %535, %539 : vector<2x32xf32>
    %541 = vector.extract_strided_slice %524 {offsets = [0, 0], sizes = [2, 96], strides = [1, 1]} : vector<2x128xf32> to vector<2x96xf32>
    %542 = arith.negf %541 : vector<2x96xf32>
    %543 = math.exp %542 : vector<2x96xf32>
    %cst_63 = arith.constant 1.000000e+00 : f32
    %544 = vector.broadcast %cst_63 : f32 to vector<2x96xf32>
    %545 = arith.addf %544, %543 : vector<2x96xf32>
    %546 = arith.divf %544, %545 : vector<2x96xf32>
    %547 = vector.extract_strided_slice %524 {offsets = [0, 96], sizes = [2, 32], strides = [1, 1]} : vector<2x128xf32> to vector<2x32xf32>
    %548 = math.tanh %547 : vector<2x32xf32>
    %549 = vector.extract_strided_slice %546 {offsets = [0, 0], sizes = [2, 32], strides = [1, 1]} : vector<2x96xf32> to vector<2x32xf32>
    %550 = vector.extract_strided_slice %546 {offsets = [0, 32], sizes = [2, 32], strides = [1, 1]} : vector<2x96xf32> to vector<2x32xf32>
    %551 = vector.extract_strided_slice %546 {offsets = [0, 64], sizes = [2, 32], strides = [1, 1]} : vector<2x96xf32> to vector<2x32xf32>
    %552 = arith.mulf %550, %514 : vector<2x32xf32>
    %553 = arith.mulf %549, %548 : vector<2x32xf32>
    %554 = arith.addf %552, %553 : vector<2x32xf32>
    %555 = math.tanh %554 : vector<2x32xf32>
    %556 = arith.mulf %551, %555 : vector<2x32xf32>
    %557 = tpu.concatenate %540, %556 in 1 : vector<2x32xf32>, vector<2x32xf32> -> vector<2x64xf32>
    %cst_64 = arith.constant dense<0.000000e+00> : vector<2x256xf32>
    %558 = tpu.matmul %557, %347, %cst_64 {dimension_numbers = #tpu.dot_dimension_numbers<[1], [0], [0], [1], [0, 0, 1, 1], [], []>} : vector<2x64xf32>, vector<64x256xf32>, vector<2x256xf32> -> vector<2x256xf32>
    %559 = vector.extract_strided_slice %352 {offsets = [10, 0], sizes = [2, 128], strides = [1, 1]} : vector<16x256xf32> to vector<2x128xf32>
    %560 = vector.extract_strided_slice %558 {offsets = [0, 0], sizes = [2, 128], strides = [1, 1]} : vector<2x256xf32> to vector<2x128xf32>
    %561 = arith.addf %559, %560 : vector<2x128xf32>
    %562 = vector.extract_strided_slice %352 {offsets = [4, 128], sizes = [2, 128], strides = [1, 1]} : vector<16x256xf32> to vector<2x128xf32>
    %563 = vector.extract_strided_slice %558 {offsets = [0, 128], sizes = [2, 128], strides = [1, 1]} : vector<2x256xf32> to vector<2x128xf32>
    %564 = arith.addf %562, %563 : vector<2x128xf32>
    %565 = vector.extract_strided_slice %561 {offsets = [0, 0], sizes = [2, 96], strides = [1, 1]} : vector<2x128xf32> to vector<2x96xf32>
    %566 = arith.negf %565 : vector<2x96xf32>
    %567 = math.exp %566 : vector<2x96xf32>
    %cst_65 = arith.constant 1.000000e+00 : f32
    %568 = vector.broadcast %cst_65 : f32 to vector<2x96xf32>
    %569 = arith.addf %568, %567 : vector<2x96xf32>
    %570 = arith.divf %568, %569 : vector<2x96xf32>
    %571 = vector.extract_strided_slice %561 {offsets = [0, 96], sizes = [2, 32], strides = [1, 1]} : vector<2x128xf32> to vector<2x32xf32>
    %572 = math.tanh %571 : vector<2x32xf32>
    %573 = vector.extract_strided_slice %570 {offsets = [0, 0], sizes = [2, 32], strides = [1, 1]} : vector<2x96xf32> to vector<2x32xf32>
    %574 = vector.extract_strided_slice %570 {offsets = [0, 32], sizes = [2, 32], strides = [1, 1]} : vector<2x96xf32> to vector<2x32xf32>
    %575 = vector.extract_strided_slice %570 {offsets = [0, 64], sizes = [2, 32], strides = [1, 1]} : vector<2x96xf32> to vector<2x32xf32>
    %576 = arith.mulf %574, %538 : vector<2x32xf32>
    %577 = arith.mulf %573, %572 : vector<2x32xf32>
    %578 = arith.addf %576, %577 : vector<2x32xf32>
    %579 = math.tanh %578 : vector<2x32xf32>
    %580 = arith.mulf %575, %579 : vector<2x32xf32>
    %581 = vector.extract_strided_slice %564 {offsets = [0, 0], sizes = [2, 96], strides = [1, 1]} : vector<2x128xf32> to vector<2x96xf32>
    %582 = arith.negf %581 : vector<2x96xf32>
    %583 = math.exp %582 : vector<2x96xf32>
    %cst_66 = arith.constant 1.000000e+00 : f32
    %584 = vector.broadcast %cst_66 : f32 to vector<2x96xf32>
    %585 = arith.addf %584, %583 : vector<2x96xf32>
    %586 = arith.divf %584, %585 : vector<2x96xf32>
    %587 = vector.extract_strided_slice %564 {offsets = [0, 96], sizes = [2, 32], strides = [1, 1]} : vector<2x128xf32> to vector<2x32xf32>
    %588 = math.tanh %587 : vector<2x32xf32>
    %589 = vector.extract_strided_slice %586 {offsets = [0, 0], sizes = [2, 32], strides = [1, 1]} : vector<2x96xf32> to vector<2x32xf32>
    %590 = vector.extract_strided_slice %586 {offsets = [0, 32], sizes = [2, 32], strides = [1, 1]} : vector<2x96xf32> to vector<2x32xf32>
    %591 = vector.extract_strided_slice %586 {offsets = [0, 64], sizes = [2, 32], strides = [1, 1]} : vector<2x96xf32> to vector<2x32xf32>
    %592 = arith.mulf %590, %554 : vector<2x32xf32>
    %593 = arith.mulf %589, %588 : vector<2x32xf32>
    %594 = arith.addf %592, %593 : vector<2x32xf32>
    %595 = math.tanh %594 : vector<2x32xf32>
    %596 = arith.mulf %591, %595 : vector<2x32xf32>
    %597 = tpu.concatenate %580, %596 in 1 : vector<2x32xf32>, vector<2x32xf32> -> vector<2x64xf32>
    %cst_67 = arith.constant dense<0.000000e+00> : vector<2x256xf32>
    %598 = tpu.matmul %597, %347, %cst_67 {dimension_numbers = #tpu.dot_dimension_numbers<[1], [0], [0], [1], [0, 0, 1, 1], [], []>} : vector<2x64xf32>, vector<64x256xf32>, vector<2x256xf32> -> vector<2x256xf32>
    %599 = vector.extract_strided_slice %352 {offsets = [12, 0], sizes = [2, 128], strides = [1, 1]} : vector<16x256xf32> to vector<2x128xf32>
    %600 = vector.extract_strided_slice %598 {offsets = [0, 0], sizes = [2, 128], strides = [1, 1]} : vector<2x256xf32> to vector<2x128xf32>
    %601 = arith.addf %599, %600 : vector<2x128xf32>
    %602 = vector.extract_strided_slice %352 {offsets = [2, 128], sizes = [2, 128], strides = [1, 1]} : vector<16x256xf32> to vector<2x128xf32>
    %603 = vector.extract_strided_slice %598 {offsets = [0, 128], sizes = [2, 128], strides = [1, 1]} : vector<2x256xf32> to vector<2x128xf32>
    %604 = arith.addf %602, %603 : vector<2x128xf32>
    %605 = vector.extract_strided_slice %601 {offsets = [0, 0], sizes = [2, 96], strides = [1, 1]} : vector<2x128xf32> to vector<2x96xf32>
    %606 = arith.negf %605 : vector<2x96xf32>
    %607 = math.exp %606 : vector<2x96xf32>
    %cst_68 = arith.constant 1.000000e+00 : f32
    %608 = vector.broadcast %cst_68 : f32 to vector<2x96xf32>
    %609 = arith.addf %608, %607 : vector<2x96xf32>
    %610 = arith.divf %608, %609 : vector<2x96xf32>
    %611 = vector.extract_strided_slice %601 {offsets = [0, 96], sizes = [2, 32], strides = [1, 1]} : vector<2x128xf32> to vector<2x32xf32>
    %612 = math.tanh %611 : vector<2x32xf32>
    %613 = vector.extract_strided_slice %610 {offsets = [0, 0], sizes = [2, 32], strides = [1, 1]} : vector<2x96xf32> to vector<2x32xf32>
    %614 = vector.extract_strided_slice %610 {offsets = [0, 32], sizes = [2, 32], strides = [1, 1]} : vector<2x96xf32> to vector<2x32xf32>
    %615 = vector.extract_strided_slice %610 {offsets = [0, 64], sizes = [2, 32], strides = [1, 1]} : vector<2x96xf32> to vector<2x32xf32>
    %616 = arith.mulf %614, %578 : vector<2x32xf32>
    %617 = arith.mulf %613, %612 : vector<2x32xf32>
    %618 = arith.addf %616, %617 : vector<2x32xf32>
    %619 = math.tanh %618 : vector<2x32xf32>
    %620 = arith.mulf %615, %619 : vector<2x32xf32>
    %621 = vector.extract_strided_slice %604 {offsets = [0, 0], sizes = [2, 96], strides = [1, 1]} : vector<2x128xf32> to vector<2x96xf32>
    %622 = arith.negf %621 : vector<2x96xf32>
    %623 = math.exp %622 : vector<2x96xf32>
    %cst_69 = arith.constant 1.000000e+00 : f32
    %624 = vector.broadcast %cst_69 : f32 to vector<2x96xf32>
    %625 = arith.addf %624, %623 : vector<2x96xf32>
    %626 = arith.divf %624, %625 : vector<2x96xf32>
    %627 = vector.extract_strided_slice %604 {offsets = [0, 96], sizes = [2, 32], strides = [1, 1]} : vector<2x128xf32> to vector<2x32xf32>
    %628 = math.tanh %627 : vector<2x32xf32>
    %629 = vector.extract_strided_slice %626 {offsets = [0, 0], sizes = [2, 32], strides = [1, 1]} : vector<2x96xf32> to vector<2x32xf32>
    %630 = vector.extract_strided_slice %626 {offsets = [0, 32], sizes = [2, 32], strides = [1, 1]} : vector<2x96xf32> to vector<2x32xf32>
    %631 = vector.extract_strided_slice %626 {offsets = [0, 64], sizes = [2, 32], strides = [1, 1]} : vector<2x96xf32> to vector<2x32xf32>
    %632 = arith.mulf %630, %594 : vector<2x32xf32>
    %633 = arith.mulf %629, %628 : vector<2x32xf32>
    %634 = arith.addf %632, %633 : vector<2x32xf32>
    %635 = math.tanh %634 : vector<2x32xf32>
    %636 = arith.mulf %631, %635 : vector<2x32xf32>
    %637 = tpu.concatenate %620, %636 in 1 : vector<2x32xf32>, vector<2x32xf32> -> vector<2x64xf32>
    %cst_70 = arith.constant dense<0.000000e+00> : vector<2x256xf32>
    %638 = tpu.matmul %637, %347, %cst_70 {dimension_numbers = #tpu.dot_dimension_numbers<[1], [0], [0], [1], [0, 0, 1, 1], [], []>} : vector<2x64xf32>, vector<64x256xf32>, vector<2x256xf32> -> vector<2x256xf32>
    %639 = vector.extract_strided_slice %352 {offsets = [14, 0], sizes = [2, 128], strides = [1, 1]} : vector<16x256xf32> to vector<2x128xf32>
    %640 = vector.extract_strided_slice %638 {offsets = [0, 0], sizes = [2, 128], strides = [1, 1]} : vector<2x256xf32> to vector<2x128xf32>
    %641 = arith.addf %639, %640 : vector<2x128xf32>
    %642 = vector.extract_strided_slice %352 {offsets = [0, 128], sizes = [2, 128], strides = [1, 1]} : vector<16x256xf32> to vector<2x128xf32>
    %643 = vector.extract_strided_slice %638 {offsets = [0, 128], sizes = [2, 128], strides = [1, 1]} : vector<2x256xf32> to vector<2x128xf32>
    %644 = arith.addf %642, %643 : vector<2x128xf32>
    %645 = vector.extract_strided_slice %641 {offsets = [0, 0], sizes = [2, 96], strides = [1, 1]} : vector<2x128xf32> to vector<2x96xf32>
    %646 = arith.negf %645 : vector<2x96xf32>
    %647 = math.exp %646 : vector<2x96xf32>
    %cst_71 = arith.constant 1.000000e+00 : f32
    %648 = vector.broadcast %cst_71 : f32 to vector<2x96xf32>
    %649 = arith.addf %648, %647 : vector<2x96xf32>
    %650 = arith.divf %648, %649 : vector<2x96xf32>
    %651 = vector.extract_strided_slice %641 {offsets = [0, 96], sizes = [2, 32], strides = [1, 1]} : vector<2x128xf32> to vector<2x32xf32>
    %652 = math.tanh %651 : vector<2x32xf32>
    %653 = vector.extract_strided_slice %650 {offsets = [0, 0], sizes = [2, 32], strides = [1, 1]} : vector<2x96xf32> to vector<2x32xf32>
    %654 = vector.extract_strided_slice %650 {offsets = [0, 32], sizes = [2, 32], strides = [1, 1]} : vector<2x96xf32> to vector<2x32xf32>
    %655 = vector.extract_strided_slice %650 {offsets = [0, 64], sizes = [2, 32], strides = [1, 1]} : vector<2x96xf32> to vector<2x32xf32>
    %656 = arith.mulf %654, %618 : vector<2x32xf32>
    %657 = arith.mulf %653, %652 : vector<2x32xf32>
    %658 = arith.addf %656, %657 : vector<2x32xf32>
    %659 = math.tanh %658 : vector<2x32xf32>
    %660 = arith.mulf %655, %659 : vector<2x32xf32>
    %661 = vector.extract_strided_slice %644 {offsets = [0, 0], sizes = [2, 96], strides = [1, 1]} : vector<2x128xf32> to vector<2x96xf32>
    %662 = arith.negf %661 : vector<2x96xf32>
    %663 = math.exp %662 : vector<2x96xf32>
    %cst_72 = arith.constant 1.000000e+00 : f32
    %664 = vector.broadcast %cst_72 : f32 to vector<2x96xf32>
    %665 = arith.addf %664, %663 : vector<2x96xf32>
    %666 = arith.divf %664, %665 : vector<2x96xf32>
    %667 = vector.extract_strided_slice %644 {offsets = [0, 96], sizes = [2, 32], strides = [1, 1]} : vector<2x128xf32> to vector<2x32xf32>
    %668 = math.tanh %667 : vector<2x32xf32>
    %669 = vector.extract_strided_slice %666 {offsets = [0, 0], sizes = [2, 32], strides = [1, 1]} : vector<2x96xf32> to vector<2x32xf32>
    %670 = vector.extract_strided_slice %666 {offsets = [0, 32], sizes = [2, 32], strides = [1, 1]} : vector<2x96xf32> to vector<2x32xf32>
    %671 = vector.extract_strided_slice %666 {offsets = [0, 64], sizes = [2, 32], strides = [1, 1]} : vector<2x96xf32> to vector<2x32xf32>
    %672 = arith.mulf %670, %634 : vector<2x32xf32>
    %673 = arith.mulf %669, %668 : vector<2x32xf32>
    %674 = arith.addf %672, %673 : vector<2x32xf32>
    %675 = math.tanh %674 : vector<2x32xf32>
    %676 = arith.mulf %671, %675 : vector<2x32xf32>
    %677 = tpu.concatenate %380, %676 in 1 : vector<2x32xf32>, vector<2x32xf32> -> vector<2x64xf32>
    %678 = tpu.concatenate %420, %636 in 1 : vector<2x32xf32>, vector<2x32xf32> -> vector<2x64xf32>
    %679 = tpu.concatenate %460, %596 in 1 : vector<2x32xf32>, vector<2x32xf32> -> vector<2x64xf32>
    %680 = tpu.concatenate %500, %556 in 1 : vector<2x32xf32>, vector<2x32xf32> -> vector<2x64xf32>
    %681 = tpu.concatenate %540, %516 in 1 : vector<2x32xf32>, vector<2x32xf32> -> vector<2x64xf32>
    %682 = tpu.concatenate %580, %476 in 1 : vector<2x32xf32>, vector<2x32xf32> -> vector<2x64xf32>
    %683 = tpu.concatenate %620, %436 in 1 : vector<2x32xf32>, vector<2x32xf32> -> vector<2x64xf32>
    %684 = tpu.concatenate %660, %396 in 1 : vector<2x32xf32>, vector<2x32xf32> -> vector<2x64xf32>
    %685 = tpu.concatenate %677, %678, %679, %680, %681, %682, %683, %684 in 0 : vector<2x64xf32>, vector<2x64xf32>, vector<2x64xf32>, vector<2x64xf32>, vector<2x64xf32>, vector<2x64xf32>, vector<2x64xf32>, vector<2x64xf32> -> vector<16x64xf32>
    %c0_73 = arith.constant 0 : index
    %c0_74 = arith.constant 0 : index
    %686 = vector.load %arg10[%c0_73, %c0_74] : memref<64x256xf32, #tpu.memory_space<vmem>>, vector<64x256xf32>
    %c0_75 = arith.constant 0 : index
    %c0_76 = arith.constant 0 : index
    %687 = vector.load %arg8[%c0_75, %c0_76] : memref<64x256xf32, #tpu.memory_space<vmem>>, vector<64x256xf32>
    %cst_77 = arith.constant dense<0.000000e+00> : vector<16x256xf32>
    %688 = tpu.matmul %685, %687, %cst_77 {dimension_numbers = #tpu.dot_dimension_numbers<[1], [0], [0], [1], [0, 0, 1, 1], [], []>} : vector<16x64xf32>, vector<64x256xf32>, vector<16x256xf32> -> vector<16x256xf32>
    %c0_78 = arith.constant 0 : index
    %c0_79 = arith.constant 0 : index
    %689 = vector.load %arg9[%c0_78, %c0_79] : memref<1x256xf32, #tpu.memory_space<vmem>>, vector<1x256xf32>
    %690 = vector.broadcast %689 : vector<1x256xf32> to vector<16x256xf32>
    %691 = arith.addf %688, %690 : vector<16x256xf32>
    %cst_80 = arith.constant 0.000000e+00 : f32
    %692 = vector.broadcast %cst_80 : f32 to vector<2x32xf32>
    %cst_81 = arith.constant 0.000000e+00 : f32
    %693 = vector.broadcast %cst_81 : f32 to vector<2x32xf32>
    %cst_82 = arith.constant 0.000000e+00 : f32
    %694 = vector.broadcast %cst_82 : f32 to vector<2x32xf32>
    %cst_83 = arith.constant 0.000000e+00 : f32
    %695 = vector.broadcast %cst_83 : f32 to vector<2x32xf32>
    %696 = tpu.concatenate %692, %694 in 1 : vector<2x32xf32>, vector<2x32xf32> -> vector<2x64xf32>
    %cst_84 = arith.constant dense<0.000000e+00> : vector<2x256xf32>
    %697 = tpu.matmul %696, %686, %cst_84 {dimension_numbers = #tpu.dot_dimension_numbers<[1], [0], [0], [1], [0, 0, 1, 1], [], []>} : vector<2x64xf32>, vector<64x256xf32>, vector<2x256xf32> -> vector<2x256xf32>
    %698 = vector.extract_strided_slice %691 {offsets = [0, 0], sizes = [2, 128], strides = [1, 1]} : vector<16x256xf32> to vector<2x128xf32>
    %699 = vector.extract_strided_slice %697 {offsets = [0, 0], sizes = [2, 128], strides = [1, 1]} : vector<2x256xf32> to vector<2x128xf32>
    %700 = arith.addf %698, %699 : vector<2x128xf32>
    %701 = vector.extract_strided_slice %691 {offsets = [14, 128], sizes = [2, 128], strides = [1, 1]} : vector<16x256xf32> to vector<2x128xf32>
    %702 = vector.extract_strided_slice %697 {offsets = [0, 128], sizes = [2, 128], strides = [1, 1]} : vector<2x256xf32> to vector<2x128xf32>
    %703 = arith.addf %701, %702 : vector<2x128xf32>
    %704 = vector.extract_strided_slice %700 {offsets = [0, 0], sizes = [2, 96], strides = [1, 1]} : vector<2x128xf32> to vector<2x96xf32>
    %705 = arith.negf %704 : vector<2x96xf32>
    %706 = math.exp %705 : vector<2x96xf32>
    %cst_85 = arith.constant 1.000000e+00 : f32
    %707 = vector.broadcast %cst_85 : f32 to vector<2x96xf32>
    %708 = arith.addf %707, %706 : vector<2x96xf32>
    %709 = arith.divf %707, %708 : vector<2x96xf32>
    %710 = vector.extract_strided_slice %700 {offsets = [0, 96], sizes = [2, 32], strides = [1, 1]} : vector<2x128xf32> to vector<2x32xf32>
    %711 = math.tanh %710 : vector<2x32xf32>
    %712 = vector.extract_strided_slice %709 {offsets = [0, 0], sizes = [2, 32], strides = [1, 1]} : vector<2x96xf32> to vector<2x32xf32>
    %713 = vector.extract_strided_slice %709 {offsets = [0, 32], sizes = [2, 32], strides = [1, 1]} : vector<2x96xf32> to vector<2x32xf32>
    %714 = vector.extract_strided_slice %709 {offsets = [0, 64], sizes = [2, 32], strides = [1, 1]} : vector<2x96xf32> to vector<2x32xf32>
    %715 = arith.mulf %713, %693 : vector<2x32xf32>
    %716 = arith.mulf %712, %711 : vector<2x32xf32>
    %717 = arith.addf %715, %716 : vector<2x32xf32>
    %718 = math.tanh %717 : vector<2x32xf32>
    %719 = arith.mulf %714, %718 : vector<2x32xf32>
    %720 = vector.extract_strided_slice %703 {offsets = [0, 0], sizes = [2, 96], strides = [1, 1]} : vector<2x128xf32> to vector<2x96xf32>
    %721 = arith.negf %720 : vector<2x96xf32>
    %722 = math.exp %721 : vector<2x96xf32>
    %cst_86 = arith.constant 1.000000e+00 : f32
    %723 = vector.broadcast %cst_86 : f32 to vector<2x96xf32>
    %724 = arith.addf %723, %722 : vector<2x96xf32>
    %725 = arith.divf %723, %724 : vector<2x96xf32>
    %726 = vector.extract_strided_slice %703 {offsets = [0, 96], sizes = [2, 32], strides = [1, 1]} : vector<2x128xf32> to vector<2x32xf32>
    %727 = math.tanh %726 : vector<2x32xf32>
    %728 = vector.extract_strided_slice %725 {offsets = [0, 0], sizes = [2, 32], strides = [1, 1]} : vector<2x96xf32> to vector<2x32xf32>
    %729 = vector.extract_strided_slice %725 {offsets = [0, 32], sizes = [2, 32], strides = [1, 1]} : vector<2x96xf32> to vector<2x32xf32>
    %730 = vector.extract_strided_slice %725 {offsets = [0, 64], sizes = [2, 32], strides = [1, 1]} : vector<2x96xf32> to vector<2x32xf32>
    %731 = arith.mulf %729, %695 : vector<2x32xf32>
    %732 = arith.mulf %728, %727 : vector<2x32xf32>
    %733 = arith.addf %731, %732 : vector<2x32xf32>
    %734 = math.tanh %733 : vector<2x32xf32>
    %735 = arith.mulf %730, %734 : vector<2x32xf32>
    %736 = tpu.concatenate %719, %735 in 1 : vector<2x32xf32>, vector<2x32xf32> -> vector<2x64xf32>
    %cst_87 = arith.constant dense<0.000000e+00> : vector<2x256xf32>
    %737 = tpu.matmul %736, %686, %cst_87 {dimension_numbers = #tpu.dot_dimension_numbers<[1], [0], [0], [1], [0, 0, 1, 1], [], []>} : vector<2x64xf32>, vector<64x256xf32>, vector<2x256xf32> -> vector<2x256xf32>
    %738 = vector.extract_strided_slice %691 {offsets = [2, 0], sizes = [2, 128], strides = [1, 1]} : vector<16x256xf32> to vector<2x128xf32>
    %739 = vector.extract_strided_slice %737 {offsets = [0, 0], sizes = [2, 128], strides = [1, 1]} : vector<2x256xf32> to vector<2x128xf32>
    %740 = arith.addf %738, %739 : vector<2x128xf32>
    %741 = vector.extract_strided_slice %691 {offsets = [12, 128], sizes = [2, 128], strides = [1, 1]} : vector<16x256xf32> to vector<2x128xf32>
    %742 = vector.extract_strided_slice %737 {offsets = [0, 128], sizes = [2, 128], strides = [1, 1]} : vector<2x256xf32> to vector<2x128xf32>
    %743 = arith.addf %741, %742 : vector<2x128xf32>
    %744 = vector.extract_strided_slice %740 {offsets = [0, 0], sizes = [2, 96], strides = [1, 1]} : vector<2x128xf32> to vector<2x96xf32>
    %745 = arith.negf %744 : vector<2x96xf32>
    %746 = math.exp %745 : vector<2x96xf32>
    %cst_88 = arith.constant 1.000000e+00 : f32
    %747 = vector.broadcast %cst_88 : f32 to vector<2x96xf32>
    %748 = arith.addf %747, %746 : vector<2x96xf32>
    %749 = arith.divf %747, %748 : vector<2x96xf32>
    %750 = vector.extract_strided_slice %740 {offsets = [0, 96], sizes = [2, 32], strides = [1, 1]} : vector<2x128xf32> to vector<2x32xf32>
    %751 = math.tanh %750 : vector<2x32xf32>
    %752 = vector.extract_strided_slice %749 {offsets = [0, 0], sizes = [2, 32], strides = [1, 1]} : vector<2x96xf32> to vector<2x32xf32>
    %753 = vector.extract_strided_slice %749 {offsets = [0, 32], sizes = [2, 32], strides = [1, 1]} : vector<2x96xf32> to vector<2x32xf32>
    %754 = vector.extract_strided_slice %749 {offsets = [0, 64], sizes = [2, 32], strides = [1, 1]} : vector<2x96xf32> to vector<2x32xf32>
    %755 = arith.mulf %753, %717 : vector<2x32xf32>
    %756 = arith.mulf %752, %751 : vector<2x32xf32>
    %757 = arith.addf %755, %756 : vector<2x32xf32>
    %758 = math.tanh %757 : vector<2x32xf32>
    %759 = arith.mulf %754, %758 : vector<2x32xf32>
    %760 = vector.extract_strided_slice %743 {offsets = [0, 0], sizes = [2, 96], strides = [1, 1]} : vector<2x128xf32> to vector<2x96xf32>
    %761 = arith.negf %760 : vector<2x96xf32>
    %762 = math.exp %761 : vector<2x96xf32>
    %cst_89 = arith.constant 1.000000e+00 : f32
    %763 = vector.broadcast %cst_89 : f32 to vector<2x96xf32>
    %764 = arith.addf %763, %762 : vector<2x96xf32>
    %765 = arith.divf %763, %764 : vector<2x96xf32>
    %766 = vector.extract_strided_slice %743 {offsets = [0, 96], sizes = [2, 32], strides = [1, 1]} : vector<2x128xf32> to vector<2x32xf32>
    %767 = math.tanh %766 : vector<2x32xf32>
    %768 = vector.extract_strided_slice %765 {offsets = [0, 0], sizes = [2, 32], strides = [1, 1]} : vector<2x96xf32> to vector<2x32xf32>
    %769 = vector.extract_strided_slice %765 {offsets = [0, 32], sizes = [2, 32], strides = [1, 1]} : vector<2x96xf32> to vector<2x32xf32>
    %770 = vector.extract_strided_slice %765 {offsets = [0, 64], sizes = [2, 32], strides = [1, 1]} : vector<2x96xf32> to vector<2x32xf32>
    %771 = arith.mulf %769, %733 : vector<2x32xf32>
    %772 = arith.mulf %768, %767 : vector<2x32xf32>
    %773 = arith.addf %771, %772 : vector<2x32xf32>
    %774 = math.tanh %773 : vector<2x32xf32>
    %775 = arith.mulf %770, %774 : vector<2x32xf32>
    %776 = tpu.concatenate %759, %775 in 1 : vector<2x32xf32>, vector<2x32xf32> -> vector<2x64xf32>
    %cst_90 = arith.constant dense<0.000000e+00> : vector<2x256xf32>
    %777 = tpu.matmul %776, %686, %cst_90 {dimension_numbers = #tpu.dot_dimension_numbers<[1], [0], [0], [1], [0, 0, 1, 1], [], []>} : vector<2x64xf32>, vector<64x256xf32>, vector<2x256xf32> -> vector<2x256xf32>
    %778 = vector.extract_strided_slice %691 {offsets = [4, 0], sizes = [2, 128], strides = [1, 1]} : vector<16x256xf32> to vector<2x128xf32>
    %779 = vector.extract_strided_slice %777 {offsets = [0, 0], sizes = [2, 128], strides = [1, 1]} : vector<2x256xf32> to vector<2x128xf32>
    %780 = arith.addf %778, %779 : vector<2x128xf32>
    %781 = vector.extract_strided_slice %691 {offsets = [10, 128], sizes = [2, 128], strides = [1, 1]} : vector<16x256xf32> to vector<2x128xf32>
    %782 = vector.extract_strided_slice %777 {offsets = [0, 128], sizes = [2, 128], strides = [1, 1]} : vector<2x256xf32> to vector<2x128xf32>
    %783 = arith.addf %781, %782 : vector<2x128xf32>
    %784 = vector.extract_strided_slice %780 {offsets = [0, 0], sizes = [2, 96], strides = [1, 1]} : vector<2x128xf32> to vector<2x96xf32>
    %785 = arith.negf %784 : vector<2x96xf32>
    %786 = math.exp %785 : vector<2x96xf32>
    %cst_91 = arith.constant 1.000000e+00 : f32
    %787 = vector.broadcast %cst_91 : f32 to vector<2x96xf32>
    %788 = arith.addf %787, %786 : vector<2x96xf32>
    %789 = arith.divf %787, %788 : vector<2x96xf32>
    %790 = vector.extract_strided_slice %780 {offsets = [0, 96], sizes = [2, 32], strides = [1, 1]} : vector<2x128xf32> to vector<2x32xf32>
    %791 = math.tanh %790 : vector<2x32xf32>
    %792 = vector.extract_strided_slice %789 {offsets = [0, 0], sizes = [2, 32], strides = [1, 1]} : vector<2x96xf32> to vector<2x32xf32>
    %793 = vector.extract_strided_slice %789 {offsets = [0, 32], sizes = [2, 32], strides = [1, 1]} : vector<2x96xf32> to vector<2x32xf32>
    %794 = vector.extract_strided_slice %789 {offsets = [0, 64], sizes = [2, 32], strides = [1, 1]} : vector<2x96xf32> to vector<2x32xf32>
    %795 = arith.mulf %793, %757 : vector<2x32xf32>
    %796 = arith.mulf %792, %791 : vector<2x32xf32>
    %797 = arith.addf %795, %796 : vector<2x32xf32>
    %798 = math.tanh %797 : vector<2x32xf32>
    %799 = arith.mulf %794, %798 : vector<2x32xf32>
    %800 = vector.extract_strided_slice %783 {offsets = [0, 0], sizes = [2, 96], strides = [1, 1]} : vector<2x128xf32> to vector<2x96xf32>
    %801 = arith.negf %800 : vector<2x96xf32>
    %802 = math.exp %801 : vector<2x96xf32>
    %cst_92 = arith.constant 1.000000e+00 : f32
    %803 = vector.broadcast %cst_92 : f32 to vector<2x96xf32>
    %804 = arith.addf %803, %802 : vector<2x96xf32>
    %805 = arith.divf %803, %804 : vector<2x96xf32>
    %806 = vector.extract_strided_slice %783 {offsets = [0, 96], sizes = [2, 32], strides = [1, 1]} : vector<2x128xf32> to vector<2x32xf32>
    %807 = math.tanh %806 : vector<2x32xf32>
    %808 = vector.extract_strided_slice %805 {offsets = [0, 0], sizes = [2, 32], strides = [1, 1]} : vector<2x96xf32> to vector<2x32xf32>
    %809 = vector.extract_strided_slice %805 {offsets = [0, 32], sizes = [2, 32], strides = [1, 1]} : vector<2x96xf32> to vector<2x32xf32>
    %810 = vector.extract_strided_slice %805 {offsets = [0, 64], sizes = [2, 32], strides = [1, 1]} : vector<2x96xf32> to vector<2x32xf32>
    %811 = arith.mulf %809, %773 : vector<2x32xf32>
    %812 = arith.mulf %808, %807 : vector<2x32xf32>
    %813 = arith.addf %811, %812 : vector<2x32xf32>
    %814 = math.tanh %813 : vector<2x32xf32>
    %815 = arith.mulf %810, %814 : vector<2x32xf32>
    %816 = tpu.concatenate %799, %815 in 1 : vector<2x32xf32>, vector<2x32xf32> -> vector<2x64xf32>
    %cst_93 = arith.constant dense<0.000000e+00> : vector<2x256xf32>
    %817 = tpu.matmul %816, %686, %cst_93 {dimension_numbers = #tpu.dot_dimension_numbers<[1], [0], [0], [1], [0, 0, 1, 1], [], []>} : vector<2x64xf32>, vector<64x256xf32>, vector<2x256xf32> -> vector<2x256xf32>
    %818 = vector.extract_strided_slice %691 {offsets = [6, 0], sizes = [2, 128], strides = [1, 1]} : vector<16x256xf32> to vector<2x128xf32>
    %819 = vector.extract_strided_slice %817 {offsets = [0, 0], sizes = [2, 128], strides = [1, 1]} : vector<2x256xf32> to vector<2x128xf32>
    %820 = arith.addf %818, %819 : vector<2x128xf32>
    %821 = vector.extract_strided_slice %691 {offsets = [8, 128], sizes = [2, 128], strides = [1, 1]} : vector<16x256xf32> to vector<2x128xf32>
    %822 = vector.extract_strided_slice %817 {offsets = [0, 128], sizes = [2, 128], strides = [1, 1]} : vector<2x256xf32> to vector<2x128xf32>
    %823 = arith.addf %821, %822 : vector<2x128xf32>
    %824 = vector.extract_strided_slice %820 {offsets = [0, 0], sizes = [2, 96], strides = [1, 1]} : vector<2x128xf32> to vector<2x96xf32>
    %825 = arith.negf %824 : vector<2x96xf32>
    %826 = math.exp %825 : vector<2x96xf32>
    %cst_94 = arith.constant 1.000000e+00 : f32
    %827 = vector.broadcast %cst_94 : f32 to vector<2x96xf32>
    %828 = arith.addf %827, %826 : vector<2x96xf32>
    %829 = arith.divf %827, %828 : vector<2x96xf32>
    %830 = vector.extract_strided_slice %820 {offsets = [0, 96], sizes = [2, 32], strides = [1, 1]} : vector<2x128xf32> to vector<2x32xf32>
    %831 = math.tanh %830 : vector<2x32xf32>
    %832 = vector.extract_strided_slice %829 {offsets = [0, 0], sizes = [2, 32], strides = [1, 1]} : vector<2x96xf32> to vector<2x32xf32>
    %833 = vector.extract_strided_slice %829 {offsets = [0, 32], sizes = [2, 32], strides = [1, 1]} : vector<2x96xf32> to vector<2x32xf32>
    %834 = vector.extract_strided_slice %829 {offsets = [0, 64], sizes = [2, 32], strides = [1, 1]} : vector<2x96xf32> to vector<2x32xf32>
    %835 = arith.mulf %833, %797 : vector<2x32xf32>
    %836 = arith.mulf %832, %831 : vector<2x32xf32>
    %837 = arith.addf %835, %836 : vector<2x32xf32>
    %838 = math.tanh %837 : vector<2x32xf32>
    %839 = arith.mulf %834, %838 : vector<2x32xf32>
    %840 = vector.extract_strided_slice %823 {offsets = [0, 0], sizes = [2, 96], strides = [1, 1]} : vector<2x128xf32> to vector<2x96xf32>
    %841 = arith.negf %840 : vector<2x96xf32>
    %842 = math.exp %841 : vector<2x96xf32>
    %cst_95 = arith.constant 1.000000e+00 : f32
    %843 = vector.broadcast %cst_95 : f32 to vector<2x96xf32>
    %844 = arith.addf %843, %842 : vector<2x96xf32>
    %845 = arith.divf %843, %844 : vector<2x96xf32>
    %846 = vector.extract_strided_slice %823 {offsets = [0, 96], sizes = [2, 32], strides = [1, 1]} : vector<2x128xf32> to vector<2x32xf32>
    %847 = math.tanh %846 : vector<2x32xf32>
    %848 = vector.extract_strided_slice %845 {offsets = [0, 0], sizes = [2, 32], strides = [1, 1]} : vector<2x96xf32> to vector<2x32xf32>
    %849 = vector.extract_strided_slice %845 {offsets = [0, 32], sizes = [2, 32], strides = [1, 1]} : vector<2x96xf32> to vector<2x32xf32>
    %850 = vector.extract_strided_slice %845 {offsets = [0, 64], sizes = [2, 32], strides = [1, 1]} : vector<2x96xf32> to vector<2x32xf32>
    %851 = arith.mulf %849, %813 : vector<2x32xf32>
    %852 = arith.mulf %848, %847 : vector<2x32xf32>
    %853 = arith.addf %851, %852 : vector<2x32xf32>
    %854 = math.tanh %853 : vector<2x32xf32>
    %855 = arith.mulf %850, %854 : vector<2x32xf32>
    %856 = tpu.concatenate %839, %855 in 1 : vector<2x32xf32>, vector<2x32xf32> -> vector<2x64xf32>
    %cst_96 = arith.constant dense<0.000000e+00> : vector<2x256xf32>
    %857 = tpu.matmul %856, %686, %cst_96 {dimension_numbers = #tpu.dot_dimension_numbers<[1], [0], [0], [1], [0, 0, 1, 1], [], []>} : vector<2x64xf32>, vector<64x256xf32>, vector<2x256xf32> -> vector<2x256xf32>
    %858 = vector.extract_strided_slice %691 {offsets = [8, 0], sizes = [2, 128], strides = [1, 1]} : vector<16x256xf32> to vector<2x128xf32>
    %859 = vector.extract_strided_slice %857 {offsets = [0, 0], sizes = [2, 128], strides = [1, 1]} : vector<2x256xf32> to vector<2x128xf32>
    %860 = arith.addf %858, %859 : vector<2x128xf32>
    %861 = vector.extract_strided_slice %691 {offsets = [6, 128], sizes = [2, 128], strides = [1, 1]} : vector<16x256xf32> to vector<2x128xf32>
    %862 = vector.extract_strided_slice %857 {offsets = [0, 128], sizes = [2, 128], strides = [1, 1]} : vector<2x256xf32> to vector<2x128xf32>
    %863 = arith.addf %861, %862 : vector<2x128xf32>
    %864 = vector.extract_strided_slice %860 {offsets = [0, 0], sizes = [2, 96], strides = [1, 1]} : vector<2x128xf32> to vector<2x96xf32>
    %865 = arith.negf %864 : vector<2x96xf32>
    %866 = math.exp %865 : vector<2x96xf32>
    %cst_97 = arith.constant 1.000000e+00 : f32
    %867 = vector.broadcast %cst_97 : f32 to vector<2x96xf32>
    %868 = arith.addf %867, %866 : vector<2x96xf32>
    %869 = arith.divf %867, %868 : vector<2x96xf32>
    %870 = vector.extract_strided_slice %860 {offsets = [0, 96], sizes = [2, 32], strides = [1, 1]} : vector<2x128xf32> to vector<2x32xf32>
    %871 = math.tanh %870 : vector<2x32xf32>
    %872 = vector.extract_strided_slice %869 {offsets = [0, 0], sizes = [2, 32], strides = [1, 1]} : vector<2x96xf32> to vector<2x32xf32>
    %873 = vector.extract_strided_slice %869 {offsets = [0, 32], sizes = [2, 32], strides = [1, 1]} : vector<2x96xf32> to vector<2x32xf32>
    %874 = vector.extract_strided_slice %869 {offsets = [0, 64], sizes = [2, 32], strides = [1, 1]} : vector<2x96xf32> to vector<2x32xf32>
    %875 = arith.mulf %873, %837 : vector<2x32xf32>
    %876 = arith.mulf %872, %871 : vector<2x32xf32>
    %877 = arith.addf %875, %876 : vector<2x32xf32>
    %878 = math.tanh %877 : vector<2x32xf32>
    %879 = arith.mulf %874, %878 : vector<2x32xf32>
    %880 = vector.extract_strided_slice %863 {offsets = [0, 0], sizes = [2, 96], strides = [1, 1]} : vector<2x128xf32> to vector<2x96xf32>
    %881 = arith.negf %880 : vector<2x96xf32>
    %882 = math.exp %881 : vector<2x96xf32>
    %cst_98 = arith.constant 1.000000e+00 : f32
    %883 = vector.broadcast %cst_98 : f32 to vector<2x96xf32>
    %884 = arith.addf %883, %882 : vector<2x96xf32>
    %885 = arith.divf %883, %884 : vector<2x96xf32>
    %886 = vector.extract_strided_slice %863 {offsets = [0, 96], sizes = [2, 32], strides = [1, 1]} : vector<2x128xf32> to vector<2x32xf32>
    %887 = math.tanh %886 : vector<2x32xf32>
    %888 = vector.extract_strided_slice %885 {offsets = [0, 0], sizes = [2, 32], strides = [1, 1]} : vector<2x96xf32> to vector<2x32xf32>
    %889 = vector.extract_strided_slice %885 {offsets = [0, 32], sizes = [2, 32], strides = [1, 1]} : vector<2x96xf32> to vector<2x32xf32>
    %890 = vector.extract_strided_slice %885 {offsets = [0, 64], sizes = [2, 32], strides = [1, 1]} : vector<2x96xf32> to vector<2x32xf32>
    %891 = arith.mulf %889, %853 : vector<2x32xf32>
    %892 = arith.mulf %888, %887 : vector<2x32xf32>
    %893 = arith.addf %891, %892 : vector<2x32xf32>
    %894 = math.tanh %893 : vector<2x32xf32>
    %895 = arith.mulf %890, %894 : vector<2x32xf32>
    %896 = tpu.concatenate %879, %895 in 1 : vector<2x32xf32>, vector<2x32xf32> -> vector<2x64xf32>
    %cst_99 = arith.constant dense<0.000000e+00> : vector<2x256xf32>
    %897 = tpu.matmul %896, %686, %cst_99 {dimension_numbers = #tpu.dot_dimension_numbers<[1], [0], [0], [1], [0, 0, 1, 1], [], []>} : vector<2x64xf32>, vector<64x256xf32>, vector<2x256xf32> -> vector<2x256xf32>
    %898 = vector.extract_strided_slice %691 {offsets = [10, 0], sizes = [2, 128], strides = [1, 1]} : vector<16x256xf32> to vector<2x128xf32>
    %899 = vector.extract_strided_slice %897 {offsets = [0, 0], sizes = [2, 128], strides = [1, 1]} : vector<2x256xf32> to vector<2x128xf32>
    %900 = arith.addf %898, %899 : vector<2x128xf32>
    %901 = vector.extract_strided_slice %691 {offsets = [4, 128], sizes = [2, 128], strides = [1, 1]} : vector<16x256xf32> to vector<2x128xf32>
    %902 = vector.extract_strided_slice %897 {offsets = [0, 128], sizes = [2, 128], strides = [1, 1]} : vector<2x256xf32> to vector<2x128xf32>
    %903 = arith.addf %901, %902 : vector<2x128xf32>
    %904 = vector.extract_strided_slice %900 {offsets = [0, 0], sizes = [2, 96], strides = [1, 1]} : vector<2x128xf32> to vector<2x96xf32>
    %905 = arith.negf %904 : vector<2x96xf32>
    %906 = math.exp %905 : vector<2x96xf32>
    %cst_100 = arith.constant 1.000000e+00 : f32
    %907 = vector.broadcast %cst_100 : f32 to vector<2x96xf32>
    %908 = arith.addf %907, %906 : vector<2x96xf32>
    %909 = arith.divf %907, %908 : vector<2x96xf32>
    %910 = vector.extract_strided_slice %900 {offsets = [0, 96], sizes = [2, 32], strides = [1, 1]} : vector<2x128xf32> to vector<2x32xf32>
    %911 = math.tanh %910 : vector<2x32xf32>
    %912 = vector.extract_strided_slice %909 {offsets = [0, 0], sizes = [2, 32], strides = [1, 1]} : vector<2x96xf32> to vector<2x32xf32>
    %913 = vector.extract_strided_slice %909 {offsets = [0, 32], sizes = [2, 32], strides = [1, 1]} : vector<2x96xf32> to vector<2x32xf32>
    %914 = vector.extract_strided_slice %909 {offsets = [0, 64], sizes = [2, 32], strides = [1, 1]} : vector<2x96xf32> to vector<2x32xf32>
    %915 = arith.mulf %913, %877 : vector<2x32xf32>
    %916 = arith.mulf %912, %911 : vector<2x32xf32>
    %917 = arith.addf %915, %916 : vector<2x32xf32>
    %918 = math.tanh %917 : vector<2x32xf32>
    %919 = arith.mulf %914, %918 : vector<2x32xf32>
    %920 = vector.extract_strided_slice %903 {offsets = [0, 0], sizes = [2, 96], strides = [1, 1]} : vector<2x128xf32> to vector<2x96xf32>
    %921 = arith.negf %920 : vector<2x96xf32>
    %922 = math.exp %921 : vector<2x96xf32>
    %cst_101 = arith.constant 1.000000e+00 : f32
    %923 = vector.broadcast %cst_101 : f32 to vector<2x96xf32>
    %924 = arith.addf %923, %922 : vector<2x96xf32>
    %925 = arith.divf %923, %924 : vector<2x96xf32>
    %926 = vector.extract_strided_slice %903 {offsets = [0, 96], sizes = [2, 32], strides = [1, 1]} : vector<2x128xf32> to vector<2x32xf32>
    %927 = math.tanh %926 : vector<2x32xf32>
    %928 = vector.extract_strided_slice %925 {offsets = [0, 0], sizes = [2, 32], strides = [1, 1]} : vector<2x96xf32> to vector<2x32xf32>
    %929 = vector.extract_strided_slice %925 {offsets = [0, 32], sizes = [2, 32], strides = [1, 1]} : vector<2x96xf32> to vector<2x32xf32>
    %930 = vector.extract_strided_slice %925 {offsets = [0, 64], sizes = [2, 32], strides = [1, 1]} : vector<2x96xf32> to vector<2x32xf32>
    %931 = arith.mulf %929, %893 : vector<2x32xf32>
    %932 = arith.mulf %928, %927 : vector<2x32xf32>
    %933 = arith.addf %931, %932 : vector<2x32xf32>
    %934 = math.tanh %933 : vector<2x32xf32>
    %935 = arith.mulf %930, %934 : vector<2x32xf32>
    %936 = tpu.concatenate %919, %935 in 1 : vector<2x32xf32>, vector<2x32xf32> -> vector<2x64xf32>
    %cst_102 = arith.constant dense<0.000000e+00> : vector<2x256xf32>
    %937 = tpu.matmul %936, %686, %cst_102 {dimension_numbers = #tpu.dot_dimension_numbers<[1], [0], [0], [1], [0, 0, 1, 1], [], []>} : vector<2x64xf32>, vector<64x256xf32>, vector<2x256xf32> -> vector<2x256xf32>
    %938 = vector.extract_strided_slice %691 {offsets = [12, 0], sizes = [2, 128], strides = [1, 1]} : vector<16x256xf32> to vector<2x128xf32>
    %939 = vector.extract_strided_slice %937 {offsets = [0, 0], sizes = [2, 128], strides = [1, 1]} : vector<2x256xf32> to vector<2x128xf32>
    %940 = arith.addf %938, %939 : vector<2x128xf32>
    %941 = vector.extract_strided_slice %691 {offsets = [2, 128], sizes = [2, 128], strides = [1, 1]} : vector<16x256xf32> to vector<2x128xf32>
    %942 = vector.extract_strided_slice %937 {offsets = [0, 128], sizes = [2, 128], strides = [1, 1]} : vector<2x256xf32> to vector<2x128xf32>
    %943 = arith.addf %941, %942 : vector<2x128xf32>
    %944 = vector.extract_strided_slice %940 {offsets = [0, 0], sizes = [2, 96], strides = [1, 1]} : vector<2x128xf32> to vector<2x96xf32>
    %945 = arith.negf %944 : vector<2x96xf32>
    %946 = math.exp %945 : vector<2x96xf32>
    %cst_103 = arith.constant 1.000000e+00 : f32
    %947 = vector.broadcast %cst_103 : f32 to vector<2x96xf32>
    %948 = arith.addf %947, %946 : vector<2x96xf32>
    %949 = arith.divf %947, %948 : vector<2x96xf32>
    %950 = vector.extract_strided_slice %940 {offsets = [0, 96], sizes = [2, 32], strides = [1, 1]} : vector<2x128xf32> to vector<2x32xf32>
    %951 = math.tanh %950 : vector<2x32xf32>
    %952 = vector.extract_strided_slice %949 {offsets = [0, 0], sizes = [2, 32], strides = [1, 1]} : vector<2x96xf32> to vector<2x32xf32>
    %953 = vector.extract_strided_slice %949 {offsets = [0, 32], sizes = [2, 32], strides = [1, 1]} : vector<2x96xf32> to vector<2x32xf32>
    %954 = vector.extract_strided_slice %949 {offsets = [0, 64], sizes = [2, 32], strides = [1, 1]} : vector<2x96xf32> to vector<2x32xf32>
    %955 = arith.mulf %953, %917 : vector<2x32xf32>
    %956 = arith.mulf %952, %951 : vector<2x32xf32>
    %957 = arith.addf %955, %956 : vector<2x32xf32>
    %958 = math.tanh %957 : vector<2x32xf32>
    %959 = arith.mulf %954, %958 : vector<2x32xf32>
    %960 = vector.extract_strided_slice %943 {offsets = [0, 0], sizes = [2, 96], strides = [1, 1]} : vector<2x128xf32> to vector<2x96xf32>
    %961 = arith.negf %960 : vector<2x96xf32>
    %962 = math.exp %961 : vector<2x96xf32>
    %cst_104 = arith.constant 1.000000e+00 : f32
    %963 = vector.broadcast %cst_104 : f32 to vector<2x96xf32>
    %964 = arith.addf %963, %962 : vector<2x96xf32>
    %965 = arith.divf %963, %964 : vector<2x96xf32>
    %966 = vector.extract_strided_slice %943 {offsets = [0, 96], sizes = [2, 32], strides = [1, 1]} : vector<2x128xf32> to vector<2x32xf32>
    %967 = math.tanh %966 : vector<2x32xf32>
    %968 = vector.extract_strided_slice %965 {offsets = [0, 0], sizes = [2, 32], strides = [1, 1]} : vector<2x96xf32> to vector<2x32xf32>
    %969 = vector.extract_strided_slice %965 {offsets = [0, 32], sizes = [2, 32], strides = [1, 1]} : vector<2x96xf32> to vector<2x32xf32>
    %970 = vector.extract_strided_slice %965 {offsets = [0, 64], sizes = [2, 32], strides = [1, 1]} : vector<2x96xf32> to vector<2x32xf32>
    %971 = arith.mulf %969, %933 : vector<2x32xf32>
    %972 = arith.mulf %968, %967 : vector<2x32xf32>
    %973 = arith.addf %971, %972 : vector<2x32xf32>
    %974 = math.tanh %973 : vector<2x32xf32>
    %975 = arith.mulf %970, %974 : vector<2x32xf32>
    %976 = tpu.concatenate %959, %975 in 1 : vector<2x32xf32>, vector<2x32xf32> -> vector<2x64xf32>
    %cst_105 = arith.constant dense<0.000000e+00> : vector<2x256xf32>
    %977 = tpu.matmul %976, %686, %cst_105 {dimension_numbers = #tpu.dot_dimension_numbers<[1], [0], [0], [1], [0, 0, 1, 1], [], []>} : vector<2x64xf32>, vector<64x256xf32>, vector<2x256xf32> -> vector<2x256xf32>
    %978 = vector.extract_strided_slice %691 {offsets = [14, 0], sizes = [2, 128], strides = [1, 1]} : vector<16x256xf32> to vector<2x128xf32>
    %979 = vector.extract_strided_slice %977 {offsets = [0, 0], sizes = [2, 128], strides = [1, 1]} : vector<2x256xf32> to vector<2x128xf32>
    %980 = arith.addf %978, %979 : vector<2x128xf32>
    %981 = vector.extract_strided_slice %691 {offsets = [0, 128], sizes = [2, 128], strides = [1, 1]} : vector<16x256xf32> to vector<2x128xf32>
    %982 = vector.extract_strided_slice %977 {offsets = [0, 128], sizes = [2, 128], strides = [1, 1]} : vector<2x256xf32> to vector<2x128xf32>
    %983 = arith.addf %981, %982 : vector<2x128xf32>
    %984 = vector.extract_strided_slice %980 {offsets = [0, 0], sizes = [2, 96], strides = [1, 1]} : vector<2x128xf32> to vector<2x96xf32>
    %985 = arith.negf %984 : vector<2x96xf32>
    %986 = math.exp %985 : vector<2x96xf32>
    %cst_106 = arith.constant 1.000000e+00 : f32
    %987 = vector.broadcast %cst_106 : f32 to vector<2x96xf32>
    %988 = arith.addf %987, %986 : vector<2x96xf32>
    %989 = arith.divf %987, %988 : vector<2x96xf32>
    %990 = vector.extract_strided_slice %980 {offsets = [0, 96], sizes = [2, 32], strides = [1, 1]} : vector<2x128xf32> to vector<2x32xf32>
    %991 = math.tanh %990 : vector<2x32xf32>
    %992 = vector.extract_strided_slice %989 {offsets = [0, 0], sizes = [2, 32], strides = [1, 1]} : vector<2x96xf32> to vector<2x32xf32>
    %993 = vector.extract_strided_slice %989 {offsets = [0, 32], sizes = [2, 32], strides = [1, 1]} : vector<2x96xf32> to vector<2x32xf32>
    %994 = vector.extract_strided_slice %989 {offsets = [0, 64], sizes = [2, 32], strides = [1, 1]} : vector<2x96xf32> to vector<2x32xf32>
    %995 = arith.mulf %993, %957 : vector<2x32xf32>
    %996 = arith.mulf %992, %991 : vector<2x32xf32>
    %997 = arith.addf %995, %996 : vector<2x32xf32>
    %998 = math.tanh %997 : vector<2x32xf32>
    %999 = arith.mulf %994, %998 : vector<2x32xf32>
    %1000 = vector.extract_strided_slice %983 {offsets = [0, 0], sizes = [2, 96], strides = [1, 1]} : vector<2x128xf32> to vector<2x96xf32>
    %1001 = arith.negf %1000 : vector<2x96xf32>
    %1002 = math.exp %1001 : vector<2x96xf32>
    %cst_107 = arith.constant 1.000000e+00 : f32
    %1003 = vector.broadcast %cst_107 : f32 to vector<2x96xf32>
    %1004 = arith.addf %1003, %1002 : vector<2x96xf32>
    %1005 = arith.divf %1003, %1004 : vector<2x96xf32>
    %1006 = vector.extract_strided_slice %983 {offsets = [0, 96], sizes = [2, 32], strides = [1, 1]} : vector<2x128xf32> to vector<2x32xf32>
    %1007 = math.tanh %1006 : vector<2x32xf32>
    %1008 = vector.extract_strided_slice %1005 {offsets = [0, 0], sizes = [2, 32], strides = [1, 1]} : vector<2x96xf32> to vector<2x32xf32>
    %1009 = vector.extract_strided_slice %1005 {offsets = [0, 32], sizes = [2, 32], strides = [1, 1]} : vector<2x96xf32> to vector<2x32xf32>
    %1010 = vector.extract_strided_slice %1005 {offsets = [0, 64], sizes = [2, 32], strides = [1, 1]} : vector<2x96xf32> to vector<2x32xf32>
    %1011 = arith.mulf %1009, %973 : vector<2x32xf32>
    %1012 = arith.mulf %1008, %1007 : vector<2x32xf32>
    %1013 = arith.addf %1011, %1012 : vector<2x32xf32>
    %1014 = math.tanh %1013 : vector<2x32xf32>
    %1015 = arith.mulf %1010, %1014 : vector<2x32xf32>
    %1016 = tpu.concatenate %719, %1015 in 1 : vector<2x32xf32>, vector<2x32xf32> -> vector<2x64xf32>
    %1017 = tpu.concatenate %759, %975 in 1 : vector<2x32xf32>, vector<2x32xf32> -> vector<2x64xf32>
    %1018 = tpu.concatenate %799, %935 in 1 : vector<2x32xf32>, vector<2x32xf32> -> vector<2x64xf32>
    %1019 = tpu.concatenate %839, %895 in 1 : vector<2x32xf32>, vector<2x32xf32> -> vector<2x64xf32>
    %1020 = tpu.concatenate %879, %855 in 1 : vector<2x32xf32>, vector<2x32xf32> -> vector<2x64xf32>
    %1021 = tpu.concatenate %919, %815 in 1 : vector<2x32xf32>, vector<2x32xf32> -> vector<2x64xf32>
    %1022 = tpu.concatenate %959, %775 in 1 : vector<2x32xf32>, vector<2x32xf32> -> vector<2x64xf32>
    %1023 = tpu.concatenate %999, %735 in 1 : vector<2x32xf32>, vector<2x32xf32> -> vector<2x64xf32>
    %1024 = tpu.concatenate %1016, %1017, %1018, %1019, %1020, %1021, %1022, %1023 in 0 : vector<2x64xf32>, vector<2x64xf32>, vector<2x64xf32>, vector<2x64xf32>, vector<2x64xf32>, vector<2x64xf32>, vector<2x64xf32>, vector<2x64xf32> -> vector<16x64xf32>
    %c0_108 = arith.constant 0 : index
    %c0_109 = arith.constant 0 : index
    %1025 = vector.load %arg13[%c0_108, %c0_109] : memref<64x256xf32, #tpu.memory_space<vmem>>, vector<64x256xf32>
    %c0_110 = arith.constant 0 : index
    %c0_111 = arith.constant 0 : index
    %1026 = vector.load %arg11[%c0_110, %c0_111] : memref<64x256xf32, #tpu.memory_space<vmem>>, vector<64x256xf32>
    %cst_112 = arith.constant dense<0.000000e+00> : vector<16x256xf32>
    %1027 = tpu.matmul %1024, %1026, %cst_112 {dimension_numbers = #tpu.dot_dimension_numbers<[1], [0], [0], [1], [0, 0, 1, 1], [], []>} : vector<16x64xf32>, vector<64x256xf32>, vector<16x256xf32> -> vector<16x256xf32>
    %c0_113 = arith.constant 0 : index
    %c0_114 = arith.constant 0 : index
    %1028 = vector.load %arg12[%c0_113, %c0_114] : memref<1x256xf32, #tpu.memory_space<vmem>>, vector<1x256xf32>
    %1029 = vector.broadcast %1028 : vector<1x256xf32> to vector<16x256xf32>
    %1030 = arith.addf %1027, %1029 : vector<16x256xf32>
    %cst_115 = arith.constant 0.000000e+00 : f32
    %1031 = vector.broadcast %cst_115 : f32 to vector<2x32xf32>
    %cst_116 = arith.constant 0.000000e+00 : f32
    %1032 = vector.broadcast %cst_116 : f32 to vector<2x32xf32>
    %cst_117 = arith.constant 0.000000e+00 : f32
    %1033 = vector.broadcast %cst_117 : f32 to vector<2x32xf32>
    %cst_118 = arith.constant 0.000000e+00 : f32
    %1034 = vector.broadcast %cst_118 : f32 to vector<2x32xf32>
    %1035 = tpu.concatenate %1031, %1033 in 1 : vector<2x32xf32>, vector<2x32xf32> -> vector<2x64xf32>
    %cst_119 = arith.constant dense<0.000000e+00> : vector<2x256xf32>
    %1036 = tpu.matmul %1035, %1025, %cst_119 {dimension_numbers = #tpu.dot_dimension_numbers<[1], [0], [0], [1], [0, 0, 1, 1], [], []>} : vector<2x64xf32>, vector<64x256xf32>, vector<2x256xf32> -> vector<2x256xf32>
    %1037 = vector.extract_strided_slice %1030 {offsets = [0, 0], sizes = [2, 128], strides = [1, 1]} : vector<16x256xf32> to vector<2x128xf32>
    %1038 = vector.extract_strided_slice %1036 {offsets = [0, 0], sizes = [2, 128], strides = [1, 1]} : vector<2x256xf32> to vector<2x128xf32>
    %1039 = arith.addf %1037, %1038 : vector<2x128xf32>
    %1040 = vector.extract_strided_slice %1030 {offsets = [14, 128], sizes = [2, 128], strides = [1, 1]} : vector<16x256xf32> to vector<2x128xf32>
    %1041 = vector.extract_strided_slice %1036 {offsets = [0, 128], sizes = [2, 128], strides = [1, 1]} : vector<2x256xf32> to vector<2x128xf32>
    %1042 = arith.addf %1040, %1041 : vector<2x128xf32>
    %1043 = vector.extract_strided_slice %1039 {offsets = [0, 0], sizes = [2, 96], strides = [1, 1]} : vector<2x128xf32> to vector<2x96xf32>
    %1044 = arith.negf %1043 : vector<2x96xf32>
    %1045 = math.exp %1044 : vector<2x96xf32>
    %cst_120 = arith.constant 1.000000e+00 : f32
    %1046 = vector.broadcast %cst_120 : f32 to vector<2x96xf32>
    %1047 = arith.addf %1046, %1045 : vector<2x96xf32>
    %1048 = arith.divf %1046, %1047 : vector<2x96xf32>
    %1049 = vector.extract_strided_slice %1039 {offsets = [0, 96], sizes = [2, 32], strides = [1, 1]} : vector<2x128xf32> to vector<2x32xf32>
    %1050 = math.tanh %1049 : vector<2x32xf32>
    %1051 = vector.extract_strided_slice %1048 {offsets = [0, 0], sizes = [2, 32], strides = [1, 1]} : vector<2x96xf32> to vector<2x32xf32>
    %1052 = vector.extract_strided_slice %1048 {offsets = [0, 32], sizes = [2, 32], strides = [1, 1]} : vector<2x96xf32> to vector<2x32xf32>
    %1053 = vector.extract_strided_slice %1048 {offsets = [0, 64], sizes = [2, 32], strides = [1, 1]} : vector<2x96xf32> to vector<2x32xf32>
    %1054 = arith.mulf %1052, %1032 : vector<2x32xf32>
    %1055 = arith.mulf %1051, %1050 : vector<2x32xf32>
    %1056 = arith.addf %1054, %1055 : vector<2x32xf32>
    %1057 = math.tanh %1056 : vector<2x32xf32>
    %1058 = arith.mulf %1053, %1057 : vector<2x32xf32>
    %1059 = vector.extract_strided_slice %1042 {offsets = [0, 0], sizes = [2, 96], strides = [1, 1]} : vector<2x128xf32> to vector<2x96xf32>
    %1060 = arith.negf %1059 : vector<2x96xf32>
    %1061 = math.exp %1060 : vector<2x96xf32>
    %cst_121 = arith.constant 1.000000e+00 : f32
    %1062 = vector.broadcast %cst_121 : f32 to vector<2x96xf32>
    %1063 = arith.addf %1062, %1061 : vector<2x96xf32>
    %1064 = arith.divf %1062, %1063 : vector<2x96xf32>
    %1065 = vector.extract_strided_slice %1042 {offsets = [0, 96], sizes = [2, 32], strides = [1, 1]} : vector<2x128xf32> to vector<2x32xf32>
    %1066 = math.tanh %1065 : vector<2x32xf32>
    %1067 = vector.extract_strided_slice %1064 {offsets = [0, 0], sizes = [2, 32], strides = [1, 1]} : vector<2x96xf32> to vector<2x32xf32>
    %1068 = vector.extract_strided_slice %1064 {offsets = [0, 32], sizes = [2, 32], strides = [1, 1]} : vector<2x96xf32> to vector<2x32xf32>
    %1069 = vector.extract_strided_slice %1064 {offsets = [0, 64], sizes = [2, 32], strides = [1, 1]} : vector<2x96xf32> to vector<2x32xf32>
    %1070 = arith.mulf %1068, %1034 : vector<2x32xf32>
    %1071 = arith.mulf %1067, %1066 : vector<2x32xf32>
    %1072 = arith.addf %1070, %1071 : vector<2x32xf32>
    %1073 = math.tanh %1072 : vector<2x32xf32>
    %1074 = arith.mulf %1069, %1073 : vector<2x32xf32>
    %1075 = tpu.concatenate %1058, %1074 in 1 : vector<2x32xf32>, vector<2x32xf32> -> vector<2x64xf32>
    %cst_122 = arith.constant dense<0.000000e+00> : vector<2x256xf32>
    %1076 = tpu.matmul %1075, %1025, %cst_122 {dimension_numbers = #tpu.dot_dimension_numbers<[1], [0], [0], [1], [0, 0, 1, 1], [], []>} : vector<2x64xf32>, vector<64x256xf32>, vector<2x256xf32> -> vector<2x256xf32>
    %1077 = vector.extract_strided_slice %1030 {offsets = [2, 0], sizes = [2, 128], strides = [1, 1]} : vector<16x256xf32> to vector<2x128xf32>
    %1078 = vector.extract_strided_slice %1076 {offsets = [0, 0], sizes = [2, 128], strides = [1, 1]} : vector<2x256xf32> to vector<2x128xf32>
    %1079 = arith.addf %1077, %1078 : vector<2x128xf32>
    %1080 = vector.extract_strided_slice %1030 {offsets = [12, 128], sizes = [2, 128], strides = [1, 1]} : vector<16x256xf32> to vector<2x128xf32>
    %1081 = vector.extract_strided_slice %1076 {offsets = [0, 128], sizes = [2, 128], strides = [1, 1]} : vector<2x256xf32> to vector<2x128xf32>
    %1082 = arith.addf %1080, %1081 : vector<2x128xf32>
    %1083 = vector.extract_strided_slice %1079 {offsets = [0, 0], sizes = [2, 96], strides = [1, 1]} : vector<2x128xf32> to vector<2x96xf32>
    %1084 = arith.negf %1083 : vector<2x96xf32>
    %1085 = math.exp %1084 : vector<2x96xf32>
    %cst_123 = arith.constant 1.000000e+00 : f32
    %1086 = vector.broadcast %cst_123 : f32 to vector<2x96xf32>
    %1087 = arith.addf %1086, %1085 : vector<2x96xf32>
    %1088 = arith.divf %1086, %1087 : vector<2x96xf32>
    %1089 = vector.extract_strided_slice %1079 {offsets = [0, 96], sizes = [2, 32], strides = [1, 1]} : vector<2x128xf32> to vector<2x32xf32>
    %1090 = math.tanh %1089 : vector<2x32xf32>
    %1091 = vector.extract_strided_slice %1088 {offsets = [0, 0], sizes = [2, 32], strides = [1, 1]} : vector<2x96xf32> to vector<2x32xf32>
    %1092 = vector.extract_strided_slice %1088 {offsets = [0, 32], sizes = [2, 32], strides = [1, 1]} : vector<2x96xf32> to vector<2x32xf32>
    %1093 = vector.extract_strided_slice %1088 {offsets = [0, 64], sizes = [2, 32], strides = [1, 1]} : vector<2x96xf32> to vector<2x32xf32>
    %1094 = arith.mulf %1092, %1056 : vector<2x32xf32>
    %1095 = arith.mulf %1091, %1090 : vector<2x32xf32>
    %1096 = arith.addf %1094, %1095 : vector<2x32xf32>
    %1097 = math.tanh %1096 : vector<2x32xf32>
    %1098 = arith.mulf %1093, %1097 : vector<2x32xf32>
    %1099 = vector.extract_strided_slice %1082 {offsets = [0, 0], sizes = [2, 96], strides = [1, 1]} : vector<2x128xf32> to vector<2x96xf32>
    %1100 = arith.negf %1099 : vector<2x96xf32>
    %1101 = math.exp %1100 : vector<2x96xf32>
    %cst_124 = arith.constant 1.000000e+00 : f32
    %1102 = vector.broadcast %cst_124 : f32 to vector<2x96xf32>
    %1103 = arith.addf %1102, %1101 : vector<2x96xf32>
    %1104 = arith.divf %1102, %1103 : vector<2x96xf32>
    %1105 = vector.extract_strided_slice %1082 {offsets = [0, 96], sizes = [2, 32], strides = [1, 1]} : vector<2x128xf32> to vector<2x32xf32>
    %1106 = math.tanh %1105 : vector<2x32xf32>
    %1107 = vector.extract_strided_slice %1104 {offsets = [0, 0], sizes = [2, 32], strides = [1, 1]} : vector<2x96xf32> to vector<2x32xf32>
    %1108 = vector.extract_strided_slice %1104 {offsets = [0, 32], sizes = [2, 32], strides = [1, 1]} : vector<2x96xf32> to vector<2x32xf32>
    %1109 = vector.extract_strided_slice %1104 {offsets = [0, 64], sizes = [2, 32], strides = [1, 1]} : vector<2x96xf32> to vector<2x32xf32>
    %1110 = arith.mulf %1108, %1072 : vector<2x32xf32>
    %1111 = arith.mulf %1107, %1106 : vector<2x32xf32>
    %1112 = arith.addf %1110, %1111 : vector<2x32xf32>
    %1113 = math.tanh %1112 : vector<2x32xf32>
    %1114 = arith.mulf %1109, %1113 : vector<2x32xf32>
    %1115 = tpu.concatenate %1098, %1114 in 1 : vector<2x32xf32>, vector<2x32xf32> -> vector<2x64xf32>
    %cst_125 = arith.constant dense<0.000000e+00> : vector<2x256xf32>
    %1116 = tpu.matmul %1115, %1025, %cst_125 {dimension_numbers = #tpu.dot_dimension_numbers<[1], [0], [0], [1], [0, 0, 1, 1], [], []>} : vector<2x64xf32>, vector<64x256xf32>, vector<2x256xf32> -> vector<2x256xf32>
    %1117 = vector.extract_strided_slice %1030 {offsets = [4, 0], sizes = [2, 128], strides = [1, 1]} : vector<16x256xf32> to vector<2x128xf32>
    %1118 = vector.extract_strided_slice %1116 {offsets = [0, 0], sizes = [2, 128], strides = [1, 1]} : vector<2x256xf32> to vector<2x128xf32>
    %1119 = arith.addf %1117, %1118 : vector<2x128xf32>
    %1120 = vector.extract_strided_slice %1030 {offsets = [10, 128], sizes = [2, 128], strides = [1, 1]} : vector<16x256xf32> to vector<2x128xf32>
    %1121 = vector.extract_strided_slice %1116 {offsets = [0, 128], sizes = [2, 128], strides = [1, 1]} : vector<2x256xf32> to vector<2x128xf32>
    %1122 = arith.addf %1120, %1121 : vector<2x128xf32>
    %1123 = vector.extract_strided_slice %1119 {offsets = [0, 0], sizes = [2, 96], strides = [1, 1]} : vector<2x128xf32> to vector<2x96xf32>
    %1124 = arith.negf %1123 : vector<2x96xf32>
    %1125 = math.exp %1124 : vector<2x96xf32>
    %cst_126 = arith.constant 1.000000e+00 : f32
    %1126 = vector.broadcast %cst_126 : f32 to vector<2x96xf32>
    %1127 = arith.addf %1126, %1125 : vector<2x96xf32>
    %1128 = arith.divf %1126, %1127 : vector<2x96xf32>
    %1129 = vector.extract_strided_slice %1119 {offsets = [0, 96], sizes = [2, 32], strides = [1, 1]} : vector<2x128xf32> to vector<2x32xf32>
    %1130 = math.tanh %1129 : vector<2x32xf32>
    %1131 = vector.extract_strided_slice %1128 {offsets = [0, 0], sizes = [2, 32], strides = [1, 1]} : vector<2x96xf32> to vector<2x32xf32>
    %1132 = vector.extract_strided_slice %1128 {offsets = [0, 32], sizes = [2, 32], strides = [1, 1]} : vector<2x96xf32> to vector<2x32xf32>
    %1133 = vector.extract_strided_slice %1128 {offsets = [0, 64], sizes = [2, 32], strides = [1, 1]} : vector<2x96xf32> to vector<2x32xf32>
    %1134 = arith.mulf %1132, %1096 : vector<2x32xf32>
    %1135 = arith.mulf %1131, %1130 : vector<2x32xf32>
    %1136 = arith.addf %1134, %1135 : vector<2x32xf32>
    %1137 = math.tanh %1136 : vector<2x32xf32>
    %1138 = arith.mulf %1133, %1137 : vector<2x32xf32>
    %1139 = vector.extract_strided_slice %1122 {offsets = [0, 0], sizes = [2, 96], strides = [1, 1]} : vector<2x128xf32> to vector<2x96xf32>
    %1140 = arith.negf %1139 : vector<2x96xf32>
    %1141 = math.exp %1140 : vector<2x96xf32>
    %cst_127 = arith.constant 1.000000e+00 : f32
    %1142 = vector.broadcast %cst_127 : f32 to vector<2x96xf32>
    %1143 = arith.addf %1142, %1141 : vector<2x96xf32>
    %1144 = arith.divf %1142, %1143 : vector<2x96xf32>
    %1145 = vector.extract_strided_slice %1122 {offsets = [0, 96], sizes = [2, 32], strides = [1, 1]} : vector<2x128xf32> to vector<2x32xf32>
    %1146 = math.tanh %1145 : vector<2x32xf32>
    %1147 = vector.extract_strided_slice %1144 {offsets = [0, 0], sizes = [2, 32], strides = [1, 1]} : vector<2x96xf32> to vector<2x32xf32>
    %1148 = vector.extract_strided_slice %1144 {offsets = [0, 32], sizes = [2, 32], strides = [1, 1]} : vector<2x96xf32> to vector<2x32xf32>
    %1149 = vector.extract_strided_slice %1144 {offsets = [0, 64], sizes = [2, 32], strides = [1, 1]} : vector<2x96xf32> to vector<2x32xf32>
    %1150 = arith.mulf %1148, %1112 : vector<2x32xf32>
    %1151 = arith.mulf %1147, %1146 : vector<2x32xf32>
    %1152 = arith.addf %1150, %1151 : vector<2x32xf32>
    %1153 = math.tanh %1152 : vector<2x32xf32>
    %1154 = arith.mulf %1149, %1153 : vector<2x32xf32>
    %1155 = tpu.concatenate %1138, %1154 in 1 : vector<2x32xf32>, vector<2x32xf32> -> vector<2x64xf32>
    %cst_128 = arith.constant dense<0.000000e+00> : vector<2x256xf32>
    %1156 = tpu.matmul %1155, %1025, %cst_128 {dimension_numbers = #tpu.dot_dimension_numbers<[1], [0], [0], [1], [0, 0, 1, 1], [], []>} : vector<2x64xf32>, vector<64x256xf32>, vector<2x256xf32> -> vector<2x256xf32>
    %1157 = vector.extract_strided_slice %1030 {offsets = [6, 0], sizes = [2, 128], strides = [1, 1]} : vector<16x256xf32> to vector<2x128xf32>
    %1158 = vector.extract_strided_slice %1156 {offsets = [0, 0], sizes = [2, 128], strides = [1, 1]} : vector<2x256xf32> to vector<2x128xf32>
    %1159 = arith.addf %1157, %1158 : vector<2x128xf32>
    %1160 = vector.extract_strided_slice %1030 {offsets = [8, 128], sizes = [2, 128], strides = [1, 1]} : vector<16x256xf32> to vector<2x128xf32>
    %1161 = vector.extract_strided_slice %1156 {offsets = [0, 128], sizes = [2, 128], strides = [1, 1]} : vector<2x256xf32> to vector<2x128xf32>
    %1162 = arith.addf %1160, %1161 : vector<2x128xf32>
    %1163 = vector.extract_strided_slice %1159 {offsets = [0, 0], sizes = [2, 96], strides = [1, 1]} : vector<2x128xf32> to vector<2x96xf32>
    %1164 = arith.negf %1163 : vector<2x96xf32>
    %1165 = math.exp %1164 : vector<2x96xf32>
    %cst_129 = arith.constant 1.000000e+00 : f32
    %1166 = vector.broadcast %cst_129 : f32 to vector<2x96xf32>
    %1167 = arith.addf %1166, %1165 : vector<2x96xf32>
    %1168 = arith.divf %1166, %1167 : vector<2x96xf32>
    %1169 = vector.extract_strided_slice %1159 {offsets = [0, 96], sizes = [2, 32], strides = [1, 1]} : vector<2x128xf32> to vector<2x32xf32>
    %1170 = math.tanh %1169 : vector<2x32xf32>
    %1171 = vector.extract_strided_slice %1168 {offsets = [0, 0], sizes = [2, 32], strides = [1, 1]} : vector<2x96xf32> to vector<2x32xf32>
    %1172 = vector.extract_strided_slice %1168 {offsets = [0, 32], sizes = [2, 32], strides = [1, 1]} : vector<2x96xf32> to vector<2x32xf32>
    %1173 = vector.extract_strided_slice %1168 {offsets = [0, 64], sizes = [2, 32], strides = [1, 1]} : vector<2x96xf32> to vector<2x32xf32>
    %1174 = arith.mulf %1172, %1136 : vector<2x32xf32>
    %1175 = arith.mulf %1171, %1170 : vector<2x32xf32>
    %1176 = arith.addf %1174, %1175 : vector<2x32xf32>
    %1177 = math.tanh %1176 : vector<2x32xf32>
    %1178 = arith.mulf %1173, %1177 : vector<2x32xf32>
    %1179 = vector.extract_strided_slice %1162 {offsets = [0, 0], sizes = [2, 96], strides = [1, 1]} : vector<2x128xf32> to vector<2x96xf32>
    %1180 = arith.negf %1179 : vector<2x96xf32>
    %1181 = math.exp %1180 : vector<2x96xf32>
    %cst_130 = arith.constant 1.000000e+00 : f32
    %1182 = vector.broadcast %cst_130 : f32 to vector<2x96xf32>
    %1183 = arith.addf %1182, %1181 : vector<2x96xf32>
    %1184 = arith.divf %1182, %1183 : vector<2x96xf32>
    %1185 = vector.extract_strided_slice %1162 {offsets = [0, 96], sizes = [2, 32], strides = [1, 1]} : vector<2x128xf32> to vector<2x32xf32>
    %1186 = math.tanh %1185 : vector<2x32xf32>
    %1187 = vector.extract_strided_slice %1184 {offsets = [0, 0], sizes = [2, 32], strides = [1, 1]} : vector<2x96xf32> to vector<2x32xf32>
    %1188 = vector.extract_strided_slice %1184 {offsets = [0, 32], sizes = [2, 32], strides = [1, 1]} : vector<2x96xf32> to vector<2x32xf32>
    %1189 = vector.extract_strided_slice %1184 {offsets = [0, 64], sizes = [2, 32], strides = [1, 1]} : vector<2x96xf32> to vector<2x32xf32>
    %1190 = arith.mulf %1188, %1152 : vector<2x32xf32>
    %1191 = arith.mulf %1187, %1186 : vector<2x32xf32>
    %1192 = arith.addf %1190, %1191 : vector<2x32xf32>
    %1193 = math.tanh %1192 : vector<2x32xf32>
    %1194 = arith.mulf %1189, %1193 : vector<2x32xf32>
    %1195 = tpu.concatenate %1178, %1194 in 1 : vector<2x32xf32>, vector<2x32xf32> -> vector<2x64xf32>
    %cst_131 = arith.constant dense<0.000000e+00> : vector<2x256xf32>
    %1196 = tpu.matmul %1195, %1025, %cst_131 {dimension_numbers = #tpu.dot_dimension_numbers<[1], [0], [0], [1], [0, 0, 1, 1], [], []>} : vector<2x64xf32>, vector<64x256xf32>, vector<2x256xf32> -> vector<2x256xf32>
    %1197 = vector.extract_strided_slice %1030 {offsets = [8, 0], sizes = [2, 128], strides = [1, 1]} : vector<16x256xf32> to vector<2x128xf32>
    %1198 = vector.extract_strided_slice %1196 {offsets = [0, 0], sizes = [2, 128], strides = [1, 1]} : vector<2x256xf32> to vector<2x128xf32>
    %1199 = arith.addf %1197, %1198 : vector<2x128xf32>
    %1200 = vector.extract_strided_slice %1030 {offsets = [6, 128], sizes = [2, 128], strides = [1, 1]} : vector<16x256xf32> to vector<2x128xf32>
    %1201 = vector.extract_strided_slice %1196 {offsets = [0, 128], sizes = [2, 128], strides = [1, 1]} : vector<2x256xf32> to vector<2x128xf32>
    %1202 = arith.addf %1200, %1201 : vector<2x128xf32>
    %1203 = vector.extract_strided_slice %1199 {offsets = [0, 0], sizes = [2, 96], strides = [1, 1]} : vector<2x128xf32> to vector<2x96xf32>
    %1204 = arith.negf %1203 : vector<2x96xf32>
    %1205 = math.exp %1204 : vector<2x96xf32>
    %cst_132 = arith.constant 1.000000e+00 : f32
    %1206 = vector.broadcast %cst_132 : f32 to vector<2x96xf32>
    %1207 = arith.addf %1206, %1205 : vector<2x96xf32>
    %1208 = arith.divf %1206, %1207 : vector<2x96xf32>
    %1209 = vector.extract_strided_slice %1199 {offsets = [0, 96], sizes = [2, 32], strides = [1, 1]} : vector<2x128xf32> to vector<2x32xf32>
    %1210 = math.tanh %1209 : vector<2x32xf32>
    %1211 = vector.extract_strided_slice %1208 {offsets = [0, 0], sizes = [2, 32], strides = [1, 1]} : vector<2x96xf32> to vector<2x32xf32>
    %1212 = vector.extract_strided_slice %1208 {offsets = [0, 32], sizes = [2, 32], strides = [1, 1]} : vector<2x96xf32> to vector<2x32xf32>
    %1213 = vector.extract_strided_slice %1208 {offsets = [0, 64], sizes = [2, 32], strides = [1, 1]} : vector<2x96xf32> to vector<2x32xf32>
    %1214 = arith.mulf %1212, %1176 : vector<2x32xf32>
    %1215 = arith.mulf %1211, %1210 : vector<2x32xf32>
    %1216 = arith.addf %1214, %1215 : vector<2x32xf32>
    %1217 = math.tanh %1216 : vector<2x32xf32>
    %1218 = arith.mulf %1213, %1217 : vector<2x32xf32>
    %1219 = vector.extract_strided_slice %1202 {offsets = [0, 0], sizes = [2, 96], strides = [1, 1]} : vector<2x128xf32> to vector<2x96xf32>
    %1220 = arith.negf %1219 : vector<2x96xf32>
    %1221 = math.exp %1220 : vector<2x96xf32>
    %cst_133 = arith.constant 1.000000e+00 : f32
    %1222 = vector.broadcast %cst_133 : f32 to vector<2x96xf32>
    %1223 = arith.addf %1222, %1221 : vector<2x96xf32>
    %1224 = arith.divf %1222, %1223 : vector<2x96xf32>
    %1225 = vector.extract_strided_slice %1202 {offsets = [0, 96], sizes = [2, 32], strides = [1, 1]} : vector<2x128xf32> to vector<2x32xf32>
    %1226 = math.tanh %1225 : vector<2x32xf32>
    %1227 = vector.extract_strided_slice %1224 {offsets = [0, 0], sizes = [2, 32], strides = [1, 1]} : vector<2x96xf32> to vector<2x32xf32>
    %1228 = vector.extract_strided_slice %1224 {offsets = [0, 32], sizes = [2, 32], strides = [1, 1]} : vector<2x96xf32> to vector<2x32xf32>
    %1229 = vector.extract_strided_slice %1224 {offsets = [0, 64], sizes = [2, 32], strides = [1, 1]} : vector<2x96xf32> to vector<2x32xf32>
    %1230 = arith.mulf %1228, %1192 : vector<2x32xf32>
    %1231 = arith.mulf %1227, %1226 : vector<2x32xf32>
    %1232 = arith.addf %1230, %1231 : vector<2x32xf32>
    %1233 = math.tanh %1232 : vector<2x32xf32>
    %1234 = arith.mulf %1229, %1233 : vector<2x32xf32>
    %1235 = tpu.concatenate %1218, %1234 in 1 : vector<2x32xf32>, vector<2x32xf32> -> vector<2x64xf32>
    %cst_134 = arith.constant dense<0.000000e+00> : vector<2x256xf32>
    %1236 = tpu.matmul %1235, %1025, %cst_134 {dimension_numbers = #tpu.dot_dimension_numbers<[1], [0], [0], [1], [0, 0, 1, 1], [], []>} : vector<2x64xf32>, vector<64x256xf32>, vector<2x256xf32> -> vector<2x256xf32>
    %1237 = vector.extract_strided_slice %1030 {offsets = [10, 0], sizes = [2, 128], strides = [1, 1]} : vector<16x256xf32> to vector<2x128xf32>
    %1238 = vector.extract_strided_slice %1236 {offsets = [0, 0], sizes = [2, 128], strides = [1, 1]} : vector<2x256xf32> to vector<2x128xf32>
    %1239 = arith.addf %1237, %1238 : vector<2x128xf32>
    %1240 = vector.extract_strided_slice %1030 {offsets = [4, 128], sizes = [2, 128], strides = [1, 1]} : vector<16x256xf32> to vector<2x128xf32>
    %1241 = vector.extract_strided_slice %1236 {offsets = [0, 128], sizes = [2, 128], strides = [1, 1]} : vector<2x256xf32> to vector<2x128xf32>
    %1242 = arith.addf %1240, %1241 : vector<2x128xf32>
    %1243 = vector.extract_strided_slice %1239 {offsets = [0, 0], sizes = [2, 96], strides = [1, 1]} : vector<2x128xf32> to vector<2x96xf32>
    %1244 = arith.negf %1243 : vector<2x96xf32>
    %1245 = math.exp %1244 : vector<2x96xf32>
    %cst_135 = arith.constant 1.000000e+00 : f32
    %1246 = vector.broadcast %cst_135 : f32 to vector<2x96xf32>
    %1247 = arith.addf %1246, %1245 : vector<2x96xf32>
    %1248 = arith.divf %1246, %1247 : vector<2x96xf32>
    %1249 = vector.extract_strided_slice %1239 {offsets = [0, 96], sizes = [2, 32], strides = [1, 1]} : vector<2x128xf32> to vector<2x32xf32>
    %1250 = math.tanh %1249 : vector<2x32xf32>
    %1251 = vector.extract_strided_slice %1248 {offsets = [0, 0], sizes = [2, 32], strides = [1, 1]} : vector<2x96xf32> to vector<2x32xf32>
    %1252 = vector.extract_strided_slice %1248 {offsets = [0, 32], sizes = [2, 32], strides = [1, 1]} : vector<2x96xf32> to vector<2x32xf32>
    %1253 = vector.extract_strided_slice %1248 {offsets = [0, 64], sizes = [2, 32], strides = [1, 1]} : vector<2x96xf32> to vector<2x32xf32>
    %1254 = arith.mulf %1252, %1216 : vector<2x32xf32>
    %1255 = arith.mulf %1251, %1250 : vector<2x32xf32>
    %1256 = arith.addf %1254, %1255 : vector<2x32xf32>
    %1257 = math.tanh %1256 : vector<2x32xf32>
    %1258 = arith.mulf %1253, %1257 : vector<2x32xf32>
    %1259 = vector.extract_strided_slice %1242 {offsets = [0, 0], sizes = [2, 96], strides = [1, 1]} : vector<2x128xf32> to vector<2x96xf32>
    %1260 = arith.negf %1259 : vector<2x96xf32>
    %1261 = math.exp %1260 : vector<2x96xf32>
    %cst_136 = arith.constant 1.000000e+00 : f32
    %1262 = vector.broadcast %cst_136 : f32 to vector<2x96xf32>
    %1263 = arith.addf %1262, %1261 : vector<2x96xf32>
    %1264 = arith.divf %1262, %1263 : vector<2x96xf32>
    %1265 = vector.extract_strided_slice %1242 {offsets = [0, 96], sizes = [2, 32], strides = [1, 1]} : vector<2x128xf32> to vector<2x32xf32>
    %1266 = math.tanh %1265 : vector<2x32xf32>
    %1267 = vector.extract_strided_slice %1264 {offsets = [0, 0], sizes = [2, 32], strides = [1, 1]} : vector<2x96xf32> to vector<2x32xf32>
    %1268 = vector.extract_strided_slice %1264 {offsets = [0, 32], sizes = [2, 32], strides = [1, 1]} : vector<2x96xf32> to vector<2x32xf32>
    %1269 = vector.extract_strided_slice %1264 {offsets = [0, 64], sizes = [2, 32], strides = [1, 1]} : vector<2x96xf32> to vector<2x32xf32>
    %1270 = arith.mulf %1268, %1232 : vector<2x32xf32>
    %1271 = arith.mulf %1267, %1266 : vector<2x32xf32>
    %1272 = arith.addf %1270, %1271 : vector<2x32xf32>
    %1273 = math.tanh %1272 : vector<2x32xf32>
    %1274 = arith.mulf %1269, %1273 : vector<2x32xf32>
    %1275 = tpu.concatenate %1258, %1274 in 1 : vector<2x32xf32>, vector<2x32xf32> -> vector<2x64xf32>
    %cst_137 = arith.constant dense<0.000000e+00> : vector<2x256xf32>
    %1276 = tpu.matmul %1275, %1025, %cst_137 {dimension_numbers = #tpu.dot_dimension_numbers<[1], [0], [0], [1], [0, 0, 1, 1], [], []>} : vector<2x64xf32>, vector<64x256xf32>, vector<2x256xf32> -> vector<2x256xf32>
    %1277 = vector.extract_strided_slice %1030 {offsets = [12, 0], sizes = [2, 128], strides = [1, 1]} : vector<16x256xf32> to vector<2x128xf32>
    %1278 = vector.extract_strided_slice %1276 {offsets = [0, 0], sizes = [2, 128], strides = [1, 1]} : vector<2x256xf32> to vector<2x128xf32>
    %1279 = arith.addf %1277, %1278 : vector<2x128xf32>
    %1280 = vector.extract_strided_slice %1030 {offsets = [2, 128], sizes = [2, 128], strides = [1, 1]} : vector<16x256xf32> to vector<2x128xf32>
    %1281 = vector.extract_strided_slice %1276 {offsets = [0, 128], sizes = [2, 128], strides = [1, 1]} : vector<2x256xf32> to vector<2x128xf32>
    %1282 = arith.addf %1280, %1281 : vector<2x128xf32>
    %1283 = vector.extract_strided_slice %1279 {offsets = [0, 0], sizes = [2, 96], strides = [1, 1]} : vector<2x128xf32> to vector<2x96xf32>
    %1284 = arith.negf %1283 : vector<2x96xf32>
    %1285 = math.exp %1284 : vector<2x96xf32>
    %cst_138 = arith.constant 1.000000e+00 : f32
    %1286 = vector.broadcast %cst_138 : f32 to vector<2x96xf32>
    %1287 = arith.addf %1286, %1285 : vector<2x96xf32>
    %1288 = arith.divf %1286, %1287 : vector<2x96xf32>
    %1289 = vector.extract_strided_slice %1279 {offsets = [0, 96], sizes = [2, 32], strides = [1, 1]} : vector<2x128xf32> to vector<2x32xf32>
    %1290 = math.tanh %1289 : vector<2x32xf32>
    %1291 = vector.extract_strided_slice %1288 {offsets = [0, 0], sizes = [2, 32], strides = [1, 1]} : vector<2x96xf32> to vector<2x32xf32>
    %1292 = vector.extract_strided_slice %1288 {offsets = [0, 32], sizes = [2, 32], strides = [1, 1]} : vector<2x96xf32> to vector<2x32xf32>
    %1293 = vector.extract_strided_slice %1288 {offsets = [0, 64], sizes = [2, 32], strides = [1, 1]} : vector<2x96xf32> to vector<2x32xf32>
    %1294 = arith.mulf %1292, %1256 : vector<2x32xf32>
    %1295 = arith.mulf %1291, %1290 : vector<2x32xf32>
    %1296 = arith.addf %1294, %1295 : vector<2x32xf32>
    %1297 = math.tanh %1296 : vector<2x32xf32>
    %1298 = arith.mulf %1293, %1297 : vector<2x32xf32>
    %1299 = vector.extract_strided_slice %1282 {offsets = [0, 0], sizes = [2, 96], strides = [1, 1]} : vector<2x128xf32> to vector<2x96xf32>
    %1300 = arith.negf %1299 : vector<2x96xf32>
    %1301 = math.exp %1300 : vector<2x96xf32>
    %cst_139 = arith.constant 1.000000e+00 : f32
    %1302 = vector.broadcast %cst_139 : f32 to vector<2x96xf32>
    %1303 = arith.addf %1302, %1301 : vector<2x96xf32>
    %1304 = arith.divf %1302, %1303 : vector<2x96xf32>
    %1305 = vector.extract_strided_slice %1282 {offsets = [0, 96], sizes = [2, 32], strides = [1, 1]} : vector<2x128xf32> to vector<2x32xf32>
    %1306 = math.tanh %1305 : vector<2x32xf32>
    %1307 = vector.extract_strided_slice %1304 {offsets = [0, 0], sizes = [2, 32], strides = [1, 1]} : vector<2x96xf32> to vector<2x32xf32>
    %1308 = vector.extract_strided_slice %1304 {offsets = [0, 32], sizes = [2, 32], strides = [1, 1]} : vector<2x96xf32> to vector<2x32xf32>
    %1309 = vector.extract_strided_slice %1304 {offsets = [0, 64], sizes = [2, 32], strides = [1, 1]} : vector<2x96xf32> to vector<2x32xf32>
    %1310 = arith.mulf %1308, %1272 : vector<2x32xf32>
    %1311 = arith.mulf %1307, %1306 : vector<2x32xf32>
    %1312 = arith.addf %1310, %1311 : vector<2x32xf32>
    %1313 = math.tanh %1312 : vector<2x32xf32>
    %1314 = arith.mulf %1309, %1313 : vector<2x32xf32>
    %1315 = tpu.concatenate %1298, %1314 in 1 : vector<2x32xf32>, vector<2x32xf32> -> vector<2x64xf32>
    %cst_140 = arith.constant dense<0.000000e+00> : vector<2x256xf32>
    %1316 = tpu.matmul %1315, %1025, %cst_140 {dimension_numbers = #tpu.dot_dimension_numbers<[1], [0], [0], [1], [0, 0, 1, 1], [], []>} : vector<2x64xf32>, vector<64x256xf32>, vector<2x256xf32> -> vector<2x256xf32>
    %1317 = vector.extract_strided_slice %1030 {offsets = [14, 0], sizes = [2, 128], strides = [1, 1]} : vector<16x256xf32> to vector<2x128xf32>
    %1318 = vector.extract_strided_slice %1316 {offsets = [0, 0], sizes = [2, 128], strides = [1, 1]} : vector<2x256xf32> to vector<2x128xf32>
    %1319 = arith.addf %1317, %1318 : vector<2x128xf32>
    %1320 = vector.extract_strided_slice %1030 {offsets = [0, 128], sizes = [2, 128], strides = [1, 1]} : vector<16x256xf32> to vector<2x128xf32>
    %1321 = vector.extract_strided_slice %1316 {offsets = [0, 128], sizes = [2, 128], strides = [1, 1]} : vector<2x256xf32> to vector<2x128xf32>
    %1322 = arith.addf %1320, %1321 : vector<2x128xf32>
    %1323 = vector.extract_strided_slice %1319 {offsets = [0, 0], sizes = [2, 96], strides = [1, 1]} : vector<2x128xf32> to vector<2x96xf32>
    %1324 = arith.negf %1323 : vector<2x96xf32>
    %1325 = math.exp %1324 : vector<2x96xf32>
    %cst_141 = arith.constant 1.000000e+00 : f32
    %1326 = vector.broadcast %cst_141 : f32 to vector<2x96xf32>
    %1327 = arith.addf %1326, %1325 : vector<2x96xf32>
    %1328 = arith.divf %1326, %1327 : vector<2x96xf32>
    %1329 = vector.extract_strided_slice %1319 {offsets = [0, 96], sizes = [2, 32], strides = [1, 1]} : vector<2x128xf32> to vector<2x32xf32>
    %1330 = math.tanh %1329 : vector<2x32xf32>
    %1331 = vector.extract_strided_slice %1328 {offsets = [0, 0], sizes = [2, 32], strides = [1, 1]} : vector<2x96xf32> to vector<2x32xf32>
    %1332 = vector.extract_strided_slice %1328 {offsets = [0, 32], sizes = [2, 32], strides = [1, 1]} : vector<2x96xf32> to vector<2x32xf32>
    %1333 = vector.extract_strided_slice %1328 {offsets = [0, 64], sizes = [2, 32], strides = [1, 1]} : vector<2x96xf32> to vector<2x32xf32>
    %1334 = arith.mulf %1332, %1296 : vector<2x32xf32>
    %1335 = arith.mulf %1331, %1330 : vector<2x32xf32>
    %1336 = arith.addf %1334, %1335 : vector<2x32xf32>
    %1337 = math.tanh %1336 : vector<2x32xf32>
    %1338 = arith.mulf %1333, %1337 : vector<2x32xf32>
    %1339 = vector.extract_strided_slice %1322 {offsets = [0, 0], sizes = [2, 96], strides = [1, 1]} : vector<2x128xf32> to vector<2x96xf32>
    %1340 = arith.negf %1339 : vector<2x96xf32>
    %1341 = math.exp %1340 : vector<2x96xf32>
    %cst_142 = arith.constant 1.000000e+00 : f32
    %1342 = vector.broadcast %cst_142 : f32 to vector<2x96xf32>
    %1343 = arith.addf %1342, %1341 : vector<2x96xf32>
    %1344 = arith.divf %1342, %1343 : vector<2x96xf32>
    %1345 = vector.extract_strided_slice %1322 {offsets = [0, 96], sizes = [2, 32], strides = [1, 1]} : vector<2x128xf32> to vector<2x32xf32>
    %1346 = math.tanh %1345 : vector<2x32xf32>
    %1347 = vector.extract_strided_slice %1344 {offsets = [0, 0], sizes = [2, 32], strides = [1, 1]} : vector<2x96xf32> to vector<2x32xf32>
    %1348 = vector.extract_strided_slice %1344 {offsets = [0, 32], sizes = [2, 32], strides = [1, 1]} : vector<2x96xf32> to vector<2x32xf32>
    %1349 = vector.extract_strided_slice %1344 {offsets = [0, 64], sizes = [2, 32], strides = [1, 1]} : vector<2x96xf32> to vector<2x32xf32>
    %1350 = arith.mulf %1348, %1312 : vector<2x32xf32>
    %1351 = arith.mulf %1347, %1346 : vector<2x32xf32>
    %1352 = arith.addf %1350, %1351 : vector<2x32xf32>
    %1353 = math.tanh %1352 : vector<2x32xf32>
    %1354 = arith.mulf %1349, %1353 : vector<2x32xf32>
    %1355 = tpu.concatenate %1338, %1354 in 1 : vector<2x32xf32>, vector<2x32xf32> -> vector<2x64xf32>
    %c0_143 = arith.constant 0 : index
    %c0_144 = arith.constant 0 : index
    %1356 = vector.load %arg14[%c0_143, %c0_144] : memref<64x32xf32, #tpu.memory_space<vmem>>, vector<64x32xf32>
    %cst_145 = arith.constant dense<0.000000e+00> : vector<2x32xf32>
    %1357 = tpu.matmul %1355, %1356, %cst_145 {dimension_numbers = #tpu.dot_dimension_numbers<[1], [0], [0], [1], [0, 0, 1, 1], [], []>} : vector<2x64xf32>, vector<64x32xf32>, vector<2x32xf32> -> vector<2x32xf32>
    %c0_146 = arith.constant 0 : index
    %c0_147 = arith.constant 0 : index
    %1358 = vector.load %arg15[%c0_146, %c0_147] : memref<1x32xf32, #tpu.memory_space<vmem>>, vector<1x32xf32>
    %1359 = vector.broadcast %1358 : vector<1x32xf32> to vector<2x32xf32>
    %1360 = arith.addf %1357, %1359 : vector<2x32xf32>
    %cst_148 = arith.constant 5.000000e-01 : f32
    %1361 = vector.broadcast %cst_148 : f32 to vector<2x32xf32>
    %1362 = arith.mulf %1361, %1360 : vector<2x32xf32>
    %cst_149 = arith.constant 0.707106769 : f32
    %1363 = vector.broadcast %cst_149 : f32 to vector<2x32xf32>
    %1364 = arith.mulf %1360, %1363 : vector<2x32xf32>
    %1365 = math.erf %1364 : vector<2x32xf32>
    %cst_150 = arith.constant 1.000000e+00 : f32
    %1366 = vector.broadcast %cst_150 : f32 to vector<2x32xf32>
    %1367 = arith.addf %1366, %1365 : vector<2x32xf32>
    %1368 = arith.mulf %1362, %1367 : vector<2x32xf32>
    %c0_151 = arith.constant 0 : index
    %c0_152 = arith.constant 0 : index
    %1369 = vector.load %arg16[%c0_151, %c0_152] : memref<32x64xf32, #tpu.memory_space<vmem>>, vector<32x64xf32>
    %cst_153 = arith.constant dense<0.000000e+00> : vector<2x64xf32>
    %1370 = tpu.matmul %1368, %1369, %cst_153 {dimension_numbers = #tpu.dot_dimension_numbers<[1], [0], [0], [1], [0, 0, 1, 1], [], []>} : vector<2x32xf32>, vector<32x64xf32>, vector<2x64xf32> -> vector<2x64xf32>
    %c0_154 = arith.constant 0 : index
    %c0_155 = arith.constant 0 : index
    %1371 = vector.load %arg17[%c0_154, %c0_155] : memref<1x64xf32, #tpu.memory_space<vmem>>, vector<1x64xf32>
    %1372 = vector.broadcast %1371 : vector<1x64xf32> to vector<2x64xf32>
    %1373 = arith.addf %1370, %1372 : vector<2x64xf32>
    %c0_156 = arith.constant 0 : index
    %c0_157 = arith.constant 0 : index
    %1374 = vector.load %arg18[%c0_156, %c0_157] : memref<2x64xf32, #tpu.memory_space<vmem>>, vector<2x64xf32>
    tpu.vector_store %arg18[%c0_156, %c0_157], %1373 {strides = array<i32>} : memref<2x64xf32, #tpu.memory_space<vmem>>, vector<2x64xf32>,
    return
  }
}

</mosaic_0001>

<bundles_post_ra>
// kernel: tag_expansion_forward.1
= control target key start
LH: loop header
LB: loop body
LE: loop exit
PB: predicated region body
PF: predicated region fallthrough
CT: control target
= control target key end

     0   :  { %s8412_s0 = inlined_call_operand.vmem [shape: s32[16,1], index: 0, kind: input, shape index: {}]   ;;  %s8413_s1 = inlined_call_operand.vmem [shape: f32[64,32], index: 1, kind: input, shape index: {}]   ;;  %s8414_s2 = inlined_call_operand.vmem [shape: f32[32,256], index: 2, kind: input, shape index: {}]   ;;  %s8415_s3 = inlined_call_operand.vmem [shape: f32[1,256], index: 3, kind: input, shape index: {}]   ;;  %s8416_s4 = inlined_call_operand.vmem [shape: f32[64,256], index: 4, kind: input, shape index: {}]   ;;  %s8417_s5 = inlined_call_operand.hbm [shape: f32[64,256], index: 5, kind: input, shape index: {}]   ;;  %s8418_s6 = inlined_call_operand.vmem [shape: f32[1,256], index: 6, kind: input, shape index: {}]   ;;  %s8419_s7 = inlined_call_operand.hbm [shape: f32[64,256], index: 7, kind: input, shape index: {}]   ;;  %s8420_s8 = inlined_call_operand.hbm [shape: f32[64,256], index: 8, kind: input, shape index: {}]   ;;  %s8421_s9 = inlined_call_operand.vmem [shape: f32[1,256], index: 9, kind: input, shape index: {}]   ;;  %s8422_s10 = inlined_call_operand.hbm [shape: f32[64,256], index: 10, kind: input, shape index: {}]   ;;  %s8423_s11 = inlined_call_operand.hbm [shape: f32[64,256], index: 11, kind: input, shape index: {}]   ;;  %s8424_s12 = inlined_call_operand.vmem [shape: f32[1,256], index: 12, kind: input, shape index: {}]   ;;  %s8425_s13 = inlined_call_operand.hbm [shape: f32[64,256], index: 13, kind: input, shape index: {}]   ;;  %s8426_s14 = inlined_call_operand.vmem [shape: f32[64,32], index: 14, kind: input, shape index: {}]   ;;  %s8427_s15 = inlined_call_operand.vmem [shape: f32[1,32], index: 15, kind: input, shape index: {}]   ;;  %s8428_s16 = inlined_call_operand.hbm [shape: f32[32,64], index: 16, kind: input, shape index: {}]   ;;  %s8429_s17 = inlined_call_operand.vmem [shape: f32[1,64], index: 17, kind: input, shape index: {}]   ;;  %s8430_s18 = inlined_call_operand.hbm [shape: f32[2,64], index: 18, kind: output, shape index: {}]  }
   0x1   :  { %8434 = sst [smem:[#allocation20_spill]] %s8412_s0 }
   0x2   :  { %8435 = sst [smem:[#allocation21_spill]] %s8413_s1 }
   0x3   :  { %8436 = sst [smem:[#allocation22_spill]] %s8414_s2 }
   0x4   :  { %23 = vsyncpa [#allocation3], 0 }
   0x5   :  { %24 = vsyncpa [#allocation6], 0 }
   0x6   :  { %25 = vsyncpa [#allocation9], 0 }
   0x7   :  { %26 = vsyncpa [#allocation12], 0 }
   0x8   :  { %27 = vsyncpa [#allocation4], 0  ;;  %s6557_s27 = smov [#allocation5]   ;;  %s6558_s29 = smov [#allocation8]  }
   0x9   :  { %s57_s28 = sshll.u32 %s6557_s27, 4  ;;  %s83_s30 = sshll.u32 %s6558_s29, 4  ;;  %s58_s28 = int_to_ptr.vmem [resolvable:$true] %s57_s28  ;;  %s84_s30 = int_to_ptr.vmem [resolvable:$true] %s83_s30 }
   0xa   :  { %s6395_s0 = scalar_lea.vmem %s58_s28, 2048  ;;  %p6400_p1 = scmp.lt.s32.totalorder %s58_s28, %s58_s28 }
   0xb   :  { %p6396_p0 = scmp.ne.s32.totalorder %s58_s28, %s6395_s0  ;;  %p6401_p2 = scmp.lt.s32.totalorder %s6395_s0, %s6395_s0 }
   0xd   :  { %p6402_p3 = por %p6401_p2, %p6400_p1 }
   0xf   :  { %p6403_p4 = pnand %p6402_p3, %p6396_p0 }
  0x11   :  { %6406 = shalt.err (!%p6403_p4)
}
  0x12   :  { %s6559_s19 = smov 256   ;;  %s6560_s1 = smov 16  }
  0x13   :  { %63 = dma.hbm_to_vmem [thread:$0]  %s8419_s7, 2048, %s58_s28, [#allocation6], %s6559_s19, %s6559_s19, %s6560_s1  }
  0x14   :  { %s6415_s22 = scalar_lea.vmem %s84_s30, 2048  ;;  %p6420_p6 = scmp.lt.s32.totalorder %s84_s30, %s84_s30 }
  0x15   :  { %p6416_p5 = scmp.ne.s32.totalorder %s84_s30, %s6415_s22  ;;  %p6421_p7 = scmp.lt.s32.totalorder %s6415_s22, %s6415_s22 }
  0x17   :  { %p6422_p8 = por %p6421_p7, %p6420_p6 }
  0x19   :  { %p6423_p9 = pnand %p6422_p8, %p6416_p5 }
  0x1b   :  { %6426 = shalt.err (!%p6423_p9)
}
  0x1c   :  { %89 = dma.hbm_to_vmem [thread:$0]  %s8422_s10, 2048, %s84_s30, [#allocation9], %s6559_s19, %s6559_s19, %s6560_s1  }
  0x1d   :  { %s6561_s24 = smov [#allocation11]   ;;  %s6562_s26 = smov [#allocation2]  }
  0x1e   :  { %s109_s25 = sshll.u32 %s6561_s24, 4  ;;  %s43_s27 = sshll.u32 %s6562_s26, 4  ;;  %s110_s25 = int_to_ptr.vmem [resolvable:$true] %s109_s25  ;;  %s44_s27 = int_to_ptr.vmem [resolvable:$true] %s43_s27 }
  0x1f   :  { %s6435_s7 = scalar_lea.vmem %s110_s25, 2048  ;;  %p6440_p11 = scmp.lt.s32.totalorder %s110_s25, %s110_s25 }
  0x20   :  { %p6436_p10 = scmp.ne.s32.totalorder %s110_s25, %s6435_s7  ;;  %p6441_p12 = scmp.lt.s32.totalorder %s6435_s7, %s6435_s7 }
  0x22   :  { %p6442_p13 = por %p6441_p12, %p6440_p11 }
  0x24   :  { %p6443_p0 = pnand %p6442_p13, %p6436_p10 }
  0x26   :  { %6446 = shalt.err (!%p6443_p0)
}
  0x27   :  { %115 = dma.hbm_to_vmem [thread:$0]  %s8425_s13, 2048, %s110_s25, [#allocation12], %s6559_s19, %s6559_s19, %s6560_s1  }
  0x28   :  { %s6455_s10 = scalar_lea.vmem %s44_s27, 2048  ;;  %p6460_p2 = scmp.lt.s32.totalorder %s44_s27, %s44_s27 }
  0x29   :  { %p6456_p1 = scmp.ne.s32.totalorder %s44_s27, %s6455_s10  ;;  %p6461_p3 = scmp.lt.s32.totalorder %s6455_s10, %s6455_s10 }
  0x2b   :  { %p6462_p4 = por %p6461_p3, %p6460_p2 }
  0x2d   :  { %p6463_p5 = pnand %p6462_p4, %p6456_p1 }
  0x2f   :  { %6466 = shalt.err (!%p6463_p5)
}
  0x30   :  { %49 = dma.hbm_to_vmem [thread:$0]  %s8417_s5, 2048, %s44_s27, [#allocation3], %s6559_s19, %s6559_s19, %s6560_s1  }
  0x31   :  { %s6563_s20 = smov [#allocation7]   ;;  %s6564_s22 = smov [#allocation10]  }
  0x32   :  { %s69_s21 = sshll.u32 %s6563_s20, 4  ;;  %s95_s2 = sshll.u32 %s6564_s22, 4  ;;  %s70_s21 = int_to_ptr.vmem [resolvable:$true] %s69_s21  ;;  %s96_s2 = int_to_ptr.vmem [resolvable:$true] %s95_s2 }
  0x33   :  { %s6475_s13 = scalar_lea.vmem %s70_s21, 2048  ;;  %p6480_p7 = scmp.lt.s32.totalorder %s70_s21, %s70_s21 }
  0x34   :  { %p6476_p6 = scmp.ne.s32.totalorder %s70_s21, %s6475_s13  ;;  %p6481_p8 = scmp.lt.s32.totalorder %s6475_s13, %s6475_s13 }
  0x36   :  { %p6482_p9 = por %p6481_p8, %p6480_p7 }
  0x38   :  { %p6483_p10 = pnand %p6482_p9, %p6476_p6 }
  0x3a   :  { %6486 = shalt.err (!%p6483_p10)
}
  0x3b   :  { %75 = dma.hbm_to_vmem [thread:$0]  %s8420_s8, 2048, %s70_s21, [#allocation6], %s6559_s19, %s6559_s19, %s6560_s1  }
  0x3c   :  { %s6495_s5 = scalar_lea.vmem %s96_s2, 2048  ;;  %p6500_p12 = scmp.lt.s32.totalorder %s96_s2, %s96_s2 }
  0x3d   :  { %p6496_p11 = scmp.ne.s32.totalorder %s96_s2, %s6495_s5  ;;  %p6501_p13 = scmp.lt.s32.totalorder %s6495_s5, %s6495_s5 }
  0x3f   :  { %p6502_p0 = por %p6501_p13, %p6500_p12 }
  0x41   :  { %p6503_p1 = pnand %p6502_p0, %p6496_p11 }
  0x43   :  { %6506 = shalt.err (!%p6503_p1)
}
  0x44   :  { %101 = dma.hbm_to_vmem [thread:$0]  %s8423_s11, 2048, %s96_s2, [#allocation9], %s6559_s19, %s6559_s19, %s6560_s1  }
  0x45   :  { %s6565_s27 = smov [#allocation13]  }
  0x46   :  { %s125_s7 = sshll.u32 %s6565_s27, 4  ;;  %s126_s7 = int_to_ptr.vmem [resolvable:$true] %s125_s7 }
  0x47   :  { %s6515_s28 = scalar_lea.vmem %s126_s7, 512  ;;  %p6520_p3 = scmp.lt.s32.totalorder %s126_s7, %s126_s7 }
  0x48   :  { %p6516_p2 = scmp.ne.s32.totalorder %s126_s7, %s6515_s28  ;;  %p6521_p4 = scmp.lt.s32.totalorder %s6515_s28, %s6515_s28 }
  0x4a   :  { %p6522_p5 = por %p6521_p4, %p6520_p3 }
  0x4c   :  { %p6523_p6 = pnand %p6522_p5, %p6516_p2 }
  0x4e   :  { %6526 = shalt.err (!%p6523_p6)
}
  0x4f   :  { %s6566_s8 = smov 128   ;;  %s6567_s29 = smov 8  }
  0x50   :  { %131 = dma.hbm_to_vmem [thread:$0]  %s8428_s16, 512, %s126_s7, [#allocation12], %s6566_s8, %s6566_s8, %s6567_s29  }
  0x51   :  { %6547 = dma.done.wait [#allocation3], 2048  }
  0x52   :  { %6548 = vsyncadd [#allocation3], 4294965248 }
  0x53   :  { %6549 = dma.done.wait [#allocation6], 4096  }
  0x54   :  { %6550 = vsyncadd [#allocation6], 4294963200 }
  0x55   :  { %6551 = dma.done.wait [#allocation9], 4096  }
  0x56   :  { %6552 = vsyncadd [#allocation9], 4294963200 }
  0x57   :  { %6553 = dma.done.wait [#allocation12], 2560  }
  0x58   :  { %6554 = vsyncadd [#allocation12], 4294964736  ;;  %v6568_v0 = vmov 0   ;;  %v6569_v1 = vmov 0.0   ;;  %s8437_s1 = sld [smem:[#allocation20_spill]]  ;;  %v157_v18 = vlaneseq  ;;  %vm179_vm0 = vcmask 523264  }
  0x59   :  { %5872 = vset.pattern.permute.xlu0 %v6568_v0  ;;  %368 = vmatprep.mubr.f32.mxu1 %v6569_v1  ;;  %s8438_s16 = sld [smem:[#allocation21_spill]]  ;;  %v6773_v26 = vld [vmem:[%s8416_s4 + $0x78] sm:$0xff]  ;;  %v6779_v27 = vld [vmem:[%s8416_s4 + $0x70] sm:$0xff]  ;;  %v6786_v28 = vld [vmem:[%s8416_s4 + $0x68] sm:$0xff]  ;;  %vm297_vm3 = vcmask 261120   ;;  %s6571_s22 = smov 96  }
  0x5a   :  { %s8439_s26 = sld [smem:[#allocation22_spill]]  ;;  %v158_v19 = vand.u32 127, %v157_v18  ;;  %v6791_v29 = vld [vmem:[%s8416_s4 + $0x60] sm:$0xff]  ;;  %v6797_v30 = vld [vmem:[%s8416_s4 + $0x58] sm:$0xff]  ;;  %v6803_v31 = vld [vmem:[%s8416_s4 + $0x50] sm:$0xff]  ;;  %v288_v44 = vshrl.u32 %v157_v18, 7 }
  0x5b   :  { %v6809_v32 = vld [vmem:[%s8416_s4 + $0x48] sm:$0xff]  ;;  %v6815_v33 = vld [vmem:[%s8416_s4 + $0x40] sm:$0xff]  ;;  %v6821_v34 = vld [vmem:[%s8416_s4 + $0x38] sm:$0xff]  ;;  %s6572_s2 = smov 64   ;;  %vm1565_vm4 = vcmask 1043456   ;;  %vm1563_vm5 = vcmask 1041408  }
  0x5c   :  { %v6827_v35 = vld [vmem:[%s8416_s4 + $0x30] sm:$0xff]  ;;  %v6833_v36 = vld [vmem:[%s8416_s4 + $0x28] sm:$0xff]  ;;  %v6839_v37 = vld [vmem:[%s8416_s4 + $0x20] sm:$0xff]  ;;  %v6907_v45 = vsub.s32 1, %v288_v44  ;;  %v6912_v47 = vsub.s32 0, %v288_v44  ;;  %vm1567_vm6 = vcmask 1045504  }
  0x5d   :  { %v6845_v38 = vld [vmem:[%s8416_s4 + $0x18] sm:$0xff]  ;;  %v6851_v39 = vld [vmem:[%s8416_s4 + $0x10] sm:$0xff]  ;;  %v6857_v40 = vld [vmem:[%s8416_s4 + $0x8] sm:$0xff]  ;;  %vm6573_vm7 = vmmov 0   ;;  %vm5653_vm8 = vcmask 517120  }
  0x5e   :  { %v155_v2 = vld [vmem:[%s8437_s1] sm:$0xff]  ;;  %v156_v5 = vld [vmem:[%s8437_s1 + $0x8] sm:$0xff] }
  0x5f   :  { %v178_v3 = vld [vmem:[%s8438_s16 + $0x38] sm:$0xff]  ;;  %160 = vperm.xlu0 %5872, %v155_v2   ;;  %v177_v4 = vld [vmem:[%s8438_s16 + $0x30] sm:$0xff]  ;;  %v176_v6 = vld [vmem:[%s8438_s16 + $0x28] sm:$0xff] }
  0x60   :  { %5805 = vmatprep.subr.mxu0 %v178_v3  ;;  %v284_v7 = vld [vmem:[%s8439_s26 + $0x38] sm:$0xff]  ;;  %v283_v8 = vld [vmem:[%s8439_s26 + $0x30] sm:$0xff]  ;;  %v175_v9 = vld [vmem:[%s8438_s16 + $0x20] sm:$0xff] }
  0x61   :  { %5806 = vmatpush3.msra.mxu0 %v178_v3  ;;  %328 = vmatprep.subr.mxu1 %v284_v7  ;;  %v282_v10 = vld [vmem:[%s8439_s26 + $0x28] sm:$0xff]  ;;  %v281_v11 = vld [vmem:[%s8439_s26 + $0x20] sm:$0xff]  ;;  %v174_v12 = vld [vmem:[%s8438_s16 + $0x18] sm:$0xff] }
  0x62   :  { %5807 = vmatprep.subr.mxu0 %v177_v4  ;;  %329 = vmatpush1.msra.mxu1 %v283_v8  ;;  %v280_v13 = vld [vmem:[%s8439_s26 + $0x18] sm:$0xff]  ;;  %v279_v14 = vld [vmem:[%s8439_s26 + $0x10] sm:$0xff]  ;;  %v172_v16 = vld [vmem:[%s8438_s16 + $0x8] sm:$0xff] }
  0x63   :  { %5808 = vmatpush3.msra.mxu0 %v177_v4  ;;  %163 = vperm.xlu0 %5872, %v156_v5   ;;  %v173_v15 = vld [vmem:[%s8438_s16 + $0x10] sm:$0xff]  ;;  %v171_v17 = vld [vmem:[%s8438_s16] sm:$0xff]  ;;  %v278_v24 = vld [vmem:[%s8439_s26 + $0x8] sm:$0xff] }
  0x64   :  { %5809 = vmatprep.subr.mxu0 %v176_v6  ;;  %330 = vmatprep.subr.mxu1 %v282_v10  ;;  %v277_v25 = vld [vmem:[%s8439_s26] sm:$0xff] }
  0x65   :  { %5810 = vmatpush3.msra.mxu0 %v176_v6  ;;  %331 = vmatpush1.msra.mxu1 %v281_v11  ;;  %v6863_v41 = vld [vmem:[%s8416_s4] sm:$0xff] }
  0x66   :  { %5811 = vmatprep.subr.mxu0 %v175_v9  ;;  %332 = vmatprep.subr.mxu1 %v280_v13  ;;  %v285_v46 = vld [vmem:[%s8415_s3] sm:$0x3]  ;;  %s6570_s3 = smov 32  }
  0x67   :  { %5812 = vmatpush3.msra.mxu0 %v175_v9  ;;  %333 = vmatpush1.msra.mxu1 %v279_v14  ;;  %v294_v48 = vrot.slane %v285_v46, %v6907_v45  ;;  %v290_v51 = vrot.slane %v285_v46, %v6912_v47 }
  0x68   :  { %5813 = vmatprep.subr.mxu0 %v174_v12  ;;  %334 = vmatprep.subr.mxu1 %v278_v24 }
  0x69   :  { %5814 = vmatpush3.msra.mxu0 %v174_v12  ;;  %335 = vmatpush1.msra.mxu1 %v277_v25 }
  0x6a   :  { %5815 = vmatprep.subr.mxu0 %v173_v15  ;;  %400 = vmatprep.subr.mxu1 %v6773_v26 }
  0x6b   :  { %5816 = vmatpush3.msra.mxu0 %v173_v15 }
  0x6c   :  { %5817 = vmatprep.subr.mxu0 %v172_v16 }
  0x6d   :  { %5818 = vmatpush3.msra.mxu0 %v172_v16 }
  0x6e   :  { %5819 = vmatprep.subr.mxu0 %v171_v17 }
  0x6f   :  { %5820 = vmatpush3.msra.mxu0 %v171_v17 }
  0x70   :  { %537 = vmatprep.subr.mxu0 %v6773_v26 }
  0xda   :  { %v161_v20 = vpop.permute.xlu0 %160 }
  0xdb   :  { %vm165_vm1 = vcmp.eq.s32.totalorder %v161_v20, %v158_v19 }
  0xdc   :  { %v5673_v21 = vsel %vm165_vm1, 1.0, %v6569_v1 }
  0xdd   :  { %5821 = vmatprep.mubr.msk.f32.mxu0 %vm179_vm0, %v5673_v21 }
  0xde   :  { %v164_v22 = vpop.permute.xlu0 %163 }
  0xdf   :  { %vm166_vm2 = vcmp.eq.s32.totalorder %v164_v22, %v158_v19 }
  0xe0   :  { %v5674_v23 = vsel %vm166_vm2, 1.0, %v6569_v1 }
  0xe1   :  { %5822 = vmatmul.mubr.msk.f32.vlgmr.msra.gmra.mxu0 %vm179_vm0, %v5674_v23 }
  0xe2   :  { %585 = vmatprep.mubr.f32.mxu0 %v6569_v1  ;;  %538 = vmatpush1.msra.mxu0 %v6779_v27 }
  0xe3   :  { %539 = vmatprep.subr.mxu0 %v6786_v28 }
  0xe4   :  { %540 = vmatpush1.msra.mxu0 %v6791_v29 }
  0xe5   :  { %541 = vmatprep.subr.mxu0 %v6797_v30 }
  0xe6   :  { %542 = vmatpush1.msra.mxu0 %v6803_v31 }
  0xe7   :  { %543 = vmatprep.subr.mxu0 %v6809_v32 }
  0xe8   :  { %544 = vmatpush1.msra.mxu0 %v6815_v33 }
  0xe9   :  { %545 = vmatprep.subr.mxu0 %v6821_v34 }
  0xea   :  { %546 = vmatpush1.msra.mxu0 %v6827_v35 }
  0xeb   :  { %547 = vmatprep.subr.mxu0 %v6833_v36 }
  0xec   :  { %548 = vmatpush1.msra.mxu0 %v6839_v37 }
  0xed   :  { %549 = vmatprep.subr.mxu0 %v6845_v38 }
  0xee   :  { %550 = vmatpush1.msra.mxu0 %v6851_v39 }
  0xef   :  { %551 = vmatprep.subr.mxu0 %v6857_v40 }
  0xf0   :  { %552 = vmatpush1.msra.mxu0 %v6863_v41 }
  0xf1   :  { %831 = vmatprep.subr.mxu0 %v6773_v26 }
 0x1a1   :  { %v5823_v42 = vpop.f32.mrf.mxu0 }
 0x1a3   :  { %v252_v43 = vpop.f32.mrf.mxu0 }
 0x1a4   :  { %5677 = vmatmul.mubr.msk.f32.vlgmr.msra.gmra.mxu1 %vm297_vm3, %v252_v43 }
 0x1a5   :  { %401 = vmatpush1.msra.mxu1 %v6779_v27  ;;  %374 = vmatprep.mubr.f32.mxu1 %v6569_v1 }
 0x1a6   :  { %402 = vmatprep.subr.mxu1 %v6786_v28 }
 0x1a7   :  { %403 = vmatpush1.msra.mxu1 %v6791_v29 }
 0x1a8   :  { %404 = vmatprep.subr.mxu1 %v6797_v30  ;;  %5678 = vmatmul.mubr.msk.f32.gmra.mxu1 %vm297_vm3, %v5823_v42 }
 0x1a9   :  { %405 = vmatpush1.msra.mxu1 %v6803_v31  ;;  %448 = vmatprep.mubr.f32.mxu1 %v6569_v1 }
 0x1aa   :  { %406 = vmatprep.subr.mxu1 %v6809_v32 }
 0x1ab   :  { %407 = vmatpush1.msra.mxu1 %v6815_v33 }
 0x1ac   :  { %408 = vmatprep.subr.mxu1 %v6821_v34 }
 0x1ad   :  { %409 = vmatpush1.msra.mxu1 %v6827_v35 }
 0x1ae   :  { %410 = vmatprep.subr.mxu1 %v6833_v36 }
 0x1af   :  { %411 = vmatpush1.msra.mxu1 %v6839_v37 }
 0x1b0   :  { %412 = vmatprep.subr.mxu1 %v6845_v38 }
 0x1b1   :  { %413 = vmatpush1.msra.mxu1 %v6851_v39 }
 0x1b2   :  { %414 = vmatprep.subr.mxu1 %v6857_v40 }
 0x1b3   :  { %415 = vmatpush1.msra.mxu1 %v6863_v41 }
 0x1b4   :  { %449 = vmatmul.mubr.f32.vlgmr.msra.gmra.mxu1 %v6569_v1  ;;  %684 = vmatprep.subr.mxu1 %v6773_v26 }
 0x1b5   :  { %685 = vmatpush1.msra.mxu1 %v6779_v27  ;;  %732 = vmatprep.mubr.f32.mxu1 %v6569_v1 }
 0x1b6   :  { %686 = vmatprep.subr.mxu1 %v6786_v28 }
 0x1b7   :  { %687 = vmatpush1.msra.mxu1 %v6791_v29 }
 0x1b8   :  { %688 = vmatprep.subr.mxu1 %v6797_v30 }
 0x1b9   :  { %689 = vmatpush1.msra.mxu1 %v6803_v31 }
 0x1ba   :  { %690 = vmatprep.subr.mxu1 %v6809_v32 }
 0x1bb   :  { %691 = vmatpush1.msra.mxu1 %v6815_v33 }
 0x1bc   :  { %692 = vmatprep.subr.mxu1 %v6821_v34 }
 0x1bd   :  { %693 = vmatpush1.msra.mxu1 %v6827_v35 }
 0x1be   :  { %694 = vmatprep.subr.mxu1 %v6833_v36 }
 0x1bf   :  { %695 = vmatpush1.msra.mxu1 %v6839_v37 }
 0x1c0   :  { %696 = vmatprep.subr.mxu1 %v6845_v38 }
 0x1c1   :  { %697 = vmatpush1.msra.mxu1 %v6851_v39 }
 0x1c2   :  { %698 = vmatprep.subr.mxu1 %v6857_v40 }
 0x1c3   :  { %699 = vmatpush1.msra.mxu1 %v6863_v41 }
 0x1c4   :  { %975 = vmatprep.subr.mxu1 %v6773_v26 }
 0x264   :  { %v370_v49 = vpop.f32.mrf.mxu1 }
 0x265   :  { %v6922_v60 = vadd.f32 %v370_v49, %v290_v51 }
 0x266   :  { %v372_v50 = vpop.f32.mrf.mxu1 }
 0x267   :  { %v6916_v52 = vadd.f32 %v372_v50, %v294_v48 }
 0x268   :  { %v376_v53 = vpop.f32.mrf.mxu1 }
 0x269   :  { %v6918_v54 = vadd.f32 %v376_v53, %v290_v51 }
 0x26a   :  { %v378_v55 = vpop.f32.mrf.mxu1 }
 0x26b   :  { %v6920_v58 = vadd.f32 %v378_v55, %v294_v48 }
 0x274   :  { %v450_v56 = vpop.f32.mrf.mxu1 }
 0x275   :  { %v455_v62 = vadd.f32 %v450_v56, %v6922_v60 }
 0x276   :  { %v452_v57 = vpop.f32.mrf.mxu1 }
 0x277   :  { %v457_v59 = vrot.slane %v452_v57, 2  ;;  %v5679_v3 = vmul.f32 -1.442695, %v455_v62 }
 0x279   :  { %v459_v61 = vadd.f32 %v457_v59, %v6920_v58 }
 0x27b   :  { %5873 = vtanh.f32 %v459_v61  ;;  %v5680_v2 = vmul.f32 -1.442695, %v459_v61 }
 0x27c   :  { %5875 = vtanh.f32 %v455_v62 }
 0x27d   :  { %5877 = vpow2.f32 %v5680_v2 }
 0x27e   :  { %5879 = vpow2.f32 %v5679_v3 }
 0x288   :  { %v5874_v63 = vpop.eup %5873 }
 0x289   :  { %493 = vrot.lane.b32.xlu1 %v5874_v63, %s6570_s3  ;;  %v5876_v0 = vpop.eup %5875 }
 0x28a   :  { %v5878_v4 = vpop.eup %5877 }
 0x28b   :  { %v487_v5 = vadd.f32 1.0, %v5878_v4  ;;  %v5880_v6 = vpop.eup %5879 }
 0x28c   :  { %v463_v7 = vadd.f32 1.0, %v5880_v6 }
 0x28d   :  { %469 = vrot.lane.b32.xlu1 %v5876_v0, %s6570_s3  ;;  %5881 = vrcp.f32 %v487_v5 }
 0x28e   :  { %5883 = vrcp.f32 %v463_v7 }
 0x29a   :  { %v5882_v8 = vpop.eup %5881 }
 0x29b   :  { %v5884_v11 = vpop.eup %5883  ;;  %v491_v14 = vmul.f32 0.0, %v5882_v8 }
 0x29c   :  { %v467_v17 = vmul.f32 0.0, %v5884_v11 }
 0x2fb   :  { %v494_v9 = vpop.permute.xlu1 %493 }
 0x2fc   :  { %v496_v10 = vmul.f32 %v5882_v8, %v494_v9 }
 0x2fe   :  { %498 = vrot.lane.b32.xlu0 %v496_v10, %s6570_s3 }
 0x2ff   :  { %v470_v12 = vpop.permute.xlu1 %469 }
 0x300   :  { %v472_v13 = vmul.f32 %v5884_v11, %v470_v12 }
 0x302   :  { %474 = vrot.lane.b32.xlu1 %v472_v13, %s6570_s3 }
 0x370   :  { %v499_v15 = vpop.permute.xlu0 %498 }
 0x371   :  { %v6930_v16 = vadd.f32 %v499_v15, %v491_v14 }
 0x373   :  { %5885 = vtanh.f32 %v6930_v16 }
 0x374   :  { %v475_v18 = vpop.permute.xlu1 %474 }
 0x375   :  { %v6933_v19 = vadd.f32 %v475_v18, %v467_v17 }
 0x377   :  { %5887 = vtanh.f32 %v6933_v19  ;;  %v608_v9 = vrot.slane %v6933_v19, 6 }
 0x380   :  { %v5886_v20 = vpop.eup %5885 }
 0x381   :  { %504 = vrot.lane.b32.xlu0 %v5886_v20, %s6570_s3 }
 0x384   :  { %v5888_v21 = vpop.eup %5887 }
 0x385   :  { %480 = vrot.lane.b32.xlu1 %v5888_v21, %s6570_s3 }
 0x3f3   :  { %v505_v22 = vpop.permute.xlu0 %504 }
 0x3f4   :  { %v6938_v23 = vmul.f32 %v5882_v8, %v505_v22 }
 0x3f6   :  { %v513_v24 = vrot.slane %v6938_v23, 6 }
 0x3f7   :  { %v481_v25 = vpop.permute.xlu1 %480 }
 0x3f8   :  { %v483_v42 = vmul.f32 %v5884_v11, %v481_v25  ;;  %514 = vrot.lane.b32.xlu1 %v513_v24, %s6571_s22  ;;  %v635_v11 = vrot.slane %v6930_v16, 2 }
 0x3fa   :  { %509 = vrot.lane.b32.xlu0 %v483_v42, %s6572_s2 }
 0x46a   :  { %v515_v43 = vpop.permute.xlu1 %514 }
 0x46c   :  { %v6943_v44 = vpop.permute.xlu0 %509 }
 0x46d   :  { %v517_v46 = vsel %vm297_vm3, %v6943_v44, %v515_v43 }
 0x46e   :  { %5681 = vmatmul.mubr.msk.f32.vlgmr.msra.gmra.mxu0 %vm179_vm0, %v517_v46 }
 0x46f   :  { %832 = vmatpush1.msra.mxu0 %v6779_v27  ;;  %879 = vmatprep.mubr.f32.mxu0 %v6569_v1 }
 0x470   :  { %833 = vmatprep.subr.mxu0 %v6786_v28 }
 0x471   :  { %834 = vmatpush1.msra.mxu0 %v6791_v29 }
 0x472   :  { %835 = vmatprep.subr.mxu0 %v6797_v30 }
 0x473   :  { %836 = vmatpush1.msra.mxu0 %v6803_v31 }
 0x474   :  { %837 = vmatprep.subr.mxu0 %v6809_v32 }
 0x475   :  { %838 = vmatpush1.msra.mxu0 %v6815_v33 }
 0x476   :  { %839 = vmatprep.subr.mxu0 %v6821_v34 }
 0x477   :  { %840 = vmatpush1.msra.mxu0 %v6827_v35 }
 0x478   :  { %841 = vmatprep.subr.mxu0 %v6833_v36 }
 0x479   :  { %842 = vmatpush1.msra.mxu0 %v6839_v37 }
 0x47a   :  { %843 = vmatprep.subr.mxu0 %v6845_v38 }
 0x47b   :  { %844 = vmatpush1.msra.mxu0 %v6851_v39 }
 0x47c   :  { %845 = vmatprep.subr.mxu0 %v6857_v40 }
 0x47d   :  { %846 = vmatpush1.msra.mxu0 %v6863_v41 }
 0x47e   :  { %1118 = vmatprep.subr.mxu0 %v6773_v26 }
 0x52e   :  { %v587_v48 = vpop.f32.mrf.mxu0 }
 0x52f   :  { %v593_v49 = vrot.slane %v587_v48, 6 }
 0x530   :  { %v589_v50 = vpop.f32.mrf.mxu0 }
 0x531   :  { %v595_v51 = vadd.f32 %v593_v49, %v6922_v60  ;;  %v597_v53 = vrot.slane %v589_v50, 4 }
 0x533   :  { %5889 = vtanh.f32 %v595_v51  ;;  %v599_v55 = vadd.f32 %v597_v53, %v6920_v58  ;;  %v5682_v59 = vmul.f32 -1.442695, %v595_v51 }
 0x535   :  { %5891 = vtanh.f32 %v599_v55  ;;  %v5683_v61 = vmul.f32 -1.442695, %v599_v55 }
 0x536   :  { %5893 = vpow2.f32 %v5682_v59 }
 0x537   :  { %5895 = vpow2.f32 %v5683_v61 }
 0x540   :  { %v5890_v56 = vpop.eup %5889 }
 0x541   :  { %612 = vrot.lane.b32.xlu1 %v5890_v56, %s6570_s3 }
 0x542   :  { %v5892_v57 = vpop.eup %5891 }
 0x543   :  { %639 = vrot.lane.b32.xlu0 %v5892_v57, %s6570_s3  ;;  %v5894_v62 = vpop.eup %5893 }
 0x544   :  { %v5896_v63 = vpop.eup %5895  ;;  %v603_v0 = vadd.f32 1.0, %v5894_v62 }
 0x545   :  { %v630_v2 = vadd.f32 1.0, %v5896_v63 }
 0x546   :  { %5897 = vrcp.f32 %v603_v0 }
 0x547   :  { %5899 = vrcp.f32 %v630_v2 }
 0x553   :  { %v5898_v3 = vpop.eup %5897 }
 0x554   :  { %v5900_v6 = vpop.eup %5899  ;;  %v610_v10 = vmul.f32 %v5898_v3, %v608_v9 }
 0x555   :  { %v637_v14 = vmul.f32 %v5900_v6, %v635_v11 }
 0x5b3   :  { %v613_v4 = vpop.permute.xlu1 %612 }
 0x5b4   :  { %v615_v5 = vmul.f32 %v5898_v3, %v613_v4 }
 0x5b5   :  { %v640_v7 = vpop.permute.xlu0 %639 }
 0x5b6   :  { %617 = vrot.lane.b32.xlu1 %v615_v5, %s6570_s3  ;;  %v642_v8 = vmul.f32 %v5900_v6, %v640_v7 }
 0x5b8   :  { %644 = vrot.lane.b32.xlu0 %v642_v8, %s6570_s3 }
 0x628   :  { %v618_v12 = vpop.permute.xlu1 %617 }
 0x629   :  { %v6973_v13 = vadd.f32 %v618_v12, %v610_v10 }
 0x62a   :  { %v645_v15 = vpop.permute.xlu0 %644 }
 0x62b   :  { %5901 = vtanh.f32 %v6973_v13  ;;  %v6976_v17 = vadd.f32 %v645_v15, %v637_v14  ;;  %v755_v9 = vrot.slane %v6973_v13, 6 }
 0x62d   :  { %5903 = vtanh.f32 %v6976_v17  ;;  %v782_v11 = vrot.slane %v6976_v17, 2 }
 0x638   :  { %v5902_v18 = vpop.eup %5901 }
 0x639   :  { %623 = vrot.lane.b32.xlu1 %v5902_v18, %s6570_s3 }
 0x63a   :  { %v5904_v20 = vpop.eup %5903 }
 0x63b   :  { %650 = vrot.lane.b32.xlu0 %v5904_v20, %s6570_s3 }
 0x6ab   :  { %v624_v19 = vpop.permute.xlu1 %623 }
 0x6ac   :  { %v626_v21 = vmul.f32 %v5898_v3, %v624_v19 }
 0x6ad   :  { %v651_v16 = vpop.permute.xlu0 %650 }
 0x6ae   :  { %655 = vrot.lane.b32.xlu0 %v626_v21, %s6572_s2  ;;  %v6982_v22 = vmul.f32 %v5900_v6, %v651_v16 }
 0x6b0   :  { %v659_v24 = vrot.slane %v6982_v22, 2 }
 0x6b2   :  { %660 = vrot.lane.b32.xlu1 %v659_v24, %s6571_s22 }
 0x720   :  { %v6986_v25 = vpop.permute.xlu0 %655 }
 0x724   :  { %v661_v42 = vpop.permute.xlu1 %660 }
 0x725   :  { %v663_v43 = vsel %vm297_vm3, %v6986_v25, %v661_v42 }
 0x726   :  { %v665_v46 = vrot.slane %v663_v43, 2 }
 0x728   :  { %5684 = vmatmul.mubr.msk.f32.vlgmr.msra.gmra.mxu1 %vm179_vm0, %v665_v46 }
 0x729   :  { %976 = vmatpush1.msra.mxu1 %v6779_v27  ;;  %1023 = vmatprep.mubr.f32.mxu1 %v6569_v1 }
 0x72a   :  { %977 = vmatprep.subr.mxu1 %v6786_v28 }
 0x72b   :  { %978 = vmatpush1.msra.mxu1 %v6791_v29 }
 0x72c   :  { %979 = vmatprep.subr.mxu1 %v6797_v30 }
 0x72d   :  { %980 = vmatpush1.msra.mxu1 %v6803_v31 }
 0x72e   :  { %981 = vmatprep.subr.mxu1 %v6809_v32 }
 0x72f   :  { %982 = vmatpush1.msra.mxu1 %v6815_v33 }
 0x730   :  { %983 = vmatprep.subr.mxu1 %v6821_v34 }
 0x731   :  { %984 = vmatpush1.msra.mxu1 %v6827_v35 }
 0x732   :  { %985 = vmatprep.subr.mxu1 %v6833_v36 }
 0x733   :  { %986 = vmatpush1.msra.mxu1 %v6839_v37 }
 0x734   :  { %987 = vmatprep.subr.mxu1 %v6845_v38 }
 0x735   :  { %988 = vmatpush1.msra.mxu1 %v6851_v39 }
 0x736   :  { %989 = vmatprep.subr.mxu1 %v6857_v40 }
 0x737   :  { %990 = vmatpush1.msra.mxu1 %v6863_v41 }
 0x738   :  { %1265 = vmatprep.subr.mxu1 %v6773_v26 }
 0x7e8   :  { %v734_v48 = vpop.f32.mrf.mxu1 }
 0x7e9   :  { %v740_v49 = vrot.slane %v734_v48, 4 }
 0x7ea   :  { %v736_v50 = vpop.f32.mrf.mxu1 }
 0x7eb   :  { %v742_v51 = vadd.f32 %v740_v49, %v6922_v60  ;;  %v744_v53 = vrot.slane %v736_v50, 6 }
 0x7ed   :  { %5905 = vtanh.f32 %v742_v51  ;;  %v746_v55 = vadd.f32 %v744_v53, %v6920_v58  ;;  %v5685_v59 = vmul.f32 -1.442695, %v742_v51 }
 0x7ef   :  { %5907 = vtanh.f32 %v746_v55  ;;  %v5686_v61 = vmul.f32 -1.442695, %v746_v55 }
 0x7f0   :  { %5909 = vpow2.f32 %v5685_v59 }
 0x7f1   :  { %5911 = vpow2.f32 %v5686_v61 }
 0x7fa   :  { %v5906_v56 = vpop.eup %5905 }
 0x7fb   :  { %759 = vrot.lane.b32.xlu1 %v5906_v56, %s6570_s3 }
 0x7fc   :  { %v5908_v57 = vpop.eup %5907 }
 0x7fd   :  { %786 = vrot.lane.b32.xlu0 %v5908_v57, %s6570_s3  ;;  %v5910_v62 = vpop.eup %5909 }
 0x7fe   :  { %v5912_v63 = vpop.eup %5911  ;;  %v750_v0 = vadd.f32 1.0, %v5910_v62 }
 0x7ff   :  { %v777_v2 = vadd.f32 1.0, %v5912_v63 }
 0x800   :  { %5913 = vrcp.f32 %v750_v0 }
 0x801   :  { %5915 = vrcp.f32 %v777_v2 }
 0x80d   :  { %v5914_v3 = vpop.eup %5913 }
 0x80e   :  { %v5916_v6 = vpop.eup %5915  ;;  %v757_v10 = vmul.f32 %v5914_v3, %v755_v9 }
 0x80f   :  { %v784_v15 = vmul.f32 %v5916_v6, %v782_v11 }
 0x86d   :  { %v760_v4 = vpop.permute.xlu1 %759 }
 0x86e   :  { %v762_v5 = vmul.f32 %v5914_v3, %v760_v4 }
 0x86f   :  { %v787_v7 = vpop.permute.xlu0 %786 }
 0x870   :  { %764 = vrot.lane.b32.xlu1 %v762_v5, %s6570_s3  ;;  %v789_v8 = vmul.f32 %v5916_v6, %v787_v7 }
 0x872   :  { %791 = vrot.lane.b32.xlu0 %v789_v8, %s6570_s3 }
 0x8e2   :  { %v765_v12 = vpop.permute.xlu1 %764 }
 0x8e3   :  { %v7016_v14 = vadd.f32 %v765_v12, %v757_v10 }
 0x8e4   :  { %v792_v18 = vpop.permute.xlu0 %791 }
 0x8e5   :  { %5917 = vtanh.f32 %v7016_v14  ;;  %v7019_v20 = vadd.f32 %v792_v18, %v784_v15  ;;  %v899_v7 = vrot.slane %v7016_v14, 6 }
 0x8e7   :  { %5919 = vtanh.f32 %v7019_v20  ;;  %v926_v8 = vrot.slane %v7019_v20, 2 }
 0x8f2   :  { %v5918_v19 = vpop.eup %5917 }
 0x8f3   :  { %770 = vrot.lane.b32.xlu1 %v5918_v19, %s6570_s3 }
 0x8f4   :  { %v5920_v21 = vpop.eup %5919 }
 0x8f5   :  { %797 = vrot.lane.b32.xlu0 %v5920_v21, %s6570_s3 }
 0x965   :  { %v771_v13 = vpop.permute.xlu1 %770 }
 0x966   :  { %v773_v16 = vmul.f32 %v5914_v3, %v771_v13 }
 0x967   :  { %v798_v17 = vpop.permute.xlu0 %797 }
 0x968   :  { %802 = vrot.lane.b32.xlu0 %v773_v16, %s6572_s2  ;;  %v7025_v24 = vmul.f32 %v5916_v6, %v798_v17 }
 0x96a   :  { %v806_v42 = vrot.slane %v7025_v24, 6 }
 0x96c   :  { %807 = vrot.lane.b32.xlu1 %v806_v42, %s6571_s22 }
 0x9da   :  { %v7029_v43 = vpop.permute.xlu0 %802 }
 0x9de   :  { %v808_v46 = vpop.permute.xlu1 %807 }
 0x9df   :  { %v810_v48 = vsel %vm297_vm3, %v7029_v43, %v808_v46 }
 0x9e0   :  { %v812_v49 = vrot.slane %v810_v48, 4 }
 0x9e2   :  { %5687 = vmatmul.mubr.msk.f32.vlgmr.msra.gmra.mxu0 %vm179_vm0, %v812_v49 }
 0x9e3   :  { %1119 = vmatpush1.msra.mxu0 %v6779_v27  ;;  %1166 = vmatprep.mubr.f32.mxu0 %v6569_v1 }
 0x9e4   :  { %1120 = vmatprep.subr.mxu0 %v6786_v28 }
 0x9e5   :  { %1121 = vmatpush1.msra.mxu0 %v6791_v29 }
 0x9e6   :  { %1122 = vmatprep.subr.mxu0 %v6797_v30 }
 0x9e7   :  { %1123 = vmatpush1.msra.mxu0 %v6803_v31 }
 0x9e8   :  { %1124 = vmatprep.subr.mxu0 %v6809_v32 }
 0x9e9   :  { %1125 = vmatpush1.msra.mxu0 %v6815_v33 }
 0x9ea   :  { %1126 = vmatprep.subr.mxu0 %v6821_v34 }
 0x9eb   :  { %1127 = vmatpush1.msra.mxu0 %v6827_v35 }
 0x9ec   :  { %1128 = vmatprep.subr.mxu0 %v6833_v36 }
 0x9ed   :  { %1129 = vmatpush1.msra.mxu0 %v6839_v37 }
 0x9ee   :  { %1130 = vmatprep.subr.mxu0 %v6845_v38 }
 0x9ef   :  { %1131 = vmatpush1.msra.mxu0 %v6851_v39 }
 0x9f0   :  { %1132 = vmatprep.subr.mxu0 %v6857_v40 }
 0x9f1   :  { %1133 = vmatpush1.msra.mxu0 %v6863_v41 }
 0x9f2   :  { %1412 = vmatprep.subr.mxu0 %v6773_v26 }
 0xaa2   :  { %v881_v50 = vpop.f32.mrf.mxu0 }
 0xaa3   :  { %v887_v51 = vrot.slane %v881_v50, 2 }
 0xaa4   :  { %v883_v53 = vpop.f32.mrf.mxu0 }
 0xaa5   :  { %v889_v55 = vadd.f32 %v887_v51, %v6922_v60  ;;  %v890_v56 = vadd.f32 %v883_v53, %v6920_v58 }
 0xaa7   :  { %5921 = vtanh.f32 %v889_v55  ;;  %v5688_v61 = vmul.f32 -1.442695, %v889_v55  ;;  %v5689_v62 = vmul.f32 -1.442695, %v890_v56 }
 0xaa8   :  { %5923 = vtanh.f32 %v890_v56 }
 0xaa9   :  { %5925 = vpow2.f32 %v5688_v61 }
 0xaaa   :  { %5927 = vpow2.f32 %v5689_v62 }
 0xab4   :  { %v5922_v57 = vpop.eup %5921 }
 0xab5   :  { %v5924_v59 = vpop.eup %5923  ;;  %903 = vrot.lane.b32.xlu1 %v5922_v57, %s6570_s3 }
 0xab6   :  { %930 = vrot.lane.b32.xlu0 %v5924_v59, %s6570_s3  ;;  %v5926_v26 = vpop.eup %5925 }
 0xab7   :  { %v5928_v63 = vpop.eup %5927  ;;  %v894_v0 = vadd.f32 1.0, %v5926_v26 }
 0xab8   :  { %v921_v2 = vadd.f32 1.0, %v5928_v63 }
 0xab9   :  { %5929 = vrcp.f32 %v894_v0 }
 0xaba   :  { %5931 = vrcp.f32 %v921_v2 }
 0xac6   :  { %v5930_v60 = vpop.eup %5929 }
 0xac7   :  { %v5932_v3 = vpop.eup %5931  ;;  %v901_v9 = vmul.f32 %v5930_v60, %v899_v7 }
 0xac8   :  { %v928_v11 = vmul.f32 %v5932_v3, %v926_v8 }
 0xb27   :  { %v904_v58 = vpop.permute.xlu1 %903 }
 0xb28   :  { %v906_v4 = vmul.f32 %v5930_v60, %v904_v58  ;;  %v931_v5 = vpop.permute.xlu0 %930 }
 0xb29   :  { %v933_v6 = vmul.f32 %v5932_v3, %v931_v5 }
 0xb2a   :  { %908 = vrot.lane.b32.xlu1 %v906_v4, %s6570_s3 }
 0xb2b   :  { %935 = vrot.lane.b32.xlu0 %v933_v6, %s6570_s3 }
 0xb9c   :  { %v909_v10 = vpop.permute.xlu1 %908 }
 0xb9d   :  { %v7059_v12 = vadd.f32 %v909_v10, %v901_v9  ;;  %v936_v15 = vpop.permute.xlu0 %935 }
 0xb9e   :  { %v7061_v18 = vadd.f32 %v936_v15, %v928_v11 }
 0xb9f   :  { %5933 = vtanh.f32 %v7059_v12  ;;  %v1043_v7 = vrot.slane %v7059_v12, 6 }
 0xba0   :  { %5935 = vtanh.f32 %v7061_v18  ;;  %v1070_v10 = vrot.slane %v7061_v18, 2 }
 0xbac   :  { %v5934_v19 = vpop.eup %5933 }
 0xbad   :  { %v5936_v21 = vpop.eup %5935  ;;  %914 = vrot.lane.b32.xlu1 %v5934_v19, %s6570_s3 }
 0xbae   :  { %941 = vrot.lane.b32.xlu0 %v5936_v21, %s6570_s3 }
 0xc1f   :  { %v915_v14 = vpop.permute.xlu1 %914 }
 0xc20   :  { %v917_v20 = vmul.f32 %v5930_v60, %v915_v14  ;;  %v942_v13 = vpop.permute.xlu0 %941 }
 0xc21   :  { %v7067_v16 = vmul.f32 %v5932_v3, %v942_v13 }
 0xc22   :  { %946 = vrot.lane.b32.xlu0 %v917_v20, %s6572_s2 }
 0xc23   :  { %v950_v17 = vrot.slane %v7067_v16, 2 }
 0xc25   :  { %951 = vrot.lane.b32.xlu1 %v950_v17, %s6571_s22 }
 0xc94   :  { %v7072_v42 = vpop.permute.xlu0 %946 }
 0xc97   :  { %v952_v46 = vpop.permute.xlu1 %951 }
 0xc98   :  { %v954_v48 = vsel %vm297_vm3, %v7072_v42, %v952_v46 }
 0xc99   :  { %v956_v49 = vrot.slane %v954_v48, 6 }
 0xc9b   :  { %5690 = vmatmul.mubr.msk.f32.vlgmr.msra.gmra.mxu1 %vm179_vm0, %v956_v49 }
 0xc9c   :  { %1266 = vmatpush1.msra.mxu1 %v6779_v27  ;;  %1313 = vmatprep.mubr.f32.mxu1 %v6569_v1 }
 0xc9d   :  { %1267 = vmatprep.subr.mxu1 %v6786_v28 }
 0xc9e   :  { %1268 = vmatpush1.msra.mxu1 %v6791_v29 }
 0xc9f   :  { %1269 = vmatprep.subr.mxu1 %v6797_v30 }
 0xca0   :  { %1270 = vmatpush1.msra.mxu1 %v6803_v31 }
 0xca1   :  { %1271 = vmatprep.subr.mxu1 %v6809_v32 }
 0xca2   :  { %1272 = vmatpush1.msra.mxu1 %v6815_v33 }
 0xca3   :  { %1273 = vmatprep.subr.mxu1 %v6821_v34 }
 0xca4   :  { %1274 = vmatpush1.msra.mxu1 %v6827_v35 }
 0xca5   :  { %1275 = vmatprep.subr.mxu1 %v6833_v36 }
 0xca6   :  { %1276 = vmatpush1.msra.mxu1 %v6839_v37 }
 0xca7   :  { %1277 = vmatprep.subr.mxu1 %v6845_v38 }
 0xca8   :  { %1278 = vmatpush1.msra.mxu1 %v6851_v39 }
 0xca9   :  { %1279 = vmatprep.subr.mxu1 %v6857_v40 }
 0xcaa   :  { %1280 = vmatpush1.msra.mxu1 %v6863_v41 }
 0xd5b   :  { %v1025_v50 = vpop.f32.mrf.mxu1 }
 0xd5c   :  { %v1030_v51 = vadd.f32 %v1025_v50, %v6918_v54 }
 0xd5d   :  { %v1027_v53 = vpop.f32.mrf.mxu1 }
 0xd5e   :  { %5937 = vtanh.f32 %v1030_v51  ;;  %v1032_v55 = vrot.slane %v1027_v53, 2  ;;  %v5691_v61 = vmul.f32 -1.442695, %v1030_v51 }
 0xd60   :  { %v1034_v56 = vadd.f32 %v1032_v55, %v6916_v52 }
 0xd62   :  { %5939 = vtanh.f32 %v1034_v56  ;;  %v5692_v62 = vmul.f32 -1.442695, %v1034_v56 }
 0xd63   :  { %5941 = vpow2.f32 %v5691_v61 }
 0xd64   :  { %5943 = vpow2.f32 %v5692_v62 }
 0xd6b   :  { %v5938_v57 = vpop.eup %5937 }
 0xd6c   :  { %1047 = vrot.lane.b32.xlu1 %v5938_v57, %s6570_s3 }
 0xd6f   :  { %v5940_v59 = vpop.eup %5939 }
 0xd70   :  { %1074 = vrot.lane.b32.xlu0 %v5940_v59, %s6570_s3  ;;  %v5942_v26 = vpop.eup %5941 }
 0xd71   :  { %v1038_v63 = vadd.f32 1.0, %v5942_v26  ;;  %v5944_v0 = vpop.eup %5943 }
 0xd72   :  { %v1065_v2 = vadd.f32 1.0, %v5944_v0 }
 0xd73   :  { %5945 = vrcp.f32 %v1038_v63 }
 0xd74   :  { %5947 = vrcp.f32 %v1065_v2 }
 0xd80   :  { %v5946_v60 = vpop.eup %5945 }
 0xd81   :  { %v5948_v4 = vpop.eup %5947  ;;  %v1045_v8 = vmul.f32 %v5946_v60, %v1043_v7 }
 0xd82   :  { %v1072_v15 = vmul.f32 %v5948_v4, %v1070_v10 }
 0xdde   :  { %v1048_v58 = vpop.permute.xlu1 %1047 }
 0xddf   :  { %v1050_v3 = vmul.f32 %v5946_v60, %v1048_v58 }
 0xde1   :  { %1052 = vrot.lane.b32.xlu1 %v1050_v3, %s6570_s3 }
 0xde2   :  { %v1075_v5 = vpop.permute.xlu0 %1074 }
 0xde3   :  { %v1077_v6 = vmul.f32 %v5948_v4, %v1075_v5 }
 0xde5   :  { %1079 = vrot.lane.b32.xlu0 %v1077_v6, %s6570_s3 }
 0xe53   :  { %v1053_v9 = vpop.permute.xlu1 %1052 }
 0xe54   :  { %v7101_v11 = vadd.f32 %v1053_v9, %v1045_v8 }
 0xe56   :  { %5949 = vtanh.f32 %v7101_v11  ;;  %v1189_v59 = vrot.slane %v7101_v11, 6 }
 0xe57   :  { %v1080_v19 = vpop.permute.xlu0 %1079 }
 0xe58   :  { %v7104_v21 = vadd.f32 %v1080_v19, %v1072_v15 }
 0xe5a   :  { %5951 = vtanh.f32 %v7104_v21  ;;  %v1216_v62 = vrot.slane %v7104_v21, 2 }
 0xe63   :  { %v5950_v14 = vpop.eup %5949 }
 0xe64   :  { %1058 = vrot.lane.b32.xlu1 %v5950_v14, %s6570_s3 }
 0xe67   :  { %v5952_v20 = vpop.eup %5951 }
 0xe68   :  { %1085 = vrot.lane.b32.xlu0 %v5952_v20, %s6570_s3 }
 0xed6   :  { %v1059_v12 = vpop.permute.xlu1 %1058 }
 0xed7   :  { %v1061_v13 = vmul.f32 %v5946_v60, %v1059_v12 }
 0xed9   :  { %1090 = vrot.lane.b32.xlu0 %v1061_v13, %s6572_s2 }
 0xeda   :  { %v1086_v18 = vpop.permute.xlu0 %1085 }
 0xedb   :  { %v7110_v17 = vmul.f32 %v5948_v4, %v1086_v18 }
 0xedd   :  { %v1094_v46 = vrot.slane %v7110_v17, 6 }
 0xedf   :  { %1095 = vrot.lane.b32.xlu1 %v1094_v46, %s6571_s22 }
 0xf4b   :  { %v7114_v48 = vpop.permute.xlu0 %1090 }
 0xf51   :  { %v1096_v49 = vpop.permute.xlu1 %1095 }
 0xf52   :  { %v1098_v50 = vsel %vm297_vm3, %v7114_v48, %v1096_v49 }
 0xf53   :  { %5693 = vmatmul.mubr.msk.f32.vlgmr.msra.gmra.mxu0 %vm179_vm0, %v1098_v50 }
 0xf54   :  { %1413 = vmatpush1.msra.mxu0 %v6779_v27  ;;  %1460 = vmatprep.mubr.f32.mxu0 %v6569_v1 }
 0xf55   :  { %1414 = vmatprep.subr.mxu0 %v6786_v28 }
 0xf56   :  { %1415 = vmatpush1.msra.mxu0 %v6791_v29 }
 0xf57   :  { %1416 = vmatprep.subr.mxu0 %v6797_v30 }
 0xf58   :  { %1417 = vmatpush1.msra.mxu0 %v6803_v31 }
 0xf59   :  { %1418 = vmatprep.subr.mxu0 %v6809_v32 }
 0xf5a   :  { %1419 = vmatpush1.msra.mxu0 %v6815_v33 }
 0xf5b   :  { %1420 = vmatprep.subr.mxu0 %v6821_v34 }
 0xf5c   :  { %1421 = vmatpush1.msra.mxu0 %v6827_v35 }
 0xf5d   :  { %1422 = vmatprep.subr.mxu0 %v6833_v36 }
 0xf5e   :  { %1423 = vmatpush1.msra.mxu0 %v6839_v37 }
 0xf5f   :  { %1424 = vmatprep.subr.mxu0 %v6845_v38 }
 0xf60   :  { %1425 = vmatpush1.msra.mxu0 %v6851_v39 }
 0xf61   :  { %1426 = vmatprep.subr.mxu0 %v6857_v40 }
 0xf62   :  { %1427 = vmatpush1.msra.mxu0 %v6863_v41 }
0x1013   :  { %v1168_v27 = vpop.f32.mrf.mxu0 }
0x1014   :  { %v1174_v28 = vrot.slane %v1168_v27, 6 }
0x1015   :  { %v1170_v29 = vpop.f32.mrf.mxu0 }
0x1016   :  { %v1176_v30 = vadd.f32 %v1174_v28, %v6918_v54  ;;  %v1178_v31 = vrot.slane %v1170_v29, 4 }
0x1018   :  { %5953 = vtanh.f32 %v1176_v30  ;;  %v1180_v32 = vadd.f32 %v1178_v31, %v6916_v52  ;;  %v5694_v35 = vmul.f32 -1.442695, %v1176_v30 }
0x101a   :  { %5955 = vtanh.f32 %v1180_v32  ;;  %v5695_v36 = vmul.f32 -1.442695, %v1180_v32 }
0x101b   :  { %5957 = vpow2.f32 %v5694_v35 }
0x101c   :  { %5959 = vpow2.f32 %v5695_v36 }
0x1025   :  { %v5954_v33 = vpop.eup %5953 }
0x1026   :  { %1193 = vrot.lane.b32.xlu1 %v5954_v33, %s6570_s3 }
0x1027   :  { %v5956_v34 = vpop.eup %5955 }
0x1028   :  { %1220 = vrot.lane.b32.xlu0 %v5956_v34, %s6570_s3  ;;  %v5958_v37 = vpop.eup %5957 }
0x1029   :  { %v5960_v38 = vpop.eup %5959  ;;  %v1184_v39 = vadd.f32 1.0, %v5958_v37 }
0x102a   :  { %v1211_v40 = vadd.f32 1.0, %v5960_v38 }
0x102b   :  { %5961 = vrcp.f32 %v1184_v39 }
0x102c   :  { %5963 = vrcp.f32 %v1211_v40 }
0x1038   :  { %v5962_v41 = vpop.eup %5961 }
0x1039   :  { %v5964_v55 = vpop.eup %5963  ;;  %v1191_v61 = vmul.f32 %v5962_v41, %v1189_v59 }
0x103a   :  { %v1218_v0 = vmul.f32 %v5964_v55, %v1216_v62 }
0x1098   :  { %v1194_v51 = vpop.permute.xlu1 %1193 }
0x1099   :  { %v1196_v53 = vmul.f32 %v5962_v41, %v1194_v51 }
0x109a   :  { %v1221_v56 = vpop.permute.xlu0 %1220 }
0x109b   :  { %1198 = vrot.lane.b32.xlu1 %v1196_v53, %s6570_s3  ;;  %v1223_v57 = vmul.f32 %v5964_v55, %v1221_v56 }
0x109d   :  { %1225 = vrot.lane.b32.xlu0 %v1223_v57, %s6570_s3 }
0x110d   :  { %v1199_v26 = vpop.permute.xlu1 %1198 }
0x110e   :  { %v1201_v63 = vadd.f32 %v1199_v26, %v1191_v61 }
0x110f   :  { %v1226_v2 = vpop.permute.xlu0 %1225 }
0x1110   :  { %5965 = vtanh.f32 %v1201_v63  ;;  %v1228_v60 = vadd.f32 %v1226_v2, %v1218_v0  ;;  %v1336_v37 = vrot.slane %v1201_v63, 6 }
0x1112   :  { %5967 = vtanh.f32 %v1228_v60  ;;  %v1363_v39 = vrot.slane %v1228_v60, 2 }
0x111d   :  { %v5966_v58 = vpop.eup %5965 }
0x111e   :  { %1204 = vrot.lane.b32.xlu1 %v5966_v58, %s6570_s3 }
0x111f   :  { %v5968_v3 = vpop.eup %5967 }
0x1120   :  { %1231 = vrot.lane.b32.xlu0 %v5968_v3, %s6570_s3 }
0x1190   :  { %v1205_v4 = vpop.permute.xlu1 %1204 }
0x1191   :  { %v1207_v5 = vmul.f32 %v5962_v41, %v1205_v4 }
0x1192   :  { %v1232_v6 = vpop.permute.xlu0 %1231 }
0x1193   :  { %1236 = vrot.lane.b32.xlu0 %v1207_v5, %s6572_s2  ;;  %v7146_v7 = vmul.f32 %v5964_v55, %v1232_v6 }
0x1195   :  { %v1240_v8 = vrot.slane %v7146_v7, 2 }
0x1197   :  { %1241 = vrot.lane.b32.xlu1 %v1240_v8, %s6571_s22 }
0x1205   :  { %v7150_v9 = vpop.permute.xlu0 %1236 }
0x1209   :  { %v1242_v10 = vpop.permute.xlu1 %1241 }
0x120a   :  { %v1244_v11 = vsel %vm297_vm3, %v7150_v9, %v1242_v10 }
0x120b   :  { %v1246_v15 = vrot.slane %v1244_v11, 2 }
0x120d   :  { %5696 = vmatmul.mubr.msk.f32.vlgmr.msra.gmra.mxu1 %vm179_vm0, %v1246_v15 }
0x120e   :  { %1686 = vmatprep.mubr.f32.mxu1 %v6569_v1 }
0x12cd   :  { %v1315_v19 = vpop.f32.mrf.mxu1 }
0x12ce   :  { %v1321_v21 = vrot.slane %v1315_v19, 4 }
0x12cf   :  { %v1317_v14 = vpop.f32.mrf.mxu1 }
0x12d0   :  { %v1323_v20 = vadd.f32 %v1321_v21, %v6918_v54  ;;  %v1325_v12 = vrot.slane %v1317_v14, 6 }
0x12d2   :  { %5969 = vtanh.f32 %v1323_v20  ;;  %v1327_v13 = vadd.f32 %v1325_v12, %v6916_v52  ;;  %v5697_v49 = vmul.f32 -1.442695, %v1323_v20 }
0x12d4   :  { %5971 = vtanh.f32 %v1327_v13  ;;  %v5698_v50 = vmul.f32 -1.442695, %v1327_v13 }
0x12d5   :  { %5973 = vpow2.f32 %v5697_v49 }
0x12d6   :  { %5975 = vpow2.f32 %v5698_v50 }
0x12df   :  { %v5970_v18 = vpop.eup %5969 }
0x12e0   :  { %1340 = vrot.lane.b32.xlu1 %v5970_v18, %s6570_s3 }
0x12e1   :  { %v5972_v46 = vpop.eup %5971 }
0x12e2   :  { %1367 = vrot.lane.b32.xlu0 %v5972_v46, %s6570_s3  ;;  %v5974_v27 = vpop.eup %5973 }
0x12e3   :  { %v5976_v28 = vpop.eup %5975  ;;  %v1331_v29 = vadd.f32 1.0, %v5974_v27 }
0x12e4   :  { %v1358_v30 = vadd.f32 1.0, %v5976_v28 }
0x12e5   :  { %5977 = vrcp.f32 %v1331_v29 }
0x12e6   :  { %5979 = vrcp.f32 %v1358_v30 }
0x12f2   :  { %v5978_v31 = vpop.eup %5977 }
0x12f3   :  { %v5980_v34 = vpop.eup %5979  ;;  %v1338_v38 = vmul.f32 %v5978_v31, %v1336_v37  ;;  %v1602_v37 = vld [vmem:[#allocation2 + $0x70] sm:$0xff] }
0x12f4   :  { %v1365_v51 = vmul.f32 %v5980_v34, %v1363_v39  ;;  %v7191_v39 = vld [vmem:[#allocation5 + $0x78] sm:$0xff] }
0x12f5   :  { %1715 = vmatprep.subr.mxu0 %v7191_v39 }
0x1352   :  { %v1341_v32 = vpop.permute.xlu1 %1340 }
0x1353   :  { %v1343_v33 = vmul.f32 %v5978_v31, %v1341_v32 }
0x1354   :  { %v1368_v35 = vpop.permute.xlu0 %1367 }
0x1355   :  { %1345 = vrot.lane.b32.xlu1 %v1343_v33, %s6570_s3  ;;  %v1370_v36 = vmul.f32 %v5980_v34, %v1368_v35 }
0x1357   :  { %1372 = vrot.lane.b32.xlu0 %v1370_v36, %s6570_s3  ;;  %v1603_v36 = vld [vmem:[#allocation2 + $0x78] sm:$0xff] }
0x1358   :  { %1638 = vmatprep.subr.mxu1 %v1603_v36 }
0x1359   :  { %1639 = vmatpush1.msra.mxu1 %v1602_v37 }
0x13c7   :  { %v1346_v40 = vpop.permute.xlu1 %1345 }
0x13c8   :  { %v1348_v41 = vadd.f32 %v1346_v40, %v1338_v38  ;;  %v1601_v38 = vld [vmem:[#allocation2 + $0x68] sm:$0xff]  ;;  %v1600_v40 = vld [vmem:[#allocation2 + $0x60] sm:$0xff] }
0x13c9   :  { %v1373_v53 = vpop.permute.xlu0 %1372  ;;  %1640 = vmatprep.subr.mxu1 %v1601_v38 }
0x13ca   :  { %5981 = vtanh.f32 %v1348_v41  ;;  %v1375_v55 = vadd.f32 %v1373_v53, %v1365_v51  ;;  %v1480_v50 = vrot.slane %v1348_v41, 6  ;;  %v7193_v41 = vld [vmem:[#allocation5 + $0x70] sm:$0xff]  ;;  %v1599_v51 = vld [vmem:[#allocation2 + $0x58] sm:$0xff]  ;;  %v7197_v53 = vld [vmem:[#allocation5 + $0x68] sm:$0xff]  ;;  %1641 = vmatpush1.msra.mxu1 %v1600_v40 }
0x13cb   :  { %1642 = vmatprep.subr.mxu1 %v1599_v51 }
0x13cc   :  { %5983 = vtanh.f32 %v1375_v55  ;;  %v1507_v27 = vrot.slane %v1375_v55, 2  ;;  %v1598_v55 = vld [vmem:[#allocation2 + $0x50] sm:$0xff] }
0x13cd   :  { %1643 = vmatpush1.msra.mxu1 %v1598_v55 }
0x13d7   :  { %v5982_v56 = vpop.eup %5981 }
0x13d8   :  { %1351 = vrot.lane.b32.xlu1 %v5982_v56, %s6570_s3  ;;  %v7201_v56 = vld [vmem:[#allocation5 + $0x60] sm:$0xff] }
0x13d9   :  { %v5984_v57 = vpop.eup %5983 }
0x13da   :  { %1378 = vrot.lane.b32.xlu0 %v5984_v57, %s6570_s3  ;;  %v1597_v57 = vld [vmem:[#allocation2 + $0x48] sm:$0xff] }
0x13db   :  { %1644 = vmatprep.subr.mxu1 %v1597_v57 }
0x144a   :  { %v1352_v59 = vpop.permute.xlu1 %1351 }
0x144b   :  { %v1354_v61 = vmul.f32 %v5978_v31, %v1352_v59  ;;  %v7205_v59 = vld [vmem:[#allocation5 + $0x58] sm:$0xff] }
0x144c   :  { %v1379_v62 = vpop.permute.xlu0 %1378 }
0x144d   :  { %1383 = vrot.lane.b32.xlu0 %v1354_v61, %s6572_s2  ;;  %v7165_v26 = vmul.f32 %v5980_v34, %v1379_v62  ;;  %v1596_v61 = vld [vmem:[#allocation2 + $0x40] sm:$0xff]  ;;  %v7209_v62 = vld [vmem:[#allocation5 + $0x50] sm:$0xff] }
0x144e   :  { %1645 = vmatpush1.msra.mxu1 %v1596_v61 }
0x144f   :  { %v1387_v63 = vrot.slane %v7165_v26, 6 }
0x1451   :  { %1388 = vrot.lane.b32.xlu1 %v1387_v63, %s6571_s22  ;;  %v7214_v63 = vld [vmem:[#allocation5 + $0x48] sm:$0xff] }
0x14bf   :  { %v7169_v0 = vpop.permute.xlu0 %1383 }
0x14c3   :  { %v1389_v2 = vpop.permute.xlu1 %1388 }
0x14c4   :  { %v1391_v60 = vsel %vm297_vm3, %v7169_v0, %v1389_v2  ;;  %v7218_v2 = vld [vmem:[#allocation5 + $0x40] sm:$0xff] }
0x14c5   :  { %v1393_v58 = vrot.slane %v1391_v60, 4  ;;  %v1593_v60 = vld [vmem:[#allocation2 + $0x28] sm:$0xff] }
0x14c7   :  { %5699 = vmatmul.mubr.msk.f32.vlgmr.msra.gmra.mxu0 %vm179_vm0, %v1393_v58  ;;  %v7221_v58 = vld [vmem:[#allocation5 + $0x38] sm:$0xff] }
0x14c8   :  { %1763 = vmatprep.mubr.f32.mxu0 %v6569_v1  ;;  %1716 = vmatpush1.msra.mxu0 %v7193_v41 }
0x14c9   :  { %1717 = vmatprep.subr.mxu0 %v7197_v53 }
0x14ca   :  { %1718 = vmatpush1.msra.mxu0 %v7201_v56 }
0x14cb   :  { %1719 = vmatprep.subr.mxu0 %v7205_v59 }
0x14cc   :  { %1720 = vmatpush1.msra.mxu0 %v7209_v62 }
0x14cd   :  { %1721 = vmatprep.subr.mxu0 %v7214_v63 }
0x14ce   :  { %1722 = vmatpush1.msra.mxu0 %v7218_v2 }
0x14cf   :  { %1723 = vmatprep.subr.mxu0 %v7221_v58 }
0x1587   :  { %v1462_v3 = vpop.f32.mrf.mxu0 }
0x1588   :  { %v1468_v4 = vrot.slane %v1462_v3, 2  ;;  %v7224_v3 = vld [vmem:[#allocation5 + $0x30] sm:$0xff] }
0x1589   :  { %v1464_v5 = vpop.f32.mrf.mxu0  ;;  %1724 = vmatpush1.msra.mxu0 %v7224_v3 }
0x158a   :  { %v1470_v6 = vadd.f32 %v1468_v4, %v6918_v54  ;;  %v1471_v8 = vadd.f32 %v1464_v5, %v6916_v52  ;;  %v7231_v4 = vld [vmem:[#allocation5 + $0x28] sm:$0xff]  ;;  %v1590_v5 = vld [vmem:[#allocation2 + $0x10] sm:$0xff] }
0x158b   :  { %1725 = vmatprep.subr.mxu0 %v7231_v4 }
0x158c   :  { %5985 = vtanh.f32 %v1470_v6  ;;  %v5700_v15 = vmul.f32 -1.442695, %v1470_v6  ;;  %v5701_v19 = vmul.f32 -1.442695, %v1471_v8  ;;  %v7234_v6 = vld [vmem:[#allocation5 + $0x20] sm:$0xff] }
0x158d   :  { %5987 = vtanh.f32 %v1471_v8  ;;  %1726 = vmatpush1.msra.mxu0 %v7234_v6  ;;  %v7237_v8 = vld [vmem:[#allocation5 + $0x18] sm:$0xff] }
0x158e   :  { %5989 = vpow2.f32 %v5700_v15  ;;  %1727 = vmatprep.subr.mxu0 %v7237_v8  ;;  %v7243_v15 = vld [vmem:[#allocation5 + $0x8] sm:$0xff] }
0x158f   :  { %5991 = vpow2.f32 %v5701_v19  ;;  %v7246_v19 = vld [vmem:[#allocation5] sm:$0xff] }
0x1599   :  { %v5986_v10 = vpop.eup %5985 }
0x159a   :  { %v5988_v11 = vpop.eup %5987  ;;  %1484 = vrot.lane.b32.xlu1 %v5986_v10, %s6570_s3  ;;  %v1588_v10 = vld [vmem:[#allocation2] sm:$0xff] }
0x159b   :  { %1511 = vrot.lane.b32.xlu0 %v5988_v11, %s6570_s3  ;;  %v5990_v21 = vpop.eup %5989  ;;  %v7240_v11 = vld [vmem:[#allocation5 + $0x10] sm:$0xff] }
0x159c   :  { %v5992_v14 = vpop.eup %5991  ;;  %v1475_v20 = vadd.f32 1.0, %v5990_v21  ;;  %1728 = vmatpush1.msra.mxu0 %v7240_v11 }
0x159d   :  { %v1502_v12 = vadd.f32 1.0, %v5992_v14  ;;  %1729 = vmatprep.subr.mxu0 %v7243_v15 }
0x159e   :  { %5993 = vrcp.f32 %v1475_v20  ;;  %1730 = vmatpush1.msra.mxu0 %v7246_v19 }
0x159f   :  { %5995 = vrcp.f32 %v1502_v12  ;;  %1764 = vmatmul.mubr.f32.vlgmr.msra.gmra.mxu0 %v6569_v1  ;;  %1999 = vmatprep.subr.mxu0 %v7191_v39 }
0x15a0   :  { %2000 = vmatpush1.msra.mxu0 %v7193_v41  ;;  %2047 = vmatprep.mubr.f32.mxu0 %v6569_v1 }
0x15a1   :  { %2001 = vmatprep.subr.mxu0 %v7197_v53 }
0x15a2   :  { %2002 = vmatpush1.msra.mxu0 %v7201_v56 }
0x15a3   :  { %2003 = vmatprep.subr.mxu0 %v7205_v59 }
0x15a4   :  { %2004 = vmatpush1.msra.mxu0 %v7209_v62 }
0x15a5   :  { %2005 = vmatprep.subr.mxu0 %v7214_v63 }
0x15a6   :  { %2006 = vmatpush1.msra.mxu0 %v7218_v2 }
0x15a7   :  { %2007 = vmatprep.subr.mxu0 %v7221_v58 }
0x15a8   :  { %2008 = vmatpush1.msra.mxu0 %v7224_v3 }
0x15a9   :  { %2009 = vmatprep.subr.mxu0 %v7231_v4 }
0x15aa   :  { %2010 = vmatpush1.msra.mxu0 %v7234_v6 }
0x15ab   :  { %v7179_v54 = vpop.eup %5993  ;;  %2011 = vmatprep.subr.mxu0 %v7237_v8 }
0x15ac   :  { %v7181_v13 = vpop.eup %5995  ;;  %v1482_v28 = vmul.f32 %v7179_v54, %v1480_v50  ;;  %2012 = vmatpush1.msra.mxu0 %v7240_v11 }
0x15ad   :  { %v1509_v30 = vmul.f32 %v7181_v13, %v1507_v27  ;;  %2013 = vmatprep.subr.mxu0 %v7243_v15 }
0x15ae   :  { %2014 = vmatpush1.msra.mxu0 %v7246_v19 }
0x15af   :  { %2290 = vmatprep.subr.mxu0 %v7191_v39 }
0x160c   :  { %v1485_v52 = vpop.permute.xlu1 %1484 }
0x160d   :  { %v1487_v18 = vmul.f32 %v7179_v54, %v1485_v52  ;;  %v1512_v46 = vpop.permute.xlu0 %1511 }
0x160e   :  { %v1514_v49 = vmul.f32 %v7181_v13, %v1512_v46 }
0x160f   :  { %1489 = vrot.lane.b32.xlu1 %v1487_v18, %s6570_s3 }
0x1610   :  { %1516 = vrot.lane.b32.xlu0 %v1514_v49, %s6570_s3 }
0x165f   :  { %v1765_v38 = vpop.f32.mrf.mxu0 }
0x1681   :  { %v1490_v29 = vpop.permute.xlu1 %1489 }
0x1682   :  { %v1492_v31 = vadd.f32 %v1490_v29, %v1482_v28  ;;  %v1517_v32 = vpop.permute.xlu0 %1516 }
0x1683   :  { %v1519_v33 = vadd.f32 %v1517_v32, %v1509_v30 }
0x1684   :  { %5997 = vtanh.f32 %v1492_v31 }
0x1685   :  { %5999 = vtanh.f32 %v1519_v33 }
0x1691   :  { %v5998_v34 = vpop.eup %5997 }
0x1692   :  { %v6000_v35 = vpop.eup %5999  ;;  %1495 = vrot.lane.b32.xlu1 %v5998_v34, %s6570_s3 }
0x1693   :  { %1522 = vrot.lane.b32.xlu0 %v6000_v35, %s6570_s3 }
0x1696   :  { %1531 = vrot.lane.b32.xlu1 %v7165_v26, %s6571_s22  ;;  %v1595_v26 = vld [vmem:[#allocation2 + $0x38] sm:$0xff] }
0x1697   :  { %1535 = vrot.lane.b32.xlu0 %v7146_v7, %s6571_s22  ;;  %v1594_v7 = vld [vmem:[#allocation2 + $0x30] sm:$0xff]  ;;  %1646 = vmatprep.subr.mxu1 %v1595_v26  ;;  %v1767_v26 = vpop.f32.mrf.mxu0 }
0x1698   :  { %1647 = vmatpush1.msra.mxu1 %v1594_v7 }
0x1699   :  { %1648 = vmatprep.subr.mxu1 %v1593_v60 }
0x169a   :  { %1539 = vrot.lane.b32.xlu1 %v7110_v17, %s6571_s22  ;;  %v1592_v17 = vld [vmem:[#allocation2 + $0x20] sm:$0xff] }
0x169b   :  { %1543 = vrot.lane.b32.xlu0 %v7067_v16, %s6571_s22  ;;  %1649 = vmatpush1.msra.mxu1 %v1592_v17  ;;  %v1591_v16 = vld [vmem:[#allocation2 + $0x18] sm:$0xff]  ;;  %v1772_v17 = vrot.slane %v1767_v26, 2 }
0x169c   :  { %1650 = vmatprep.subr.mxu1 %v1591_v16 }
0x169d   :  { %1651 = vmatpush1.msra.mxu1 %v1590_v5 }
0x169e   :  { %1547 = vrot.lane.b32.xlu1 %v7025_v24, %s6571_s22  ;;  %v1589_v24 = vld [vmem:[#allocation2 + $0x8] sm:$0xff] }
0x169f   :  { %1652 = vmatprep.subr.mxu1 %v1589_v24 }
0x16a0   :  { %1653 = vmatpush1.msra.mxu1 %v1588_v10 }
0x16a1   :  { %1852 = vmatprep.subr.mxu1 %v7191_v39 }
0x1704   :  { %v1496_v21 = vpop.permute.xlu1 %1495 }
0x1705   :  { %v1498_v14 = vmul.f32 %v7179_v54, %v1496_v21  ;;  %v1523_v20 = vpop.permute.xlu0 %1522 }
0x1706   :  { %v1525_v12 = vmul.f32 %v7181_v13, %v1523_v20 }
0x1707   :  { %1556 = vrot.lane.b32.xlu1 %v1498_v14, %s6572_s2 }
0x1708   :  { %1527 = vrot.lane.b32.xlu0 %v1525_v12, %s6571_s22  ;;  %v1532_v54 = vpop.permute.xlu1 %1531 }
0x1709   :  { %v1536_v52 = vpop.permute.xlu0 %1535  ;;  %v1534_v46 = vsel %vm297_vm3, %v6986_v25, %v1532_v54 }
0x170c   :  { %1551 = vrot.lane.b32.xlu0 %v6982_v22, %s6571_s22  ;;  %v1540_v13 = vpop.permute.xlu1 %1539 }
0x170d   :  { %v1544_v18 = vpop.permute.xlu0 %1543  ;;  %v1542_v28 = vsel %vm297_vm3, %v7072_v42, %v1540_v13 }
0x1710   :  { %1559 = vrot.lane.b32.xlu0 %v6938_v23, %s6571_s22  ;;  %v1538_v23 = vsel %vm297_vm3, %v7029_v43, %v1536_v52  ;;  %v1548_v50 = vpop.permute.xlu1 %1547  ;;  %v1546_v43 = vsel %vm297_vm3, %v7114_v48, %v1544_v18  ;;  %v1604_v48 = vld [vmem:[%s8418_s6] sm:$0x3] }
0x1711   :  { %v1550_v25 = vsel %vm297_vm3, %v7150_v9, %v1548_v50  ;;  %v1609_v35 = vrot.slane %v1604_v48, %v6912_v47  ;;  %v1613_v36 = vrot.slane %v1604_v48, %v6907_v45 }
0x1712   :  { %v1569_v42 = vsel %vm1563_vm5, %v1546_v43, %v1550_v25 }
0x1779   :  { %v1557_v32 = vpop.permute.xlu1 %1556 }
0x177a   :  { %v1528_v22 = vpop.permute.xlu0 %1527 }
0x177b   :  { %v1530_v49 = vsel %vm297_vm3, %v6943_v44, %v1528_v22 }
0x177c   :  { %v1564_v27 = vsel %vm1563_vm5, %v1530_v49, %v1534_v46 }
0x177d   :  { %v1566_v29 = vsel %vm1565_vm4, %v1564_v27, %v1538_v23 }
0x177e   :  { %v1552_v30 = vpop.permute.xlu0 %1551  ;;  %v1568_v31 = vsel %vm1567_vm6, %v1566_v29, %v1542_v28 }
0x177f   :  { %5702 = vmatmul.mubr.msk.f32.vlgmr.msra.gmra.mxu1 %vm179_vm0, %v1568_v31  ;;  %v1554_v44 = vsel %vm297_vm3, %v7169_v0, %v1552_v30 }
0x1780   :  { %1692 = vmatprep.mubr.f32.mxu1 %v6569_v1  ;;  %1853 = vmatpush1.msra.mxu1 %v7193_v41  ;;  %v1570_v9 = vsel %vm1565_vm4, %v1569_v42, %v1554_v44 }
0x1781   :  { %1854 = vmatprep.subr.mxu1 %v7197_v53 }
0x1782   :  { %v1560_v33 = vpop.permute.xlu0 %1559  ;;  %1855 = vmatpush1.msra.mxu1 %v7201_v56 }
0x1783   :  { %v1562_v34 = vsel %vm297_vm3, %v1557_v32, %v1560_v33  ;;  %1856 = vmatprep.subr.mxu1 %v7205_v59 }
0x1784   :  { %v1571_v0 = vsel %vm1567_vm6, %v1570_v9, %v1562_v34  ;;  %1857 = vmatpush1.msra.mxu1 %v7209_v62 }
0x1785   :  { %5703 = vmatmul.mubr.msk.f32.gmra.mxu1 %vm179_vm0, %v1571_v0  ;;  %1858 = vmatprep.subr.mxu1 %v7214_v63 }
0x1786   :  { %1859 = vmatpush1.msra.mxu1 %v7218_v2  ;;  %1900 = vmatprep.mubr.f32.mxu1 %v6569_v1 }
0x1787   :  { %1860 = vmatprep.subr.mxu1 %v7221_v58 }
0x1788   :  { %1861 = vmatpush1.msra.mxu1 %v7224_v3 }
0x1789   :  { %1862 = vmatprep.subr.mxu1 %v7231_v4 }
0x178a   :  { %1863 = vmatpush1.msra.mxu1 %v7234_v6 }
0x178b   :  { %1864 = vmatprep.subr.mxu1 %v7237_v8 }
0x178c   :  { %1865 = vmatpush1.msra.mxu1 %v7240_v11 }
0x178d   :  { %1866 = vmatprep.subr.mxu1 %v7243_v15 }
0x178e   :  { %1867 = vmatpush1.msra.mxu1 %v7246_v19 }
0x178f   :  { %2146 = vmatprep.subr.mxu1 %v7191_v39 }
0x183f   :  { %v1688_v37 = vpop.f32.mrf.mxu1 }
0x1840   :  { %v7323_v40 = vadd.f32 %v1688_v37, %v1609_v35 }
0x1841   :  { %v1690_v51 = vpop.f32.mrf.mxu1 }
0x1842   :  { %v7325_v55 = vadd.f32 %v1690_v51, %v1613_v36  ;;  %v1770_v57 = vadd.f32 %v1765_v38, %v7323_v40 }
0x1844   :  { %6001 = vtanh.f32 %v1770_v57  ;;  %v5704_v21 = vmul.f32 -1.442695, %v1770_v57 }
0x1845   :  { %v1694_v61 = vpop.f32.mrf.mxu1 }
0x1846   :  { %v7328_v7 = vadd.f32 %v1694_v61, %v1609_v35 }
0x1847   :  { %v1696_v60 = vpop.f32.mrf.mxu1 }
0x1848   :  { %v7330_v16 = vadd.f32 %v1696_v60, %v1613_v36 }
0x184a   :  { %v1774_v5 = vadd.f32 %v1772_v17, %v7330_v16 }
0x184c   :  { %6003 = vtanh.f32 %v1774_v5  ;;  %v5705_v14 = vmul.f32 -1.442695, %v1774_v5 }
0x184d   :  { %6005 = vpow2.f32 %v5704_v21 }
0x184e   :  { %6007 = vpow2.f32 %v5705_v14 }
0x1851   :  { %v6002_v24 = vpop.eup %6001 }
0x1852   :  { %1784 = vrot.lane.b32.xlu0 %v6002_v24, %s6570_s3 }
0x1859   :  { %v6004_v10 = vpop.eup %6003 }
0x185a   :  { %1808 = vrot.lane.b32.xlu1 %v6004_v10, %s6570_s3  ;;  %v6006_v20 = vpop.eup %6005 }
0x185b   :  { %v1778_v12 = vadd.f32 1.0, %v6006_v20  ;;  %v6008_v54 = vpop.eup %6007 }
0x185c   :  { %v1802_v52 = vadd.f32 1.0, %v6008_v54 }
0x185d   :  { %6009 = vrcp.f32 %v1778_v12 }
0x185e   :  { %6011 = vrcp.f32 %v1802_v52 }
0x186a   :  { %v6010_v13 = vpop.eup %6009 }
0x186b   :  { %v6012_v46 = vpop.eup %6011  ;;  %v1782_v50 = vmul.f32 0.0, %v6010_v13 }
0x186c   :  { %v1806_v29 = vmul.f32 0.0, %v6012_v46 }
0x18c4   :  { %v1785_v18 = vpop.permute.xlu0 %1784 }
0x18c5   :  { %v1787_v22 = vmul.f32 %v6010_v13, %v1785_v18 }
0x18c7   :  { %1789 = vrot.lane.b32.xlu0 %v1787_v22, %s6570_s3 }
0x18cc   :  { %v1809_v49 = vpop.permute.xlu1 %1808 }
0x18cd   :  { %v1811_v23 = vmul.f32 %v6012_v46, %v1809_v49 }
0x18cf   :  { %1813 = vrot.lane.b32.xlu1 %v1811_v23, %s6570_s3 }
0x1939   :  { %v1790_v27 = vpop.permute.xlu0 %1789 }
0x193a   :  { %v7337_v28 = vadd.f32 %v1790_v27, %v1782_v50 }
0x193c   :  { %6013 = vtanh.f32 %v7337_v28  ;;  %v1923_v18 = vrot.slane %v7337_v28, 6 }
0x1941   :  { %v1814_v30 = vpop.permute.xlu1 %1813 }
0x1942   :  { %v7340_v31 = vadd.f32 %v1814_v30, %v1806_v29 }
0x1944   :  { %6015 = vtanh.f32 %v7340_v31 }
0x1949   :  { %v6014_v25 = vpop.eup %6013 }
0x194a   :  { %1795 = vrot.lane.b32.xlu0 %v6014_v25, %s6570_s3 }
0x1951   :  { %v6016_v44 = vpop.eup %6015 }
0x1952   :  { %1819 = vrot.lane.b32.xlu1 %v6016_v44, %s6570_s3 }
0x19bc   :  { %v1796_v43 = vpop.permute.xlu0 %1795 }
0x19bd   :  { %v1798_v42 = vmul.f32 %v6010_v13, %v1796_v43 }
0x19bf   :  { %1824 = vrot.lane.b32.xlu1 %v1798_v42, %s6572_s2 }
0x19c4   :  { %v1820_v32 = vpop.permute.xlu1 %1819 }
0x19c5   :  { %v7346_v33 = vmul.f32 %v6012_v46, %v1820_v32  ;;  %v1950_v46 = vrot.slane %v7340_v31, 2 }
0x19c7   :  { %v1828_v9 = vrot.slane %v7346_v33, 6 }
0x19c9   :  { %1829 = vrot.lane.b32.xlu0 %v1828_v9, %s6571_s22 }
0x1a31   :  { %v7350_v34 = vpop.permute.xlu1 %1824 }
0x1a3b   :  { %v1830_v0 = vpop.permute.xlu0 %1829 }
0x1a3c   :  { %v1832_v48 = vsel %vm297_vm3, %v7350_v34, %v1830_v0 }
0x1a3d   :  { %5706 = vmatmul.mubr.msk.f32.vlgmr.msra.gmra.mxu1 %vm179_vm0, %v1832_v48 }
0x1a3e   :  { %2147 = vmatpush1.msra.mxu1 %v7193_v41  ;;  %2194 = vmatprep.mubr.f32.mxu1 %v6569_v1 }
0x1a3f   :  { %2148 = vmatprep.subr.mxu1 %v7197_v53 }
0x1a40   :  { %2149 = vmatpush1.msra.mxu1 %v7201_v56 }
0x1a41   :  { %2150 = vmatprep.subr.mxu1 %v7205_v59 }
0x1a42   :  { %2151 = vmatpush1.msra.mxu1 %v7209_v62 }
0x1a43   :  { %2152 = vmatprep.subr.mxu1 %v7214_v63 }
0x1a44   :  { %2153 = vmatpush1.msra.mxu1 %v7218_v2 }
0x1a45   :  { %2154 = vmatprep.subr.mxu1 %v7221_v58 }
0x1a46   :  { %2155 = vmatpush1.msra.mxu1 %v7224_v3 }
0x1a47   :  { %2156 = vmatprep.subr.mxu1 %v7231_v4 }
0x1a48   :  { %2157 = vmatpush1.msra.mxu1 %v7234_v6 }
0x1a49   :  { %2158 = vmatprep.subr.mxu1 %v7237_v8 }
0x1a4a   :  { %2159 = vmatpush1.msra.mxu1 %v7240_v11 }
0x1a4b   :  { %2160 = vmatprep.subr.mxu1 %v7243_v15 }
0x1a4c   :  { %2161 = vmatpush1.msra.mxu1 %v7246_v19 }
0x1a4d   :  { %2433 = vmatprep.subr.mxu1 %v7191_v39 }
0x1afd   :  { %v1902_v35 = vpop.f32.mrf.mxu1 }
0x1afe   :  { %v1908_v36 = vrot.slane %v1902_v35, 6 }
0x1aff   :  { %v1904_v37 = vpop.f32.mrf.mxu1 }
0x1b00   :  { %v1910_v38 = vadd.f32 %v1908_v36, %v7323_v40  ;;  %v1912_v51 = vrot.slane %v1904_v37, 4 }
0x1b02   :  { %6017 = vtanh.f32 %v1910_v38  ;;  %v1914_v57 = vadd.f32 %v1912_v51, %v7330_v16  ;;  %v5707_v60 = vmul.f32 -1.442695, %v1910_v38 }
0x1b04   :  { %6019 = vtanh.f32 %v1914_v57  ;;  %v5708_v17 = vmul.f32 -1.442695, %v1914_v57 }
0x1b05   :  { %6021 = vpow2.f32 %v5707_v60 }
0x1b06   :  { %6023 = vpow2.f32 %v5708_v17 }
0x1b0f   :  { %v6018_v61 = vpop.eup %6017 }
0x1b10   :  { %1927 = vrot.lane.b32.xlu0 %v6018_v61, %s6570_s3 }
0x1b11   :  { %v6020_v26 = vpop.eup %6019 }
0x1b12   :  { %1954 = vrot.lane.b32.xlu1 %v6020_v26, %s6570_s3  ;;  %v6022_v5 = vpop.eup %6021 }
0x1b13   :  { %v6024_v24 = vpop.eup %6023  ;;  %v1918_v10 = vadd.f32 1.0, %v6022_v5 }
0x1b14   :  { %v1945_v21 = vadd.f32 1.0, %v6024_v24 }
0x1b15   :  { %6025 = vrcp.f32 %v1918_v10 }
0x1b16   :  { %6027 = vrcp.f32 %v1945_v21 }
0x1b22   :  { %v6026_v14 = vpop.eup %6025 }
0x1b23   :  { %v6028_v54 = vpop.eup %6027  ;;  %v1925_v22 = vmul.f32 %v6026_v14, %v1923_v18 }
0x1b24   :  { %v1952_v50 = vmul.f32 %v6028_v54, %v1950_v46 }
0x1b82   :  { %v1928_v20 = vpop.permute.xlu0 %1927 }
0x1b83   :  { %v1930_v12 = vmul.f32 %v6026_v14, %v1928_v20 }
0x1b84   :  { %v1955_v52 = vpop.permute.xlu1 %1954 }
0x1b85   :  { %1932 = vrot.lane.b32.xlu0 %v1930_v12, %s6570_s3  ;;  %v1957_v13 = vmul.f32 %v6028_v54, %v1955_v52 }
0x1b87   :  { %1959 = vrot.lane.b32.xlu1 %v1957_v13, %s6570_s3 }
0x1bf7   :  { %v1933_v49 = vpop.permute.xlu0 %1932 }
0x1bf8   :  { %v7380_v23 = vadd.f32 %v1933_v49, %v1925_v22 }
0x1bf9   :  { %v1960_v27 = vpop.permute.xlu1 %1959 }
0x1bfa   :  { %6029 = vtanh.f32 %v7380_v23  ;;  %v7383_v29 = vadd.f32 %v1960_v27, %v1952_v50  ;;  %v2070_v18 = vrot.slane %v7380_v23, 6 }
0x1bfc   :  { %6031 = vtanh.f32 %v7383_v29  ;;  %v2097_v46 = vrot.slane %v7383_v29, 2 }
0x1c07   :  { %v6030_v30 = vpop.eup %6029 }
0x1c08   :  { %1938 = vrot.lane.b32.xlu0 %v6030_v30, %s6570_s3 }
0x1c09   :  { %v6032_v25 = vpop.eup %6031 }
0x1c0a   :  { %1965 = vrot.lane.b32.xlu1 %v6032_v25, %s6570_s3 }
0x1c7a   :  { %v1939_v28 = vpop.permute.xlu0 %1938 }
0x1c7b   :  { %v1941_v44 = vmul.f32 %v6026_v14, %v1939_v28 }
0x1c7c   :  { %v1966_v31 = vpop.permute.xlu1 %1965 }
0x1c7d   :  { %1970 = vrot.lane.b32.xlu1 %v1941_v44, %s6572_s2  ;;  %v7389_v43 = vmul.f32 %v6028_v54, %v1966_v31 }
0x1c7f   :  { %v1974_v42 = vrot.slane %v7389_v43, 2 }
0x1c81   :  { %1975 = vrot.lane.b32.xlu0 %v1974_v42, %s6571_s22 }
0x1cef   :  { %v7393_v32 = vpop.permute.xlu1 %1970 }
0x1cf3   :  { %v1976_v9 = vpop.permute.xlu0 %1975 }
0x1cf4   :  { %v1978_v0 = vsel %vm297_vm3, %v7393_v32, %v1976_v9 }
0x1cf5   :  { %v1980_v48 = vrot.slane %v1978_v0, 2 }
0x1cf7   :  { %5709 = vmatmul.mubr.msk.f32.vlgmr.msra.gmra.mxu0 %vm179_vm0, %v1980_v48 }
0x1cf8   :  { %2291 = vmatpush1.msra.mxu0 %v7193_v41  ;;  %2338 = vmatprep.mubr.f32.mxu0 %v6569_v1 }
0x1cf9   :  { %2292 = vmatprep.subr.mxu0 %v7197_v53 }
0x1cfa   :  { %2293 = vmatpush1.msra.mxu0 %v7201_v56 }
0x1cfb   :  { %2294 = vmatprep.subr.mxu0 %v7205_v59 }
0x1cfc   :  { %2295 = vmatpush1.msra.mxu0 %v7209_v62 }
0x1cfd   :  { %2296 = vmatprep.subr.mxu0 %v7214_v63 }
0x1cfe   :  { %2297 = vmatpush1.msra.mxu0 %v7218_v2 }
0x1cff   :  { %2298 = vmatprep.subr.mxu0 %v7221_v58 }
0x1d00   :  { %2299 = vmatpush1.msra.mxu0 %v7224_v3 }
0x1d01   :  { %2300 = vmatprep.subr.mxu0 %v7231_v4 }
0x1d02   :  { %2301 = vmatpush1.msra.mxu0 %v7234_v6 }
0x1d03   :  { %2302 = vmatprep.subr.mxu0 %v7237_v8 }
0x1d04   :  { %2303 = vmatpush1.msra.mxu0 %v7240_v11 }
0x1d05   :  { %2304 = vmatprep.subr.mxu0 %v7243_v15 }
0x1d06   :  { %2305 = vmatpush1.msra.mxu0 %v7246_v19 }
0x1d07   :  { %2580 = vmatprep.subr.mxu0 %v7191_v39 }
0x1db7   :  { %v2049_v35 = vpop.f32.mrf.mxu0 }
0x1db8   :  { %v2055_v36 = vrot.slane %v2049_v35, 4 }
0x1db9   :  { %v2051_v37 = vpop.f32.mrf.mxu0 }
0x1dba   :  { %v2057_v38 = vadd.f32 %v2055_v36, %v7323_v40  ;;  %v2059_v51 = vrot.slane %v2051_v37, 6 }
0x1dbc   :  { %6033 = vtanh.f32 %v2057_v38  ;;  %v2061_v57 = vadd.f32 %v2059_v51, %v7330_v16  ;;  %v5710_v60 = vmul.f32 -1.442695, %v2057_v38 }
0x1dbe   :  { %6035 = vtanh.f32 %v2061_v57  ;;  %v5711_v17 = vmul.f32 -1.442695, %v2061_v57 }
0x1dbf   :  { %6037 = vpow2.f32 %v5710_v60 }
0x1dc0   :  { %6039 = vpow2.f32 %v5711_v17 }
0x1dc9   :  { %v6034_v61 = vpop.eup %6033 }
0x1dca   :  { %2074 = vrot.lane.b32.xlu0 %v6034_v61, %s6570_s3 }
0x1dcb   :  { %v6036_v26 = vpop.eup %6035 }
0x1dcc   :  { %2101 = vrot.lane.b32.xlu1 %v6036_v26, %s6570_s3  ;;  %v6038_v5 = vpop.eup %6037 }
0x1dcd   :  { %v6040_v24 = vpop.eup %6039  ;;  %v2065_v10 = vadd.f32 1.0, %v6038_v5 }
0x1dce   :  { %v2092_v21 = vadd.f32 1.0, %v6040_v24 }
0x1dcf   :  { %6041 = vrcp.f32 %v2065_v10 }
0x1dd0   :  { %6043 = vrcp.f32 %v2092_v21 }
0x1ddc   :  { %v6042_v14 = vpop.eup %6041 }
0x1ddd   :  { %v6044_v54 = vpop.eup %6043  ;;  %v2072_v22 = vmul.f32 %v6042_v14, %v2070_v18 }
0x1dde   :  { %v2099_v27 = vmul.f32 %v6044_v54, %v2097_v46 }
0x1e3c   :  { %v2075_v20 = vpop.permute.xlu0 %2074 }
0x1e3d   :  { %v2077_v12 = vmul.f32 %v6042_v14, %v2075_v20 }
0x1e3e   :  { %v2102_v52 = vpop.permute.xlu1 %2101 }
0x1e3f   :  { %2079 = vrot.lane.b32.xlu0 %v2077_v12, %s6570_s3  ;;  %v2104_v13 = vmul.f32 %v6044_v54, %v2102_v52 }
0x1e41   :  { %2106 = vrot.lane.b32.xlu1 %v2104_v13, %s6570_s3 }
0x1eb1   :  { %v2080_v49 = vpop.permute.xlu0 %2079 }
0x1eb2   :  { %v7423_v50 = vadd.f32 %v2080_v49, %v2072_v22 }
0x1eb3   :  { %v2107_v30 = vpop.permute.xlu1 %2106 }
0x1eb4   :  { %6045 = vtanh.f32 %v7423_v50  ;;  %v7426_v25 = vadd.f32 %v2107_v30, %v2099_v27  ;;  %v2214_v52 = vrot.slane %v7423_v50, 6 }
0x1eb6   :  { %6047 = vtanh.f32 %v7426_v25  ;;  %v2241_v13 = vrot.slane %v7426_v25, 2 }
0x1ec1   :  { %v6046_v28 = vpop.eup %6045 }
0x1ec2   :  { %2085 = vrot.lane.b32.xlu0 %v6046_v28, %s6570_s3 }
0x1ec3   :  { %v6048_v44 = vpop.eup %6047 }
0x1ec4   :  { %2112 = vrot.lane.b32.xlu1 %v6048_v44, %s6570_s3 }
0x1f34   :  { %v2086_v23 = vpop.permute.xlu0 %2085 }
0x1f35   :  { %v2088_v31 = vmul.f32 %v6042_v14, %v2086_v23 }
0x1f36   :  { %v2113_v29 = vpop.permute.xlu1 %2112 }
0x1f37   :  { %2117 = vrot.lane.b32.xlu1 %v2088_v31, %s6572_s2  ;;  %v7432_v42 = vmul.f32 %v6044_v54, %v2113_v29 }
0x1f39   :  { %v2121_v9 = vrot.slane %v7432_v42, 6 }
0x1f3b   :  { %2122 = vrot.lane.b32.xlu0 %v2121_v9, %s6571_s22 }
0x1fa9   :  { %v7436_v0 = vpop.permute.xlu1 %2117 }
0x1fad   :  { %v2123_v48 = vpop.permute.xlu0 %2122 }
0x1fae   :  { %v2125_v35 = vsel %vm297_vm3, %v7436_v0, %v2123_v48 }
0x1faf   :  { %v2127_v36 = vrot.slane %v2125_v35, 4 }
0x1fb1   :  { %5712 = vmatmul.mubr.msk.f32.vlgmr.msra.gmra.mxu1 %vm179_vm0, %v2127_v36 }
0x1fb2   :  { %2434 = vmatpush1.msra.mxu1 %v7193_v41  ;;  %2481 = vmatprep.mubr.f32.mxu1 %v6569_v1 }
0x1fb3   :  { %2435 = vmatprep.subr.mxu1 %v7197_v53 }
0x1fb4   :  { %2436 = vmatpush1.msra.mxu1 %v7201_v56 }
0x1fb5   :  { %2437 = vmatprep.subr.mxu1 %v7205_v59 }
0x1fb6   :  { %2438 = vmatpush1.msra.mxu1 %v7209_v62 }
0x1fb7   :  { %2439 = vmatprep.subr.mxu1 %v7214_v63 }
0x1fb8   :  { %2440 = vmatpush1.msra.mxu1 %v7218_v2 }
0x1fb9   :  { %2441 = vmatprep.subr.mxu1 %v7221_v58 }
0x1fba   :  { %2442 = vmatpush1.msra.mxu1 %v7224_v3 }
0x1fbb   :  { %2443 = vmatprep.subr.mxu1 %v7231_v4 }
0x1fbc   :  { %2444 = vmatpush1.msra.mxu1 %v7234_v6 }
0x1fbd   :  { %2445 = vmatprep.subr.mxu1 %v7237_v8 }
0x1fbe   :  { %2446 = vmatpush1.msra.mxu1 %v7240_v11 }
0x1fbf   :  { %2447 = vmatprep.subr.mxu1 %v7243_v15 }
0x1fc0   :  { %2448 = vmatpush1.msra.mxu1 %v7246_v19 }
0x1fc1   :  { %2727 = vmatprep.subr.mxu1 %v7191_v39 }
0x2071   :  { %v2196_v37 = vpop.f32.mrf.mxu1 }
0x2072   :  { %v2202_v38 = vrot.slane %v2196_v37, 2 }
0x2073   :  { %v2198_v51 = vpop.f32.mrf.mxu1 }
0x2074   :  { %v2204_v57 = vadd.f32 %v2202_v38, %v7323_v40  ;;  %v2205_v61 = vadd.f32 %v2198_v51, %v7330_v16 }
0x2076   :  { %6049 = vtanh.f32 %v2204_v57  ;;  %v5713_v17 = vmul.f32 -1.442695, %v2204_v57  ;;  %v5714_v5 = vmul.f32 -1.442695, %v2205_v61 }
0x2077   :  { %6051 = vtanh.f32 %v2205_v61 }
0x2078   :  { %6053 = vpow2.f32 %v5713_v17 }
0x2079   :  { %6055 = vpow2.f32 %v5714_v5 }
0x2083   :  { %v6050_v26 = vpop.eup %6049 }
0x2084   :  { %v6052_v60 = vpop.eup %6051  ;;  %2218 = vrot.lane.b32.xlu0 %v6050_v26, %s6570_s3 }
0x2085   :  { %2245 = vrot.lane.b32.xlu1 %v6052_v60, %s6570_s3  ;;  %v6054_v39 = vpop.eup %6053 }
0x2086   :  { %v6056_v24 = vpop.eup %6055  ;;  %v2209_v10 = vadd.f32 1.0, %v6054_v39 }
0x2087   :  { %v2236_v21 = vadd.f32 1.0, %v6056_v24 }
0x2088   :  { %6057 = vrcp.f32 %v2209_v10 }
0x2089   :  { %6059 = vrcp.f32 %v2236_v21 }
0x2095   :  { %v6058_v40 = vpop.eup %6057 }
0x2096   :  { %v6060_v14 = vpop.eup %6059  ;;  %v2216_v18 = vmul.f32 %v6058_v40, %v2214_v52 }
0x2097   :  { %v2243_v46 = vmul.f32 %v6060_v14, %v2241_v13 }
0x20f6   :  { %v2219_v16 = vpop.permute.xlu0 %2218 }
0x20f7   :  { %v2221_v20 = vmul.f32 %v6058_v40, %v2219_v16  ;;  %v2246_v12 = vpop.permute.xlu1 %2245 }
0x20f8   :  { %v2248_v54 = vmul.f32 %v6060_v14, %v2246_v12 }
0x20f9   :  { %2223 = vrot.lane.b32.xlu0 %v2221_v20, %s6570_s3 }
0x20fa   :  { %2250 = vrot.lane.b32.xlu1 %v2248_v54, %s6570_s3 }
0x216b   :  { %v2224_v22 = vpop.permute.xlu0 %2223 }
0x216c   :  { %v7466_v49 = vadd.f32 %v2224_v22, %v2216_v18  ;;  %v2251_v27 = vpop.permute.xlu1 %2250 }
0x216d   :  { %v7468_v30 = vadd.f32 %v2251_v27, %v2243_v46 }
0x216e   :  { %6061 = vtanh.f32 %v7466_v49  ;;  %v2358_v52 = vrot.slane %v7466_v49, 6 }
0x216f   :  { %6063 = vtanh.f32 %v7468_v30  ;;  %v2385_v22 = vrot.slane %v7468_v30, 2 }
0x217b   :  { %v6062_v28 = vpop.eup %6061 }
0x217c   :  { %v6064_v44 = vpop.eup %6063  ;;  %2229 = vrot.lane.b32.xlu0 %v6062_v28, %s6570_s3 }
0x217d   :  { %2256 = vrot.lane.b32.xlu1 %v6064_v44, %s6570_s3 }
0x21ee   :  { %v2230_v50 = vpop.permute.xlu0 %2229 }
0x21ef   :  { %v2232_v25 = vmul.f32 %v6058_v40, %v2230_v50  ;;  %v2257_v23 = vpop.permute.xlu1 %2256 }
0x21f0   :  { %v7474_v31 = vmul.f32 %v6060_v14, %v2257_v23 }
0x21f1   :  { %2261 = vrot.lane.b32.xlu1 %v2232_v25, %s6572_s2 }
0x21f2   :  { %v2265_v29 = vrot.slane %v7474_v31, 2 }
0x21f4   :  { %2266 = vrot.lane.b32.xlu0 %v2265_v29, %s6571_s22 }
0x2263   :  { %v7479_v9 = vpop.permute.xlu1 %2261 }
0x2266   :  { %v2267_v48 = vpop.permute.xlu0 %2266 }
0x2267   :  { %v2269_v35 = vsel %vm297_vm3, %v7479_v9, %v2267_v48 }
0x2268   :  { %v2271_v36 = vrot.slane %v2269_v35, 6 }
0x226a   :  { %5715 = vmatmul.mubr.msk.f32.vlgmr.msra.gmra.mxu0 %vm179_vm0, %v2271_v36 }
0x226b   :  { %2581 = vmatpush1.msra.mxu0 %v7193_v41  ;;  %2628 = vmatprep.mubr.f32.mxu0 %v6569_v1 }
0x226c   :  { %2582 = vmatprep.subr.mxu0 %v7197_v53 }
0x226d   :  { %2583 = vmatpush1.msra.mxu0 %v7201_v56 }
0x226e   :  { %2584 = vmatprep.subr.mxu0 %v7205_v59 }
0x226f   :  { %2585 = vmatpush1.msra.mxu0 %v7209_v62 }
0x2270   :  { %2586 = vmatprep.subr.mxu0 %v7214_v63 }
0x2271   :  { %2587 = vmatpush1.msra.mxu0 %v7218_v2 }
0x2272   :  { %2588 = vmatprep.subr.mxu0 %v7221_v58 }
0x2273   :  { %2589 = vmatpush1.msra.mxu0 %v7224_v3 }
0x2274   :  { %2590 = vmatprep.subr.mxu0 %v7231_v4 }
0x2275   :  { %2591 = vmatpush1.msra.mxu0 %v7234_v6 }
0x2276   :  { %2592 = vmatprep.subr.mxu0 %v7237_v8 }
0x2277   :  { %2593 = vmatpush1.msra.mxu0 %v7240_v11 }
0x2278   :  { %2594 = vmatprep.subr.mxu0 %v7243_v15 }
0x2279   :  { %2595 = vmatpush1.msra.mxu0 %v7246_v19 }
0x232a   :  { %v2340_v37 = vpop.f32.mrf.mxu0 }
0x232b   :  { %v2345_v38 = vadd.f32 %v2340_v37, %v7328_v7 }
0x232c   :  { %v2342_v51 = vpop.f32.mrf.mxu0 }
0x232d   :  { %6065 = vtanh.f32 %v2345_v38  ;;  %v2347_v57 = vrot.slane %v2342_v51, 2  ;;  %v5716_v17 = vmul.f32 -1.442695, %v2345_v38 }
0x232f   :  { %v2349_v61 = vadd.f32 %v2347_v57, %v7325_v55 }
0x2331   :  { %6067 = vtanh.f32 %v2349_v61  ;;  %v5717_v5 = vmul.f32 -1.442695, %v2349_v61 }
0x2332   :  { %6069 = vpow2.f32 %v5716_v17 }
0x2333   :  { %6071 = vpow2.f32 %v5717_v5 }
0x233a   :  { %v6066_v26 = vpop.eup %6065 }
0x233b   :  { %2362 = vrot.lane.b32.xlu0 %v6066_v26, %s6570_s3 }
0x233e   :  { %v6068_v60 = vpop.eup %6067 }
0x233f   :  { %2389 = vrot.lane.b32.xlu1 %v6068_v60, %s6570_s3  ;;  %v6070_v39 = vpop.eup %6069 }
0x2340   :  { %v2353_v24 = vadd.f32 1.0, %v6070_v39  ;;  %v6072_v10 = vpop.eup %6071 }
0x2341   :  { %v2380_v21 = vadd.f32 1.0, %v6072_v10 }
0x2342   :  { %6073 = vrcp.f32 %v2353_v24 }
0x2343   :  { %6075 = vrcp.f32 %v2380_v21 }
0x234f   :  { %v6074_v40 = vpop.eup %6073 }
0x2350   :  { %v6076_v20 = vpop.eup %6075  ;;  %v2360_v13 = vmul.f32 %v6074_v40, %v2358_v52 }
0x2351   :  { %v2387_v27 = vmul.f32 %v6076_v20, %v2385_v22 }
0x23ad   :  { %v2363_v16 = vpop.permute.xlu0 %2362 }
0x23ae   :  { %v2365_v14 = vmul.f32 %v6074_v40, %v2363_v16 }
0x23b0   :  { %2367 = vrot.lane.b32.xlu0 %v2365_v14, %s6570_s3 }
0x23b1   :  { %v2390_v12 = vpop.permute.xlu1 %2389 }
0x23b2   :  { %v2392_v54 = vmul.f32 %v6076_v20, %v2390_v12 }
0x23b4   :  { %2394 = vrot.lane.b32.xlu1 %v2392_v54, %s6570_s3 }
0x2422   :  { %v2368_v18 = vpop.permute.xlu0 %2367 }
0x2423   :  { %v7508_v46 = vadd.f32 %v2368_v18, %v2360_v13 }
0x2425   :  { %6077 = vtanh.f32 %v7508_v46  ;;  %v2504_v60 = vrot.slane %v7508_v46, 6 }
0x2426   :  { %v2395_v28 = vpop.permute.xlu1 %2394 }
0x2427   :  { %v7511_v44 = vadd.f32 %v2395_v28, %v2387_v27 }
0x2429   :  { %6079 = vtanh.f32 %v7511_v44  ;;  %v2531_v5 = vrot.slane %v7511_v44, 2 }
0x2432   :  { %v6078_v50 = vpop.eup %6077 }
0x2433   :  { %2373 = vrot.lane.b32.xlu0 %v6078_v50, %s6570_s3 }
0x2436   :  { %v6080_v25 = vpop.eup %6079 }
0x2437   :  { %2400 = vrot.lane.b32.xlu1 %v6080_v25, %s6570_s3 }
0x24a5   :  { %v2374_v49 = vpop.permute.xlu0 %2373 }
0x24a6   :  { %v2376_v23 = vmul.f32 %v6074_v40, %v2374_v49 }
0x24a8   :  { %2405 = vrot.lane.b32.xlu1 %v2376_v23, %s6572_s2 }
0x24a9   :  { %v2401_v30 = vpop.permute.xlu1 %2400 }
0x24aa   :  { %v7517_v29 = vmul.f32 %v6076_v20, %v2401_v30 }
0x24ac   :  { %v2409_v48 = vrot.slane %v7517_v29, 6 }
0x24ae   :  { %2410 = vrot.lane.b32.xlu0 %v2409_v48, %s6571_s22 }
0x251a   :  { %v7521_v35 = vpop.permute.xlu1 %2405 }
0x2520   :  { %v2411_v36 = vpop.permute.xlu0 %2410 }
0x2521   :  { %v2413_v37 = vsel %vm297_vm3, %v7521_v35, %v2411_v36 }
0x2522   :  { %5718 = vmatmul.mubr.msk.f32.vlgmr.msra.gmra.mxu1 %vm179_vm0, %v2413_v37 }
0x2523   :  { %2728 = vmatpush1.msra.mxu1 %v7193_v41  ;;  %2775 = vmatprep.mubr.f32.mxu1 %v6569_v1 }
0x2524   :  { %2729 = vmatprep.subr.mxu1 %v7197_v53 }
0x2525   :  { %2730 = vmatpush1.msra.mxu1 %v7201_v56 }
0x2526   :  { %2731 = vmatprep.subr.mxu1 %v7205_v59 }
0x2527   :  { %2732 = vmatpush1.msra.mxu1 %v7209_v62 }
0x2528   :  { %2733 = vmatprep.subr.mxu1 %v7214_v63 }
0x2529   :  { %2734 = vmatpush1.msra.mxu1 %v7218_v2 }
0x252a   :  { %2735 = vmatprep.subr.mxu1 %v7221_v58 }
0x252b   :  { %2736 = vmatpush1.msra.mxu1 %v7224_v3 }
0x252c   :  { %2737 = vmatprep.subr.mxu1 %v7231_v4 }
0x252d   :  { %2738 = vmatpush1.msra.mxu1 %v7234_v6 }
0x252e   :  { %2739 = vmatprep.subr.mxu1 %v7237_v8 }
0x252f   :  { %2740 = vmatpush1.msra.mxu1 %v7240_v11 }
0x2530   :  { %2741 = vmatprep.subr.mxu1 %v7243_v15 }
0x2531   :  { %2742 = vmatpush1.msra.mxu1 %v7246_v19 }
0x25e2   :  { %v2483_v41 = vpop.f32.mrf.mxu1 }
0x25e3   :  { %v2489_v53 = vrot.slane %v2483_v41, 6 }
0x25e4   :  { %v2485_v56 = vpop.f32.mrf.mxu1 }
0x25e5   :  { %v2491_v59 = vadd.f32 %v2489_v53, %v7328_v7  ;;  %v2493_v62 = vrot.slane %v2485_v56, 4 }
0x25e7   :  { %6081 = vtanh.f32 %v2491_v59  ;;  %v2495_v63 = vadd.f32 %v2493_v62, %v7325_v55  ;;  %v5719_v3 = vmul.f32 -1.442695, %v2491_v59 }
0x25e9   :  { %6083 = vtanh.f32 %v2495_v63  ;;  %v5720_v4 = vmul.f32 -1.442695, %v2495_v63 }
0x25ea   :  { %6085 = vpow2.f32 %v5719_v3 }
0x25eb   :  { %6087 = vpow2.f32 %v5720_v4 }
0x25f4   :  { %v6082_v2 = vpop.eup %6081 }
0x25f5   :  { %2508 = vrot.lane.b32.xlu0 %v6082_v2, %s6570_s3 }
0x25f6   :  { %v6084_v58 = vpop.eup %6083 }
0x25f7   :  { %2535 = vrot.lane.b32.xlu1 %v6084_v58, %s6570_s3  ;;  %v6086_v6 = vpop.eup %6085 }
0x25f8   :  { %v6088_v8 = vpop.eup %6087  ;;  %v2499_v11 = vadd.f32 1.0, %v6086_v6 }
0x25f9   :  { %v2526_v15 = vadd.f32 1.0, %v6088_v8 }
0x25fa   :  { %6089 = vrcp.f32 %v2499_v11 }
0x25fb   :  { %6091 = vrcp.f32 %v2526_v15 }
0x2607   :  { %v6090_v19 = vpop.eup %6089 }
0x2608   :  { %v6092_v57 = vpop.eup %6091  ;;  %v2506_v17 = vmul.f32 %v6090_v19, %v2504_v60 }
0x2609   :  { %v2533_v10 = vmul.f32 %v6092_v57, %v2531_v5 }
0x2667   :  { %v2509_v38 = vpop.permute.xlu0 %2508 }
0x2668   :  { %v2511_v51 = vmul.f32 %v6090_v19, %v2509_v38 }
0x2669   :  { %v2536_v61 = vpop.permute.xlu1 %2535 }
0x266a   :  { %2513 = vrot.lane.b32.xlu0 %v2511_v51, %s6570_s3  ;;  %v2538_v26 = vmul.f32 %v6092_v57, %v2536_v61 }
0x266c   :  { %2540 = vrot.lane.b32.xlu1 %v2538_v26, %s6570_s3 }
0x26dc   :  { %v2514_v39 = vpop.permute.xlu0 %2513 }
0x26dd   :  { %v2516_v24 = vadd.f32 %v2514_v39, %v2506_v17 }
0x26de   :  { %v2541_v21 = vpop.permute.xlu1 %2540 }
0x26df   :  { %6093 = vtanh.f32 %v2516_v24  ;;  %v2543_v40 = vadd.f32 %v2541_v21, %v2533_v10  ;;  %v2651_v6 = vrot.slane %v2516_v24, 6 }
0x26e1   :  { %6095 = vtanh.f32 %v2543_v40  ;;  %v2678_v11 = vrot.slane %v2543_v40, 2 }
0x26ec   :  { %v6094_v16 = vpop.eup %6093 }
0x26ed   :  { %2519 = vrot.lane.b32.xlu0 %v6094_v16, %s6570_s3 }
0x26ee   :  { %v6096_v14 = vpop.eup %6095 }
0x26ef   :  { %2546 = vrot.lane.b32.xlu1 %v6096_v14, %s6570_s3 }
0x275f   :  { %v2520_v20 = vpop.permute.xlu0 %2519 }
0x2760   :  { %v2522_v12 = vmul.f32 %v6090_v19, %v2520_v20 }
0x2761   :  { %v2547_v54 = vpop.permute.xlu1 %2546 }
0x2762   :  { %2551 = vrot.lane.b32.xlu1 %v2522_v12, %s6572_s2  ;;  %v7553_v52 = vmul.f32 %v6092_v57, %v2547_v54 }
0x2764   :  { %v2555_v13 = vrot.slane %v7553_v52, 2 }
0x2766   :  { %2556 = vrot.lane.b32.xlu0 %v2555_v13, %s6571_s22 }
0x27d4   :  { %v7557_v18 = vpop.permute.xlu1 %2551 }
0x27d8   :  { %v2557_v22 = vpop.permute.xlu0 %2556 }
0x27d9   :  { %v2559_v46 = vsel %vm297_vm3, %v7557_v18, %v2557_v22 }
0x27da   :  { %v2561_v27 = vrot.slane %v2559_v46, 2 }
0x27dc   :  { %5721 = vmatmul.mubr.msk.f32.vlgmr.msra.gmra.mxu0 %vm179_vm0, %v2561_v27 }
0x27dd   :  { %2998 = vmatprep.mubr.f32.mxu0 %v6569_v1 }
0x289c   :  { %v2630_v28 = vpop.f32.mrf.mxu0 }
0x289d   :  { %v2636_v44 = vrot.slane %v2630_v28, 4 }
0x289e   :  { %v2632_v50 = vpop.f32.mrf.mxu0 }
0x289f   :  { %v2638_v25 = vadd.f32 %v2636_v44, %v7328_v7  ;;  %v2640_v49 = vrot.slane %v2632_v50, 6 }
0x28a1   :  { %6097 = vtanh.f32 %v2638_v25  ;;  %v2642_v23 = vadd.f32 %v2640_v49, %v7325_v55  ;;  %v5722_v36 = vmul.f32 -1.442695, %v2638_v25 }
0x28a3   :  { %6099 = vtanh.f32 %v2642_v23  ;;  %v5723_v37 = vmul.f32 -1.442695, %v2642_v23 }
0x28a4   :  { %6101 = vpow2.f32 %v5722_v36 }
0x28a5   :  { %6103 = vpow2.f32 %v5723_v37 }
0x28ae   :  { %v6098_v30 = vpop.eup %6097 }
0x28af   :  { %2655 = vrot.lane.b32.xlu0 %v6098_v30, %s6570_s3 }
0x28b0   :  { %v6100_v48 = vpop.eup %6099 }
0x28b1   :  { %2682 = vrot.lane.b32.xlu1 %v6100_v48, %s6570_s3  ;;  %v6102_v41 = vpop.eup %6101 }
0x28b2   :  { %v6104_v53 = vpop.eup %6103  ;;  %v2646_v56 = vadd.f32 1.0, %v6102_v41 }
0x28b3   :  { %v2673_v59 = vadd.f32 1.0, %v6104_v53 }
0x28b4   :  { %6105 = vrcp.f32 %v2646_v56 }
0x28b5   :  { %6107 = vrcp.f32 %v2673_v59 }
0x28c1   :  { %v6106_v62 = vpop.eup %6105 }
0x28c2   :  { %v6108_v58 = vpop.eup %6107  ;;  %v2653_v8 = vmul.f32 %v6106_v62, %v2651_v6  ;;  %v2914_v6 = vld [vmem:[#allocation7 + $0x70] sm:$0xff] }
0x28c3   :  { %v2680_v38 = vmul.f32 %v6108_v58, %v2678_v11  ;;  %v7598_v11 = vld [vmem:[#allocation8 + $0x78] sm:$0xff] }
0x28c4   :  { %3027 = vmatprep.subr.mxu1 %v7598_v11 }
0x2921   :  { %v2656_v63 = vpop.permute.xlu0 %2655 }
0x2922   :  { %v2658_v2 = vmul.f32 %v6106_v62, %v2656_v63 }
0x2923   :  { %v2683_v3 = vpop.permute.xlu1 %2682 }
0x2924   :  { %2660 = vrot.lane.b32.xlu0 %v2658_v2, %s6570_s3  ;;  %v2685_v4 = vmul.f32 %v6108_v58, %v2683_v3 }
0x2926   :  { %2687 = vrot.lane.b32.xlu1 %v2685_v4, %s6570_s3  ;;  %v2915_v4 = vld [vmem:[#allocation7 + $0x78] sm:$0xff] }
0x2927   :  { %2950 = vmatprep.subr.mxu0 %v2915_v4 }
0x2928   :  { %2951 = vmatpush1.msra.mxu0 %v2914_v6 }
0x2996   :  { %v2661_v15 = vpop.permute.xlu0 %2660 }
0x2997   :  { %v2663_v19 = vadd.f32 %v2661_v15, %v2653_v8  ;;  %v2913_v8 = vld [vmem:[#allocation7 + $0x68] sm:$0xff]  ;;  %v2912_v15 = vld [vmem:[#allocation7 + $0x60] sm:$0xff] }
0x2998   :  { %v2688_v51 = vpop.permute.xlu1 %2687  ;;  %2952 = vmatprep.subr.mxu0 %v2913_v8 }
0x2999   :  { %6109 = vtanh.f32 %v2663_v19  ;;  %v2690_v57 = vadd.f32 %v2688_v51, %v2680_v38  ;;  %v2795_v37 = vrot.slane %v2663_v19, 6  ;;  %v7600_v19 = vld [vmem:[#allocation8 + $0x70] sm:$0xff]  ;;  %v2911_v38 = vld [vmem:[#allocation7 + $0x58] sm:$0xff]  ;;  %v7604_v51 = vld [vmem:[#allocation8 + $0x68] sm:$0xff]  ;;  %2953 = vmatpush1.msra.mxu0 %v2912_v15 }
0x299a   :  { %2954 = vmatprep.subr.mxu0 %v2911_v38 }
0x299b   :  { %6111 = vtanh.f32 %v2690_v57  ;;  %v2822_v41 = vrot.slane %v2690_v57, 2  ;;  %v2910_v57 = vld [vmem:[#allocation7 + $0x50] sm:$0xff] }
0x299c   :  { %2955 = vmatpush1.msra.mxu0 %v2910_v57 }
0x29a6   :  { %v6110_v61 = vpop.eup %6109 }
0x29a7   :  { %2666 = vrot.lane.b32.xlu0 %v6110_v61, %s6570_s3  ;;  %v7608_v61 = vld [vmem:[#allocation8 + $0x60] sm:$0xff] }
0x29a8   :  { %v6112_v26 = vpop.eup %6111 }
0x29a9   :  { %2693 = vrot.lane.b32.xlu1 %v6112_v26, %s6570_s3  ;;  %v2909_v26 = vld [vmem:[#allocation7 + $0x48] sm:$0xff] }
0x29aa   :  { %2956 = vmatprep.subr.mxu0 %v2909_v26 }
0x2a19   :  { %v2667_v60 = vpop.permute.xlu0 %2666 }
0x2a1a   :  { %v2669_v17 = vmul.f32 %v6106_v62, %v2667_v60  ;;  %v7612_v60 = vld [vmem:[#allocation8 + $0x58] sm:$0xff] }
0x2a1b   :  { %v2694_v5 = vpop.permute.xlu1 %2693 }
0x2a1c   :  { %2698 = vrot.lane.b32.xlu1 %v2669_v17, %s6572_s2  ;;  %v7572_v39 = vmul.f32 %v6108_v58, %v2694_v5  ;;  %v2908_v17 = vld [vmem:[#allocation7 + $0x40] sm:$0xff]  ;;  %v7616_v5 = vld [vmem:[#allocation8 + $0x50] sm:$0xff] }
0x2a1d   :  { %2957 = vmatpush1.msra.mxu0 %v2908_v17 }
0x2a1e   :  { %v2702_v24 = vrot.slane %v7572_v39, 6 }
0x2a20   :  { %2703 = vrot.lane.b32.xlu0 %v2702_v24, %s6571_s22  ;;  %v7621_v24 = vld [vmem:[#allocation8 + $0x48] sm:$0xff] }
0x2a8e   :  { %v7576_v10 = vpop.permute.xlu1 %2698 }
0x2a92   :  { %v2704_v21 = vpop.permute.xlu0 %2703 }
0x2a93   :  { %v2706_v40 = vsel %vm297_vm3, %v7576_v10, %v2704_v21  ;;  %v7625_v21 = vld [vmem:[#allocation8 + $0x40] sm:$0xff] }
0x2a94   :  { %v2708_v16 = vrot.slane %v2706_v40, 4  ;;  %v2905_v40 = vld [vmem:[#allocation7 + $0x28] sm:$0xff] }
0x2a96   :  { %5724 = vmatmul.mubr.msk.f32.vlgmr.msra.gmra.mxu1 %vm179_vm0, %v2708_v16  ;;  %v7628_v16 = vld [vmem:[#allocation8 + $0x38] sm:$0xff] }
0x2a97   :  { %3075 = vmatprep.mubr.f32.mxu1 %v6569_v1  ;;  %3028 = vmatpush1.msra.mxu1 %v7600_v19 }
0x2a98   :  { %3029 = vmatprep.subr.mxu1 %v7604_v51 }
0x2a99   :  { %3030 = vmatpush1.msra.mxu1 %v7608_v61 }
0x2a9a   :  { %3031 = vmatprep.subr.mxu1 %v7612_v60 }
0x2a9b   :  { %3032 = vmatpush1.msra.mxu1 %v7616_v5 }
0x2a9c   :  { %3033 = vmatprep.subr.mxu1 %v7621_v24 }
0x2a9d   :  { %3034 = vmatpush1.msra.mxu1 %v7625_v21 }
0x2a9e   :  { %3035 = vmatprep.subr.mxu1 %v7628_v16 }
0x2b56   :  { %v2777_v14 = vpop.f32.mrf.mxu1 }
0x2b57   :  { %v2783_v20 = vrot.slane %v2777_v14, 2  ;;  %v7631_v14 = vld [vmem:[#allocation8 + $0x30] sm:$0xff] }
0x2b58   :  { %v2779_v12 = vpop.f32.mrf.mxu1  ;;  %3036 = vmatpush1.msra.mxu1 %v7631_v14 }
0x2b59   :  { %v2785_v54 = vadd.f32 %v2783_v20, %v7328_v7  ;;  %v2786_v13 = vadd.f32 %v2779_v12, %v7325_v55  ;;  %v7638_v20 = vld [vmem:[#allocation8 + $0x28] sm:$0xff]  ;;  %v2902_v12 = vld [vmem:[#allocation7 + $0x10] sm:$0xff] }
0x2b5a   :  { %3037 = vmatprep.subr.mxu1 %v7638_v20 }
0x2b5b   :  { %6113 = vtanh.f32 %v2785_v54  ;;  %v5725_v27 = vmul.f32 -1.442695, %v2785_v54  ;;  %v5726_v28 = vmul.f32 -1.442695, %v2786_v13  ;;  %v7641_v54 = vld [vmem:[#allocation8 + $0x20] sm:$0xff] }
0x2b5c   :  { %6115 = vtanh.f32 %v2786_v13  ;;  %3038 = vmatpush1.msra.mxu1 %v7641_v54  ;;  %v7644_v13 = vld [vmem:[#allocation8 + $0x18] sm:$0xff] }
0x2b5d   :  { %6117 = vpow2.f32 %v5725_v27  ;;  %3039 = vmatprep.subr.mxu1 %v7644_v13  ;;  %v7650_v27 = vld [vmem:[#allocation8 + $0x8] sm:$0xff] }
0x2b5e   :  { %6119 = vpow2.f32 %v5726_v28  ;;  %v7653_v28 = vld [vmem:[#allocation8] sm:$0xff] }
0x2b68   :  { %v6114_v22 = vpop.eup %6113 }
0x2b69   :  { %v6116_v46 = vpop.eup %6115  ;;  %2799 = vrot.lane.b32.xlu0 %v6114_v22, %s6570_s3  ;;  %v2900_v22 = vld [vmem:[#allocation7] sm:$0xff] }
0x2b6a   :  { %2826 = vrot.lane.b32.xlu1 %v6116_v46, %s6570_s3  ;;  %v6118_v44 = vpop.eup %6117  ;;  %v7647_v46 = vld [vmem:[#allocation8 + $0x10] sm:$0xff] }
0x2b6b   :  { %v6120_v50 = vpop.eup %6119  ;;  %v2790_v25 = vadd.f32 1.0, %v6118_v44  ;;  %3040 = vmatpush1.msra.mxu1 %v7647_v46 }
0x2b6c   :  { %v2817_v49 = vadd.f32 1.0, %v6120_v50  ;;  %3041 = vmatprep.subr.mxu1 %v7650_v27 }
0x2b6d   :  { %6121 = vrcp.f32 %v2790_v25  ;;  %3042 = vmatpush1.msra.mxu1 %v7653_v28 }
0x2b6e   :  { %6123 = vrcp.f32 %v2817_v49  ;;  %3076 = vmatmul.mubr.f32.vlgmr.msra.gmra.mxu1 %v6569_v1  ;;  %3311 = vmatprep.subr.mxu1 %v7598_v11 }
0x2b6f   :  { %3312 = vmatpush1.msra.mxu1 %v7600_v19  ;;  %3359 = vmatprep.mubr.f32.mxu1 %v6569_v1 }
0x2b70   :  { %3313 = vmatprep.subr.mxu1 %v7604_v51 }
0x2b71   :  { %3314 = vmatpush1.msra.mxu1 %v7608_v61 }
0x2b72   :  { %3315 = vmatprep.subr.mxu1 %v7612_v60 }
0x2b73   :  { %3316 = vmatpush1.msra.mxu1 %v7616_v5 }
0x2b74   :  { %3317 = vmatprep.subr.mxu1 %v7621_v24 }
0x2b75   :  { %3318 = vmatpush1.msra.mxu1 %v7625_v21 }
0x2b76   :  { %3319 = vmatprep.subr.mxu1 %v7628_v16 }
0x2b77   :  { %3320 = vmatpush1.msra.mxu1 %v7631_v14 }
0x2b78   :  { %3321 = vmatprep.subr.mxu1 %v7638_v20 }
0x2b79   :  { %3322 = vmatpush1.msra.mxu1 %v7641_v54 }
0x2b7a   :  { %v7586_v7 = vpop.eup %6121  ;;  %3323 = vmatprep.subr.mxu1 %v7644_v13 }
0x2b7b   :  { %v7588_v23 = vpop.eup %6123  ;;  %v2797_v53 = vmul.f32 %v7586_v7, %v2795_v37  ;;  %3324 = vmatpush1.msra.mxu1 %v7647_v46 }
0x2b7c   :  { %v2824_v59 = vmul.f32 %v7588_v23, %v2822_v41  ;;  %3325 = vmatprep.subr.mxu1 %v7650_v27 }
0x2b7d   :  { %3326 = vmatpush1.msra.mxu1 %v7653_v28 }
0x2b7e   :  { %3602 = vmatprep.subr.mxu1 %v7598_v11 }
0x2bdb   :  { %v2800_v55 = vpop.permute.xlu0 %2799 }
0x2bdc   :  { %v2802_v30 = vmul.f32 %v7586_v7, %v2800_v55  ;;  %v2827_v48 = vpop.permute.xlu1 %2826 }
0x2bdd   :  { %v2829_v36 = vmul.f32 %v7588_v23, %v2827_v48 }
0x2bde   :  { %2804 = vrot.lane.b32.xlu0 %v2802_v30, %s6570_s3 }
0x2bdf   :  { %2831 = vrot.lane.b32.xlu1 %v2829_v36, %s6570_s3 }
0x2c2e   :  { %v3077_v8 = vpop.f32.mrf.mxu1 }
0x2c50   :  { %v2805_v56 = vpop.permute.xlu0 %2804 }
0x2c51   :  { %v2807_v62 = vadd.f32 %v2805_v56, %v2797_v53  ;;  %v2832_v63 = vpop.permute.xlu1 %2831 }
0x2c52   :  { %v2834_v2 = vadd.f32 %v2832_v63, %v2824_v59 }
0x2c53   :  { %6125 = vtanh.f32 %v2807_v62 }
0x2c54   :  { %6127 = vtanh.f32 %v2834_v2 }
0x2c60   :  { %v6126_v58 = vpop.eup %6125 }
0x2c61   :  { %v6128_v3 = vpop.eup %6127  ;;  %2810 = vrot.lane.b32.xlu0 %v6126_v58, %s6570_s3 }
0x2c62   :  { %2837 = vrot.lane.b32.xlu1 %v6128_v3, %s6570_s3 }
0x2c65   :  { %2846 = vrot.lane.b32.xlu0 %v7572_v39, %s6571_s22  ;;  %v2907_v39 = vld [vmem:[#allocation7 + $0x38] sm:$0xff] }
0x2c66   :  { %2850 = vrot.lane.b32.xlu1 %v7553_v52, %s6571_s22  ;;  %v2906_v52 = vld [vmem:[#allocation7 + $0x30] sm:$0xff]  ;;  %2958 = vmatprep.subr.mxu0 %v2907_v39  ;;  %v3079_v39 = vpop.f32.mrf.mxu1 }
0x2c67   :  { %2959 = vmatpush1.msra.mxu0 %v2906_v52 }
0x2c68   :  { %2960 = vmatprep.subr.mxu0 %v2905_v40 }
0x2c69   :  { %2854 = vrot.lane.b32.xlu0 %v7517_v29, %s6571_s22  ;;  %v2904_v29 = vld [vmem:[#allocation7 + $0x20] sm:$0xff] }
0x2c6a   :  { %2858 = vrot.lane.b32.xlu1 %v7474_v31, %s6571_s22  ;;  %2961 = vmatpush1.msra.mxu0 %v2904_v29  ;;  %v2903_v31 = vld [vmem:[#allocation7 + $0x18] sm:$0xff]  ;;  %v3084_v29 = vrot.slane %v3079_v39, 2 }
0x2c6b   :  { %2962 = vmatprep.subr.mxu0 %v2903_v31 }
0x2c6c   :  { %2963 = vmatpush1.msra.mxu0 %v2902_v12 }
0x2c6d   :  { %2862 = vrot.lane.b32.xlu0 %v7432_v42, %s6571_s22  ;;  %v2901_v42 = vld [vmem:[#allocation7 + $0x8] sm:$0xff] }
0x2c6e   :  { %2964 = vmatprep.subr.mxu0 %v2901_v42 }
0x2c6f   :  { %2965 = vmatpush1.msra.mxu0 %v2900_v22 }
0x2c70   :  { %3164 = vmatprep.subr.mxu0 %v7598_v11 }
0x2cd3   :  { %v2811_v44 = vpop.permute.xlu0 %2810 }
0x2cd4   :  { %v2813_v50 = vmul.f32 %v7586_v7, %v2811_v44  ;;  %v2838_v25 = vpop.permute.xlu1 %2837 }
0x2cd5   :  { %v2840_v49 = vmul.f32 %v7588_v23, %v2838_v25 }
0x2cd6   :  { %2871 = vrot.lane.b32.xlu0 %v2813_v50, %s6572_s2 }
0x2cd7   :  { %2842 = vrot.lane.b32.xlu1 %v2840_v49, %s6571_s22  ;;  %v2847_v7 = vpop.permute.xlu0 %2846 }
0x2cd8   :  { %v2851_v55 = vpop.permute.xlu1 %2850  ;;  %v2849_v48 = vsel %vm297_vm3, %v7393_v32, %v2847_v7 }
0x2cd9   :  { %v2853_v37 = vsel %vm297_vm3, %v7436_v0, %v2851_v55 }
0x2cdb   :  { %2866 = vrot.lane.b32.xlu1 %v7389_v43, %s6571_s22  ;;  %v2855_v23 = vpop.permute.xlu0 %2854 }
0x2cdc   :  { %v2859_v30 = vpop.permute.xlu1 %2858  ;;  %v2857_v53 = vsel %vm297_vm3, %v7479_v9, %v2855_v23 }
0x2cdd   :  { %v2861_v0 = vsel %vm297_vm3, %v7521_v35, %v2859_v30  ;;  %v2916_v35 = vld [vmem:[%s8421_s9] sm:$0x3] }
0x2cde   :  { %v2921_v3 = vrot.slane %v2916_v35, %v6912_v47  ;;  %v2925_v4 = vrot.slane %v2916_v35, %v6907_v45 }
0x2cdf   :  { %2874 = vrot.lane.b32.xlu1 %v7346_v33, %s6571_s22  ;;  %v2863_v41 = vpop.permute.xlu0 %2862 }
0x2ce0   :  { %v2865_v32 = vsel %vm297_vm3, %v7557_v18, %v2863_v41 }
0x2ce1   :  { %v2881_v9 = vsel %vm1563_vm5, %v2861_v0, %v2865_v32 }
0x2d48   :  { %v2872_v63 = vpop.permute.xlu0 %2871 }
0x2d49   :  { %v2843_v43 = vpop.permute.xlu1 %2842 }
0x2d4a   :  { %v2845_v36 = vsel %vm297_vm3, %v7350_v34, %v2843_v43 }
0x2d4b   :  { %v2878_v33 = vsel %vm1563_vm5, %v2845_v36, %v2849_v48 }
0x2d4c   :  { %v2879_v56 = vsel %vm1565_vm4, %v2878_v33, %v2853_v37 }
0x2d4d   :  { %v2867_v59 = vpop.permute.xlu1 %2866  ;;  %v2880_v62 = vsel %vm1567_vm6, %v2879_v56, %v2857_v53 }
0x2d4e   :  { %5727 = vmatmul.mubr.msk.f32.vlgmr.msra.gmra.mxu0 %vm179_vm0, %v2880_v62  ;;  %v2869_v34 = vsel %vm297_vm3, %v7576_v10, %v2867_v59 }
0x2d4f   :  { %3004 = vmatprep.mubr.f32.mxu0 %v6569_v1  ;;  %3165 = vmatpush1.msra.mxu0 %v7600_v19  ;;  %v2882_v18 = vsel %vm1565_vm4, %v2881_v9, %v2869_v34 }
0x2d50   :  { %3166 = vmatprep.subr.mxu0 %v7604_v51 }
0x2d51   :  { %v2875_v2 = vpop.permute.xlu1 %2874  ;;  %3167 = vmatpush1.msra.mxu0 %v7608_v61 }
0x2d52   :  { %v2877_v58 = vsel %vm297_vm3, %v2872_v63, %v2875_v2  ;;  %3168 = vmatprep.subr.mxu0 %v7612_v60 }
0x2d53   :  { %v2883_v10 = vsel %vm1567_vm6, %v2882_v18, %v2877_v58  ;;  %3169 = vmatpush1.msra.mxu0 %v7616_v5 }
0x2d54   :  { %5728 = vmatmul.mubr.msk.f32.gmra.mxu0 %vm179_vm0, %v2883_v10  ;;  %3170 = vmatprep.subr.mxu0 %v7621_v24 }
0x2d55   :  { %3171 = vmatpush1.msra.mxu0 %v7625_v21  ;;  %3212 = vmatprep.mubr.f32.mxu0 %v6569_v1 }
0x2d56   :  { %3172 = vmatprep.subr.mxu0 %v7628_v16 }
0x2d57   :  { %3173 = vmatpush1.msra.mxu0 %v7631_v14 }
0x2d58   :  { %3174 = vmatprep.subr.mxu0 %v7638_v20 }
0x2d59   :  { %3175 = vmatpush1.msra.mxu0 %v7641_v54 }
0x2d5a   :  { %3176 = vmatprep.subr.mxu0 %v7644_v13 }
0x2d5b   :  { %3177 = vmatpush1.msra.mxu0 %v7647_v46 }
0x2d5c   :  { %3178 = vmatprep.subr.mxu0 %v7650_v27 }
0x2d5d   :  { %3179 = vmatpush1.msra.mxu0 %v7653_v28 }
0x2d5e   :  { %3458 = vmatprep.subr.mxu0 %v7598_v11 }
0x2e0e   :  { %v3000_v6 = vpop.f32.mrf.mxu0 }
0x2e0f   :  { %v7730_v15 = vadd.f32 %v3000_v6, %v2921_v3 }
0x2e10   :  { %v3002_v38 = vpop.f32.mrf.mxu0 }
0x2e11   :  { %v7732_v57 = vadd.f32 %v3002_v38, %v2925_v4  ;;  %v3082_v26 = vadd.f32 %v3077_v8, %v7730_v15 }
0x2e13   :  { %6129 = vtanh.f32 %v3082_v26  ;;  %v5729_v44 = vmul.f32 -1.442695, %v3082_v26 }
0x2e14   :  { %v3006_v17 = vpop.f32.mrf.mxu0 }
0x2e15   :  { %v7735_v52 = vadd.f32 %v3006_v17, %v2921_v3 }
0x2e16   :  { %v3008_v40 = vpop.f32.mrf.mxu0 }
0x2e17   :  { %v7737_v31 = vadd.f32 %v3008_v40, %v2925_v4 }
0x2e19   :  { %v3086_v12 = vadd.f32 %v3084_v29, %v7737_v31 }
0x2e1b   :  { %6131 = vtanh.f32 %v3086_v12  ;;  %v5730_v50 = vmul.f32 -1.442695, %v3086_v12 }
0x2e1c   :  { %6133 = vpow2.f32 %v5729_v44 }
0x2e1d   :  { %6135 = vpow2.f32 %v5730_v50 }
0x2e20   :  { %v6130_v42 = vpop.eup %6129 }
0x2e21   :  { %3096 = vrot.lane.b32.xlu1 %v6130_v42, %s6570_s3 }
0x2e28   :  { %v6132_v22 = vpop.eup %6131 }
0x2e29   :  { %3120 = vrot.lane.b32.xlu0 %v6132_v22, %s6570_s3  ;;  %v6134_v25 = vpop.eup %6133 }
0x2e2a   :  { %v3090_v49 = vadd.f32 1.0, %v6134_v25  ;;  %v6136_v7 = vpop.eup %6135 }
0x2e2b   :  { %v3114_v55 = vadd.f32 1.0, %v6136_v7 }
0x2e2c   :  { %6137 = vrcp.f32 %v3090_v49 }
0x2e2d   :  { %6139 = vrcp.f32 %v3114_v55 }
0x2e39   :  { %v6138_v23 = vpop.eup %6137 }
0x2e3a   :  { %v6140_v48 = vpop.eup %6139  ;;  %v3094_v41 = vmul.f32 0.0, %v6138_v23 }
0x2e3b   :  { %v3118_v56 = vmul.f32 0.0, %v6140_v48 }
0x2e93   :  { %v3097_v30 = vpop.permute.xlu1 %3096 }
0x2e94   :  { %v3099_v43 = vmul.f32 %v6138_v23, %v3097_v30 }
0x2e96   :  { %3101 = vrot.lane.b32.xlu1 %v3099_v43, %s6570_s3 }
0x2e9b   :  { %v3121_v36 = vpop.permute.xlu0 %3120 }
0x2e9c   :  { %v3123_v37 = vmul.f32 %v6140_v48, %v3121_v36 }
0x2e9e   :  { %3125 = vrot.lane.b32.xlu0 %v3123_v37, %s6570_s3 }
0x2f08   :  { %v3102_v33 = vpop.permute.xlu1 %3101 }
0x2f09   :  { %v7744_v53 = vadd.f32 %v3102_v33, %v3094_v41 }
0x2f0b   :  { %6141 = vtanh.f32 %v7744_v53  ;;  %v3235_v30 = vrot.slane %v7744_v53, 6 }
0x2f10   :  { %v3126_v59 = vpop.permute.xlu0 %3125 }
0x2f11   :  { %v7747_v62 = vadd.f32 %v3126_v59, %v3118_v56 }
0x2f13   :  { %6143 = vtanh.f32 %v7747_v62 }
0x2f18   :  { %v6142_v32 = vpop.eup %6141 }
0x2f19   :  { %3107 = vrot.lane.b32.xlu1 %v6142_v32, %s6570_s3 }
0x2f20   :  { %v6144_v34 = vpop.eup %6143 }
0x2f21   :  { %3131 = vrot.lane.b32.xlu0 %v6144_v34, %s6570_s3 }
0x2f8b   :  { %v3108_v0 = vpop.permute.xlu1 %3107 }
0x2f8c   :  { %v3110_v9 = vmul.f32 %v6138_v23, %v3108_v0 }
0x2f8e   :  { %3136 = vrot.lane.b32.xlu0 %v3110_v9, %s6572_s2 }
0x2f93   :  { %v3132_v63 = vpop.permute.xlu0 %3131 }
0x2f94   :  { %v7753_v2 = vmul.f32 %v6140_v48, %v3132_v63  ;;  %v3262_v48 = vrot.slane %v7747_v62, 2 }
0x2f96   :  { %v3140_v18 = vrot.slane %v7753_v2, 6 }
0x2f98   :  { %3141 = vrot.lane.b32.xlu1 %v3140_v18, %s6571_s22 }
0x3000   :  { %v7757_v58 = vpop.permute.xlu0 %3136 }
0x300a   :  { %v3142_v10 = vpop.permute.xlu1 %3141 }
0x300b   :  { %v3144_v35 = vsel %vm297_vm3, %v7757_v58, %v3142_v10 }
0x300c   :  { %5731 = vmatmul.mubr.msk.f32.vlgmr.msra.gmra.mxu0 %vm179_vm0, %v3144_v35 }
0x300d   :  { %3459 = vmatpush1.msra.mxu0 %v7600_v19  ;;  %3506 = vmatprep.mubr.f32.mxu0 %v6569_v1 }
0x300e   :  { %3460 = vmatprep.subr.mxu0 %v7604_v51 }
0x300f   :  { %3461 = vmatpush1.msra.mxu0 %v7608_v61 }
0x3010   :  { %3462 = vmatprep.subr.mxu0 %v7612_v60 }
0x3011   :  { %3463 = vmatpush1.msra.mxu0 %v7616_v5 }
0x3012   :  { %3464 = vmatprep.subr.mxu0 %v7621_v24 }
0x3013   :  { %3465 = vmatpush1.msra.mxu0 %v7625_v21 }
0x3014   :  { %3466 = vmatprep.subr.mxu0 %v7628_v16 }
0x3015   :  { %3467 = vmatpush1.msra.mxu0 %v7631_v14 }
0x3016   :  { %3468 = vmatprep.subr.mxu0 %v7638_v20 }
0x3017   :  { %3469 = vmatpush1.msra.mxu0 %v7641_v54 }
0x3018   :  { %3470 = vmatprep.subr.mxu0 %v7644_v13 }
0x3019   :  { %3471 = vmatpush1.msra.mxu0 %v7647_v46 }
0x301a   :  { %3472 = vmatprep.subr.mxu0 %v7650_v27 }
0x301b   :  { %3473 = vmatpush1.msra.mxu0 %v7653_v28 }
0x301c   :  { %3745 = vmatprep.subr.mxu0 %v7598_v11 }
0x30cc   :  { %v3214_v3 = vpop.f32.mrf.mxu0 }
0x30cd   :  { %v3220_v4 = vrot.slane %v3214_v3, 6 }
0x30ce   :  { %v3216_v6 = vpop.f32.mrf.mxu0 }
0x30cf   :  { %v3222_v8 = vadd.f32 %v3220_v4, %v7730_v15  ;;  %v3224_v38 = vrot.slane %v3216_v6, 4 }
0x30d1   :  { %6145 = vtanh.f32 %v3222_v8  ;;  %v3226_v26 = vadd.f32 %v3224_v38, %v7737_v31  ;;  %v5732_v40 = vmul.f32 -1.442695, %v3222_v8 }
0x30d3   :  { %6147 = vtanh.f32 %v3226_v26  ;;  %v5733_v29 = vmul.f32 -1.442695, %v3226_v26 }
0x30d4   :  { %6149 = vpow2.f32 %v5732_v40 }
0x30d5   :  { %6151 = vpow2.f32 %v5733_v29 }
0x30de   :  { %v6146_v17 = vpop.eup %6145 }
0x30df   :  { %3239 = vrot.lane.b32.xlu1 %v6146_v17, %s6570_s3 }
0x30e0   :  { %v6148_v39 = vpop.eup %6147 }
0x30e1   :  { %3266 = vrot.lane.b32.xlu0 %v6148_v39, %s6570_s3  ;;  %v6150_v12 = vpop.eup %6149 }
0x30e2   :  { %v6152_v42 = vpop.eup %6151  ;;  %v3230_v22 = vadd.f32 1.0, %v6150_v12 }
0x30e3   :  { %v3257_v44 = vadd.f32 1.0, %v6152_v42 }
0x30e4   :  { %6153 = vrcp.f32 %v3230_v22 }
0x30e5   :  { %6155 = vrcp.f32 %v3257_v44 }
0x30f1   :  { %v6154_v50 = vpop.eup %6153 }
0x30f2   :  { %v6156_v7 = vpop.eup %6155  ;;  %v3237_v43 = vmul.f32 %v6154_v50, %v3235_v30 }
0x30f3   :  { %v3264_v41 = vmul.f32 %v6156_v7, %v3262_v48 }
0x3151   :  { %v3240_v25 = vpop.permute.xlu1 %3239 }
0x3152   :  { %v3242_v49 = vmul.f32 %v6154_v50, %v3240_v25 }
0x3153   :  { %v3267_v55 = vpop.permute.xlu0 %3266 }
0x3154   :  { %3244 = vrot.lane.b32.xlu1 %v3242_v49, %s6570_s3  ;;  %v3269_v23 = vmul.f32 %v6156_v7, %v3267_v55 }
0x3156   :  { %3271 = vrot.lane.b32.xlu0 %v3269_v23, %s6570_s3 }
0x31c6   :  { %v3245_v36 = vpop.permute.xlu1 %3244 }
0x31c7   :  { %v7787_v37 = vadd.f32 %v3245_v36, %v3237_v43 }
0x31c8   :  { %v3272_v33 = vpop.permute.xlu0 %3271 }
0x31c9   :  { %6157 = vtanh.f32 %v7787_v37  ;;  %v7790_v56 = vadd.f32 %v3272_v33, %v3264_v41  ;;  %v3382_v30 = vrot.slane %v7787_v37, 6 }
0x31cb   :  { %6159 = vtanh.f32 %v7790_v56  ;;  %v3409_v48 = vrot.slane %v7790_v56, 2 }
0x31d6   :  { %v6158_v59 = vpop.eup %6157 }
0x31d7   :  { %3250 = vrot.lane.b32.xlu1 %v6158_v59, %s6570_s3 }
0x31d8   :  { %v6160_v32 = vpop.eup %6159 }
0x31d9   :  { %3277 = vrot.lane.b32.xlu0 %v6160_v32, %s6570_s3 }
0x3249   :  { %v3251_v53 = vpop.permute.xlu1 %3250 }
0x324a   :  { %v3253_v34 = vmul.f32 %v6154_v50, %v3251_v53 }
0x324b   :  { %v3278_v62 = vpop.permute.xlu0 %3277 }
0x324c   :  { %3282 = vrot.lane.b32.xlu0 %v3253_v34, %s6572_s2  ;;  %v7796_v0 = vmul.f32 %v6156_v7, %v3278_v62 }
0x324e   :  { %v3286_v9 = vrot.slane %v7796_v0, 2 }
0x3250   :  { %3287 = vrot.lane.b32.xlu1 %v3286_v9, %s6571_s22 }
0x32be   :  { %v7800_v63 = vpop.permute.xlu0 %3282 }
0x32c2   :  { %v3288_v18 = vpop.permute.xlu1 %3287 }
0x32c3   :  { %v3290_v10 = vsel %vm297_vm3, %v7800_v63, %v3288_v18 }
0x32c4   :  { %v3292_v35 = vrot.slane %v3290_v10, 2 }
0x32c6   :  { %5734 = vmatmul.mubr.msk.f32.vlgmr.msra.gmra.mxu1 %vm179_vm0, %v3292_v35 }
0x32c7   :  { %3603 = vmatpush1.msra.mxu1 %v7600_v19  ;;  %3650 = vmatprep.mubr.f32.mxu1 %v6569_v1 }
0x32c8   :  { %3604 = vmatprep.subr.mxu1 %v7604_v51 }
0x32c9   :  { %3605 = vmatpush1.msra.mxu1 %v7608_v61 }
0x32ca   :  { %3606 = vmatprep.subr.mxu1 %v7612_v60 }
0x32cb   :  { %3607 = vmatpush1.msra.mxu1 %v7616_v5 }
0x32cc   :  { %3608 = vmatprep.subr.mxu1 %v7621_v24 }
0x32cd   :  { %3609 = vmatpush1.msra.mxu1 %v7625_v21 }
0x32ce   :  { %3610 = vmatprep.subr.mxu1 %v7628_v16 }
0x32cf   :  { %3611 = vmatpush1.msra.mxu1 %v7631_v14 }
0x32d0   :  { %3612 = vmatprep.subr.mxu1 %v7638_v20 }
0x32d1   :  { %3613 = vmatpush1.msra.mxu1 %v7641_v54 }
0x32d2   :  { %3614 = vmatprep.subr.mxu1 %v7644_v13 }
0x32d3   :  { %3615 = vmatpush1.msra.mxu1 %v7647_v46 }
0x32d4   :  { %3616 = vmatprep.subr.mxu1 %v7650_v27 }
0x32d5   :  { %3617 = vmatpush1.msra.mxu1 %v7653_v28 }
0x32d6   :  { %3892 = vmatprep.subr.mxu1 %v7598_v11 }
0x3386   :  { %v3361_v3 = vpop.f32.mrf.mxu1 }
0x3387   :  { %v3367_v4 = vrot.slane %v3361_v3, 4 }
0x3388   :  { %v3363_v6 = vpop.f32.mrf.mxu1 }
0x3389   :  { %v3369_v8 = vadd.f32 %v3367_v4, %v7730_v15  ;;  %v3371_v38 = vrot.slane %v3363_v6, 6 }
0x338b   :  { %6161 = vtanh.f32 %v3369_v8  ;;  %v3373_v26 = vadd.f32 %v3371_v38, %v7737_v31  ;;  %v5735_v40 = vmul.f32 -1.442695, %v3369_v8 }
0x338d   :  { %6163 = vtanh.f32 %v3373_v26  ;;  %v5736_v29 = vmul.f32 -1.442695, %v3373_v26 }
0x338e   :  { %6165 = vpow2.f32 %v5735_v40 }
0x338f   :  { %6167 = vpow2.f32 %v5736_v29 }
0x3398   :  { %v6162_v17 = vpop.eup %6161 }
0x3399   :  { %3386 = vrot.lane.b32.xlu1 %v6162_v17, %s6570_s3 }
0x339a   :  { %v6164_v39 = vpop.eup %6163 }
0x339b   :  { %3413 = vrot.lane.b32.xlu0 %v6164_v39, %s6570_s3  ;;  %v6166_v12 = vpop.eup %6165 }
0x339c   :  { %v6168_v42 = vpop.eup %6167  ;;  %v3377_v22 = vadd.f32 1.0, %v6166_v12 }
0x339d   :  { %v3404_v44 = vadd.f32 1.0, %v6168_v42 }
0x339e   :  { %6169 = vrcp.f32 %v3377_v22 }
0x339f   :  { %6171 = vrcp.f32 %v3404_v44 }
0x33ab   :  { %v6170_v50 = vpop.eup %6169 }
0x33ac   :  { %v6172_v7 = vpop.eup %6171  ;;  %v3384_v43 = vmul.f32 %v6170_v50, %v3382_v30 }
0x33ad   :  { %v3411_v33 = vmul.f32 %v6172_v7, %v3409_v48 }
0x340b   :  { %v3387_v25 = vpop.permute.xlu1 %3386 }
0x340c   :  { %v3389_v49 = vmul.f32 %v6170_v50, %v3387_v25 }
0x340d   :  { %v3414_v55 = vpop.permute.xlu0 %3413 }
0x340e   :  { %3391 = vrot.lane.b32.xlu1 %v3389_v49, %s6570_s3  ;;  %v3416_v23 = vmul.f32 %v6172_v7, %v3414_v55 }
0x3410   :  { %3418 = vrot.lane.b32.xlu0 %v3416_v23, %s6570_s3 }
0x3480   :  { %v3392_v36 = vpop.permute.xlu1 %3391 }
0x3481   :  { %v7830_v41 = vadd.f32 %v3392_v36, %v3384_v43 }
0x3482   :  { %v3419_v59 = vpop.permute.xlu0 %3418 }
0x3483   :  { %6173 = vtanh.f32 %v7830_v41  ;;  %v7833_v32 = vadd.f32 %v3419_v59, %v3411_v33  ;;  %v3526_v55 = vrot.slane %v7830_v41, 6 }
0x3485   :  { %6175 = vtanh.f32 %v7833_v32  ;;  %v3553_v23 = vrot.slane %v7833_v32, 2 }
0x3490   :  { %v6174_v53 = vpop.eup %6173 }
0x3491   :  { %3397 = vrot.lane.b32.xlu1 %v6174_v53, %s6570_s3 }
0x3492   :  { %v6176_v34 = vpop.eup %6175 }
0x3493   :  { %3424 = vrot.lane.b32.xlu0 %v6176_v34, %s6570_s3 }
0x3503   :  { %v3398_v37 = vpop.permute.xlu1 %3397 }
0x3504   :  { %v3400_v62 = vmul.f32 %v6170_v50, %v3398_v37 }
0x3505   :  { %v3425_v56 = vpop.permute.xlu0 %3424 }
0x3506   :  { %3429 = vrot.lane.b32.xlu0 %v3400_v62, %s6572_s2  ;;  %v7839_v9 = vmul.f32 %v6172_v7, %v3425_v56 }
0x3508   :  { %v3433_v18 = vrot.slane %v7839_v9, 6 }
0x350a   :  { %3434 = vrot.lane.b32.xlu1 %v3433_v18, %s6571_s22 }
0x3578   :  { %v7843_v10 = vpop.permute.xlu0 %3429 }
0x357c   :  { %v3435_v35 = vpop.permute.xlu1 %3434 }
0x357d   :  { %v3437_v3 = vsel %vm297_vm3, %v7843_v10, %v3435_v35 }
0x357e   :  { %v3439_v4 = vrot.slane %v3437_v3, 4 }
0x3580   :  { %5737 = vmatmul.mubr.msk.f32.vlgmr.msra.gmra.mxu0 %vm179_vm0, %v3439_v4 }
0x3581   :  { %3746 = vmatpush1.msra.mxu0 %v7600_v19  ;;  %3793 = vmatprep.mubr.f32.mxu0 %v6569_v1 }
0x3582   :  { %3747 = vmatprep.subr.mxu0 %v7604_v51 }
0x3583   :  { %3748 = vmatpush1.msra.mxu0 %v7608_v61 }
0x3584   :  { %3749 = vmatprep.subr.mxu0 %v7612_v60 }
0x3585   :  { %3750 = vmatpush1.msra.mxu0 %v7616_v5 }
0x3586   :  { %3751 = vmatprep.subr.mxu0 %v7621_v24 }
0x3587   :  { %3752 = vmatpush1.msra.mxu0 %v7625_v21 }
0x3588   :  { %3753 = vmatprep.subr.mxu0 %v7628_v16 }
0x3589   :  { %3754 = vmatpush1.msra.mxu0 %v7631_v14 }
0x358a   :  { %3755 = vmatprep.subr.mxu0 %v7638_v20 }
0x358b   :  { %3756 = vmatpush1.msra.mxu0 %v7641_v54 }
0x358c   :  { %3757 = vmatprep.subr.mxu0 %v7644_v13 }
0x358d   :  { %3758 = vmatpush1.msra.mxu0 %v7647_v46 }
0x358e   :  { %3759 = vmatprep.subr.mxu0 %v7650_v27 }
0x358f   :  { %3760 = vmatpush1.msra.mxu0 %v7653_v28 }
0x3590   :  { %4039 = vmatprep.subr.mxu0 %v7598_v11 }
0x3640   :  { %v3508_v6 = vpop.f32.mrf.mxu0 }
0x3641   :  { %v3514_v8 = vrot.slane %v3508_v6, 2 }
0x3642   :  { %v3510_v38 = vpop.f32.mrf.mxu0 }
0x3643   :  { %v3516_v26 = vadd.f32 %v3514_v8, %v7730_v15  ;;  %v3517_v17 = vadd.f32 %v3510_v38, %v7737_v31 }
0x3645   :  { %6177 = vtanh.f32 %v3516_v26  ;;  %v5738_v29 = vmul.f32 -1.442695, %v3516_v26  ;;  %v5739_v12 = vmul.f32 -1.442695, %v3517_v17 }
0x3646   :  { %6179 = vtanh.f32 %v3517_v17 }
0x3647   :  { %6181 = vpow2.f32 %v5738_v29 }
0x3648   :  { %6183 = vpow2.f32 %v5739_v12 }
0x3652   :  { %v6178_v39 = vpop.eup %6177 }
0x3653   :  { %v6180_v40 = vpop.eup %6179  ;;  %3530 = vrot.lane.b32.xlu1 %v6178_v39, %s6570_s3 }
0x3654   :  { %3557 = vrot.lane.b32.xlu0 %v6180_v40, %s6570_s3  ;;  %v6182_v11 = vpop.eup %6181 }
0x3655   :  { %v6184_v42 = vpop.eup %6183  ;;  %v3521_v22 = vadd.f32 1.0, %v6182_v11 }
0x3656   :  { %v3548_v44 = vadd.f32 1.0, %v6184_v42 }
0x3657   :  { %6185 = vrcp.f32 %v3521_v22 }
0x3658   :  { %6187 = vrcp.f32 %v3548_v44 }
0x3664   :  { %v6186_v15 = vpop.eup %6185 }
0x3665   :  { %v6188_v50 = vpop.eup %6187  ;;  %v3528_v30 = vmul.f32 %v6186_v15, %v3526_v55 }
0x3666   :  { %v3555_v48 = vmul.f32 %v6188_v50, %v3553_v23 }
0x36c5   :  { %v3531_v31 = vpop.permute.xlu1 %3530 }
0x36c6   :  { %v3533_v25 = vmul.f32 %v6186_v15, %v3531_v31  ;;  %v3558_v49 = vpop.permute.xlu0 %3557 }
0x36c7   :  { %v3560_v7 = vmul.f32 %v6188_v50, %v3558_v49 }
0x36c8   :  { %3535 = vrot.lane.b32.xlu1 %v3533_v25, %s6570_s3 }
0x36c9   :  { %3562 = vrot.lane.b32.xlu0 %v3560_v7, %s6570_s3 }
0x373a   :  { %v3536_v43 = vpop.permute.xlu1 %3535 }
0x373b   :  { %v7873_v36 = vadd.f32 %v3536_v43, %v3528_v30  ;;  %v3563_v33 = vpop.permute.xlu0 %3562 }
0x373c   :  { %v7875_v59 = vadd.f32 %v3563_v33, %v3555_v48 }
0x373d   :  { %6189 = vtanh.f32 %v7873_v36  ;;  %v3670_v55 = vrot.slane %v7873_v36, 6 }
0x373e   :  { %6191 = vtanh.f32 %v7875_v59  ;;  %v3697_v43 = vrot.slane %v7875_v59, 2 }
0x374a   :  { %v6190_v53 = vpop.eup %6189 }
0x374b   :  { %v6192_v34 = vpop.eup %6191  ;;  %3541 = vrot.lane.b32.xlu1 %v6190_v53, %s6570_s3 }
0x374c   :  { %3568 = vrot.lane.b32.xlu0 %v6192_v34, %s6570_s3 }
0x37bd   :  { %v3542_v41 = vpop.permute.xlu1 %3541 }
0x37be   :  { %v3544_v32 = vmul.f32 %v6186_v15, %v3542_v41  ;;  %v3569_v37 = vpop.permute.xlu0 %3568 }
0x37bf   :  { %v7881_v62 = vmul.f32 %v6188_v50, %v3569_v37 }
0x37c0   :  { %3573 = vrot.lane.b32.xlu0 %v3544_v32, %s6572_s2 }
0x37c1   :  { %v3577_v56 = vrot.slane %v7881_v62, 2 }
0x37c3   :  { %3578 = vrot.lane.b32.xlu1 %v3577_v56, %s6571_s22 }
0x3832   :  { %v7886_v18 = vpop.permute.xlu0 %3573 }
0x3835   :  { %v3579_v35 = vpop.permute.xlu1 %3578 }
0x3836   :  { %v3581_v3 = vsel %vm297_vm3, %v7886_v18, %v3579_v35 }
0x3837   :  { %v3583_v4 = vrot.slane %v3581_v3, 6 }
0x3839   :  { %5740 = vmatmul.mubr.msk.f32.vlgmr.msra.gmra.mxu1 %vm179_vm0, %v3583_v4 }
0x383a   :  { %3893 = vmatpush1.msra.mxu1 %v7600_v19  ;;  %3940 = vmatprep.mubr.f32.mxu1 %v6569_v1 }
0x383b   :  { %3894 = vmatprep.subr.mxu1 %v7604_v51 }
0x383c   :  { %3895 = vmatpush1.msra.mxu1 %v7608_v61 }
0x383d   :  { %3896 = vmatprep.subr.mxu1 %v7612_v60 }
0x383e   :  { %3897 = vmatpush1.msra.mxu1 %v7616_v5 }
0x383f   :  { %3898 = vmatprep.subr.mxu1 %v7621_v24 }
0x3840   :  { %3899 = vmatpush1.msra.mxu1 %v7625_v21 }
0x3841   :  { %3900 = vmatprep.subr.mxu1 %v7628_v16 }
0x3842   :  { %3901 = vmatpush1.msra.mxu1 %v7631_v14 }
0x3843   :  { %3902 = vmatprep.subr.mxu1 %v7638_v20 }
0x3844   :  { %3903 = vmatpush1.msra.mxu1 %v7641_v54 }
0x3845   :  { %3904 = vmatprep.subr.mxu1 %v7644_v13 }
0x3846   :  { %3905 = vmatpush1.msra.mxu1 %v7647_v46 }
0x3847   :  { %3906 = vmatprep.subr.mxu1 %v7650_v27 }
0x3848   :  { %3907 = vmatpush1.msra.mxu1 %v7653_v28 }
0x38f9   :  { %v3652_v6 = vpop.f32.mrf.mxu1 }
0x38fa   :  { %v3657_v8 = vadd.f32 %v3652_v6, %v7735_v52 }
0x38fb   :  { %v3654_v38 = vpop.f32.mrf.mxu1 }
0x38fc   :  { %6193 = vtanh.f32 %v3657_v8  ;;  %v3659_v26 = vrot.slane %v3654_v38, 2  ;;  %v5741_v29 = vmul.f32 -1.442695, %v3657_v8 }
0x38fe   :  { %v3661_v17 = vadd.f32 %v3659_v26, %v7732_v57 }
0x3900   :  { %6195 = vtanh.f32 %v3661_v17  ;;  %v5742_v12 = vmul.f32 -1.442695, %v3661_v17 }
0x3901   :  { %6197 = vpow2.f32 %v5741_v29 }
0x3902   :  { %6199 = vpow2.f32 %v5742_v12 }
0x3909   :  { %v6194_v39 = vpop.eup %6193 }
0x390a   :  { %3674 = vrot.lane.b32.xlu1 %v6194_v39, %s6570_s3 }
0x390d   :  { %v6196_v40 = vpop.eup %6195 }
0x390e   :  { %3701 = vrot.lane.b32.xlu0 %v6196_v40, %s6570_s3  ;;  %v6198_v11 = vpop.eup %6197 }
0x390f   :  { %v3665_v42 = vadd.f32 1.0, %v6198_v11  ;;  %v6200_v22 = vpop.eup %6199 }
0x3910   :  { %v3692_v44 = vadd.f32 1.0, %v6200_v22 }
0x3911   :  { %6201 = vrcp.f32 %v3665_v42 }
0x3912   :  { %6203 = vrcp.f32 %v3692_v44 }
0x391e   :  { %v6202_v15 = vpop.eup %6201 }
0x391f   :  { %v6204_v25 = vpop.eup %6203  ;;  %v3672_v23 = vmul.f32 %v6202_v15, %v3670_v55 }
0x3920   :  { %v3699_v33 = vmul.f32 %v6204_v25, %v3697_v43 }
0x397c   :  { %v3675_v31 = vpop.permute.xlu1 %3674 }
0x397d   :  { %v3677_v50 = vmul.f32 %v6202_v15, %v3675_v31 }
0x397f   :  { %3679 = vrot.lane.b32.xlu1 %v3677_v50, %s6570_s3 }
0x3980   :  { %v3702_v49 = vpop.permute.xlu0 %3701 }
0x3981   :  { %v3704_v7 = vmul.f32 %v6204_v25, %v3702_v49 }
0x3983   :  { %3706 = vrot.lane.b32.xlu0 %v3704_v7, %s6570_s3 }
0x39f1   :  { %v3680_v30 = vpop.permute.xlu1 %3679 }
0x39f2   :  { %v7915_v48 = vadd.f32 %v3680_v30, %v3672_v23 }
0x39f4   :  { %6205 = vtanh.f32 %v7915_v48  ;;  %v3816_v40 = vrot.slane %v7915_v48, 6 }
0x39f5   :  { %v3707_v53 = vpop.permute.xlu0 %3706 }
0x39f6   :  { %v7918_v34 = vadd.f32 %v3707_v53, %v3699_v33 }
0x39f8   :  { %6207 = vtanh.f32 %v7918_v34  ;;  %v3843_v12 = vrot.slane %v7918_v34, 2 }
0x3a01   :  { %v6206_v41 = vpop.eup %6205 }
0x3a02   :  { %3685 = vrot.lane.b32.xlu1 %v6206_v41, %s6570_s3 }
0x3a05   :  { %v6208_v32 = vpop.eup %6207 }
0x3a06   :  { %3712 = vrot.lane.b32.xlu0 %v6208_v32, %s6570_s3 }
0x3a74   :  { %v3686_v36 = vpop.permute.xlu1 %3685 }
0x3a75   :  { %v3688_v37 = vmul.f32 %v6202_v15, %v3686_v36 }
0x3a77   :  { %3717 = vrot.lane.b32.xlu0 %v3688_v37, %s6572_s2 }
0x3a78   :  { %v3713_v59 = vpop.permute.xlu0 %3712 }
0x3a79   :  { %v7924_v56 = vmul.f32 %v6204_v25, %v3713_v59 }
0x3a7b   :  { %v3721_v35 = vrot.slane %v7924_v56, 6 }
0x3a7d   :  { %3722 = vrot.lane.b32.xlu1 %v3721_v35, %s6571_s22 }
0x3ae9   :  { %v7928_v3 = vpop.permute.xlu0 %3717 }
0x3aef   :  { %v3723_v4 = vpop.permute.xlu1 %3722 }
0x3af0   :  { %v3725_v6 = vsel %vm297_vm3, %v7928_v3, %v3723_v4 }
0x3af1   :  { %5743 = vmatmul.mubr.msk.f32.vlgmr.msra.gmra.mxu0 %vm179_vm0, %v3725_v6 }
0x3af2   :  { %4040 = vmatpush1.msra.mxu0 %v7600_v19  ;;  %4087 = vmatprep.mubr.f32.mxu0 %v6569_v1 }
0x3af3   :  { %4041 = vmatprep.subr.mxu0 %v7604_v51 }
0x3af4   :  { %4042 = vmatpush1.msra.mxu0 %v7608_v61 }
0x3af5   :  { %4043 = vmatprep.subr.mxu0 %v7612_v60 }
0x3af6   :  { %4044 = vmatpush1.msra.mxu0 %v7616_v5 }
0x3af7   :  { %4045 = vmatprep.subr.mxu0 %v7621_v24 }
0x3af8   :  { %4046 = vmatpush1.msra.mxu0 %v7625_v21 }
0x3af9   :  { %4047 = vmatprep.subr.mxu0 %v7628_v16 }
0x3afa   :  { %4048 = vmatpush1.msra.mxu0 %v7631_v14 }
0x3afb   :  { %4049 = vmatprep.subr.mxu0 %v7638_v20 }
0x3afc   :  { %4050 = vmatpush1.msra.mxu0 %v7641_v54 }
0x3afd   :  { %4051 = vmatprep.subr.mxu0 %v7644_v13 }
0x3afe   :  { %4052 = vmatpush1.msra.mxu0 %v7647_v46 }
0x3aff   :  { %4053 = vmatprep.subr.mxu0 %v7650_v27 }
0x3b00   :  { %4054 = vmatpush1.msra.mxu0 %v7653_v28 }
0x3bb1   :  { %v3795_v19 = vpop.f32.mrf.mxu0 }
0x3bb2   :  { %v3801_v51 = vrot.slane %v3795_v19, 6 }
0x3bb3   :  { %v3797_v61 = vpop.f32.mrf.mxu0 }
0x3bb4   :  { %v3803_v60 = vadd.f32 %v3801_v51, %v7735_v52  ;;  %v3805_v5 = vrot.slane %v3797_v61, 4 }
0x3bb6   :  { %6209 = vtanh.f32 %v3803_v60  ;;  %v3807_v24 = vadd.f32 %v3805_v5, %v7732_v57  ;;  %v5744_v14 = vmul.f32 -1.442695, %v3803_v60 }
0x3bb8   :  { %6211 = vtanh.f32 %v3807_v24  ;;  %v5745_v20 = vmul.f32 -1.442695, %v3807_v24 }
0x3bb9   :  { %6213 = vpow2.f32 %v5744_v14 }
0x3bba   :  { %6215 = vpow2.f32 %v5745_v20 }
0x3bc3   :  { %v6210_v21 = vpop.eup %6209 }
0x3bc4   :  { %3820 = vrot.lane.b32.xlu1 %v6210_v21, %s6570_s3 }
0x3bc5   :  { %v6212_v16 = vpop.eup %6211 }
0x3bc6   :  { %3847 = vrot.lane.b32.xlu0 %v6212_v16, %s6570_s3  ;;  %v6214_v54 = vpop.eup %6213 }
0x3bc7   :  { %v6216_v13 = vpop.eup %6215  ;;  %v3811_v46 = vadd.f32 1.0, %v6214_v54 }
0x3bc8   :  { %v3838_v27 = vadd.f32 1.0, %v6216_v13 }
0x3bc9   :  { %6217 = vrcp.f32 %v3811_v46 }
0x3bca   :  { %6219 = vrcp.f32 %v3838_v27 }
0x3bd6   :  { %v6218_v28 = vpop.eup %6217 }
0x3bd7   :  { %v6220_v26 = vpop.eup %6219  ;;  %v3818_v29 = vmul.f32 %v6218_v28, %v3816_v40 }
0x3bd8   :  { %v3845_v22 = vmul.f32 %v6220_v26, %v3843_v12 }
0x3c36   :  { %v3821_v8 = vpop.permute.xlu1 %3820 }
0x3c37   :  { %v3823_v38 = vmul.f32 %v6218_v28, %v3821_v8 }
0x3c38   :  { %v3848_v17 = vpop.permute.xlu0 %3847 }
0x3c39   :  { %3825 = vrot.lane.b32.xlu1 %v3823_v38, %s6570_s3  ;;  %v3850_v39 = vmul.f32 %v6220_v26, %v3848_v17 }
0x3c3b   :  { %3852 = vrot.lane.b32.xlu0 %v3850_v39, %s6570_s3 }
0x3cab   :  { %v3826_v11 = vpop.permute.xlu1 %3825 }
0x3cac   :  { %v3828_v42 = vadd.f32 %v3826_v11, %v3818_v29 }
0x3cad   :  { %v3853_v44 = vpop.permute.xlu0 %3852 }
0x3cae   :  { %6221 = vtanh.f32 %v3828_v42  ;;  %v3855_v15 = vadd.f32 %v3853_v44, %v3845_v22  ;;  %v3963_v54 = vrot.slane %v3828_v42, 6 }
0x3cb0   :  { %6223 = vtanh.f32 %v3855_v15  ;;  %v3990_v46 = vrot.slane %v3855_v15, 2 }
0x3cbb   :  { %v6222_v31 = vpop.eup %6221 }
0x3cbc   :  { %3831 = vrot.lane.b32.xlu1 %v6222_v31, %s6570_s3 }
0x3cbd   :  { %v6224_v50 = vpop.eup %6223 }
0x3cbe   :  { %3858 = vrot.lane.b32.xlu0 %v6224_v50, %s6570_s3 }
0x3d2e   :  { %v3832_v25 = vpop.permute.xlu1 %3831 }
0x3d2f   :  { %v3834_v49 = vmul.f32 %v6218_v28, %v3832_v25 }
0x3d30   :  { %v3859_v7 = vpop.permute.xlu0 %3858 }
0x3d31   :  { %3863 = vrot.lane.b32.xlu0 %v3834_v49, %s6572_s2  ;;  %v7960_v55 = vmul.f32 %v6220_v26, %v3859_v7 }
0x3d33   :  { %v3867_v23 = vrot.slane %v7960_v55, 2 }
0x3d35   :  { %3868 = vrot.lane.b32.xlu1 %v3867_v23, %s6571_s22 }
0x3da3   :  { %v7964_v30 = vpop.permute.xlu0 %3863 }
0x3da7   :  { %v3869_v43 = vpop.permute.xlu1 %3868 }
0x3da8   :  { %v3871_v48 = vsel %vm297_vm3, %v7964_v30, %v3869_v43 }
0x3da9   :  { %v3873_v33 = vrot.slane %v3871_v48, 2 }
0x3dab   :  { %5746 = vmatmul.mubr.msk.f32.vlgmr.msra.gmra.mxu1 %vm179_vm0, %v3873_v33 }
0x3dac   :  { %4310 = vmatprep.mubr.f32.mxu1 %v6569_v1 }
0x3e6b   :  { %v3942_v53 = vpop.f32.mrf.mxu1 }
0x3e6c   :  { %v3948_v34 = vrot.slane %v3942_v53, 4 }
0x3e6d   :  { %v3944_v41 = vpop.f32.mrf.mxu1 }
0x3e6e   :  { %v3950_v32 = vadd.f32 %v3948_v34, %v7735_v52  ;;  %v3952_v36 = vrot.slane %v3944_v41, 6 }
0x3e70   :  { %6225 = vtanh.f32 %v3950_v32  ;;  %v3954_v37 = vadd.f32 %v3952_v36, %v7732_v57  ;;  %v5747_v4 = vmul.f32 -1.442695, %v3950_v32 }
0x3e72   :  { %6227 = vtanh.f32 %v3954_v37  ;;  %v5748_v6 = vmul.f32 -1.442695, %v3954_v37 }
0x3e73   :  { %6229 = vpow2.f32 %v5747_v4 }
0x3e74   :  { %6231 = vpow2.f32 %v5748_v6 }
0x3e7d   :  { %v6226_v59 = vpop.eup %6225 }
0x3e7e   :  { %3967 = vrot.lane.b32.xlu1 %v6226_v59, %s6570_s3 }
0x3e7f   :  { %v6228_v35 = vpop.eup %6227 }
0x3e80   :  { %3994 = vrot.lane.b32.xlu0 %v6228_v35, %s6570_s3  ;;  %v6230_v19 = vpop.eup %6229 }
0x3e81   :  { %v6232_v51 = vpop.eup %6231  ;;  %v3958_v61 = vadd.f32 1.0, %v6230_v19 }
0x3e82   :  { %v3985_v60 = vadd.f32 1.0, %v6232_v51 }
0x3e83   :  { %6233 = vrcp.f32 %v3958_v61 }
0x3e84   :  { %6235 = vrcp.f32 %v3985_v60 }
0x3e90   :  { %v6234_v5 = vpop.eup %6233 }
0x3e91   :  { %v6236_v16 = vpop.eup %6235  ;;  %v3965_v13 = vmul.f32 %v6234_v5, %v3963_v54  ;;  %v4226_v54 = vld [vmem:[#allocation10 + $0x70] sm:$0xff] }
0x3e92   :  { %v3992_v8 = vmul.f32 %v6236_v16, %v3990_v46  ;;  %v8005_v46 = vld [vmem:[#allocation11 + $0x78] sm:$0xff] }
0x3e93   :  { %4339 = vmatprep.subr.mxu0 %v8005_v46 }
0x3ef0   :  { %v3968_v24 = vpop.permute.xlu1 %3967 }
0x3ef1   :  { %v3970_v21 = vmul.f32 %v6234_v5, %v3968_v24 }
0x3ef2   :  { %v3995_v14 = vpop.permute.xlu0 %3994 }
0x3ef3   :  { %3972 = vrot.lane.b32.xlu1 %v3970_v21, %s6570_s3  ;;  %v3997_v20 = vmul.f32 %v6236_v16, %v3995_v14 }
0x3ef5   :  { %3999 = vrot.lane.b32.xlu0 %v3997_v20, %s6570_s3  ;;  %v4227_v20 = vld [vmem:[#allocation10 + $0x78] sm:$0xff] }
0x3ef6   :  { %4262 = vmatprep.subr.mxu1 %v4227_v20 }
0x3ef7   :  { %4263 = vmatpush1.msra.mxu1 %v4226_v54 }
0x3f65   :  { %v3973_v27 = vpop.permute.xlu1 %3972 }
0x3f66   :  { %v3975_v28 = vadd.f32 %v3973_v27, %v3965_v13  ;;  %v4225_v13 = vld [vmem:[#allocation10 + $0x68] sm:$0xff]  ;;  %v4224_v27 = vld [vmem:[#allocation10 + $0x60] sm:$0xff] }
0x3f67   :  { %v4000_v38 = vpop.permute.xlu0 %3999  ;;  %4264 = vmatprep.subr.mxu1 %v4225_v13 }
0x3f68   :  { %6237 = vtanh.f32 %v3975_v28  ;;  %v4002_v26 = vadd.f32 %v4000_v38, %v3992_v8  ;;  %v4107_v6 = vrot.slane %v3975_v28, 6  ;;  %v8007_v28 = vld [vmem:[#allocation11 + $0x70] sm:$0xff]  ;;  %v4223_v8 = vld [vmem:[#allocation10 + $0x58] sm:$0xff]  ;;  %v8011_v38 = vld [vmem:[#allocation11 + $0x68] sm:$0xff]  ;;  %4265 = vmatpush1.msra.mxu1 %v4224_v27 }
0x3f69   :  { %4266 = vmatprep.subr.mxu1 %v4223_v8 }
0x3f6a   :  { %6239 = vtanh.f32 %v4002_v26  ;;  %v4134_v19 = vrot.slane %v4002_v26, 2  ;;  %v4222_v26 = vld [vmem:[#allocation10 + $0x50] sm:$0xff] }
0x3f6b   :  { %4267 = vmatpush1.msra.mxu1 %v4222_v26 }
0x3f75   :  { %v6238_v17 = vpop.eup %6237 }
0x3f76   :  { %3978 = vrot.lane.b32.xlu1 %v6238_v17, %s6570_s3  ;;  %v8015_v17 = vld [vmem:[#allocation11 + $0x60] sm:$0xff] }
0x3f77   :  { %v6240_v39 = vpop.eup %6239 }
0x3f78   :  { %4005 = vrot.lane.b32.xlu0 %v6240_v39, %s6570_s3  ;;  %v4221_v39 = vld [vmem:[#allocation10 + $0x48] sm:$0xff] }
0x3f79   :  { %4268 = vmatprep.subr.mxu1 %v4221_v39 }
0x3fe8   :  { %v3979_v40 = vpop.permute.xlu1 %3978 }
0x3fe9   :  { %v3981_v29 = vmul.f32 %v6234_v5, %v3979_v40  ;;  %v8019_v40 = vld [vmem:[#allocation11 + $0x58] sm:$0xff] }
0x3fea   :  { %v4006_v12 = vpop.permute.xlu0 %4005 }
0x3feb   :  { %4010 = vrot.lane.b32.xlu0 %v3981_v29, %s6572_s2  ;;  %v7979_v11 = vmul.f32 %v6236_v16, %v4006_v12  ;;  %v4220_v29 = vld [vmem:[#allocation10 + $0x40] sm:$0xff]  ;;  %v8023_v12 = vld [vmem:[#allocation11 + $0x50] sm:$0xff] }
0x3fec   :  { %4269 = vmatpush1.msra.mxu1 %v4220_v29 }
0x3fed   :  { %v4014_v42 = vrot.slane %v7979_v11, 6 }
0x3fef   :  { %4015 = vrot.lane.b32.xlu1 %v4014_v42, %s6571_s22  ;;  %v8028_v42 = vld [vmem:[#allocation11 + $0x48] sm:$0xff] }
0x405d   :  { %v7983_v22 = vpop.permute.xlu0 %4010 }
0x4061   :  { %v4016_v44 = vpop.permute.xlu1 %4015 }
0x4062   :  { %v4018_v15 = vsel %vm297_vm3, %v7983_v22, %v4016_v44  ;;  %v8032_v44 = vld [vmem:[#allocation11 + $0x40] sm:$0xff] }
0x4063   :  { %v4020_v31 = vrot.slane %v4018_v15, 4  ;;  %v4217_v15 = vld [vmem:[#allocation10 + $0x28] sm:$0xff] }
0x4065   :  { %5749 = vmatmul.mubr.msk.f32.vlgmr.msra.gmra.mxu0 %vm179_vm0, %v4020_v31  ;;  %v8035_v31 = vld [vmem:[#allocation11 + $0x38] sm:$0xff] }
0x4066   :  { %4387 = vmatprep.mubr.f32.mxu0 %v6569_v1  ;;  %4340 = vmatpush1.msra.mxu0 %v8007_v28 }
0x4067   :  { %4341 = vmatprep.subr.mxu0 %v8011_v38 }
0x4068   :  { %4342 = vmatpush1.msra.mxu0 %v8015_v17 }
0x4069   :  { %4343 = vmatprep.subr.mxu0 %v8019_v40 }
0x406a   :  { %4344 = vmatpush1.msra.mxu0 %v8023_v12 }
0x406b   :  { %4345 = vmatprep.subr.mxu0 %v8028_v42 }
0x406c   :  { %4346 = vmatpush1.msra.mxu0 %v8032_v44 }
0x406d   :  { %4347 = vmatprep.subr.mxu0 %v8035_v31 }
0x4125   :  { %v4089_v50 = vpop.f32.mrf.mxu0 }
0x4126   :  { %v4095_v25 = vrot.slane %v4089_v50, 2  ;;  %v8038_v50 = vld [vmem:[#allocation11 + $0x30] sm:$0xff] }
0x4127   :  { %v4091_v49 = vpop.f32.mrf.mxu0  ;;  %4348 = vmatpush1.msra.mxu0 %v8038_v50 }
0x4128   :  { %v4097_v7 = vadd.f32 %v4095_v25, %v7735_v52  ;;  %v4098_v23 = vadd.f32 %v4091_v49, %v7732_v57  ;;  %v8045_v25 = vld [vmem:[#allocation11 + $0x28] sm:$0xff]  ;;  %v4214_v49 = vld [vmem:[#allocation10 + $0x10] sm:$0xff] }
0x4129   :  { %4349 = vmatprep.subr.mxu0 %v8045_v25 }
0x412a   :  { %6241 = vtanh.f32 %v4097_v7  ;;  %v5750_v33 = vmul.f32 -1.442695, %v4097_v7  ;;  %v5751_v53 = vmul.f32 -1.442695, %v4098_v23  ;;  %v8048_v7 = vld [vmem:[#allocation11 + $0x20] sm:$0xff] }
0x412b   :  { %6243 = vtanh.f32 %v4098_v23  ;;  %4350 = vmatpush1.msra.mxu0 %v8048_v7  ;;  %v8051_v23 = vld [vmem:[#allocation11 + $0x18] sm:$0xff] }
0x412c   :  { %6245 = vpow2.f32 %v5750_v33  ;;  %4351 = vmatprep.subr.mxu0 %v8051_v23  ;;  %v8057_v33 = vld [vmem:[#allocation11 + $0x8] sm:$0xff] }
0x412d   :  { %6247 = vpow2.f32 %v5751_v53  ;;  %v8060_v53 = vld [vmem:[#allocation11] sm:$0xff] }
0x4137   :  { %v6242_v43 = vpop.eup %6241 }
0x4138   :  { %v6244_v48 = vpop.eup %6243  ;;  %4111 = vrot.lane.b32.xlu1 %v6242_v43, %s6570_s3  ;;  %v4212_v43 = vld [vmem:[#allocation10] sm:$0xff] }
0x4139   :  { %4138 = vrot.lane.b32.xlu0 %v6244_v48, %s6570_s3  ;;  %v6246_v34 = vpop.eup %6245  ;;  %v8054_v48 = vld [vmem:[#allocation11 + $0x10] sm:$0xff] }
0x413a   :  { %v6248_v41 = vpop.eup %6247  ;;  %v4102_v32 = vadd.f32 1.0, %v6246_v34  ;;  %4352 = vmatpush1.msra.mxu0 %v8054_v48 }
0x413b   :  { %v4129_v36 = vadd.f32 1.0, %v6248_v41  ;;  %4353 = vmatprep.subr.mxu0 %v8057_v33 }
0x413c   :  { %6249 = vrcp.f32 %v4102_v32  ;;  %4354 = vmatpush1.msra.mxu0 %v8060_v53 }
0x413d   :  { %6251 = vrcp.f32 %v4129_v36  ;;  %4388 = vmatmul.mubr.f32.vlgmr.msra.gmra.mxu0 %v6569_v1  ;;  %4623 = vmatprep.subr.mxu0 %v8005_v46 }
0x413e   :  { %4624 = vmatpush1.msra.mxu0 %v8007_v28  ;;  %4671 = vmatprep.mubr.f32.mxu0 %v6569_v1 }
0x413f   :  { %4625 = vmatprep.subr.mxu0 %v8011_v38 }
0x4140   :  { %4626 = vmatpush1.msra.mxu0 %v8015_v17 }
0x4141   :  { %4627 = vmatprep.subr.mxu0 %v8019_v40 }
0x4142   :  { %4628 = vmatpush1.msra.mxu0 %v8023_v12 }
0x4143   :  { %4629 = vmatprep.subr.mxu0 %v8028_v42 }
0x4144   :  { %4630 = vmatpush1.msra.mxu0 %v8032_v44 }
0x4145   :  { %4631 = vmatprep.subr.mxu0 %v8035_v31 }
0x4146   :  { %4632 = vmatpush1.msra.mxu0 %v8038_v50 }
0x4147   :  { %4633 = vmatprep.subr.mxu0 %v8045_v25 }
0x4148   :  { %4634 = vmatpush1.msra.mxu0 %v8048_v7 }
0x4149   :  { %v7993_v52 = vpop.eup %6249  ;;  %4635 = vmatprep.subr.mxu0 %v8051_v23 }
0x414a   :  { %v7995_v37 = vpop.eup %6251  ;;  %v4109_v51 = vmul.f32 %v7993_v52, %v4107_v6  ;;  %4636 = vmatpush1.msra.mxu0 %v8054_v48 }
0x414b   :  { %v4136_v60 = vmul.f32 %v7995_v37, %v4134_v19  ;;  %4637 = vmatprep.subr.mxu0 %v8057_v33 }
0x414c   :  { %4638 = vmatpush1.msra.mxu0 %v8060_v53 }
0x414d   :  { %4914 = vmatprep.subr.mxu0 %v8005_v46 }
0x41aa   :  { %v4112_v57 = vpop.permute.xlu1 %4111 }
0x41ab   :  { %v4114_v59 = vmul.f32 %v7993_v52, %v4112_v57  ;;  %v4139_v35 = vpop.permute.xlu0 %4138 }
0x41ac   :  { %v4141_v4 = vmul.f32 %v7995_v37, %v4139_v35 }
0x41ad   :  { %4116 = vrot.lane.b32.xlu1 %v4114_v59, %s6570_s3 }
0x41ae   :  { %4143 = vrot.lane.b32.xlu0 %v4141_v4, %s6570_s3 }
0x41fd   :  { %v4389_v13 = vpop.f32.mrf.mxu0 }
0x421f   :  { %v4117_v61 = vpop.permute.xlu1 %4116 }
0x4220   :  { %v4119_v5 = vadd.f32 %v4117_v61, %v4109_v51  ;;  %v4144_v24 = vpop.permute.xlu0 %4143 }
0x4221   :  { %v4146_v21 = vadd.f32 %v4144_v24, %v4136_v60 }
0x4222   :  { %6253 = vtanh.f32 %v4119_v5 }
0x4223   :  { %6255 = vtanh.f32 %v4146_v21 }
0x422f   :  { %v6254_v16 = vpop.eup %6253 }
0x4230   :  { %v6256_v14 = vpop.eup %6255  ;;  %4122 = vrot.lane.b32.xlu1 %v6254_v16, %s6570_s3 }
0x4231   :  { %4149 = vrot.lane.b32.xlu0 %v6256_v14, %s6570_s3 }
0x4234   :  { %4158 = vrot.lane.b32.xlu1 %v7979_v11, %s6571_s22  ;;  %v4219_v11 = vld [vmem:[#allocation10 + $0x38] sm:$0xff] }
0x4235   :  { %4162 = vrot.lane.b32.xlu0 %v7960_v55, %s6571_s22  ;;  %v4218_v55 = vld [vmem:[#allocation10 + $0x30] sm:$0xff]  ;;  %4270 = vmatprep.subr.mxu1 %v4219_v11  ;;  %v4391_v11 = vpop.f32.mrf.mxu0 }
0x4236   :  { %4271 = vmatpush1.msra.mxu1 %v4218_v55 }
0x4237   :  { %4272 = vmatprep.subr.mxu1 %v4217_v15 }
0x4238   :  { %4166 = vrot.lane.b32.xlu1 %v7924_v56, %s6571_s22  ;;  %v4216_v56 = vld [vmem:[#allocation10 + $0x20] sm:$0xff] }
0x4239   :  { %4170 = vrot.lane.b32.xlu0 %v7881_v62, %s6571_s22  ;;  %4273 = vmatpush1.msra.mxu1 %v4216_v56  ;;  %v4215_v62 = vld [vmem:[#allocation10 + $0x18] sm:$0xff]  ;;  %v4396_v56 = vrot.slane %v4391_v11, 2 }
0x423a   :  { %4274 = vmatprep.subr.mxu1 %v4215_v62 }
0x423b   :  { %4275 = vmatpush1.msra.mxu1 %v4214_v49 }
0x423c   :  { %4174 = vrot.lane.b32.xlu1 %v7839_v9, %s6571_s22  ;;  %v4213_v9 = vld [vmem:[#allocation10 + $0x8] sm:$0xff] }
0x423d   :  { %4276 = vmatprep.subr.mxu1 %v4213_v9 }
0x423e   :  { %4277 = vmatpush1.msra.mxu1 %v4212_v43 }
0x423f   :  { %4476 = vmatprep.subr.mxu1 %v8005_v46 }
0x42a2   :  { %v4123_v34 = vpop.permute.xlu1 %4122 }
0x42a3   :  { %v4125_v41 = vmul.f32 %v7993_v52, %v4123_v34  ;;  %v4150_v32 = vpop.permute.xlu0 %4149 }
0x42a4   :  { %v4152_v36 = vmul.f32 %v7995_v37, %v4150_v32 }
0x42a5   :  { %4183 = vrot.lane.b32.xlu1 %v4125_v41, %s6572_s2 }
0x42a6   :  { %4154 = vrot.lane.b32.xlu0 %v4152_v36, %s6571_s22  ;;  %v4159_v52 = vpop.permute.xlu1 %4158 }
0x42a7   :  { %v4163_v57 = vpop.permute.xlu0 %4162  ;;  %v4161_v35 = vsel %vm297_vm3, %v7800_v63, %v4159_v52 }
0x42a8   :  { %v4165_v6 = vsel %vm297_vm3, %v7843_v10, %v4163_v57 }
0x42aa   :  { %4178 = vrot.lane.b32.xlu0 %v7796_v0, %s6571_s22  ;;  %v4167_v37 = vpop.permute.xlu1 %4166 }
0x42ab   :  { %v4171_v59 = vpop.permute.xlu0 %4170  ;;  %v4169_v51 = vsel %vm297_vm3, %v7886_v18, %v4167_v37 }
0x42ac   :  { %v4173_v10 = vsel %vm297_vm3, %v7928_v3, %v4171_v59  ;;  %v4228_v3 = vld [vmem:[%s8424_s12] sm:$0x3] }
0x42ad   :  { %v4233_v14 = vrot.slane %v4228_v3, %v6912_v47  ;;  %v4237_v20 = vrot.slane %v4228_v3, %v6907_v45 }
0x42ae   :  { %4186 = vrot.lane.b32.xlu0 %v7753_v2, %s6571_s22  ;;  %v4175_v19 = vpop.permute.xlu1 %4174 }
0x42af   :  { %v4177_v63 = vsel %vm297_vm3, %v7964_v30, %v4175_v19 }
0x42b0   :  { %v4193_v18 = vsel %vm1563_vm5, %v4173_v10, %v4177_v63 }
0x4317   :  { %v4184_v24 = vpop.permute.xlu1 %4183 }
0x4318   :  { %v4155_v0 = vpop.permute.xlu0 %4154 }
0x4319   :  { %v4157_v4 = vsel %vm297_vm3, %v7757_v58, %v4155_v0 }
0x431a   :  { %v4190_v2 = vsel %vm1563_vm5, %v4157_v4, %v4161_v35 }
0x431b   :  { %v4191_v61 = vsel %vm1565_vm4, %v4190_v2, %v4165_v6 }
0x431c   :  { %v4179_v60 = vpop.permute.xlu0 %4178  ;;  %v4192_v5 = vsel %vm1567_vm6, %v4191_v61, %v4169_v51 }
0x431d   :  { %5752 = vmatmul.mubr.msk.f32.vlgmr.msra.gmra.mxu1 %vm179_vm0, %v4192_v5  ;;  %v4181_v58 = vsel %vm297_vm3, %v7983_v22, %v4179_v60 }
0x431e   :  { %4316 = vmatprep.mubr.f32.mxu1 %v6569_v1  ;;  %4477 = vmatpush1.msra.mxu1 %v8007_v28  ;;  %v4194_v30 = vsel %vm1565_vm4, %v4193_v18, %v4181_v58 }
0x431f   :  { %4478 = vmatprep.subr.mxu1 %v8011_v38 }
0x4320   :  { %v4187_v21 = vpop.permute.xlu0 %4186  ;;  %4479 = vmatpush1.msra.mxu1 %v8015_v17 }
0x4321   :  { %v4189_v16 = vsel %vm297_vm3, %v4184_v24, %v4187_v21  ;;  %4480 = vmatprep.subr.mxu1 %v8019_v40 }
0x4322   :  { %v4195_v22 = vsel %vm1567_vm6, %v4194_v30, %v4189_v16  ;;  %4481 = vmatpush1.msra.mxu1 %v8023_v12 }
0x4323   :  { %5753 = vmatmul.mubr.msk.f32.gmra.mxu1 %vm179_vm0, %v4195_v22  ;;  %4482 = vmatprep.subr.mxu1 %v8028_v42 }
0x4324   :  { %4483 = vmatpush1.msra.mxu1 %v8032_v44  ;;  %4524 = vmatprep.mubr.f32.mxu1 %v6569_v1 }
0x4325   :  { %4484 = vmatprep.subr.mxu1 %v8035_v31 }
0x4326   :  { %4485 = vmatpush1.msra.mxu1 %v8038_v50 }
0x4327   :  { %4486 = vmatprep.subr.mxu1 %v8045_v25 }
0x4328   :  { %4487 = vmatpush1.msra.mxu1 %v8048_v7 }
0x4329   :  { %4488 = vmatprep.subr.mxu1 %v8051_v23 }
0x432a   :  { %4489 = vmatpush1.msra.mxu1 %v8054_v48 }
0x432b   :  { %4490 = vmatprep.subr.mxu1 %v8057_v33 }
0x432c   :  { %4491 = vmatpush1.msra.mxu1 %v8060_v53 }
0x432d   :  { %4770 = vmatprep.subr.mxu1 %v8005_v46 }
0x43dd   :  { %v4312_v54 = vpop.f32.mrf.mxu1 }
0x43de   :  { %v8137_v27 = vadd.f32 %v4312_v54, %v4233_v14 }
0x43df   :  { %v4314_v8 = vpop.f32.mrf.mxu1 }
0x43e0   :  { %v8139_v26 = vadd.f32 %v4314_v8, %v4237_v20  ;;  %v4394_v39 = vadd.f32 %v4389_v13, %v8137_v27 }
0x43e2   :  { %6257 = vtanh.f32 %v4394_v39  ;;  %v5754_v9 = vmul.f32 -1.442695, %v4394_v39 }
0x43e3   :  { %v4318_v29 = vpop.f32.mrf.mxu1 }
0x43e4   :  { %v8142_v55 = vadd.f32 %v4318_v29, %v4233_v14 }
0x43e5   :  { %v4320_v15 = vpop.f32.mrf.mxu1 }
0x43e6   :  { %v8144_v62 = vadd.f32 %v4320_v15, %v4237_v20 }
0x43e8   :  { %v4398_v45 = vadd.f32 %v4396_v56, %v8144_v62 }
0x43ea   :  { %6259 = vtanh.f32 %v4398_v45  ;;  %v5755_v43 = vmul.f32 -1.442695, %v4398_v45 }
0x43eb   :  { %6261 = vpow2.f32 %v5754_v9 }
0x43ec   :  { %6263 = vpow2.f32 %v5755_v43 }
0x43ef   :  { %v6258_v47 = vpop.eup %6257 }
0x43f0   :  { %4408 = vrot.lane.b32.xlu0 %v6258_v47, %s6570_s3 }
0x43f7   :  { %v6260_v49 = vpop.eup %6259 }
0x43f8   :  { %4432 = vrot.lane.b32.xlu1 %v6260_v49, %s6570_s3  ;;  %v6262_v34 = vpop.eup %6261 }
0x43f9   :  { %v4402_v41 = vadd.f32 1.0, %v6262_v34  ;;  %v6264_v32 = vpop.eup %6263 }
0x43fa   :  { %v4426_v36 = vadd.f32 1.0, %v6264_v32 }
0x43fb   :  { %6265 = vrcp.f32 %v4402_v41 }
0x43fc   :  { %6267 = vrcp.f32 %v4426_v36 }
0x4408   :  { %v6266_v52 = vpop.eup %6265 }
0x4409   :  { %v6268_v59 = vpop.eup %6267  ;;  %v4406_v4 = vmul.f32 0.0, %v6266_v52 }
0x440a   :  { %v4430_v2 = vmul.f32 0.0, %v6268_v59 }
0x4462   :  { %v4409_v57 = vpop.permute.xlu0 %4408 }
0x4463   :  { %v4411_v37 = vmul.f32 %v6266_v52, %v4409_v57 }
0x4465   :  { %4413 = vrot.lane.b32.xlu0 %v4411_v37, %s6570_s3 }
0x446a   :  { %v4433_v0 = vpop.permute.xlu1 %4432 }
0x446b   :  { %v4435_v35 = vmul.f32 %v6268_v59, %v4433_v0 }
0x446d   :  { %4437 = vrot.lane.b32.xlu1 %v4435_v35, %s6570_s3 }
0x44d7   :  { %v4414_v6 = vpop.permute.xlu0 %4413 }
0x44d8   :  { %v8151_v19 = vadd.f32 %v4414_v6, %v4406_v4 }
0x44da   :  { %6269 = vtanh.f32 %v8151_v19  ;;  %v4547_v36 = vrot.slane %v8151_v19, 6 }
0x44df   :  { %v4438_v51 = vpop.permute.xlu1 %4437 }
0x44e0   :  { %v8154_v61 = vadd.f32 %v4438_v51, %v4430_v2 }
0x44e2   :  { %6271 = vtanh.f32 %v8154_v61  ;;  %v4574_v57 = vrot.slane %v8154_v61, 2 }
0x44e7   :  { %v6270_v60 = vpop.eup %6269 }
0x44e8   :  { %4419 = vrot.lane.b32.xlu0 %v6270_v60, %s6570_s3 }
0x44ef   :  { %v6272_v5 = vpop.eup %6271 }
0x44f0   :  { %4443 = vrot.lane.b32.xlu1 %v6272_v5, %s6570_s3 }
0x455a   :  { %v4420_v63 = vpop.permute.xlu0 %4419 }
0x455b   :  { %v4422_v58 = vmul.f32 %v6266_v52, %v4420_v63 }
0x455d   :  { %4448 = vrot.lane.b32.xlu1 %v4422_v58, %s6572_s2 }
0x4562   :  { %v4444_v10 = vpop.permute.xlu1 %4443 }
0x4563   :  { %v4446_v18 = vmul.f32 %v6268_v59, %v4444_v10 }
0x4565   :  { %v4452_v24 = vrot.slane %v4446_v18, 6 }
0x4567   :  { %4453 = vrot.lane.b32.xlu0 %v4452_v24, %s6571_s22 }
0x45cf   :  { %v4449_v21 = vpop.permute.xlu1 %4448 }
0x45d9   :  { %v4454_v30 = vpop.permute.xlu0 %4453 }
0x45da   :  { %v4456_v16 = vsel %vm297_vm3, %v4449_v21, %v4454_v30 }
0x45db   :  { %5756 = vmatmul.mubr.msk.f32.vlgmr.msra.gmra.mxu1 %vm179_vm0, %v4456_v16 }
0x45dc   :  { %4771 = vmatpush1.msra.mxu1 %v8007_v28  ;;  %4818 = vmatprep.mubr.f32.mxu1 %v6569_v1 }
0x45dd   :  { %4772 = vmatprep.subr.mxu1 %v8011_v38 }
0x45de   :  { %4773 = vmatpush1.msra.mxu1 %v8015_v17 }
0x45df   :  { %4774 = vmatprep.subr.mxu1 %v8019_v40 }
0x45e0   :  { %4775 = vmatpush1.msra.mxu1 %v8023_v12 }
0x45e1   :  { %4776 = vmatprep.subr.mxu1 %v8028_v42 }
0x45e2   :  { %4777 = vmatpush1.msra.mxu1 %v8032_v44 }
0x45e3   :  { %4778 = vmatprep.subr.mxu1 %v8035_v31 }
0x45e4   :  { %4779 = vmatpush1.msra.mxu1 %v8038_v50 }
0x45e5   :  { %4780 = vmatprep.subr.mxu1 %v8045_v25 }
0x45e6   :  { %4781 = vmatpush1.msra.mxu1 %v8048_v7 }
0x45e7   :  { %4782 = vmatprep.subr.mxu1 %v8051_v23 }
0x45e8   :  { %4783 = vmatpush1.msra.mxu1 %v8054_v48 }
0x45e9   :  { %4784 = vmatprep.subr.mxu1 %v8057_v33 }
0x45ea   :  { %4785 = vmatpush1.msra.mxu1 %v8060_v53 }
0x45eb   :  { %5057 = vmatprep.subr.mxu1 %v8005_v46 }
0x469b   :  { %v4526_v22 = vpop.f32.mrf.mxu1 }
0x469c   :  { %v4532_v3 = vrot.slane %v4526_v22, 6 }
0x469d   :  { %v4528_v14 = vpop.f32.mrf.mxu1 }
0x469e   :  { %v4534_v20 = vadd.f32 %v4532_v3, %v8137_v27  ;;  %v4536_v54 = vrot.slane %v4528_v14, 4 }
0x46a0   :  { %6273 = vtanh.f32 %v4534_v20  ;;  %v4538_v13 = vadd.f32 %v4536_v54, %v8144_v62  ;;  %v5757_v29 = vmul.f32 -1.442695, %v4534_v20 }
0x46a2   :  { %6275 = vtanh.f32 %v4538_v13  ;;  %v5758_v11 = vmul.f32 -1.442695, %v4538_v13 }
0x46a3   :  { %6277 = vpow2.f32 %v5757_v29 }
0x46a4   :  { %6279 = vpow2.f32 %v5758_v11 }
0x46ad   :  { %v6274_v8 = vpop.eup %6273 }
0x46ae   :  { %4551 = vrot.lane.b32.xlu0 %v6274_v8, %s6570_s3 }
0x46af   :  { %v6276_v39 = vpop.eup %6275 }
0x46b0   :  { %4578 = vrot.lane.b32.xlu1 %v6276_v39, %s6570_s3  ;;  %v6278_v15 = vpop.eup %6277 }
0x46b1   :  { %v6280_v56 = vpop.eup %6279  ;;  %v4542_v45 = vadd.f32 1.0, %v6278_v15 }
0x46b2   :  { %v4569_v47 = vadd.f32 1.0, %v6280_v56 }
0x46b3   :  { %6281 = vrcp.f32 %v4542_v45 }
0x46b4   :  { %6283 = vrcp.f32 %v4569_v47 }
0x46c0   :  { %v6282_v49 = vpop.eup %6281 }
0x46c1   :  { %v6284_v34 = vpop.eup %6283  ;;  %v4549_v52 = vmul.f32 %v6282_v49, %v4547_v36 }
0x46c2   :  { %v4576_v0 = vmul.f32 %v6284_v34, %v4574_v57 }
0x4720   :  { %v4552_v9 = vpop.permute.xlu0 %4551 }
0x4721   :  { %v4554_v43 = vmul.f32 %v6282_v49, %v4552_v9 }
0x4722   :  { %v4579_v41 = vpop.permute.xlu1 %4578 }
0x4723   :  { %4556 = vrot.lane.b32.xlu0 %v4554_v43, %s6570_s3  ;;  %v4581_v32 = vmul.f32 %v6284_v34, %v4579_v41 }
0x4725   :  { %4583 = vrot.lane.b32.xlu1 %v4581_v32, %s6570_s3 }
0x4795   :  { %v4557_v37 = vpop.permute.xlu0 %4556 }
0x4796   :  { %v8188_v59 = vadd.f32 %v4557_v37, %v4549_v52 }
0x4797   :  { %v4584_v35 = vpop.permute.xlu1 %4583 }
0x4798   :  { %6285 = vtanh.f32 %v8188_v59  ;;  %v8191_v4 = vadd.f32 %v4584_v35, %v4576_v0  ;;  %v4694_v43 = vrot.slane %v8188_v59, 6 }
0x479a   :  { %6287 = vtanh.f32 %v8191_v4  ;;  %v4721_v41 = vrot.slane %v8191_v4, 2 }
0x47a5   :  { %v6286_v6 = vpop.eup %6285 }
0x47a6   :  { %4562 = vrot.lane.b32.xlu0 %v6286_v6, %s6570_s3 }
0x47a7   :  { %v6288_v2 = vpop.eup %6287 }
0x47a8   :  { %4589 = vrot.lane.b32.xlu1 %v6288_v2, %s6570_s3 }
0x4818   :  { %v4563_v19 = vpop.permute.xlu0 %4562 }
0x4819   :  { %v4565_v51 = vmul.f32 %v6282_v49, %v4563_v19 }
0x481a   :  { %v4590_v61 = vpop.permute.xlu1 %4589 }
0x481b   :  { %4594 = vrot.lane.b32.xlu1 %v4565_v51, %s6572_s2  ;;  %v4592_v60 = vmul.f32 %v6284_v34, %v4590_v61 }
0x481d   :  { %v4598_v5 = vrot.slane %v4592_v60, 2 }
0x481f   :  { %4599 = vrot.lane.b32.xlu0 %v4598_v5, %s6571_s22 }
0x488d   :  { %v4595_v63 = vpop.permute.xlu1 %4594 }
0x4891   :  { %v4600_v58 = vpop.permute.xlu0 %4599 }
0x4892   :  { %v4602_v10 = vsel %vm297_vm3, %v4595_v63, %v4600_v58 }
0x4893   :  { %v4604_v18 = vrot.slane %v4602_v10, 2 }
0x4895   :  { %5759 = vmatmul.mubr.msk.f32.vlgmr.msra.gmra.mxu0 %vm179_vm0, %v4604_v18 }
0x4896   :  { %4915 = vmatpush1.msra.mxu0 %v8007_v28  ;;  %4962 = vmatprep.mubr.f32.mxu0 %v6569_v1 }
0x4897   :  { %4916 = vmatprep.subr.mxu0 %v8011_v38 }
0x4898   :  { %4917 = vmatpush1.msra.mxu0 %v8015_v17 }
0x4899   :  { %4918 = vmatprep.subr.mxu0 %v8019_v40 }
0x489a   :  { %4919 = vmatpush1.msra.mxu0 %v8023_v12 }
0x489b   :  { %4920 = vmatprep.subr.mxu0 %v8028_v42 }
0x489c   :  { %4921 = vmatpush1.msra.mxu0 %v8032_v44 }
0x489d   :  { %4922 = vmatprep.subr.mxu0 %v8035_v31 }
0x489e   :  { %4923 = vmatpush1.msra.mxu0 %v8038_v50 }
0x489f   :  { %4924 = vmatprep.subr.mxu0 %v8045_v25 }
0x48a0   :  { %4925 = vmatpush1.msra.mxu0 %v8048_v7 }
0x48a1   :  { %4926 = vmatprep.subr.mxu0 %v8051_v23 }
0x48a2   :  { %4927 = vmatpush1.msra.mxu0 %v8054_v48 }
0x48a3   :  { %4928 = vmatprep.subr.mxu0 %v8057_v33 }
0x48a4   :  { %4929 = vmatpush1.msra.mxu0 %v8060_v53 }
0x48a5   :  { %5204 = vmatprep.subr.mxu0 %v8005_v46 }
0x4955   :  { %v4673_v24 = vpop.f32.mrf.mxu0 }
0x4956   :  { %v4679_v21 = vrot.slane %v4673_v24, 4 }
0x4957   :  { %v4675_v30 = vpop.f32.mrf.mxu0 }
0x4958   :  { %v4681_v16 = vadd.f32 %v4679_v21, %v8137_v27  ;;  %v4683_v22 = vrot.slane %v4675_v30, 6 }
0x495a   :  { %6289 = vtanh.f32 %v4681_v16  ;;  %v4685_v3 = vadd.f32 %v4683_v22, %v8144_v62  ;;  %v5760_v54 = vmul.f32 -1.442695, %v4681_v16 }
0x495c   :  { %6291 = vtanh.f32 %v4685_v3  ;;  %v5761_v13 = vmul.f32 -1.442695, %v4685_v3 }
0x495d   :  { %6293 = vpow2.f32 %v5760_v54 }
0x495e   :  { %6295 = vpow2.f32 %v5761_v13 }
0x4967   :  { %v6290_v14 = vpop.eup %6289 }
0x4968   :  { %4698 = vrot.lane.b32.xlu0 %v6290_v14, %s6570_s3 }
0x4969   :  { %v6292_v20 = vpop.eup %6291 }
0x496a   :  { %4725 = vrot.lane.b32.xlu1 %v6292_v20, %s6570_s3  ;;  %v6294_v8 = vpop.eup %6293 }
0x496b   :  { %v6296_v39 = vpop.eup %6295  ;;  %v4689_v29 = vadd.f32 1.0, %v6294_v8 }
0x496c   :  { %v4716_v11 = vadd.f32 1.0, %v6296_v39 }
0x496d   :  { %6297 = vrcp.f32 %v4689_v29 }
0x496e   :  { %6299 = vrcp.f32 %v4716_v11 }
0x497a   :  { %v6298_v15 = vpop.eup %6297 }
0x497b   :  { %v6300_v47 = vpop.eup %6299  ;;  %v4696_v34 = vmul.f32 %v6298_v15, %v4694_v43 }
0x497c   :  { %v4723_v52 = vmul.f32 %v6300_v47, %v4721_v41 }
0x49da   :  { %v4699_v56 = vpop.permute.xlu0 %4698 }
0x49db   :  { %v4701_v45 = vmul.f32 %v6298_v15, %v4699_v56 }
0x49dc   :  { %v4726_v49 = vpop.permute.xlu1 %4725 }
0x49dd   :  { %4703 = vrot.lane.b32.xlu0 %v4701_v45, %s6570_s3  ;;  %v4728_v9 = vmul.f32 %v6300_v47, %v4726_v49 }
0x49df   :  { %4730 = vrot.lane.b32.xlu1 %v4728_v9, %s6570_s3 }
0x4a4f   :  { %v4704_v32 = vpop.permute.xlu0 %4703 }
0x4a50   :  { %v8225_v36 = vadd.f32 %v4704_v32, %v4696_v34 }
0x4a51   :  { %v4731_v57 = vpop.permute.xlu1 %4730 }
0x4a52   :  { %6301 = vtanh.f32 %v8225_v36  ;;  %v8228_v37 = vadd.f32 %v4731_v57, %v4723_v52  ;;  %v4838_v29 = vrot.slane %v8225_v36, 6 }
0x4a54   :  { %6303 = vtanh.f32 %v8228_v37  ;;  %v4865_v11 = vrot.slane %v8228_v37, 2 }
0x4a5f   :  { %v6302_v0 = vpop.eup %6301 }
0x4a60   :  { %4709 = vrot.lane.b32.xlu0 %v6302_v0, %s6570_s3 }
0x4a61   :  { %v6304_v35 = vpop.eup %6303 }
0x4a62   :  { %4736 = vrot.lane.b32.xlu1 %v6304_v35, %s6570_s3 }
0x4ad2   :  { %v4710_v59 = vpop.permute.xlu0 %4709 }
0x4ad3   :  { %v4712_v6 = vmul.f32 %v6298_v15, %v4710_v59 }
0x4ad4   :  { %v4737_v4 = vpop.permute.xlu1 %4736 }
0x4ad5   :  { %4741 = vrot.lane.b32.xlu1 %v4712_v6, %s6572_s2  ;;  %v4739_v2 = vmul.f32 %v6300_v47, %v4737_v4 }
0x4ad7   :  { %v4745_v19 = vrot.slane %v4739_v2, 6 }
0x4ad9   :  { %4746 = vrot.lane.b32.xlu0 %v4745_v19, %s6571_s22 }
0x4b47   :  { %v4742_v51 = vpop.permute.xlu1 %4741 }
0x4b4b   :  { %v4747_v61 = vpop.permute.xlu0 %4746 }
0x4b4c   :  { %v4749_v60 = vsel %vm297_vm3, %v4742_v51, %v4747_v61 }
0x4b4d   :  { %v4751_v5 = vrot.slane %v4749_v60, 4 }
0x4b4f   :  { %5762 = vmatmul.mubr.msk.f32.vlgmr.msra.gmra.mxu1 %vm179_vm0, %v4751_v5 }
0x4b50   :  { %5058 = vmatpush1.msra.mxu1 %v8007_v28  ;;  %5105 = vmatprep.mubr.f32.mxu1 %v6569_v1 }
0x4b51   :  { %5059 = vmatprep.subr.mxu1 %v8011_v38 }
0x4b52   :  { %5060 = vmatpush1.msra.mxu1 %v8015_v17 }
0x4b53   :  { %5061 = vmatprep.subr.mxu1 %v8019_v40 }
0x4b54   :  { %5062 = vmatpush1.msra.mxu1 %v8023_v12 }
0x4b55   :  { %5063 = vmatprep.subr.mxu1 %v8028_v42 }
0x4b56   :  { %5064 = vmatpush1.msra.mxu1 %v8032_v44 }
0x4b57   :  { %5065 = vmatprep.subr.mxu1 %v8035_v31 }
0x4b58   :  { %5066 = vmatpush1.msra.mxu1 %v8038_v50 }
0x4b59   :  { %5067 = vmatprep.subr.mxu1 %v8045_v25 }
0x4b5a   :  { %5068 = vmatpush1.msra.mxu1 %v8048_v7 }
0x4b5b   :  { %5069 = vmatprep.subr.mxu1 %v8051_v23 }
0x4b5c   :  { %5070 = vmatpush1.msra.mxu1 %v8054_v48 }
0x4b5d   :  { %5071 = vmatprep.subr.mxu1 %v8057_v33 }
0x4b5e   :  { %5072 = vmatpush1.msra.mxu1 %v8060_v53 }
0x4b5f   :  { %5351 = vmatprep.subr.mxu1 %v8005_v46 }
0x4c0f   :  { %v4820_v63 = vpop.f32.mrf.mxu1 }
0x4c10   :  { %v4826_v58 = vrot.slane %v4820_v63, 2 }
0x4c11   :  { %v4822_v10 = vpop.f32.mrf.mxu1 }
0x4c12   :  { %v4828_v18 = vadd.f32 %v4826_v58, %v8137_v27  ;;  %v4829_v24 = vadd.f32 %v4822_v10, %v8144_v62 }
0x4c14   :  { %6305 = vtanh.f32 %v4828_v18  ;;  %v5763_v16 = vmul.f32 -1.442695, %v4828_v18  ;;  %v5764_v22 = vmul.f32 -1.442695, %v4829_v24 }
0x4c15   :  { %6307 = vtanh.f32 %v4829_v24 }
0x4c16   :  { %6309 = vpow2.f32 %v5763_v16 }
0x4c17   :  { %6311 = vpow2.f32 %v5764_v22 }
0x4c21   :  { %v6306_v21 = vpop.eup %6305 }
0x4c22   :  { %v6308_v30 = vpop.eup %6307  ;;  %4842 = vrot.lane.b32.xlu0 %v6306_v21, %s6570_s3 }
0x4c23   :  { %4869 = vrot.lane.b32.xlu1 %v6308_v30, %s6570_s3  ;;  %v6310_v46 = vpop.eup %6309 }
0x4c24   :  { %v6312_v3 = vpop.eup %6311  ;;  %v4833_v14 = vadd.f32 1.0, %v6310_v46 }
0x4c25   :  { %v4860_v20 = vadd.f32 1.0, %v6312_v3 }
0x4c26   :  { %6313 = vrcp.f32 %v4833_v14 }
0x4c27   :  { %6315 = vrcp.f32 %v4860_v20 }
0x4c33   :  { %v6314_v27 = vpop.eup %6313 }
0x4c34   :  { %v6316_v54 = vpop.eup %6315  ;;  %v4840_v15 = vmul.f32 %v6314_v27, %v4838_v29 }
0x4c35   :  { %v4867_v45 = vmul.f32 %v6316_v54, %v4865_v11 }
0x4c94   :  { %v4843_v62 = vpop.permute.xlu0 %4842 }
0x4c95   :  { %v4845_v13 = vmul.f32 %v6314_v27, %v4843_v62  ;;  %v4870_v8 = vpop.permute.xlu1 %4869 }
0x4c96   :  { %v4872_v39 = vmul.f32 %v6316_v54, %v4870_v8 }
0x4c97   :  { %4847 = vrot.lane.b32.xlu0 %v4845_v13, %s6570_s3 }
0x4c98   :  { %4874 = vrot.lane.b32.xlu1 %v4872_v39, %s6570_s3 }
0x4d09   :  { %v4848_v56 = vpop.permute.xlu0 %4847 }
0x4d0a   :  { %v8262_v47 = vadd.f32 %v4848_v56, %v4840_v15  ;;  %v4875_v49 = vpop.permute.xlu1 %4874 }
0x4d0b   :  { %v8264_v9 = vadd.f32 %v4875_v49, %v4867_v45 }
0x4d0c   :  { %6317 = vtanh.f32 %v8262_v47  ;;  %v4982_v14 = vrot.slane %v8262_v47, 6 }
0x4d0d   :  { %6319 = vtanh.f32 %v8264_v9  ;;  %v5009_v62 = vrot.slane %v8264_v9, 2 }
0x4d19   :  { %v6318_v43 = vpop.eup %6317 }
0x4d1a   :  { %v6320_v34 = vpop.eup %6319  ;;  %4853 = vrot.lane.b32.xlu0 %v6318_v43, %s6570_s3 }
0x4d1b   :  { %4880 = vrot.lane.b32.xlu1 %v6320_v34, %s6570_s3 }
0x4d8c   :  { %v4854_v41 = vpop.permute.xlu0 %4853 }
0x4d8d   :  { %v4856_v32 = vmul.f32 %v6314_v27, %v4854_v41  ;;  %v4881_v36 = vpop.permute.xlu1 %4880 }
0x4d8e   :  { %v4883_v52 = vmul.f32 %v6316_v54, %v4881_v36 }
0x4d8f   :  { %4885 = vrot.lane.b32.xlu1 %v4856_v32, %s6572_s2 }
0x4d90   :  { %v4889_v57 = vrot.slane %v4883_v52, 2 }
0x4d92   :  { %4890 = vrot.lane.b32.xlu0 %v4889_v57, %s6571_s22 }
0x4e01   :  { %v4886_v37 = vpop.permute.xlu1 %4885 }
0x4e04   :  { %v4891_v0 = vpop.permute.xlu0 %4890 }
0x4e05   :  { %v4893_v35 = vsel %vm297_vm3, %v4886_v37, %v4891_v0 }
0x4e06   :  { %v4895_v59 = vrot.slane %v4893_v35, 6 }
0x4e08   :  { %5765 = vmatmul.mubr.msk.f32.vlgmr.msra.gmra.mxu0 %vm179_vm0, %v4895_v59 }
0x4e09   :  { %5205 = vmatpush1.msra.mxu0 %v8007_v28  ;;  %5252 = vmatprep.mubr.f32.mxu0 %v6569_v1 }
0x4e0a   :  { %5206 = vmatprep.subr.mxu0 %v8011_v38 }
0x4e0b   :  { %5207 = vmatpush1.msra.mxu0 %v8015_v17 }
0x4e0c   :  { %5208 = vmatprep.subr.mxu0 %v8019_v40 }
0x4e0d   :  { %5209 = vmatpush1.msra.mxu0 %v8023_v12 }
0x4e0e   :  { %5210 = vmatprep.subr.mxu0 %v8028_v42 }
0x4e0f   :  { %5211 = vmatpush1.msra.mxu0 %v8032_v44 }
0x4e10   :  { %5212 = vmatprep.subr.mxu0 %v8035_v31 }
0x4e11   :  { %5213 = vmatpush1.msra.mxu0 %v8038_v50 }
0x4e12   :  { %5214 = vmatprep.subr.mxu0 %v8045_v25 }
0x4e13   :  { %5215 = vmatpush1.msra.mxu0 %v8048_v7 }
0x4e14   :  { %5216 = vmatprep.subr.mxu0 %v8051_v23 }
0x4e15   :  { %5217 = vmatpush1.msra.mxu0 %v8054_v48 }
0x4e16   :  { %5218 = vmatprep.subr.mxu0 %v8057_v33 }
0x4e17   :  { %5219 = vmatpush1.msra.mxu0 %v8060_v53 }
0x4e18   :  { %5824 = vmatprep.subr.mxu0 %v6569_v1 }
0x4ec8   :  { %v4964_v6 = vpop.f32.mrf.mxu0 }
0x4ec9   :  { %v4969_v4 = vadd.f32 %v4964_v6, %v8142_v55 }
0x4eca   :  { %v4966_v2 = vpop.f32.mrf.mxu0 }
0x4ecb   :  { %6321 = vtanh.f32 %v4969_v4  ;;  %v4971_v19 = vrot.slane %v4966_v2, 2  ;;  %v5766_v5 = vmul.f32 -1.442695, %v4969_v4 }
0x4ecd   :  { %v4973_v51 = vadd.f32 %v4971_v19, %v8139_v26 }
0x4ecf   :  { %6323 = vtanh.f32 %v4973_v51  ;;  %v5767_v63 = vmul.f32 -1.442695, %v4973_v51 }
0x4ed0   :  { %6325 = vpow2.f32 %v5766_v5 }
0x4ed1   :  { %6327 = vpow2.f32 %v5767_v63 }
0x4ed8   :  { %v6322_v61 = vpop.eup %6321 }
0x4ed9   :  { %4986 = vrot.lane.b32.xlu0 %v6322_v61, %s6570_s3 }
0x4edc   :  { %v6324_v60 = vpop.eup %6323 }
0x4edd   :  { %5013 = vrot.lane.b32.xlu1 %v6324_v60, %s6570_s3  ;;  %v6326_v58 = vpop.eup %6325 }
0x4ede   :  { %v4977_v10 = vadd.f32 1.0, %v6326_v58  ;;  %v6328_v18 = vpop.eup %6327 }
0x4edf   :  { %v5004_v24 = vadd.f32 1.0, %v6328_v18 }
0x4ee0   :  { %6329 = vrcp.f32 %v4977_v10 }
0x4ee1   :  { %6331 = vrcp.f32 %v5004_v24 }
0x4eed   :  { %v6330_v21 = vpop.eup %6329 }
0x4eee   :  { %v6332_v22 = vpop.eup %6331  ;;  %v4984_v20 = vmul.f32 %v6330_v21, %v4982_v14 }
0x4eef   :  { %v5011_v13 = vmul.f32 %v6332_v22, %v5009_v62 }
0x4f4b   :  { %v4987_v30 = vpop.permute.xlu0 %4986 }
0x4f4c   :  { %v4989_v16 = vmul.f32 %v6330_v21, %v4987_v30 }
0x4f4e   :  { %4991 = vrot.lane.b32.xlu0 %v4989_v16, %s6570_s3 }
0x4f4f   :  { %v5014_v46 = vpop.permute.xlu1 %5013 }
0x4f50   :  { %v5016_v3 = vmul.f32 %v6332_v22, %v5014_v46 }
0x4f52   :  { %5018 = vrot.lane.b32.xlu1 %v5016_v3, %s6570_s3 }
0x4fc0   :  { %v4992_v27 = vpop.permute.xlu0 %4991 }
0x4fc1   :  { %v8299_v54 = vadd.f32 %v4992_v27, %v4984_v20 }
0x4fc3   :  { %6333 = vtanh.f32 %v8299_v54  ;;  %v5128_v37 = vrot.slane %v8299_v54, 6 }
0x4fc4   :  { %v5019_v8 = vpop.permute.xlu1 %5018 }
0x4fc5   :  { %v8302_v39 = vadd.f32 %v5019_v8, %v5011_v13 }
0x4fc7   :  { %6335 = vtanh.f32 %v8302_v39  ;;  %v5155_v35 = vrot.slane %v8302_v39, 2 }
0x4fd0   :  { %v6334_v29 = vpop.eup %6333 }
0x4fd1   :  { %4997 = vrot.lane.b32.xlu0 %v6334_v29, %s6570_s3 }
0x4fd4   :  { %v6336_v11 = vpop.eup %6335 }
0x4fd5   :  { %5024 = vrot.lane.b32.xlu1 %v6336_v11, %s6570_s3 }
0x5043   :  { %v4998_v15 = vpop.permute.xlu0 %4997 }
0x5044   :  { %v5000_v56 = vmul.f32 %v6330_v21, %v4998_v15 }
0x5046   :  { %5029 = vrot.lane.b32.xlu1 %v5000_v56, %s6572_s2 }
0x5047   :  { %v5025_v45 = vpop.permute.xlu1 %5024 }
0x5048   :  { %v5027_v47 = vmul.f32 %v6332_v22, %v5025_v45 }
0x504a   :  { %v5033_v49 = vrot.slane %v5027_v47, 6 }
0x504c   :  { %5034 = vrot.lane.b32.xlu0 %v5033_v49, %s6571_s22 }
0x50b8   :  { %v5030_v9 = vpop.permute.xlu1 %5029 }
0x50be   :  { %v5035_v43 = vpop.permute.xlu0 %5034 }
0x50bf   :  { %v5037_v34 = vsel %vm297_vm3, %v5030_v9, %v5035_v43 }
0x50c0   :  { %5768 = vmatmul.mubr.msk.f32.vlgmr.msra.gmra.mxu1 %vm179_vm0, %v5037_v34 }
0x50c1   :  { %5352 = vmatpush1.msra.mxu1 %v8007_v28  ;;  %5399 = vmatprep.mubr.f32.mxu1 %v6569_v1 }
0x50c2   :  { %5353 = vmatprep.subr.mxu1 %v8011_v38 }
0x50c3   :  { %5354 = vmatpush1.msra.mxu1 %v8015_v17 }
0x50c4   :  { %5355 = vmatprep.subr.mxu1 %v8019_v40 }
0x50c5   :  { %5356 = vmatpush1.msra.mxu1 %v8023_v12 }
0x50c6   :  { %5357 = vmatprep.subr.mxu1 %v8028_v42 }
0x50c7   :  { %5358 = vmatpush1.msra.mxu1 %v8032_v44 }
0x50c8   :  { %5359 = vmatprep.subr.mxu1 %v8035_v31 }
0x50c9   :  { %5360 = vmatpush1.msra.mxu1 %v8038_v50 }
0x50ca   :  { %5361 = vmatprep.subr.mxu1 %v8045_v25 }
0x50cb   :  { %5362 = vmatpush1.msra.mxu1 %v8048_v7 }
0x50cc   :  { %5363 = vmatprep.subr.mxu1 %v8051_v23 }
0x50cd   :  { %5364 = vmatpush1.msra.mxu1 %v8054_v48 }
0x50ce   :  { %5365 = vmatprep.subr.mxu1 %v8057_v33 }
0x50cf   :  { %5366 = vmatpush1.msra.mxu1 %v8060_v53 }
0x50d0   :  { %5843 = vmatprep.subr.mxu1 %v6569_v1 }
0x5180   :  { %v5107_v28 = vpop.f32.mrf.mxu1 }
0x5181   :  { %v5113_v38 = vrot.slane %v5107_v28, 6 }
0x5182   :  { %v5109_v17 = vpop.f32.mrf.mxu1 }
0x5183   :  { %v5115_v40 = vadd.f32 %v5113_v38, %v8142_v55  ;;  %v5117_v12 = vrot.slane %v5109_v17, 4 }
0x5185   :  { %6337 = vtanh.f32 %v5115_v40  ;;  %v5119_v42 = vadd.f32 %v5117_v12, %v8139_v26  ;;  %v5769_v50 = vmul.f32 -1.442695, %v5115_v40 }
0x5187   :  { %6339 = vtanh.f32 %v5119_v42  ;;  %v5770_v25 = vmul.f32 -1.442695, %v5119_v42 }
0x5188   :  { %6341 = vpow2.f32 %v5769_v50 }
0x5189   :  { %6343 = vpow2.f32 %v5770_v25 }
0x5192   :  { %v6338_v44 = vpop.eup %6337 }
0x5193   :  { %5132 = vrot.lane.b32.xlu0 %v6338_v44, %s6570_s3 }
0x5194   :  { %v6340_v31 = vpop.eup %6339 }
0x5195   :  { %5159 = vrot.lane.b32.xlu1 %v6340_v31, %s6570_s3  ;;  %v6342_v7 = vpop.eup %6341 }
0x5196   :  { %v6344_v23 = vpop.eup %6343  ;;  %v5123_v48 = vadd.f32 1.0, %v6342_v7 }
0x5197   :  { %v5150_v33 = vadd.f32 1.0, %v6344_v23 }
0x5198   :  { %6345 = vrcp.f32 %v5123_v48 }
0x5199   :  { %6347 = vrcp.f32 %v5150_v33 }
0x51a5   :  { %v6346_v53 = vpop.eup %6345 }
0x51a6   :  { %v6348_v36 = vpop.eup %6347  ;;  %v5130_v0 = vmul.f32 %v6346_v53, %v5128_v37 }
0x51a7   :  { %v5157_v4 = vmul.f32 %v6348_v36, %v5155_v35 }
0x5205   :  { %v5133_v41 = vpop.permute.xlu0 %5132 }
0x5206   :  { %v5135_v32 = vmul.f32 %v6346_v53, %v5133_v41 }
0x5207   :  { %v5160_v52 = vpop.permute.xlu1 %5159 }
0x5208   :  { %5137 = vrot.lane.b32.xlu0 %v5135_v32, %s6570_s3  ;;  %v5162_v57 = vmul.f32 %v6348_v36, %v5160_v52 }
0x520a   :  { %5164 = vrot.lane.b32.xlu1 %v5162_v57, %s6570_s3 }
0x527a   :  { %v5138_v59 = vpop.permute.xlu0 %5137 }
0x527b   :  { %v5140_v6 = vadd.f32 %v5138_v59, %v5130_v0 }
0x527c   :  { %v5165_v2 = vpop.permute.xlu1 %5164 }
0x527d   :  { %6349 = vtanh.f32 %v5140_v6  ;;  %v5167_v19 = vadd.f32 %v5165_v2, %v5157_v4  ;;  %v5275_v43 = vrot.slane %v5140_v6, 6 }
0x527f   :  { %6351 = vtanh.f32 %v5167_v19  ;;  %v5302_v28 = vrot.slane %v5167_v19, 2 }
0x528a   :  { %v6350_v51 = vpop.eup %6349 }
0x528b   :  { %5143 = vrot.lane.b32.xlu0 %v6350_v51, %s6570_s3 }
0x528c   :  { %v6352_v61 = vpop.eup %6351 }
0x528d   :  { %5170 = vrot.lane.b32.xlu1 %v6352_v61, %s6570_s3 }
0x52fd   :  { %v5144_v60 = vpop.permute.xlu0 %5143 }
0x52fe   :  { %v5146_v5 = vmul.f32 %v6346_v53, %v5144_v60 }
0x52ff   :  { %v5171_v63 = vpop.permute.xlu1 %5170 }
0x5300   :  { %5175 = vrot.lane.b32.xlu1 %v5146_v5, %s6572_s2  ;;  %v5173_v58 = vmul.f32 %v6348_v36, %v5171_v63 }
0x5302   :  { %v5179_v10 = vrot.slane %v5173_v58, 2 }
0x5304   :  { %5180 = vrot.lane.b32.xlu0 %v5179_v10, %s6571_s22 }
0x5372   :  { %v5176_v18 = vpop.permute.xlu1 %5175 }
0x5376   :  { %v5181_v24 = vpop.permute.xlu0 %5180 }
0x5377   :  { %v5183_v21 = vsel %vm297_vm3, %v5176_v18, %v5181_v24 }
0x5378   :  { %v5185_v30 = vrot.slane %v5183_v21, 2 }
0x537a   :  { %5771 = vmatmul.mubr.msk.f32.vlgmr.msra.gmra.mxu0 %vm179_vm0, %v5185_v30 }
0x537b   :  { %5840 = vmatprep.mubr.msk.f32.mxu0 %vm6573_vm7, %v6569_v1 }
0x543a   :  { %v5254_v16 = vpop.f32.mrf.mxu0 }
0x543b   :  { %v5260_v22 = vrot.slane %v5254_v16, 4 }
0x543c   :  { %v5256_v46 = vpop.f32.mrf.mxu0 }
0x543d   :  { %v5262_v3 = vadd.f32 %v5260_v22, %v8142_v55  ;;  %v5264_v14 = vrot.slane %v5256_v46, 6 }
0x543f   :  { %6353 = vtanh.f32 %v5262_v3  ;;  %v5266_v20 = vadd.f32 %v5264_v14, %v8139_v26  ;;  %v5772_v54 = vmul.f32 -1.442695, %v5262_v3  ;;  %v5482_v3 = vld [vmem:[%s8426_s14 + $0x38] sm:$0xff]  ;;  %v5481_v14 = vld [vmem:[%s8426_s14 + $0x30] sm:$0xff] }
0x5440   :  { %5825 = vmatpush3.msra.mxu0 %v5482_v3 }
0x5441   :  { %6355 = vtanh.f32 %v5266_v20  ;;  %v5773_v13 = vmul.f32 -1.442695, %v5266_v20  ;;  %5826 = vmatprep.subr.mxu0 %v6569_v1  ;;  %v5480_v20 = vld [vmem:[%s8426_s14 + $0x28] sm:$0xff] }
0x5442   :  { %6357 = vpow2.f32 %v5772_v54  ;;  %5827 = vmatpush3.msra.mxu0 %v5481_v14 }
0x5443   :  { %6359 = vpow2.f32 %v5773_v13  ;;  %5828 = vmatprep.subr.mxu0 %v6569_v1 }
0x5444   :  { %5829 = vmatpush3.msra.mxu0 %v5480_v20 }
0x5445   :  { %5830 = vmatprep.subr.mxu0 %v6569_v1 }
0x544c   :  { %v6354_v27 = vpop.eup %6353 }
0x544d   :  { %5279 = vrot.lane.b32.xlu0 %v6354_v27, %s6570_s3  ;;  %v5479_v27 = vld [vmem:[%s8426_s14 + $0x20] sm:$0xff] }
0x544e   :  { %v6356_v62 = vpop.eup %6355  ;;  %5831 = vmatpush3.msra.mxu0 %v5479_v27 }
0x544f   :  { %5306 = vrot.lane.b32.xlu1 %v6356_v62, %s6570_s3  ;;  %v6358_v8 = vpop.eup %6357  ;;  %v5478_v62 = vld [vmem:[%s8426_s14 + $0x18] sm:$0xff]  ;;  %5832 = vmatprep.subr.mxu0 %v6569_v1 }
0x5450   :  { %v6360_v39 = vpop.eup %6359  ;;  %v5270_v29 = vadd.f32 1.0, %v6358_v8  ;;  %5833 = vmatpush3.msra.mxu0 %v5478_v62  ;;  %v5477_v8 = vld [vmem:[%s8426_s14 + $0x10] sm:$0xff] }
0x5451   :  { %v5297_v11 = vadd.f32 1.0, %v6360_v39  ;;  %5834 = vmatprep.subr.mxu0 %v6569_v1  ;;  %v5476_v39 = vld [vmem:[%s8426_s14 + $0x8] sm:$0xff] }
0x5452   :  { %6361 = vrcp.f32 %v5270_v29  ;;  %5835 = vmatpush3.msra.mxu0 %v5477_v8  ;;  %v5475_v29 = vld [vmem:[%s8426_s14] sm:$0xff] }
0x5453   :  { %6363 = vrcp.f32 %v5297_v11  ;;  %5836 = vmatprep.subr.mxu0 %v6569_v1 }
0x5454   :  { %5837 = vmatpush3.msra.mxu0 %v5476_v39 }
0x5455   :  { %5838 = vmatprep.subr.mxu0 %v6569_v1 }
0x5456   :  { %5839 = vmatpush3.msra.mxu0 %v5475_v29 }
0x545f   :  { %v6362_v15 = vpop.eup %6361 }
0x5460   :  { %v6364_v47 = vpop.eup %6363  ;;  %v5277_v34 = vmul.f32 %v6362_v15, %v5275_v43 }
0x5461   :  { %v5304_v40 = vmul.f32 %v6364_v47, %v5302_v28  ;;  %v5572_v28 = vld [vmem:[#allocation13 + $0x18] sm:$0xff] }
0x54bf   :  { %v5280_v56 = vpop.permute.xlu0 %5279 }
0x54c0   :  { %v5282_v45 = vmul.f32 %v6362_v15, %v5280_v56 }
0x54c1   :  { %v5307_v49 = vpop.permute.xlu1 %5306 }
0x54c2   :  { %5284 = vrot.lane.b32.xlu0 %v5282_v45, %s6570_s3  ;;  %v5309_v9 = vmul.f32 %v6364_v47, %v5307_v49 }
0x54c4   :  { %5311 = vrot.lane.b32.xlu1 %v5309_v9, %s6570_s3 }
0x5534   :  { %v5285_v38 = vpop.permute.xlu0 %5284 }
0x5535   :  { %v5287_v17 = vadd.f32 %v5285_v38, %v5277_v34  ;;  %v5571_v38 = vld [vmem:[#allocation13 + $0x10] sm:$0xff] }
0x5536   :  { %v5312_v12 = vpop.permute.xlu1 %5311 }
0x5537   :  { %6365 = vtanh.f32 %v5287_v17  ;;  %v5314_v42 = vadd.f32 %v5312_v12, %v5304_v40  ;;  %v5419_v10 = vrot.slane %v5287_v17, 6  ;;  %v5570_v17 = vld [vmem:[#allocation13 + $0x8] sm:$0xff]  ;;  %v5569_v40 = vld [vmem:[#allocation13] sm:$0xff] }
0x5538   :  { %v5777_v12 = vld [vmem:[%s8427_s15] ss:$0 sm:$0xff] }
0x5539   :  { %6367 = vtanh.f32 %v5314_v42  ;;  %v5446_v18 = vrot.slane %v5314_v42, 2 }
0x5544   :  { %v6366_v44 = vpop.eup %6365 }
0x5545   :  { %5290 = vrot.lane.b32.xlu0 %v6366_v44, %s6570_s3 }
0x5546   :  { %v6368_v31 = vpop.eup %6367 }
0x5547   :  { %5317 = vrot.lane.b32.xlu1 %v6368_v31, %s6570_s3 }
0x55b7   :  { %v5291_v50 = vpop.permute.xlu0 %5290 }
0x55b8   :  { %v5293_v25 = vmul.f32 %v6362_v15, %v5291_v50 }
0x55b9   :  { %v5318_v7 = vpop.permute.xlu1 %5317 }
0x55ba   :  { %5322 = vrot.lane.b32.xlu1 %v5293_v25, %s6572_s2  ;;  %v5320_v23 = vmul.f32 %v6364_v47, %v5318_v7 }
0x55bc   :  { %v5326_v48 = vrot.slane %v5320_v23, 6 }
0x55be   :  { %5327 = vrot.lane.b32.xlu0 %v5326_v48, %s6571_s22 }
0x562c   :  { %v5323_v33 = vpop.permute.xlu1 %5322 }
0x5630   :  { %v5328_v53 = vpop.permute.xlu0 %5327 }
0x5631   :  { %v5330_v41 = vsel %vm297_vm3, %v5323_v33, %v5328_v53 }
0x5632   :  { %v5332_v32 = vrot.slane %v5330_v41, 4 }
0x5634   :  { %5774 = vmatmul.mubr.msk.f32.vlgmr.msra.gmra.mxu1 %vm179_vm0, %v5332_v32 }
0x5635   :  { %5851 = vmatprep.mubr.msk.f32.mxu1 %vm6573_vm7, %v6569_v1  ;;  %5844 = vmatpush3.msra.mxu1 %v5572_v28 }
0x5636   :  { %5845 = vmatprep.subr.mxu1 %v6569_v1 }
0x5637   :  { %5846 = vmatpush3.msra.mxu1 %v5571_v38 }
0x5638   :  { %5847 = vmatprep.subr.mxu1 %v6569_v1 }
0x5639   :  { %5848 = vmatpush3.msra.mxu1 %v5570_v17 }
0x563a   :  { %5849 = vmatprep.subr.mxu1 %v6569_v1  ;;  %v5779_v1 = vld [vmem:[%s8429_s17] ss:$0 sm:$0xff] }
0x563b   :  { %5850 = vmatpush3.msra.mxu1 %v5569_v40 }
0x56f4   :  { %v5401_v36 = vpop.f32.mrf.mxu1 }
0x56f5   :  { %v5407_v52 = vrot.slane %v5401_v36, 2 }
0x56f6   :  { %v5403_v57 = vpop.f32.mrf.mxu1 }
0x56f7   :  { %v5409_v37 = vadd.f32 %v5407_v52, %v8142_v55  ;;  %v5410_v0 = vadd.f32 %v5403_v57, %v8139_v26 }
0x56f9   :  { %6369 = vtanh.f32 %v5409_v37  ;;  %v5775_v6 = vmul.f32 -1.442695, %v5409_v37  ;;  %v5776_v4 = vmul.f32 -1.442695, %v5410_v0 }
0x56fa   :  { %6371 = vtanh.f32 %v5410_v0 }
0x56fb   :  { %6373 = vpow2.f32 %v5775_v6 }
0x56fc   :  { %6375 = vpow2.f32 %v5776_v4 }
0x5706   :  { %v6370_v35 = vpop.eup %6369 }
0x5707   :  { %v6372_v59 = vpop.eup %6371  ;;  %5423 = vrot.lane.b32.xlu0 %v6370_v35, %s6570_s3 }
0x5708   :  { %5450 = vrot.lane.b32.xlu1 %v6372_v59, %s6570_s3  ;;  %v6374_v2 = vpop.eup %6373 }
0x5709   :  { %v6376_v19 = vpop.eup %6375  ;;  %v5414_v51 = vadd.f32 1.0, %v6374_v2 }
0x570a   :  { %v5441_v61 = vadd.f32 1.0, %v6376_v19 }
0x570b   :  { %6377 = vrcp.f32 %v5414_v51 }
0x570c   :  { %6379 = vrcp.f32 %v5441_v61 }
0x5718   :  { %v6378_v55 = vpop.eup %6377 }
0x5719   :  { %v6380_v60 = vpop.eup %6379  ;;  %v5421_v24 = vmul.f32 %v6378_v55, %v5419_v10 }
0x571a   :  { %v5448_v30 = vmul.f32 %v6380_v60, %v5446_v18 }
0x5779   :  { %v5424_v26 = vpop.permute.xlu0 %5423 }
0x577a   :  { %v5426_v5 = vmul.f32 %v6378_v55, %v5424_v26  ;;  %v5451_v63 = vpop.permute.xlu1 %5450 }
0x577b   :  { %v5453_v58 = vmul.f32 %v6380_v60, %v5451_v63 }
0x577c   :  { %5428 = vrot.lane.b32.xlu0 %v5426_v5, %s6570_s3 }
0x577d   :  { %5455 = vrot.lane.b32.xlu1 %v5453_v58, %s6570_s3 }
0x57ee   :  { %v5429_v21 = vpop.permute.xlu0 %5428 }
0x57ef   :  { %v5431_v16 = vadd.f32 %v5429_v21, %v5421_v24  ;;  %v5456_v22 = vpop.permute.xlu1 %5455 }
0x57f0   :  { %v5458_v46 = vadd.f32 %v5456_v22, %v5448_v30 }
0x57f1   :  { %6381 = vtanh.f32 %v5431_v16 }
0x57f2   :  { %6383 = vtanh.f32 %v5458_v46 }
0x57fe   :  { %v6382_v54 = vpop.eup %6381 }
0x57ff   :  { %v6384_v13 = vpop.eup %6383  ;;  %5434 = vrot.lane.b32.xlu0 %v6382_v54, %s6570_s3 }
0x5800   :  { %5461 = vrot.lane.b32.xlu1 %v6384_v13, %s6570_s3 }
0x5871   :  { %v5435_v11 = vpop.permute.xlu0 %5434 }
0x5872   :  { %v5437_v15 = vmul.f32 %v6378_v55, %v5435_v11  ;;  %v5462_v56 = vpop.permute.xlu1 %5461 }
0x5873   :  { %v5464_v45 = vmul.f32 %v6380_v60, %v5462_v56 }
0x5874   :  { %5466 = vrot.lane.b32.xlu1 %v5437_v15, %s6572_s2 }
0x5875   :  { %v5470_v47 = vrot.slane %v5464_v45, 2 }
0x5877   :  { %5471 = vrot.lane.b32.xlu0 %v5470_v47, %s6571_s22  ;;  %s6574_s22 = smov [#allocation14]  }
0x5878   :  { %s5661_s2 = sshll.u32 %s6574_s22, 4  ;;  %s5662_s2 = int_to_ptr.vmem [resolvable:$true] %s5661_s2 }
0x5879   :  { %s6527_s15 = scalar_lea.vmem %s5662_s2, 32  ;;  %p6532_p8 = scmp.lt.s32.totalorder %s5662_s2, %s5662_s2 }
0x587a   :  { %p6528_p7 = scmp.ne.s32.totalorder %s5662_s2, %s6527_s15  ;;  %p6533_p9 = scmp.lt.s32.totalorder %s6527_s15, %s6527_s15 }
0x587c   :  { %p6534_p10 = por %p6533_p9, %p6532_p8 }
0x587e   :  { %p6535_p11 = pnand %p6534_p10, %p6528_p7 }
0x58e6   :  { %v5467_v49 = vpop.permute.xlu1 %5466 }
0x58e9   :  { %v5472_v9 = vpop.permute.xlu0 %5471 }
0x58ea   :  { %v5474_v43 = vsel %vm297_vm3, %v5467_v49, %v5472_v9 }
0x58eb   :  { %v5491_v34 = vrot.slane %v5474_v43, 6 }
0x58ed   :  { %5841 = vmatmul.mubr.msk.f32.vlgmr.msra.gmra.mxu0 %vm179_vm0, %v5491_v34 }
0x59ad   :  { %v5560_v42 = vpop.f32.mrf.mxu0 }
0x59ae   :  { %v5561_v44 = vadd.f32 %v5777_v12, %v5560_v42 }
0x59af   :  { %v5842_v31 = vpop.f32.mrf.mxu0 }
0x59b0   :  { %v5565_v50 = vmul.f32 0.70710677, %v5561_v44  ;;  %v5564_v7 = vmul.f32 0.5, %v5561_v44 }
0x59b2   :  { %6385 = verf.f32 %v5565_v50 }
0x59bf   :  { %v6386_v25 = vpop.eup %6385 }
0x59c0   :  { %v5567_v23 = vadd.f32 1.0, %v6386_v25 }
0x59c2   :  { %v5568_v48 = vmul.f32 %v5567_v23, %v5564_v7 }
0x59c4   :  { %5852 = vmatmul.mubr.msk.f32.vlgmr.msra.gmra.mxu1 %vm297_vm3, %v5568_v48 }
0x5a84   :  { %v5649_v33 = vpop.f32.mrf.mxu1 }
0x5a85   :  { %v5650_v53 = vadd.f32 %v5779_v1, %v5649_v33 }
0x5a86   :  { %v5853_v41 = vpop.f32.mrf.mxu1 }
0x5a87   :  { %5654 = vst.msk [vmem:[#allocation14] sm:$0x3] %vm5653_vm8, %v5650_v53 }
0x5a88   :  { %6538 = shalt.err (!%p6535_p11)
}
0x5a89   :  { %5664 = dma.vmem_to_hbm [thread:$0]  %s5662_s2, 32, %s8430_s18, [#allocation4]  }
0x5a8a   :  { %6555 = dma.done.wait [#allocation4], 32  }
0x5a8b   :  { %6556 = vsyncadd [#allocation4], 4294967264 }
0x5a8c   :  { %5668 = vsyncpa [#allocation3], 1 }
0x5a8d   :  { %5669 = vsyncpa [#allocation6], 1 }
0x5a8e   :  { %5670 = vsyncpa [#allocation9], 1 }
0x5a8f   :  { %5671 = vsyncpa [#allocation12], 1 }
0x5a90   :  { %5672 = vsyncpa [#allocation4], 1 }

</bundles_post_ra>
